<compile_context>
chip_gen: v5e
topology: v5e:2x2
jax: 0.10.0
libtpu: 0.0.40
codegen_flags: <defaults>
</compile_context>

<pallas_src>
import jax
import jax.numpy as jnp
from jax.experimental import pallas as pl
from jax.experimental.pallas import tpu as pltpu


def _round_up(x, m):
    return ((x + m - 1) // m) * m


def _fusion_kernel(img_ref, st_ref, w1_ref, b1_ref, w2_ref, b2_ref, out_ref):
    # einsum('bd,bd->bd') == elementwise multiply.  Upcast to f32 for the VPU
    # (portable: v5e has no bf16 VALU), then round to the MXU input dtype.
    combined = (img_ref[...].astype(jnp.float32) *
                st_ref[...].astype(jnp.float32)).astype(w1_ref.dtype)

    # Linear 1 (MXU, f32 accumulate) + bias + ReLU in f32.
    h = jnp.dot(combined, w1_ref[...], preferred_element_type=jnp.float32)
    h = jnp.maximum(h + b1_ref[...], 0.0)

    # Dropout(0.3) -> identity at inference time.
    # TODO(synk): training-mode dropout via pltpu.prng_seed/prng_random_bits.

    # Downcast before the second matmul: bf16 MXU rate + lower vreg pressure.
    h = h.astype(w2_ref.dtype)

    # Linear 2 (MXU, f32 accumulate) + bias.
    o = jnp.dot(h, w2_ref[...], preferred_element_type=jnp.float32)
    out_ref[...] = (o + b2_ref[...]).astype(out_ref.dtype)


def img_state_fusion(image_features, state_embeddings, w1, b1, w2, b2,
                     *, tb=256, matmul_dtype=jnp.bfloat16,
                     activation_dtype=jnp.bfloat16, out_dtype=None):
    """image_features, state_embeddings: (B, D); w1: (D, H); b1: (1, H);
    w2: (H, O); b2: (1, O).  Returns (B, O) in `out_dtype`
    (default: image_features.dtype)."""
    B, D = image_features.shape
    H = w1.shape[1]
    O = w2.shape[1]
    assert state_embeddings.shape == (B, D)
    assert w1.shape == (D, H) and b1.shape == (1, H)
    assert w2.shape == (H, O) and b2.shape == (1, O)

    if out_dtype is None:
        out_dtype = image_features.dtype

    # Stream activations in the narrow dtype.  Ideally callers already pass
    # bf16 (a standalone cast here just relocates HBM traffic unless it fuses
    # into the upstream producer under jit).
    if image_features.dtype != activation_dtype:
        image_features = image_features.astype(activation_dtype)
    if state_embeddings.dtype != activation_dtype:
        state_embeddings = state_embeddings.astype(activation_dtype)

    # Batch tile: sublane-aligned (multiple of 8).  Prefer >= 4 grid steps so
    # both v7x TensorCores get work and the auto-pipeline can hide input DMA;
    # never exceed the (rounded-up) batch.  No padding — the ragged last block
    # is handled by Pallas' masked partial output store.
    steps_target = 4
    tb = max(8, _round_up(tb, 8))
    tb = min(tb, max(8, _round_up(pl.cdiv(B, steps_target), 8)))
    tb = min(tb, _round_up(B, 8))
    grid = (pl.cdiv(B, tb),)

    # Matmul operands in bf16 (f32 accumulation in-kernel); biases kept f32.
    w1c = w1.astype(matmul_dtype)
    w2c = w2.astype(matmul_dtype)
    b1c = b1.astype(jnp.float32)
    b2c = b2.astype(jnp.float32)

    # VMEM budget derived from actual tile footprint (2x margin, 12 MiB floor).
    act_bytes = jnp.dtype(activation_dtype).itemsize
    w_bytes = jnp.dtype(matmul_dtype).itemsize
    out_bytes = jnp.dtype(out_dtype).itemsize
    vmem_bytes = (
        2 * (2 * tb * D * act_bytes)        # img + state tiles, double-buffered
        + 2 * (tb * O * out_bytes)          # output tile, double-buffered
        + (D * H + H * O) * w_bytes         # resident weights (single-buffered)
        + (H + O) * 4                       # resident biases (f32)
        + tb * (2 * D + H + O) * 4          # in-kernel f32 temporaries (upper bound)
    )
    vmem_limit = int(min(max(2 * vmem_bytes, 12 << 20), 100 << 20))

    out = pl.pallas_call(
        _fusion_kernel,
        out_shape=jax.ShapeDtypeStruct((B, O), out_dtype),
        grid_spec=pltpu.PrefetchScalarGridSpec(
            num_scalar_prefetch=0,
            grid=grid,
            in_specs=[
                pl.BlockSpec((tb, D), lambda i: (i, 0)),   # image features tile
                pl.BlockSpec((tb, D), lambda i: (i, 0)),   # state embeddings tile
                # Grid-invariant operands: resident across the grid, single-buffered.
                pl.BlockSpec((D, H), lambda i: (0, 0), pipeline_mode=pl.Buffered(1)),
                pl.BlockSpec((1, H), lambda i: (0, 0), pipeline_mode=pl.Buffered(1)),
                pl.BlockSpec((H, O), lambda i: (0, 0), pipeline_mode=pl.Buffered(1)),
                pl.BlockSpec((1, O), lambda i: (0, 0), pipeline_mode=pl.Buffered(1)),
            ],
            out_specs=pl.BlockSpec((tb, O), lambda i: (i, 0)),
        ),
        compiler_params=pltpu.CompilerParams(
            dimension_semantics=("parallel",),
            vmem_limit_bytes=vmem_limit,
        ),
    )(image_features, state_embeddings, w1c, b1c, w2c, b2c)

    return out


def _reference_matched(image_features, state_embeddings, w1, b1, w2, b2,
                       matmul_dtype=jnp.bfloat16):
    # Pure-JAX reference with the same precision policy as the kernel (f32 result).
    c = (image_features.astype(jnp.float32) *
         state_embeddings.astype(jnp.float32)).astype(matmul_dtype)
    h = jnp.dot(c, w1.astype(matmul_dtype), preferred_element_type=jnp.float32)
    h = jnp.maximum(h + b1, 0.0)
    o = jnp.dot(h.astype(matmul_dtype), w2.astype(matmul_dtype),
                preferred_element_type=jnp.float32)
    return o + b2


def _reference_f32(image_features, state_embeddings, w1, b1, w2, b2):
    c = image_features.astype(jnp.float32) * state_embeddings.astype(jnp.float32)
    h = jnp.maximum(c @ w1 + b1, 0.0)
    return h @ w2 + b2


if __name__ == "__main__":
    # Module defaults: Linear(512 -> 1024) -> ReLU -> Dropout -> Linear(1024 -> 512).
    # B=500 exercises a ragged batch (no padding: last grid block is partial /
    # masked) and a 4-step grid (tb=128) so both v7x TensorCores get work.
    B, D, H, O = 500, 512, 1024, 512

    key = jax.random.PRNGKey(0)
    k_img, k_st, k_w1, k_b1, k_w2, k_b2 = jax.random.split(key, 6)

    # Activations streamed in bf16 (the kernel's intended input dtype).
    image_features = jax.random.normal(k_img, (B, D), jnp.float32).astype(jnp.bfloat16)
    state_embeddings = jax.random.normal(k_st, (B, D), jnp.float32).astype(jnp.bfloat16)

    # Deterministic synthetic parameters (uniform, roughly PyTorch-Linear-scale).
    w1 = jax.random.uniform(k_w1, (D, H), jnp.float32, -1.0, 1.0) / jnp.sqrt(D)
    b1 = jax.random.uniform(k_b1, (1, H), jnp.float32, -1.0, 1.0) / jnp.sqrt(D)
    w2 = jax.random.uniform(k_w2, (H, O), jnp.float32, -1.0, 1.0) / jnp.sqrt(H)
    b2 = jax.random.uniform(k_b2, (1, O), jnp.float32, -1.0, 1.0) / jnp.sqrt(H)

    out = img_state_fusion(image_features, state_embeddings, w1, b1, w2, b2)
    out = jax.block_until_ready(out)
    assert out.shape == (B, O)
    assert out.dtype == jnp.bfloat16
    out_f32 = out.astype(jnp.float32)

    # Tight check against a precision-matched (bf16 MXU, f32 accumulate) reference.
    ref_m = _reference_matched(image_features, state_embeddings, w1, b1, w2, b2)
    assert jnp.allclose(out_f32, ref_m, atol=2e-2, rtol=2e-2), "mismatch vs matched reference"

    # Loose sanity check against the full-f32 reference (bf16 precision trade).
    ref_f = _reference_f32(image_features, state_embeddings, w1, b1, w2, b2)
    assert jnp.allclose(out_f32, ref_f, atol=1e-1, rtol=1e-1), "mismatch vs f32 reference"

    print("KERNEL_OK")
</pallas_src>

<mosaic_0001>
module attributes {stable_mosaic.version = 11 : i64} {
  func.func @_fusion_kernel(%arg0: i32, %arg1: memref<128x512xbf16, #tpu.memory_space<vmem>>, %arg2: memref<128x512xbf16, #tpu.memory_space<vmem>>, %arg3: memref<512x1024xbf16, #tpu.memory_space<vmem>>, %arg4: memref<1x1024xf32, #tpu.memory_space<vmem>>, %arg5: memref<1024x512xbf16, #tpu.memory_space<vmem>>, %arg6: memref<1x512xf32, #tpu.memory_space<vmem>>, %arg7: memref<128x512xbf16, #tpu.memory_space<vmem>>) attributes {dimension_semantics = [#tpu.dimension_semantics<parallel>], iteration_bounds = array<i64: 4>, scalar_prefetch = 0 : i64, scratch_operands = 0 : i64, tpu.core_type = #tpu.core_type<tc>, window_params = [{transform_indices = @transform_0, window_bounds = array<i64: 128, 512>}, {transform_indices = @transform_1, window_bounds = array<i64: 128, 512>}, {pipeline_mode = #tpu.pipeline_mode<synchronous>, transform_indices = @transform_2, window_bounds = array<i64: 512, 1024>}, {pipeline_mode = #tpu.pipeline_mode<synchronous>, transform_indices = @transform_3, window_bounds = array<i64: 1, 1024>}, {pipeline_mode = #tpu.pipeline_mode<synchronous>, transform_indices = @transform_4, window_bounds = array<i64: 1024, 512>}, {pipeline_mode = #tpu.pipeline_mode<synchronous>, transform_indices = @transform_5, window_bounds = array<i64: 1, 512>}, {transform_indices = @transform_6, window_bounds = array<i64: 128, 512>}]} {
    %c0 = arith.constant 0 : index
    %c0_0 = arith.constant 0 : index
    %0 = vector.load %arg1[%c0, %c0_0] : memref<128x512xbf16, #tpu.memory_space<vmem>>, vector<128x512xbf16>
    %1 = arith.extf %0 : vector<128x512xbf16> to vector<128x512xf32>
    %c0_1 = arith.constant 0 : index
    %c0_2 = arith.constant 0 : index
    %2 = vector.load %arg2[%c0_1, %c0_2] : memref<128x512xbf16, #tpu.memory_space<vmem>>, vector<128x512xbf16>
    %3 = arith.extf %2 : vector<128x512xbf16> to vector<128x512xf32>
    %4 = arith.mulf %1, %3 : vector<128x512xf32>
    %5 = arith.truncf %4 : vector<128x512xf32> to vector<128x512xbf16>
    %c0_3 = arith.constant 0 : index
    %c0_4 = arith.constant 0 : index
    %6 = vector.load %arg3[%c0_3, %c0_4] : memref<512x1024xbf16, #tpu.memory_space<vmem>>, vector<512x1024xbf16>
    %cst = arith.constant dense<0.000000e+00> : vector<128x1024xf32>
    %7 = tpu.matmul %5, %6, %cst {dimension_numbers = #tpu.dot_dimension_numbers<[1], [0], [0], [1], [0, 0, 1, 1], [], []>} : vector<128x512xbf16>, vector<512x1024xbf16>, vector<128x1024xf32> -> vector<128x1024xf32>
    %c0_5 = arith.constant 0 : index
    %c0_6 = arith.constant 0 : index
    %8 = vector.load %arg4[%c0_5, %c0_6] : memref<1x1024xf32, #tpu.memory_space<vmem>>, vector<1x1024xf32>
    %9 = vector.broadcast %8 : vector<1x1024xf32> to vector<128x1024xf32>
    %10 = arith.addf %7, %9 : vector<128x1024xf32>
    %cst_7 = arith.constant 0.000000e+00 : f32
    %11 = vector.broadcast %cst_7 : f32 to vector<128x1024xf32>
    %12 = arith.maximumf %10, %11 : vector<128x1024xf32>
    %13 = arith.truncf %12 : vector<128x1024xf32> to vector<128x1024xbf16>
    %c0_8 = arith.constant 0 : index
    %c0_9 = arith.constant 0 : index
    %14 = vector.load %arg5[%c0_8, %c0_9] : memref<1024x512xbf16, #tpu.memory_space<vmem>>, vector<1024x512xbf16>
    %cst_10 = arith.constant dense<0.000000e+00> : vector<128x512xf32>
    %15 = tpu.matmul %13, %14, %cst_10 {dimension_numbers = #tpu.dot_dimension_numbers<[1], [0], [0], [1], [0, 0, 1, 1], [], []>} : vector<128x1024xbf16>, vector<1024x512xbf16>, vector<128x512xf32> -> vector<128x512xf32>
    %c0_11 = arith.constant 0 : index
    %c0_12 = arith.constant 0 : index
    %16 = vector.load %arg6[%c0_11, %c0_12] : memref<1x512xf32, #tpu.memory_space<vmem>>, vector<1x512xf32>
    %17 = vector.broadcast %16 : vector<1x512xf32> to vector<128x512xf32>
    %18 = arith.addf %15, %17 : vector<128x512xf32>
    %19 = arith.truncf %18 : vector<128x512xf32> to vector<128x512xbf16>
    %c0_13 = arith.constant 0 : index
    %c0_14 = arith.constant 0 : index
    %20 = vector.load %arg7[%c0_13, %c0_14] : memref<128x512xbf16, #tpu.memory_space<vmem>>, vector<128x512xbf16>
    tpu.vector_store %arg7[%c0_13, %c0_14], %19 {strides = array<i32>} : memref<128x512xbf16, #tpu.memory_space<vmem>>, vector<128x512xbf16>,
    return
  }
  func.func @transform_0(%arg0: i32) -> (i32, i32) {
    %c0_i32 = arith.constant 0 : i32
    %c0_i32_0 = arith.constant 0 : i32
    return %arg0, %c0_i32 : i32, i32
  }
  func.func @transform_1(%arg0: i32) -> (i32, i32) {
    %c0_i32 = arith.constant 0 : i32
    %c0_i32_0 = arith.constant 0 : i32
    return %arg0, %c0_i32 : i32, i32
  }
  func.func @transform_2(%arg0: i32) -> (i32, i32) {
    %c0_i32 = arith.constant 0 : i32
    %c0_i32_0 = arith.constant 0 : i32
    %c0_i32_1 = arith.constant 0 : i32
    return %c0_i32, %c0_i32_0 : i32, i32
  }
  func.func @transform_3(%arg0: i32) -> (i32, i32) {
    %c0_i32 = arith.constant 0 : i32
    %c0_i32_0 = arith.constant 0 : i32
    %c0_i32_1 = arith.constant 0 : i32
    return %c0_i32, %c0_i32_0 : i32, i32
  }
  func.func @transform_4(%arg0: i32) -> (i32, i32) {
    %c0_i32 = arith.constant 0 : i32
    %c0_i32_0 = arith.constant 0 : i32
    %c0_i32_1 = arith.constant 0 : i32
    return %c0_i32, %c0_i32_0 : i32, i32
  }
  func.func @transform_5(%arg0: i32) -> (i32, i32) {
    %c0_i32 = arith.constant 0 : i32
    %c0_i32_0 = arith.constant 0 : i32
    %c0_i32_1 = arith.constant 0 : i32
    return %c0_i32, %c0_i32_0 : i32, i32
  }
  func.func @transform_6(%arg0: i32) -> (i32, i32) {
    %c0_i32 = arith.constant 0 : i32
    %c0_i32_0 = arith.constant 0 : i32
    return %arg0, %c0_i32 : i32, i32
  }
}

</mosaic_0001>

<bundles_post_ra>
// kernel: tpu_custom_call.1
= control target key start
LH: loop header
LB: loop body
LE: loop exit
PB: predicated region body
PF: predicated region fallthrough
CT: control target
= control target key end

     0   :  { %s11978_s0 = inlined_call_operand.hbm [shape: bf16[500,512], index: 0, kind: input, shape index: {}]   ;;  %s11979_s1 = inlined_call_operand.hbm [shape: bf16[500,512], index: 1, kind: input, shape index: {}]   ;;  %s11980_s2 = inlined_call_operand.hbm [shape: bf16[512,1024], index: 2, kind: input, shape index: {}]   ;;  %s11981_s3 = inlined_call_operand.hbm [shape: f32[1,1024], index: 3, kind: input, shape index: {}]   ;;  %s11982_s4 = inlined_call_operand.hbm [shape: bf16[1024,512], index: 4, kind: input, shape index: {}]   ;;  %s11983_s5 = inlined_call_operand.vmem [shape: f32[1,512], index: 5, kind: input, shape index: {}]   ;;  %s11984_s6 = inlined_call_operand.hbm [shape: bf16[500,512], index: 6, kind: output, shape index: {}]  }
   0x1   :  { %12070 = sst [smem:[#allocation71_spill]] %s11980_s2 }
   0x2   :  { %12071 = sst [smem:[#allocation72_spill]] %s11981_s3 }
   0x3   :  { %11 = vsyncpa [#allocation3], 0 }
   0x4   :  { %13 = vsyncpa [#allocation3 + $0x1], 0 }
   0x5   :  { %14 = vsyncpa [#allocation6], 0 }
   0x6   :  { %16 = vsyncpa [#allocation6 + $0x1], 0 }
   0x7   :  { %17 = vsyncpa [#allocation9], 0 }
   0x8   :  { %18 = vsyncpa [#allocation4], 0 }
   0x9   :  { %20 = vsyncpa [#allocation4 + $0x1], 0  ;;  %s10334_s21 = smov 0   ;;  %s10336_s22 = smov 0  }
   0xa   :  { %s10338_s23 = smov 0   ;;  %s10340_s24 = smov 0  }
   0xb LB: > { %s10355_s25 = sadd.s32 4294967295, %s10281_s24   ;;  %s7326_s26 = sadd.s32 4294967294, %s10281_s24   ;;  %s10281_s24 = sphi %s10340_s24, %s12322_s24   ;;  %s10277_s23 = sphi %s10338_s23, %s12321_s23   ;;  %s10273_s22 = sphi %s10336_s22, %s12320_s22   ;;  %s10269_s21 = sphi %s10334_s21, %s12319_s21  }
   0xc   : > { %s10359_s27 = sadd.s32 1, %s10281_s24   ;;  %s33_s28 = sadd.s32 1, %s10277_s23 }
   0xd   : > { %s30_s29 = ssub.s32 %s10281_s24, %s10359_s27  ;;  %p40_p0 = scmp.ne.s32.totalorder %s10277_s23, %s10273_s22 }
   0xe   : > { %p31_p1 = scmp.eq.s32.totalorder %s30_s29, 0  ;;  %p41_p2 = scmp.eq.s32.totalorder %s10281_s24, 0 }
   0xf   : > { %p46_p3 = scmp.ne.s32.totalorder %s10273_s22, %s10269_s21  ;;  %p11986_p4 = scmp.eq.s32.totalorder %s10355_s25, 0 }
  0x10   : > { %s10371_s30 = scalar_select %p31_p1, %s10277_s23, %s33_s28  }
  0x11   : > { %p10373_p5 = por %p41_p2, %p40_p0  ;;  %p10379_p6 = por %p11986_p4, %p46_p3 }
  0x12   : > { %12072 = sst [smem:[#allocation17_spill]] %s10371_s30  ;;  %p180_p7 = scmp.eq.s32.totalorder %s10355_s25, 3 }
  0x13   : > { %p186_p8 = scmp.eq.s32.totalorder %s7326_s26, 3  ;;  %p7327_p9 = scmp.ge.s32.totalorder %s10281_s24, 1 }
  0x14   : > { %p193_p10 = scmp.lt.s32.totalorder %s10281_s24, 5  ;;  %p10386_p11 = por %p180_p7, %p40_p0 }
  0x15   : > { %p10390_p12 = por %p186_p8, %p46_p3  ;;  %s12078_s3 = sld [smem:[#allocation72_spill]] }
  0x16   : > { %s12075_s9 = scalar_select %p10386_p11, 1, 0 }
  0x17   : > { %s12076_s10 = scalar_select %p10390_p12, 1, 0 }
  0x18   : > { %p10394_p13 = pnand %p7327_p9, %p193_p10  ;;  %s10283_s15 = smov [#allocation8]  }
  0x19   : > { %s221_s16 = sshll.u32 %s10283_s15, 4  ;;  %s12079_s2 = sld [smem:[#allocation71_spill]]  ;;  %s222_s16 = int_to_ptr.vmem [resolvable:$true] %s221_s16 }
  0x1a   : > { %p9952_p1 = pneg %p10394_p13  ;;  %s10284_s26 = smov [#allocation7]  }
  0x1b   : > { %s219_s14 = sshll.u32 %s12078_s3, 4  ;;  %s206_s28 = sshll.u32 %s10284_s26, 4  ;;  %s220_s14 = int_to_ptr.hbm [resolvable:$true] %s219_s14  ;;  %s207_s28 = int_to_ptr.vmem [resolvable:$true] %s206_s28 }
  0x1c   : > { %p10408_p0 = pnand %p9952_p1, %p11986_p4  ;;  %s230_s13 = sshll.u32 %s11982_s4, 4  ;;  %s231_s13 = int_to_ptr.hbm [resolvable:$true] %s230_s13 }
  0x1d   : > { %s10285_s15 = smov 512   ;;  %s10286_s17 = smov 32  }
  0x1e   : > { %9958 = dma.hbm_to_vmem [thread:$0]  (!%p10408_p0), %s220_s14, 128, %s222_s16, [#allocation9]  }
  0x1f   : > { %s204_s19 = sshll.u32 %s12079_s2, 4  ;;  %s10287_s18 = smov [#allocation10]   ;;  %s205_s19 = int_to_ptr.hbm [resolvable:$true] %s204_s19 }
  0x20   : > { %9955 = dma.hbm_to_vmem [thread:$0]  (!%p10408_p0), %s205_s19, 32768, %s207_s28, [#allocation6], %s10285_s15, %s10285_s15, %s10286_s17  }
  0x21   : > { %s232_s2 = sshll.u32 %s10287_s18, 4  ;;  %s10288_s3 = smov 256   ;;  %s233_s2 = int_to_ptr.vmem [resolvable:$true] %s232_s2 }
  0x22   : > { %s10289_s30 = smov 16   ;;  %p7331_p2 = scmp.ge.s32.totalorder %s10281_s24, 4 }
  0x23   : > { %9961 = dma.hbm_to_vmem [thread:$0]  (!%p10408_p0), %s231_s13, 32768, %s233_s2, [#allocation9], %s10288_s3, %s10288_s3, %s10289_s30  }
  0x24   : > { %245 = sbr.rel (%p7331_p2) target bundleno = 114 (0x72), region = 32 }
  0x29   : > { %248 = sbr.rel (!%p10373_p5) target bundleno = 78 (0x4e), region = 36  ;;  %s249_s14 = sand.u32 (%p10373_p5), 1, %s10277_s23  }
  0x2a   : > { %s7333_s16 = sshll.u32 (%p10373_p5), %s10281_s24, 4  ;;  %s7332_s26 = sshll.u32 (%p10373_p5), %s249_s14, 8 }
  0x2b   : > { %s255_s19 = ssub.s32 (%p10373_p5), 63, %s7333_s16  ;;  %s10429_s2 = scalar_lea.sflag (%p10373_p5), [#allocation3], %s249_s14 }
  0x2c   : > { %p256_p3 = scmp.lt.s32.totalorder (%p10373_p5), %s255_s19, 16  ;;  %s253_s3 = scalar_lea.vmem (%p10373_p5), [#allocation2], %s7332_s26 }
  0x2e   : > { %s12324_s19 = smov (!%p256_p3, %s255_s19), 16 }
  0x2f   : > { %s9416_s28 = sshll.u32 %s12324_s19, 4 }
  0x30   : > { %s260_s29 = ssub.s32 256, %s9416_s28 }
  0x31   : > { %s261_s20 = sshll.u32 %s260_s29, 4 }
  0x32   : > { %262 = vsyncadd %s10429_s2, %s261_s20  ;;  %p10432_p7 = scmp.ne.s32.totalorder %s9416_s28, 0  ;;  %s9418_s12 = sshll.u32 %s10281_s24, 8 }
  0x33   : > { %s266_s17 = scalar_lea.hbm %s11978_s0, %s9418_s12  ;;  %s10440_s18 = sshll.u32 %s253_s3, 4  ;;  %s271_s18 = int_to_ptr.vmem [resolvable:$true] %s10440_s18 }
  0x34   : > { %s268_s14 = sshll.u32 %s266_s17, 4  ;;  %s11985_s16 = sshll.u32 %s12324_s19, 8  ;;  %s10443_s14 = int_to_ptr.hbm [resolvable:$true] %s268_s14 }
  0x35   : > { %s10114_s26 = sshra.s32 %s10443_s14, 4  ;;  %s10116_s28 = sshrl.u32 %s11985_s16, 4  ;;  %s10115_s26 = int_to_ptr.hbm [resolvable:$true] %s10114_s26 }
  0x36   : > { %s10121_s29 = scalar_lea.hbm %s10115_s26, %s10116_s28  ;;  %s10125_s3 = scalar_lea.hbm %s11978_s0, 1008 }
  0x37   : > { %p10122_p8 = scmp.ne.s32.totalorder %s10115_s26, %s10121_s29  ;;  %p10126_p1 = scmp.lt.s32.totalorder %s10115_s26, %s11978_s0 }
  0x38   : > { %p10127_p0 = scmp.lt.s32.totalorder %s10125_s3, %s10121_s29 }
  0x39   : > { %p10123_p9 = pnand %p10122_p8, %p10432_p7 }
  0x3a   : > { %p10128_p2 = por %p10127_p0, %p10126_p1 }
  0x3b   : > { %p10124_p10 = pneg %p10123_p9 }
  0x3d   : > { %p10129_p3 = pnand %p10128_p2, %p10124_p10 }
  0x3f   : > { %10132 = shalt.err (!%p10129_p3)
}
  0x40   : > { %s10133_s17 = sshra.s32 %s271_s18, 4  ;;  %s10290_s20 = smov [#allocation2]   ;;  %s10134_s17 = int_to_ptr.vmem [resolvable:$true] %s10133_s17 }
  0x41   : > { %s10140_s16 = scalar_lea.vmem %s10134_s17, %s10116_s28  ;;  %s10144_s12 = scalar_lea.vmem %s10290_s20, 512 }
  0x42   : > { %p10141_p8 = scmp.ne.s32.totalorder %s10134_s17, %s10140_s16  ;;  %p10146_p12 = scmp.lt.s32.totalorder %s10144_s12, %s10140_s16 }
  0x44   : > { %p10142_p9 = pnand %p10141_p8, %p10432_p7 }
  0x46   : > { %p10143_p4 = pneg %p10142_p9 }
  0x48   : > { %p10148_p11 = pnand %p10146_p12, %p10143_p4 }
  0x4a   : > { %10151 = shalt.err (!%p10148_p11)
}
  0x4b   : > { %s10291_s26 = smov 256   ;;  %s10292_s29 = smov 16  }
  0x4c   : > { %s12082_s3 = sshll.u32 %s12324_s19, 8 }
  0x4d   : > { %276 = dma.hbm_to_vmem [thread:$0]  (%p10432_p7), %s10443_s14, %s12082_s3, %s271_s18, %s10429_s2, %s10291_s26, %s10291_s26, %s10292_s29  }
  0x4e PF: > { %279 = sbr.rel (!%p10373_p5) target bundleno = 114 (0x72), region = 40  ;;  %s280_s16 = sand.u32 (%p10373_p5), 1, %s10281_s24  }
  0x4f   : > { %s282_s28 = sand.u32 (%p10373_p5), 1, %s10277_s23   ;;  %s7342_s15 = sshll.u32 (%p10373_p5), %s10281_s24, 4 }
  0x50   : > { %s7341_s13 = sshll.u32 (%p10373_p5), %s282_s28, 8  ;;  %s286_s17 = ssub.s32 (%p10373_p5), 63, %s7342_s15 }
  0x51   : > { %p287_p4 = scmp.lt.s32.totalorder (%p10373_p5), %s286_s17, 16  ;;  %s10477_s2 = scalar_lea.sflag (%p10373_p5), [#allocation6], %s280_s16 }
  0x52   : > { %s284_s7 = scalar_lea.vmem (%p10373_p5), [#allocation5], %s7341_s13 }
  0x53   : > { %s12326_s17 = smov (!%p287_p4, %s286_s17), 16 }
  0x54   : > { %s9419_s30 = sshll.u32 %s12326_s17, 4 }
  0x55   : > { %s291_s20 = ssub.s32 256, %s9419_s30 }
  0x56   : > { %s292_s19 = sshll.u32 %s291_s20, 4 }
  0x57   : > { %293 = vsyncadd %s10477_s2, %s292_s19  ;;  %p10480_p5 = scmp.ne.s32.totalorder %s9419_s30, 0  ;;  %s9421_s14 = sshll.u32 %s10281_s24, 8 }
  0x58   : > { %s297_s29 = scalar_lea.hbm %s11979_s1, %s9421_s14  ;;  %s10488_s3 = sshll.u32 %s284_s7, 4  ;;  %s302_s3 = int_to_ptr.vmem [resolvable:$true] %s10488_s3 }
  0x59   : > { %s299_s16 = sshll.u32 %s297_s29, 4  ;;  %s7349_s28 = sshll.u32 %s12326_s17, 8  ;;  %s10491_s16 = int_to_ptr.hbm [resolvable:$true] %s299_s16 }
  0x5a   : > { %s10153_s13 = sshra.s32 %s10491_s16, 4  ;;  %s10155_s15 = sshrl.u32 %s7349_s28, 4  ;;  %s10154_s13 = int_to_ptr.hbm [resolvable:$true] %s10153_s13 }
  0x5b   : > { %s10160_s30 = scalar_lea.hbm %s10154_s13, %s10155_s15  ;;  %s10164_s7 = scalar_lea.hbm %s11979_s1, 1008 }
  0x5c   : > { %p10161_p11 = scmp.ne.s32.totalorder %s10154_s13, %s10160_s30  ;;  %p10165_p10 = scmp.lt.s32.totalorder %s10154_s13, %s11979_s1 }
  0x5d   : > { %p10166_p1 = scmp.lt.s32.totalorder %s10164_s7, %s10160_s30 }
  0x5e   : > { %p10162_p12 = pnand %p10161_p11, %p10480_p5 }
  0x5f   : > { %p10167_p0 = por %p10166_p1, %p10165_p10 }
  0x60   : > { %p10163_p7 = pneg %p10162_p12 }
  0x62   : > { %p10168_p2 = pnand %p10167_p0, %p10163_p7 }
  0x64   : > { %10171 = shalt.err (!%p10168_p2)
}
  0x65   : > { %s10172_s26 = sshra.s32 %s302_s3, 4  ;;  %s10293_s20 = smov [#allocation5]   ;;  %s10173_s26 = int_to_ptr.vmem [resolvable:$true] %s10172_s26 }
  0x66   : > { %s10179_s29 = scalar_lea.vmem %s10173_s26, %s10155_s15  ;;  %s10183_s19 = scalar_lea.vmem %s10293_s20, 512 }
  0x67   : > { %p10180_p3 = scmp.ne.s32.totalorder %s10173_s26, %s10179_s29  ;;  %p10185_p4 = scmp.lt.s32.totalorder %s10183_s19, %s10179_s29 }
  0x69   : > { %p10181_p8 = pnand %p10180_p3, %p10480_p5 }
  0x6b   : > { %p10182_p9 = pneg %p10181_p8 }
  0x6d   : > { %p10187_p11 = pnand %p10185_p4, %p10182_p9 }
  0x6f   : > { %10190 = shalt.err (!%p10187_p11)
}
  0x70   : > { %s10294_s13 = smov 256   ;;  %s10295_s30 = smov 16  }
  0x71   : > { %307 = dma.hbm_to_vmem [thread:$0]  (%p10480_p5), %s10491_s16, %s7349_s28, %s302_s3, %s10477_s2, %s10294_s13, %s10294_s13, %s10295_s30  }
  0x72 PF: > { %313 = sbr.rel (%p10394_p13) target bundleno = 2412 (0x96c), region = 44 }
  0x77   : > { %s10520_s15 = sand.u32 1, %s10273_s22  }
  0x78   : > { %s10523_s7 = sshll.u32 %s10520_s15, 8  ;;  %s316_s14 = scalar_lea.sflag [#allocation3], %s10520_s15 }
  0x79   : > { %s10527_s12 = scalar_lea.vmem [#allocation2], %s10523_s7 }
  0x7a   : > { %10248 = dma.done.wait (%p10379_p6), %s316_s14, 4096  }
  0x7b   : > { %10250 = vsyncadd (%p10379_p6), %s316_s14, 4294963200  ;;  %s325_s11 = sand.u32 1, %s10355_s25   ;;  %s10535_s2 = scalar_lea.vmem [#allocation5], %s10523_s7 }
  0x7c   : > { %s326_s17 = scalar_lea.sflag [#allocation6], %s325_s11 }
  0x7d   : > { %10252 = dma.done.wait (%p10379_p6), %s326_s17, 4096  }
  0x7e   : > { %10254 = vsyncadd (%p10379_p6), %s326_s17, 4294963200  ;;  %p12084_p13 = scmp.eq.s32.totalorder %s10355_s25, 0 }
  0x80   : > { %10256 = dma.done.wait (%p12084_p13), [#allocation6], 32768   ;;  %p12085_p5 = pmov %p12084_p13 }
  0x82   : > { %10258 = vsyncadd (%p12085_p5), [#allocation6], 4294934528  ;;  %p12086_p12 = pmov %p12085_p5 }
  0x83   : > { %p12087_p7 = pmov %p12085_p5 }
  0x84   : > { %10260 = dma.done.wait (%p12086_p12), [#allocation9], 32896  }
  0x85   : > { %10262 = vsyncadd (%p12087_p7), [#allocation9], 4294934400  ;;  %v7583_v0 = vld [vmem:[#allocation7 + $0x1c0] sm:$0xf]  ;;  %s11543_s28 = scalar_lea.vmem [#allocation11], %s10523_s7  ;;  %s7178_s13 = scalar_lea.sflag [#allocation4], %s10520_s15 }
  0x86   : > { %v9482_v1 = vld [vmem:[#allocation7 + $0x1dc] sm:$0xf0]  ;;  %p12315_p6 = scmp.ne.s32.totalorder %s12075_s9, 0 }
  0x87   : > { %v7839_v2 = vld [vmem:[#allocation7 + $0x3c0] sm:$0xf]  ;;  %v7584_v3 = vor.u32 %v9482_v1, %v7583_v0  ;;  %s9406_s30 = sshll.u32 (%p12315_p6), %s10355_s25, 4 }
  0x88   : > { %v9546_v4 = vld [vmem:[#allocation7 + $0x3dc] sm:$0xf0]  ;;  %s7186_s7 = ssub.s32 (%p12315_p6), 63, %s9406_s30 }
  0x89   : > { %v8095_v5 = vld [vmem:[#allocation7 + $0x5c0] sm:$0xf]  ;;  %v7840_v7 = vor.u32 %v9546_v4, %v7839_v2  ;;  %2239 = vmatpush.bf16.msra.mxu0 %v7584_v3  ;;  %p7187_p10 = scmp.lt.s32.totalorder (%p12315_p6), %s7186_s7, 16 }
  0x8a   : > { %v9610_v6 = vld [vmem:[#allocation7 + $0x5dc] sm:$0xf0] }
  0x8b   : > { %v8096_v8 = vor.u32 %v9610_v6, %v8095_v5  ;;  %v8351_v9 = vld [vmem:[#allocation7 + $0x7c0] sm:$0xf]  ;;  %2288 = vmatpush.bf16.msra.mxu1 %v7840_v7 }
  0x8c   : > { %v9674_v10 = vld [vmem:[#allocation7 + $0x7dc] sm:$0xf0] }
  0x8d   : > { %v7551_v11 = vld [vmem:[#allocation7 + $0x180] sm:$0xf]  ;;  %v8352_v12 = vor.u32 %v9674_v10, %v8351_v9  ;;  %2337 = vmatpush.bf16.msra.mxu2 %v8096_v8 }
  0x8e   : > { %v9474_v13 = vld [vmem:[#allocation7 + $0x19c] sm:$0xf0] }
  0x8f   : > { %v7807_v14 = vld [vmem:[#allocation7 + $0x380] sm:$0xf]  ;;  %v7552_v16 = vor.u32 %v9474_v13, %v7551_v11  ;;  %2386 = vmatpush.bf16.msra.mxu3 %v8352_v12 }
  0x90   : > { %v9538_v15 = vld [vmem:[#allocation7 + $0x39c] sm:$0xf0] }
  0x91   : > { %v7808_v17 = vor.u32 %v9538_v15, %v7807_v14  ;;  %v8063_v18 = vld [vmem:[#allocation7 + $0x580] sm:$0xf]  ;;  %2240 = vmatpush.bf16.msra.mxu0 %v7552_v16 }
  0x92   : > { %v9602_v19 = vld [vmem:[#allocation7 + $0x59c] sm:$0xf0] }
  0x93   : > { %v8319_v20 = vld [vmem:[#allocation7 + $0x780] sm:$0xf]  ;;  %v8064_v21 = vor.u32 %v9602_v19, %v8063_v18  ;;  %2289 = vmatpush.bf16.msra.mxu1 %v7808_v17 }
  0x94   : > { %v9666_v22 = vld [vmem:[#allocation7 + $0x79c] sm:$0xf0] }
  0x95   : > { %v7519_v23 = vld [vmem:[#allocation7 + $0x140] sm:$0xf]  ;;  %v8320_v25 = vor.u32 %v9666_v22, %v8319_v20  ;;  %2338 = vmatpush.bf16.msra.mxu2 %v8064_v21  ;;  %v399_v22 = vld [vmem:[%s10527_s12 + $0x10] sm:$0xff] }
  0x96   : > { %v9466_v24 = vld [vmem:[#allocation7 + $0x15c] sm:$0xf0] }
  0x97   : > { %v7775_v26 = vld [vmem:[#allocation7 + $0x340] sm:$0xf]  ;;  %v7520_v29 = vor.u32 %v9466_v24, %v7519_v23  ;;  %2387 = vmatpush.bf16.msra.mxu3 %v8320_v25  ;;  %v433_v25 = vunpack.c.l.bf16 %v399_v22 }
  0x98   : > { %v9530_v27 = vld [vmem:[#allocation7 + $0x35c] sm:$0xf0] }
  0x99   : > { %v8031_v28 = vld [vmem:[#allocation7 + $0x540] sm:$0xf]  ;;  %v7776_v33 = vor.u32 %v9530_v27, %v7775_v26  ;;  %2241 = vmatpush.bf16.msra.mxu0 %v7520_v29  ;;  %v495_v27 = vld [vmem:[%s10535_s2 + $0x10] sm:$0xff]  ;;  %v398_v29 = vld [vmem:[%s10527_s12 + $0x8] sm:$0xff] }
  0x9a   : > { %v9594_v30 = vld [vmem:[#allocation7 + $0x55c] sm:$0xf0] }
  0x9b   : > { %v8287_v31 = vld [vmem:[#allocation7 + $0x740] sm:$0xf]  ;;  %v8032_v34 = vor.u32 %v9594_v30, %v8031_v28  ;;  %2290 = vmatpush.bf16.msra.mxu1 %v7776_v33 }
  0x9c   : > { %v9658_v32 = vld [vmem:[#allocation7 + $0x75c] sm:$0xf0] }
  0x9d   : > { %v7487_v35 = vld [vmem:[#allocation7 + $0x100] sm:$0xf]  ;;  %v8288_v38 = vor.u32 %v9658_v32, %v8287_v31  ;;  %2339 = vmatpush.bf16.msra.mxu2 %v8032_v34  ;;  %v529_v31 = vunpack.c.l.bf16 %v495_v27  ;;  %v434_v32 = vunpack.c.h.bf16 %v399_v22  ;;  %v400_v34 = vld [vmem:[%s10527_s12 + $0x18] sm:$0xff]  ;;  %v9470_v22 = vld [vmem:[#allocation7 + $0x184] sm:$0xf] }
  0x9e   : > { %v9458_v36 = vld [vmem:[#allocation7 + $0x11c] sm:$0xf0] }
  0x9f   : > { %v7743_v37 = vld [vmem:[#allocation7 + $0x300] sm:$0xf]  ;;  %v7488_v44 = vor.u32 %v9458_v36, %v7487_v35  ;;  %2388 = vmatpush.bf16.msra.mxu3 %v8288_v38  ;;  %v494_v35 = vld [vmem:[%s10535_s2 + $0x8] sm:$0xff]  ;;  %v496_v36 = vld [vmem:[%s10535_s2 + $0x18] sm:$0xff] }
  0xa0   : > { %v9522_v39 = vld [vmem:[#allocation7 + $0x31c] sm:$0xf0] }
  0xa1   : > { %v7999_v40 = vld [vmem:[#allocation7 + $0x500] sm:$0xf]  ;;  %v7744_v46 = vor.u32 %v9522_v39, %v7743_v37  ;;  %2242 = vmatpush.bf16.msra.mxu0 %v7488_v44  ;;  %v530_v39 = vunpack.c.h.bf16 %v495_v27 }
  0xa2   : > { %v9586_v41 = vld [vmem:[#allocation7 + $0x51c] sm:$0xf0] }
  0xa3   : > { %v8255_v42 = vld [vmem:[#allocation7 + $0x700] sm:$0xf]  ;;  %v8000_v47 = vor.u32 %v9586_v41, %v7999_v40  ;;  %2291 = vmatpush.bf16.msra.mxu1 %v7744_v46  ;;  %v431_v40 = vunpack.c.l.bf16 %v398_v29  ;;  %v435_v41 = vunpack.c.l.bf16 %v400_v34 }
  0xa4   : > { %v9650_v43 = vld [vmem:[#allocation7 + $0x71c] sm:$0xf0] }
  0xa5   : > { %v7455_v45 = vld [vmem:[#allocation7 + $0xc0] sm:$0xf]  ;;  %v8256_v51 = vor.u32 %v9650_v43, %v8255_v42  ;;  %2340 = vmatpush.bf16.msra.mxu2 %v8000_v47  ;;  %v527_v42 = vunpack.c.l.bf16 %v494_v35 }
  0xa6   : > { %v9450_v48 = vld [vmem:[#allocation7 + $0xdc] sm:$0xf0] }
  0xa7   : > { %v7711_v49 = vld [vmem:[#allocation7 + $0x2c0] sm:$0xf]  ;;  %v7456_v58 = vor.u32 %v9450_v48, %v7455_v45  ;;  %2389 = vmatpush.bf16.msra.mxu3 %v8256_v51  ;;  %v593_v48 = vmul.f32 %v529_v31, %v433_v25  ;;  %v9662_v25 = vld [vmem:[#allocation7 + $0x784] sm:$0xf] }
  0xa8   : > { %v9514_v50 = vld [vmem:[#allocation7 + $0x2dc] sm:$0xf0]  ;;  %v7809_v31 = vld [vmem:[#allocation7 + $0x3a0] sm:$0xf0] }
  0xa9   : > { %v7967_v52 = vld [vmem:[#allocation7 + $0x4c0] sm:$0xf]  ;;  %v7712_v62 = vor.u32 %v9514_v50, %v7711_v49  ;;  %2243 = vmatpush.bf16.msra.mxu0 %v7456_v58  ;;  %v531_v49 = vunpack.c.l.bf16 %v496_v36 }
  0xaa   : > { %v9578_v53 = vld [vmem:[#allocation7 + $0x4dc] sm:$0xf0] }
  0xab   : > { %v8223_v54 = vld [vmem:[#allocation7 + $0x6c0] sm:$0xf]  ;;  %v7968_v63 = vor.u32 %v9578_v53, %v7967_v52  ;;  %2292 = vmatpush.bf16.msra.mxu1 %v7712_v62  ;;  %v594_v52 = vmul.f32 %v530_v39, %v434_v32  ;;  %v432_v53 = vunpack.c.h.bf16 %v398_v29  ;;  %v595_v58 = vmul.f32 %v531_v49, %v435_v41  ;;  %v8353_v62 = vld [vmem:[#allocation7 + $0x7e0] sm:$0xf0]  ;;  %v404_v29 = vld [vmem:[%s10527_s12 + $0x38] sm:$0xff] }
  0xac   : > { %v9642_v55 = vld [vmem:[#allocation7 + $0x6dc] sm:$0xf0] }
  0xad   : > { %v7423_v56 = vld [vmem:[#allocation7 + $0x80] sm:$0xf]  ;;  %v8224_v3 = vor.u32 %v9642_v55, %v8223_v54  ;;  %2341 = vmatpush.bf16.msra.mxu2 %v7968_v63  ;;  %v436_v54 = vunpack.c.h.bf16 %v400_v34  ;;  %v9606_v55 = vld [vmem:[#allocation7 + $0x5c4] sm:$0xf]  ;;  %v498_v34 = vld [vmem:[%s10535_s2 + $0x28] sm:$0xff] }
  0xae   : > { %v9442_v57 = vld [vmem:[#allocation7 + $0x9c] sm:$0xf0]  ;;  %v536_v49 = vunpack.c.h.bf16 %v498_v34 }
  0xaf   : > { %v7679_v59 = vld [vmem:[#allocation7 + $0x280] sm:$0xf]  ;;  %v7424_v10 = vor.u32 %v9442_v57, %v7423_v56  ;;  %2390 = vmatpush.bf16.msra.mxu3 %v8224_v3  ;;  %v8097_v56 = vld [vmem:[#allocation7 + $0x5e0] sm:$0xf0]  ;;  %v591_v57 = vmul.f32 %v527_v42, %v431_v40 }
  0xb0   : > { %v9506_v60 = vld [vmem:[#allocation7 + $0x29c] sm:$0xf0] }
  0xb1   : > { %v7935_v61 = vld [vmem:[#allocation7 + $0x480] sm:$0xf]  ;;  %v7680_v13 = vor.u32 %v9506_v60, %v7679_v59  ;;  %2244 = vmatpush.bf16.msra.mxu0 %v7424_v10  ;;  %v528_v59 = vunpack.c.h.bf16 %v494_v35  ;;  %v532_v60 = vunpack.c.h.bf16 %v496_v36  ;;  %v7841_v10 = vld [vmem:[#allocation7 + $0x3e0] sm:$0xf0]  ;;  %v500_v35 = vld [vmem:[%s10535_s2 + $0x38] sm:$0xff] }
  0xb2   : > { %v9570_v0 = vld [vmem:[#allocation7 + $0x49c] sm:$0xf0] }
  0xb3   : > { %v8191_v1 = vld [vmem:[#allocation7 + $0x680] sm:$0xf]  ;;  %v7936_v14 = vor.u32 %v9570_v0, %v7935_v61  ;;  %2293 = vmatpush.bf16.msra.mxu1 %v7680_v13  ;;  %v9670_v61 = vld [vmem:[#allocation7 + $0x7c4] sm:$0xf]  ;;  %v596_v3 = vmul.f32 %v532_v60, %v436_v54 }
  0xb4   : > { %v9634_v2 = vld [vmem:[#allocation7 + $0x69c] sm:$0xf0]  ;;  %v9462_v54 = vld [vmem:[#allocation7 + $0x144] sm:$0xf] }
  0xb5   : > { %v7391_v4 = vld [vmem:[#allocation7 + $0x40] sm:$0xf]  ;;  %v8192_v16 = vor.u32 %v9634_v2, %v8191_v1  ;;  %2342 = vmatpush.bf16.msra.mxu2 %v7936_v14  ;;  %v592_v2 = vmul.f32 %v528_v59, %v432_v53  ;;  %v10591_v14 = vld [vmem:[%s10527_s12 + $0x30] sm:$0xff]  ;;  %v8033_v53 = vld [vmem:[#allocation7 + $0x560] sm:$0xf0] }
  0xb6   : > { %v9434_v5 = vld [vmem:[#allocation7 + $0x5c] sm:$0xf0]  ;;  %v442_v39 = vunpack.c.h.bf16 %v10591_v14 }
  0xb7   : > { %v10549_v6 = vld [vmem:[#allocation7 + $0x240] sm:$0xf]  ;;  %v7392_v17 = vor.u32 %v9434_v5, %v7391_v4  ;;  %2391 = vmatpush.bf16.msra.mxu3 %v8192_v16  ;;  %v8100_v4 = vor.u32 %v9606_v55, %v8097_v56  ;;  %v9478_v5 = vld [vmem:[#allocation7 + $0x1c4] sm:$0xf] }
  0xb8   : > { %v10551_v7 = vld [vmem:[#allocation7 + $0x25c] sm:$0xf0]  ;;  %v7521_v55 = vld [vmem:[#allocation7 + $0x160] sm:$0xf0] }
  0xb9   : > { %v10553_v8 = vld [vmem:[#allocation7 + $0x440] sm:$0xf]  ;;  %v7648_v18 = vor.u32 %v10551_v7, %v10549_v6  ;;  %2245 = vmatpush.bf16.msra.mxu0 %v7392_v17  ;;  %v7585_v6 = vld [vmem:[#allocation7 + $0x1e0] sm:$0xf0] }
  0xba   : > { %v10555_v9 = vld [vmem:[#allocation7 + $0x45c] sm:$0xf0]  ;;  %v7588_v16 = vor.u32 %v9478_v5, %v7585_v6  ;;  %v9654_v56 = vld [vmem:[#allocation7 + $0x744] sm:$0xf]  ;;  %v7524_v5 = vor.u32 %v9462_v54, %v7521_v55 }
  0xbb   : > { %v10557_v11 = vld [vmem:[#allocation7 + $0x640] sm:$0xf]  ;;  %v7904_v19 = vor.u32 %v10555_v9, %v10553_v8  ;;  %2294 = vmatpush.bf16.msra.mxu1 %v7648_v18  ;;  %v8356_v8 = vor.u32 %v9670_v61, %v8353_v62  ;;  %v9542_v9 = vld [vmem:[#allocation7 + $0x3c4] sm:$0xf]  ;;  %v499_v18 = vld [vmem:[%s10535_s2 + $0x30] sm:$0xff] }
  0xbc   : > { %v10559_v12 = vld [vmem:[#allocation7 + $0x65c] sm:$0xf0]  ;;  %v538_v42 = vunpack.c.h.bf16 %v499_v18  ;;  %v9526_v61 = vld [vmem:[#allocation7 + $0x344] sm:$0xf] }
  0xbd   : > { %v10561_v15 = vld [vmem:[#allocation7] sm:$0xf]  ;;  %v8160_v23 = vor.u32 %v10559_v12, %v10557_v11  ;;  %2343 = vmatpush.bf16.msra.mxu2 %v7904_v19  ;;  %v10585_v12 = vpack.c.bf16 %v595_v58, %v591_v57  ;;  %v9598_v19 = vld [vmem:[#allocation7 + $0x584] sm:$0xf] }
  0xbe   : > { %v10567_v20 = vld [vmem:[#allocation7 + $0x1c] sm:$0xf0]  ;;  %v8289_v57 = vld [vmem:[#allocation7 + $0x760] sm:$0xf0] }
  0xbf   : > { %v397_v21 = vld [vmem:[%s10527_s12] sm:$0xff]  ;;  %v7360_v43 = vor.u32 %v10567_v20, %v10561_v15  ;;  %2392 = vmatpush.bf16.msra.mxu3 %v8160_v23  ;;  %v10593_v15 = vpack.c.bf16 %v596_v3, %v592_v2  ;;  %v7844_v20 = vor.u32 %v9542_v9, %v7841_v10  ;;  %v8292_v6 = vor.u32 %v9654_v56, %v8289_v57 }
  0xc0   : > { %v429_v24 = vunpack.c.l.bf16 %v397_v21  ;;  %v493_v26 = vld [vmem:[%s10535_s2] sm:$0xff]  ;;  %v430_v28 = vunpack.c.h.bf16 %v397_v21 }
  0xc1   : > { %v525_v30 = vunpack.c.l.bf16 %v493_v26  ;;  %v526_v33 = vunpack.c.h.bf16 %v493_v26  ;;  %v7615_v37 = vld [vmem:[#allocation7 + $0x200] sm:$0xf]  ;;  %2246 = vmatpush.bf16.msra.mxu0 %v7360_v43  ;;  %v8065_v21 = vld [vmem:[#allocation7 + $0x5a0] sm:$0xf0] }
  0xc2   : > { %v9490_v38 = vld [vmem:[#allocation7 + $0x21c] sm:$0xf0]  ;;  %v7553_v23 = vld [vmem:[#allocation7 + $0x1a0] sm:$0xf0]  ;;  %v8068_v36 = vor.u32 %v9598_v19, %v8065_v21  ;;  %v503_v19 = vld [vmem:[%s10535_s2 + $0x50] sm:$0xff] }
  0xc3   : > { %v7871_v44 = vld [vmem:[#allocation7 + $0x400] sm:$0xf]  ;;  %v589_v47 = vmul.f32 %v525_v30, %v429_v24  ;;  %v590_v51 = vmul.f32 %v526_v33, %v430_v28  ;;  %v7616_v63 = vor.u32 %v9490_v38, %v7615_v37  ;;  %v402_v24 = vld [vmem:[%s10527_s12 + $0x28] sm:$0xff]  ;;  %v8321_v26 = vld [vmem:[#allocation7 + $0x7a0] sm:$0xf0]  ;;  %v441_v28 = vunpack.c.l.bf16 %v10591_v14 }
  0xc4   : > { %v9554_v45 = vld [vmem:[#allocation7 + $0x41c] sm:$0xf0]  ;;  %v9534_v30 = vld [vmem:[#allocation7 + $0x384] sm:$0xf]  ;;  %v537_v33 = vunpack.c.l.bf16 %v499_v18  ;;  %v7556_v37 = vor.u32 %v9470_v22, %v7553_v23  ;;  %v8324_v41 = vor.u32 %v9662_v25, %v8321_v26  ;;  %v439_v43 = vunpack.c.l.bf16 %v402_v24  ;;  %v408_v21 = vld [vmem:[%s10527_s12 + $0x58] sm:$0xff] }
  0xc5   : > { %v8127_v46 = vld [vmem:[#allocation7 + $0x600] sm:$0xf]  ;;  %v7872_v0 = vor.u32 %v9554_v45, %v7871_v44  ;;  %v10581_v7 = vpack.c.bf16 %v593_v48, %v589_v47  ;;  %v10583_v11 = vpack.c.bf16 %v594_v52, %v590_v51  ;;  %2295 = vmatpush.bf16.msra.mxu1 %v7616_v63  ;;  %2435 = vmatpush.bf16.msrb.mxu0 %v7588_v16  ;;  %v443_v44 = vunpack.c.l.bf16 %v404_v29  ;;  %v9590_v52 = vld [vmem:[#allocation7 + $0x544] sm:$0xf]  ;;  %v502_v22 = vld [vmem:[%s10535_s2 + $0x48] sm:$0xff] }
  0xc6   : > { %v9618_v50 = vld [vmem:[#allocation7 + $0x61c] sm:$0xf0]  ;;  %v7812_v45 = vor.u32 %v9534_v30, %v7809_v31  ;;  %v539_v47 = vunpack.c.l.bf16 %v500_v35  ;;  %v440_v48 = vunpack.c.h.bf16 %v402_v24  ;;  %v540_v51 = vunpack.c.h.bf16 %v500_v35  ;;  %v7777_v62 = vld [vmem:[#allocation7 + $0x360] sm:$0xf0]  ;;  %v504_v23 = vld [vmem:[%s10535_s2 + $0x58] sm:$0xff] }
  0xc7   : > { %v8128_v1 = vor.u32 %v9618_v50, %v8127_v46  ;;  %v10588_v13 = vld [vmem:[%s10527_s12 + $0x20] sm:$0xff]  ;;  %2344 = vmatpush.bf16.msra.mxu2 %v7872_v0  ;;  %2247 = vmatmul.bf16.vlgmr.msra.gmra.mxu0 %v10581_v7  ;;  %v535_v46 = vunpack.c.l.bf16 %v498_v34  ;;  %v444_v50 = vunpack.c.h.bf16 %v404_v29  ;;  %v601_v59 = vmul.f32 %v537_v33, %v441_v28 }
  0xc8   : > { %v497_v17 = vld [vmem:[%s10535_s2 + $0x20] sm:$0xff]  ;;  %2296 = vmatmul.bf16.vlgmr.msra.gmra.mxu1 %v10583_v11  ;;  %v437_v27 = vunpack.c.l.bf16 %v10588_v13  ;;  %v438_v38 = vunpack.c.h.bf16 %v10588_v13  ;;  %v602_v63 = vmul.f32 %v538_v42, %v442_v39  ;;  %v600_v2 = vmul.f32 %v536_v49, %v440_v48 }
  0xc9   : > { %2393 = vmatpush.bf16.msra.mxu3 %v8128_v1  ;;  %v533_v32 = vunpack.c.l.bf16 %v497_v17  ;;  %2484 = vmatpush.bf16.msrb.mxu1 %v7844_v20  ;;  %v534_v40 = vunpack.c.h.bf16 %v497_v17  ;;  %v599_v0 = vmul.f32 %v535_v46, %v439_v43  ;;  %v603_v1 = vmul.f32 %v539_v47, %v443_v44  ;;  %v405_v16 = vld [vmem:[%s10527_s12 + $0x40] sm:$0xff]  ;;  %v407_v17 = vld [vmem:[%s10527_s12 + $0x50] sm:$0xff]  ;;  %v406_v20 = vld [vmem:[%s10527_s12 + $0x48] sm:$0xff] }
  0xca   : > { %2345 = vmatmul.bf16.vlgmr.msra.gmra.mxu2 %v10585_v12  ;;  %2436 = vmatpush.bf16.msrb.mxu0 %v7556_v37  ;;  %v604_v3 = vmul.f32 %v540_v51, %v444_v50  ;;  %v501_v18 = vld [vmem:[%s10535_s2 + $0x40] sm:$0xff]  ;;  %v445_v24 = vunpack.c.l.bf16 %v405_v16  ;;  %v449_v25 = vunpack.c.l.bf16 %v407_v17  ;;  %v446_v31 = vunpack.c.h.bf16 %v405_v16 }
  0xcb   : > { %2533 = vmatpush.bf16.msrb.mxu2 %v8100_v4  ;;  %v597_v58 = vmul.f32 %v533_v32, %v437_v27  ;;  %v598_v60 = vmul.f32 %v534_v40, %v438_v38  ;;  %v8036_v4 = vor.u32 %v9590_v52, %v8033_v53  ;;  %v10613_v13 = vpack.c.bf16 %v603_v1, %v599_v0  ;;  %v9582_v28 = vld [vmem:[#allocation7 + $0x504] sm:$0xf]  ;;  %v411_v1 = vld [vmem:[%s10527_s12 + $0x70] sm:$0xff] }
  0xcc   : > { %2394 = vmatmul.bf16.vlgmr.msra.gmra.mxu3 %v10593_v15  ;;  %v10615_v14 = vpack.c.bf16 %v604_v3, %v600_v2  ;;  %v541_v26 = vunpack.c.l.bf16 %v501_v18  ;;  %v545_v27 = vunpack.c.l.bf16 %v503_v19  ;;  %v8001_v29 = vld [vmem:[#allocation7 + $0x520] sm:$0xf0]  ;;  %v450_v32 = vunpack.c.h.bf16 %v407_v17  ;;  %v507_v3 = vld [vmem:[%s10535_s2 + $0x70] sm:$0xff] }
  0xcd   : > { %2582 = vmatpush.bf16.msrb.mxu3 %v8356_v8  ;;  %2485 = vmatpush.bf16.msrb.mxu1 %v7812_v45  ;;  %v7780_v8 = vor.u32 %v9526_v61, %v7777_v62  ;;  %v10609_v9 = vpack.c.bf16 %v601_v59, %v597_v58  ;;  %v10611_v10 = vpack.c.bf16 %v602_v63, %v598_v60  ;;  %v9454_v30 = vld [vmem:[#allocation7 + $0x104] sm:$0xf]  ;;  %v542_v33 = vunpack.c.h.bf16 %v501_v18 }
  0xce   : > { %2437 = vmatpush.bf16.msrb.mxu0 %v7524_v5  ;;  %v8004_v34 = vor.u32 %v9582_v28, %v8001_v29  ;;  %v7489_v35 = vld [vmem:[#allocation7 + $0x120] sm:$0xf0]  ;;  %v546_v38 = vunpack.c.h.bf16 %v503_v19  ;;  %v447_v39 = vunpack.c.l.bf16 %v406_v20  ;;  %v451_v44 = vunpack.c.l.bf16 %v408_v21  ;;  %v412_v5 = vld [vmem:[%s10527_s12 + $0x78] sm:$0xff] }
  0xcf   : > { %2534 = vmatpush.bf16.msrb.mxu2 %v8068_v36  ;;  %v9646_v36 = vld [vmem:[#allocation7 + $0x704] sm:$0xf]  ;;  %v7492_v40 = vor.u32 %v9454_v30, %v7489_v35  ;;  %v543_v45 = vunpack.c.l.bf16 %v502_v22  ;;  %v547_v46 = vunpack.c.l.bf16 %v504_v23  ;;  %v448_v48 = vunpack.c.h.bf16 %v406_v20 }
  0xd0   : > { %v8257_v37 = vld [vmem:[#allocation7 + $0x720] sm:$0xf0]  ;;  %v452_v49 = vunpack.c.h.bf16 %v408_v21  ;;  %v544_v50 = vunpack.c.h.bf16 %v502_v22  ;;  %v548_v51 = vunpack.c.h.bf16 %v504_v23  ;;  %v605_v52 = vmul.f32 %v541_v26, %v445_v24 }
  0xd1   : > { %2583 = vmatpush.bf16.msrb.mxu3 %v8324_v41  ;;  %2486 = vmatpush.bf16.msrb.mxu1 %v7780_v8  ;;  %v8260_v41 = vor.u32 %v9646_v36, %v8257_v37  ;;  %v9518_v42 = vld [vmem:[#allocation7 + $0x304] sm:$0xf]  ;;  %v609_v53 = vmul.f32 %v545_v27, %v449_v25  ;;  %v606_v54 = vmul.f32 %v542_v33, %v446_v31  ;;  %v508_v8 = vld [vmem:[%s10535_s2 + $0x78] sm:$0xff]  ;;  %v457_v17 = vunpack.c.l.bf16 %v411_v1 }
  0xd2   : > { %v7745_v43 = vld [vmem:[#allocation7 + $0x320] sm:$0xf0]  ;;  %2438 = vmatpush.bf16.msrb.mxu0 %v7492_v40  ;;  %v610_v55 = vmul.f32 %v546_v38, %v450_v32  ;;  %v607_v56 = vmul.f32 %v543_v45, %v447_v39  ;;  %v611_v57 = vmul.f32 %v547_v46, %v451_v44  ;;  %v608_v58 = vmul.f32 %v544_v50, %v448_v48 }
  0xd3   : > { %2535 = vmatpush.bf16.msrb.mxu2 %v8036_v4  ;;  %v7748_v47 = vor.u32 %v9518_v42, %v7745_v43  ;;  %v612_v59 = vmul.f32 %v548_v51, %v452_v49  ;;  %v10629_v60 = vpack.c.bf16 %v609_v53, %v605_v52  ;;  %v409_v0 = vld [vmem:[%s10527_s12 + $0x60] sm:$0xff]  ;;  %v410_v4 = vld [vmem:[%s10527_s12 + $0x68] sm:$0xff]  ;;  %v553_v19 = vunpack.c.l.bf16 %v507_v3 }
  0xd4   : > { %v10631_v61 = vpack.c.bf16 %v610_v55, %v606_v54  ;;  %v10633_v62 = vpack.c.bf16 %v611_v57, %v607_v56  ;;  %v505_v2 = vld [vmem:[%s10535_s2 + $0x60] sm:$0xff]  ;;  %v453_v16 = vunpack.c.l.bf16 %v409_v0  ;;  %v454_v23 = vunpack.c.h.bf16 %v409_v0  ;;  %v415_v57 = vld [vmem:[%s10527_s12 + $0x90] sm:$0xff]  ;;  %v414_v0 = vld [vmem:[%s10527_s12 + $0x88] sm:$0xff] }
  0xd5   : > { %2584 = vmatpush.bf16.msrb.mxu3 %v8292_v6  ;;  %2487 = vmatpush.bf16.msrb.mxu1 %v7748_v47  ;;  %v10635_v63 = vpack.c.bf16 %v612_v59, %v608_v58  ;;  %v506_v6 = vld [vmem:[%s10535_s2 + $0x68] sm:$0xff]  ;;  %v549_v18 = vunpack.c.l.bf16 %v505_v2  ;;  %v9574_v20 = vld [vmem:[#allocation7 + $0x4c4] sm:$0xf]  ;;  %v458_v24 = vunpack.c.h.bf16 %v411_v1  ;;  %v550_v25 = vunpack.c.h.bf16 %v505_v2  ;;  %v511_v59 = vld [vmem:[%s10535_s2 + $0x90] sm:$0xff] }
  0xd6   : > { %v7969_v21 = vld [vmem:[#allocation7 + $0x4e0] sm:$0xf0]  ;;  %v554_v30 = vunpack.c.h.bf16 %v507_v3  ;;  %v455_v31 = vunpack.c.l.bf16 %v410_v4  ;;  %v459_v36 = vunpack.c.l.bf16 %v412_v5  ;;  %v551_v37 = vunpack.c.l.bf16 %v506_v6  ;;  %v416_v1 = vld [vmem:[%s10527_s12 + $0x98] sm:$0xff]  ;;  %v510_v2 = vld [vmem:[%s10535_s2 + $0x88] sm:$0xff] }
  0xd7   : > { %2252 = vmatmul.bf16.gmra.mxu0 %v10609_v9  ;;  %2536 = vmatpush.bf16.msrb.mxu2 %v8004_v34  ;;  %v9446_v22 = vld [vmem:[#allocation7 + $0xc4] sm:$0xf]  ;;  %v7972_v26 = vor.u32 %v9574_v20, %v7969_v21  ;;  %v555_v38 = vunpack.c.l.bf16 %v508_v8  ;;  %v456_v40 = vunpack.c.h.bf16 %v410_v4  ;;  %v552_v42 = vunpack.c.h.bf16 %v506_v6  ;;  %v512_v3 = vld [vmem:[%s10535_s2 + $0x98] sm:$0xff] }
  0xd8   : > { %2301 = vmatmul.bf16.gmra.mxu1 %v10611_v10  ;;  %v7457_v27 = vld [vmem:[#allocation7 + $0xe0] sm:$0xf0]  ;;  %v556_v43 = vunpack.c.h.bf16 %v508_v8  ;;  %v613_v44 = vmul.f32 %v549_v18, %v453_v16  ;;  %v617_v45 = vmul.f32 %v553_v19, %v457_v17  ;;  %v614_v46 = vmul.f32 %v550_v25, %v454_v23 }
  0xd9   : > { %2585 = vmatpush.bf16.msrb.mxu3 %v8260_v41  ;;  %v9638_v28 = vld [vmem:[#allocation7 + $0x6c4] sm:$0xf]  ;;  %v7460_v32 = vor.u32 %v9446_v22, %v7457_v27  ;;  %v460_v41 = vunpack.c.h.bf16 %v412_v5  ;;  %v618_v47 = vmul.f32 %v554_v30, %v458_v24  ;;  %v615_v48 = vmul.f32 %v551_v37, %v455_v31 }
  0xda   : > { %2350 = vmatmul.bf16.gmra.mxu2 %v10613_v13  ;;  %v8225_v29 = vld [vmem:[#allocation7 + $0x6e0] sm:$0xf0]  ;;  %v619_v49 = vmul.f32 %v555_v38, %v459_v36  ;;  %v616_v50 = vmul.f32 %v552_v42, %v456_v40  ;;  %v10649_v52 = vpack.c.bf16 %v617_v45, %v613_v44  ;;  %v465_v5 = vunpack.c.l.bf16 %v415_v57 }
  0xdb   : > { %v8228_v33 = vor.u32 %v9638_v28, %v8225_v29  ;;  %v9510_v34 = vld [vmem:[#allocation7 + $0x2c4] sm:$0xf]  ;;  %2537 = vmatpush.bf16.msrb.mxu2 %v7972_v26  ;;  %2439 = vmatpush.bf16.msrb.mxu0 %v7460_v32  ;;  %v620_v51 = vmul.f32 %v556_v43, %v460_v41  ;;  %v10651_v53 = vpack.c.bf16 %v618_v47, %v614_v46  ;;  %v561_v8 = vunpack.c.l.bf16 %v511_v59 }
  0xdc   : > { %2399 = vmatmul.bf16.gmra.mxu3 %v10615_v14  ;;  %v7713_v35 = vld [vmem:[#allocation7 + $0x2e0] sm:$0xf0]  ;;  %v10653_v54 = vpack.c.bf16 %v619_v49, %v615_v48  ;;  %v466_v20 = vunpack.c.h.bf16 %v415_v57  ;;  %v562_v26 = vunpack.c.h.bf16 %v511_v59  ;;  %v463_v27 = vunpack.c.l.bf16 %v414_v0  ;;  %v419_v57 = vld [vmem:[%s10527_s12 + $0xb0] sm:$0xff] }
  0xdd   : > { %v7716_v39 = vor.u32 %v9510_v34, %v7713_v35  ;;  %2586 = vmatpush.bf16.msrb.mxu3 %v8228_v33  ;;  %v10655_v55 = vpack.c.bf16 %v620_v51, %v616_v50  ;;  %v413_v56 = vld [vmem:[%s10527_s12 + $0x80] sm:$0xff]  ;;  %v467_v32 = vunpack.c.l.bf16 %v416_v1  ;;  %v559_v33 = vunpack.c.l.bf16 %v510_v2  ;;  %v515_v59 = vld [vmem:[%s10535_s2 + $0xb0] sm:$0xff] }
  0xde   : > { %v509_v58 = vld [vmem:[%s10535_s2 + $0x80] sm:$0xff]  ;;  %v461_v4 = vunpack.c.l.bf16 %v413_v56  ;;  %v462_v19 = vunpack.c.h.bf16 %v413_v56  ;;  %v563_v34 = vunpack.c.l.bf16 %v512_v3  ;;  %v464_v36 = vunpack.c.h.bf16 %v414_v0  ;;  %v418_v0 = vld [vmem:[%s10527_s12 + $0xa8] sm:$0xff] }
  0xdf   : > { %2488 = vmatpush.bf16.msrb.mxu1 %v7716_v39  ;;  %v557_v6 = vunpack.c.l.bf16 %v509_v58  ;;  %v9566_v16 = vld [vmem:[#allocation7 + $0x484] sm:$0xf]  ;;  %v558_v21 = vunpack.c.h.bf16 %v509_v58  ;;  %v468_v37 = vunpack.c.h.bf16 %v416_v1  ;;  %v560_v38 = vunpack.c.h.bf16 %v510_v2  ;;  %v420_v1 = vld [vmem:[%s10527_s12 + $0xb8] sm:$0xff]  ;;  %v514_v2 = vld [vmem:[%s10535_s2 + $0xa8] sm:$0xff] }
  0xe0   : > { %v7937_v17 = vld [vmem:[#allocation7 + $0x4a0] sm:$0xf0]  ;;  %v564_v39 = vunpack.c.h.bf16 %v512_v3  ;;  %v625_v41 = vmul.f32 %v561_v8, %v465_v5  ;;  %v626_v43 = vmul.f32 %v562_v26, %v466_v20  ;;  %v623_v44 = vmul.f32 %v559_v33, %v463_v27  ;;  %v516_v3 = vld [vmem:[%s10535_s2 + $0xb8] sm:$0xff] }
  0xe1   : > { %v9438_v18 = vld [vmem:[#allocation7 + $0x84] sm:$0xf]  ;;  %v7940_v22 = vor.u32 %v9566_v16, %v7937_v17  ;;  %v621_v40 = vmul.f32 %v557_v6, %v461_v4  ;;  %v622_v42 = vmul.f32 %v558_v21, %v462_v19  ;;  %v627_v45 = vmul.f32 %v563_v34, %v467_v32 }
  0xe2   : > { %v7425_v23 = vld [vmem:[#allocation7 + $0xa0] sm:$0xf0]  ;;  %v624_v46 = vmul.f32 %v560_v38, %v464_v36  ;;  %v628_v47 = vmul.f32 %v564_v39, %v468_v37  ;;  %v473_v5 = vunpack.c.l.bf16 %v419_v57  ;;  %v569_v8 = vunpack.c.l.bf16 %v515_v59 }
  0xe3   : > { %v9630_v24 = vld [vmem:[#allocation7 + $0x684] sm:$0xf]  ;;  %v7428_v28 = vor.u32 %v9438_v18, %v7425_v23  ;;  %2538 = vmatpush.bf16.msrb.mxu2 %v7940_v22  ;;  %v10669_v48 = vpack.c.bf16 %v625_v41, %v621_v40  ;;  %v10671_v49 = vpack.c.bf16 %v626_v43, %v622_v42  ;;  %v10673_v50 = vpack.c.bf16 %v627_v45, %v623_v44 }
  0xe4   : > { %v8193_v25 = vld [vmem:[#allocation7 + $0x6a0] sm:$0xf0]  ;;  %v10675_v51 = vpack.c.bf16 %v628_v47, %v624_v46  ;;  %v474_v20 = vunpack.c.h.bf16 %v419_v57  ;;  %v570_v26 = vunpack.c.h.bf16 %v515_v59  ;;  %v471_v27 = vunpack.c.l.bf16 %v418_v0 }
  0xe5   : > { %v8196_v29 = vor.u32 %v9630_v24, %v8193_v25  ;;  %v9502_v30 = vld [vmem:[#allocation7 + $0x284] sm:$0xf]  ;;  %2440 = vmatpush.bf16.msrb.mxu0 %v7428_v28  ;;  %v475_v32 = vunpack.c.l.bf16 %v420_v1  ;;  %v567_v33 = vunpack.c.l.bf16 %v514_v2  ;;  %v571_v34 = vunpack.c.l.bf16 %v516_v3 }
  0xe6   : > { %v7681_v31 = vld [vmem:[#allocation7 + $0x2a0] sm:$0xf0]  ;;  %v472_v36 = vunpack.c.h.bf16 %v418_v0  ;;  %v476_v37 = vunpack.c.h.bf16 %v420_v1  ;;  %v568_v38 = vunpack.c.h.bf16 %v514_v2  ;;  %v572_v39 = vunpack.c.h.bf16 %v516_v3  ;;  %v423_v1 = vld [vmem:[%s10527_s12 + $0xd0] sm:$0xff] }
  0xe7   : > { %2257 = vmatmul.bf16.gmra.mxu0 %v10629_v60  ;;  %v7684_v35 = vor.u32 %v9502_v30, %v7681_v31  ;;  %2587 = vmatpush.bf16.msrb.mxu3 %v8196_v29  ;;  %v417_v56 = vld [vmem:[%s10527_s12 + $0xa0] sm:$0xff]  ;;  %v633_v41 = vmul.f32 %v569_v8, %v473_v5  ;;  %v634_v43 = vmul.f32 %v570_v26, %v474_v20  ;;  %v519_v3 = vld [vmem:[%s10535_s2 + $0xd0] sm:$0xff]  ;;  %v424_v5 = vld [vmem:[%s10527_s12 + $0xd8] sm:$0xff] }
  0xe8   : > { %2306 = vmatmul.bf16.gmra.mxu1 %v10631_v61  ;;  %v513_v58 = vld [vmem:[%s10535_s2 + $0xa0] sm:$0xff]  ;;  %v469_v4 = vunpack.c.l.bf16 %v417_v56  ;;  %v470_v19 = vunpack.c.h.bf16 %v417_v56  ;;  %v631_v44 = vmul.f32 %v567_v33, %v471_v27  ;;  %v635_v45 = vmul.f32 %v571_v34, %v475_v32  ;;  %v520_v8 = vld [vmem:[%s10535_s2 + $0xd8] sm:$0xff] }
  0xe9   : > { %2489 = vmatpush.bf16.msrb.mxu1 %v7684_v35  ;;  %v565_v6 = vunpack.c.l.bf16 %v513_v58  ;;  %v9558_v16 = vld [vmem:[#allocation7 + $0x444] sm:$0xf]  ;;  %v566_v21 = vunpack.c.h.bf16 %v513_v58  ;;  %v632_v46 = vmul.f32 %v568_v38, %v472_v36  ;;  %v636_v47 = vmul.f32 %v572_v39, %v476_v37 }
  0xea   : > { %2355 = vmatmul.bf16.gmra.mxu2 %v10633_v62  ;;  %v7905_v17 = vld [vmem:[#allocation7 + $0x460] sm:$0xf0]  ;;  %v10693_v58 = vpack.c.bf16 %v635_v45, %v631_v44  ;;  %v483_v36 = vunpack.c.l.bf16 %v424_v5  ;;  %v579_v38 = vunpack.c.l.bf16 %v520_v8 }
  0xeb   : > { %v9430_v18 = vld [vmem:[#allocation7 + $0x44] sm:$0xf]  ;;  %v7908_v22 = vor.u32 %v9558_v16, %v7905_v17  ;;  %v629_v40 = vmul.f32 %v565_v6, %v469_v4  ;;  %v630_v42 = vmul.f32 %v566_v21, %v470_v19  ;;  %v10695_v59 = vpack.c.bf16 %v636_v47, %v632_v46  ;;  %v422_v4 = vld [vmem:[%s10527_s12 + $0xc8] sm:$0xff] }
  0xec   : > { %2404 = vmatmul.bf16.gmra.mxu3 %v10635_v63  ;;  %v7393_v23 = vld [vmem:[#allocation7 + $0x60] sm:$0xf0]  ;;  %v518_v6 = vld [vmem:[%s10535_s2 + $0xc8] sm:$0xff]  ;;  %v481_v17 = vunpack.c.l.bf16 %v423_v1  ;;  %v577_v19 = vunpack.c.l.bf16 %v519_v3 }
  0xed   : > { %v9622_v24 = vld [vmem:[#allocation7 + $0x644] sm:$0xf]  ;;  %v7396_v28 = vor.u32 %v9430_v18, %v7393_v23  ;;  %2539 = vmatpush.bf16.msrb.mxu2 %v7908_v22  ;;  %v10689_v56 = vpack.c.bf16 %v633_v41, %v629_v40  ;;  %v10691_v57 = vpack.c.bf16 %v634_v43, %v630_v42  ;;  %v575_v37 = vunpack.c.l.bf16 %v518_v6 }
  0xee   : > { %v8161_v25 = vld [vmem:[#allocation7 + $0x660] sm:$0xf0]  ;;  %v480_v40 = vunpack.c.h.bf16 %v422_v4  ;;  %v484_v41 = vunpack.c.h.bf16 %v424_v5  ;;  %v576_v42 = vunpack.c.h.bf16 %v518_v6  ;;  %v580_v43 = vunpack.c.h.bf16 %v520_v8 }
  0xef   : > { %v8164_v29 = vor.u32 %v9622_v24, %v8161_v25  ;;  %v9494_v30 = vld [vmem:[#allocation7 + $0x244] sm:$0xf]  ;;  %2441 = vmatpush.bf16.msrb.mxu0 %v7396_v28  ;;  %v482_v24 = vunpack.c.h.bf16 %v423_v1  ;;  %v641_v45 = vmul.f32 %v577_v19, %v481_v17  ;;  %v643_v1 = vmul.f32 %v579_v38, %v483_v36  ;;  %v427_v17 = vld [vmem:[%s10527_s12 + $0xf0] sm:$0xff]  ;;  %v9675_v36 = vld [vmem:[#allocation7 + $0x7e4] sm:$0xf0] }
  0xf0   : > { %v7649_v31 = vld [vmem:[#allocation7 + $0x260] sm:$0xf0]  ;;  %v523_v19 = vld [vmem:[%s10535_s2 + $0xf0] sm:$0xff] }
  0xf1   : > { %v7652_v35 = vor.u32 %v9494_v30, %v7649_v31  ;;  %2588 = vmatpush.bf16.msrb.mxu3 %v8164_v29  ;;  %v421_v0 = vld [vmem:[%s10527_s12 + $0xc0] sm:$0xff]  ;;  %v578_v30 = vunpack.c.h.bf16 %v519_v3  ;;  %v479_v31 = vunpack.c.l.bf16 %v422_v4  ;;  %v644_v3 = vmul.f32 %v580_v43, %v484_v41 }
  0xf2   : > { %v517_v2 = vld [vmem:[%s10535_s2 + $0xc0] sm:$0xff]  ;;  %v477_v16 = vunpack.c.l.bf16 %v421_v0  ;;  %v478_v23 = vunpack.c.h.bf16 %v421_v0  ;;  %v586_v38 = vunpack.c.h.bf16 %v523_v19 }
  0xf3   : > { %2490 = vmatpush.bf16.msrb.mxu1 %v7652_v35  ;;  %v573_v18 = vunpack.c.l.bf16 %v517_v2  ;;  %v9550_v20 = vld [vmem:[#allocation7 + $0x404] sm:$0xf]  ;;  %v574_v25 = vunpack.c.h.bf16 %v517_v2  ;;  %v642_v47 = vmul.f32 %v578_v30, %v482_v24  ;;  %v639_v0 = vmul.f32 %v575_v37, %v479_v31 }
  0xf4   : > { %v7873_v21 = vld [vmem:[#allocation7 + $0x420] sm:$0xf0]  ;;  %v640_v2 = vmul.f32 %v576_v42, %v480_v40  ;;  %v585_v30 = vunpack.c.l.bf16 %v523_v19  ;;  %v7847_v19 = vld [vmem:[#allocation7 + $0x3c8] sm:$0xf] }
  0xf5   : > { %v9422_v22 = vld [vmem:[#allocation7 + $0x4] sm:$0xf]  ;;  %v7876_v26 = vor.u32 %v9550_v20, %v7873_v21  ;;  %v637_v44 = vmul.f32 %v573_v18, %v477_v16  ;;  %v638_v46 = vmul.f32 %v574_v25, %v478_v23  ;;  %v10713_v6 = vpack.c.bf16 %v643_v1, %v639_v0  ;;  %v426_v20 = vld [vmem:[%s10527_s12 + $0xe8] sm:$0xff]  ;;  %v428_v21 = vld [vmem:[%s10527_s12 + $0xf8] sm:$0xff] }
  0xf6   : > { %v7361_v27 = vld [vmem:[#allocation7 + $0x20] sm:$0xf0]  ;;  %v10715_v8 = vpack.c.bf16 %v644_v3, %v640_v2  ;;  %v524_v23 = vld [vmem:[%s10535_s2 + $0xf8] sm:$0xff]  ;;  %v489_v25 = vunpack.c.l.bf16 %v427_v17  ;;  %v487_v41 = vunpack.c.l.bf16 %v426_v20  ;;  %v491_v42 = vunpack.c.l.bf16 %v428_v21 }
  0xf7   : > { %2262 = vmatmul.bf16.gmra.mxu0 %v10649_v52  ;;  %v9614_v28 = vld [vmem:[#allocation7 + $0x604] sm:$0xf]  ;;  %v7364_v32 = vor.u32 %v9422_v22, %v7361_v27  ;;  %2540 = vmatpush.bf16.msrb.mxu2 %v7876_v26  ;;  %v10709_v4 = vpack.c.bf16 %v641_v45, %v637_v44  ;;  %v10711_v5 = vpack.c.bf16 %v642_v47, %v638_v46  ;;  %v522_v22 = vld [vmem:[%s10535_s2 + $0xe8] sm:$0xff]  ;;  %v587_v44 = vunpack.c.l.bf16 %v524_v23 }
  0xf8   : > { %2311 = vmatmul.bf16.gmra.mxu1 %v10651_v53  ;;  %v8129_v29 = vld [vmem:[#allocation7 + $0x620] sm:$0xf0]  ;;  %v8103_v27 = vld [vmem:[#allocation7 + $0x5c8] sm:$0xf]  ;;  %v583_v43 = vunpack.c.l.bf16 %v522_v22  ;;  %v488_v45 = vunpack.c.h.bf16 %v426_v20  ;;  %v492_v46 = vunpack.c.h.bf16 %v428_v21  ;;  %v584_v47 = vunpack.c.h.bf16 %v522_v22 }
  0xf9   : > { %v8132_v33 = vor.u32 %v9614_v28, %v8129_v29  ;;  %v9486_v34 = vld [vmem:[#allocation7 + $0x204] sm:$0xf]  ;;  %2442 = vmatpush.bf16.msrb.mxu0 %v7364_v32  ;;  %v9611_v28 = vld [vmem:[#allocation7 + $0x5e4] sm:$0xf0]  ;;  %v490_v32 = vunpack.c.h.bf16 %v427_v17  ;;  %v588_v0 = vunpack.c.h.bf16 %v524_v23  ;;  %v649_v2 = vmul.f32 %v585_v30, %v489_v25 }
  0xfa   : > { %2360 = vmatmul.bf16.gmra.mxu2 %v10653_v54  ;;  %v7617_v35 = vld [vmem:[#allocation7 + $0x220] sm:$0xf0]  ;;  %v7591_v29 = vld [vmem:[#allocation7 + $0x1c8] sm:$0xf]  ;;  %v647_v17 = vmul.f32 %v583_v43, %v487_v41 }
  0xfb   : > { %v7620_v39 = vor.u32 %v9486_v34, %v7617_v35  ;;  %2589 = vmatpush.bf16.msrb.mxu3 %v8132_v33  ;;  %v425_v16 = vld [vmem:[%s10527_s12 + $0xe0] sm:$0xff]  ;;  %v8104_v33 = vor.u32 %v9611_v28, %v8103_v27  ;;  %v9483_v34 = vld [vmem:[#allocation7 + $0x1e4] sm:$0xf0]  ;;  %v648_v28 = vmul.f32 %v584_v47, %v488_v45 }
  0xfc   : > { %2409 = vmatmul.bf16.gmra.mxu3 %v10655_v55  ;;  %v521_v18 = vld [vmem:[%s10535_s2 + $0xe0] sm:$0xff]  ;;  %v485_v24 = vunpack.c.l.bf16 %v425_v16  ;;  %v486_v31 = vunpack.c.h.bf16 %v425_v16  ;;  %v8359_v35 = vld [vmem:[#allocation7 + $0x7c8] sm:$0xf]  ;;  %v650_v16 = vmul.f32 %v586_v38, %v490_v32 }
  0xfd   : > { %2491 = vmatpush.bf16.msrb.mxu1 %v7620_v39  ;;  %v581_v26 = vunpack.c.l.bf16 %v521_v18  ;;  %v582_v37 = vunpack.c.h.bf16 %v521_v18  ;;  %v7592_v39 = vor.u32 %v9483_v34, %v7591_v29  ;;  %v8360_v40 = vor.u32 %v9675_v36, %v8359_v35  ;;  %2729 = vmatpush.bf16.msra.mxu2 %v8104_v33  ;;  %v9547_v27 = vld [vmem:[#allocation7 + $0x3e4] sm:$0xf0] }
  0xfe   : > { %v651_v18 = vmul.f32 %v587_v44, %v491_v42  ;;  %v652_v29 = vmul.f32 %v588_v0, %v492_v46  ;;  %v7848_v34 = vor.u32 %v9547_v27, %v7847_v19  ;;  %v8071_v23 = vld [vmem:[#allocation7 + $0x588] sm:$0xf] }
  0xff   : > { %2631 = vmatpush.bf16.msra.mxu0 %v7592_v39  ;;  %2778 = vmatpush.bf16.msra.mxu3 %v8360_v40  ;;  %v645_v1 = vmul.f32 %v581_v26, %v485_v24  ;;  %v646_v3 = vmul.f32 %v582_v37, %v486_v31  ;;  %v9603_v24 = vld [vmem:[#allocation7 + $0x5a4] sm:$0xf0]  ;;  %v10741_v37 = vld [vmem:[#allocation8] sm:$0xff] }
 0x100   : > { %v10733_v21 = vpack.c.bf16 %v651_v18, %v647_v17  ;;  %v10735_v22 = vpack.c.bf16 %v652_v29, %v648_v28  ;;  %v7559_v25 = vld [vmem:[#allocation7 + $0x188] sm:$0xf]  ;;  %v8072_v26 = vor.u32 %v9603_v24, %v8071_v23  ;;  %v10744_v40 = vperm.slane %v10741_v37, 0 }
 0x101   : > { %v10729_v35 = vpack.c.bf16 %v649_v2, %v645_v1  ;;  %2680 = vmatpush.bf16.msra.mxu1 %v7848_v34  ;;  %v10731_v20 = vpack.c.bf16 %v650_v16, %v646_v3  ;;  %v9475_v30 = vld [vmem:[#allocation7 + $0x1a4] sm:$0xf0] }
 0x102   : > { %v8327_v31 = vld [vmem:[#allocation7 + $0x788] sm:$0xf]  ;;  %v7560_v33 = vor.u32 %v9475_v30, %v7559_v25  ;;  %2730 = vmatpush.bf16.msra.mxu2 %v8072_v26 }
 0x103   : > { %v9667_v32 = vld [vmem:[#allocation7 + $0x7a4] sm:$0xf0] }
 0x104   : > { %v8328_v36 = vor.u32 %v9667_v32, %v8327_v31  ;;  %2632 = vmatpush.bf16.msra.mxu0 %v7560_v33  ;;  %v7815_v38 = vld [vmem:[#allocation7 + $0x388] sm:$0xf] }
 0x105   : > { %v9539_v39 = vld [vmem:[#allocation7 + $0x3a4] sm:$0xf0] }
 0x106   : > { %2779 = vmatpush.bf16.msra.mxu3 %v8328_v36  ;;  %v7816_v41 = vor.u32 %v9539_v39, %v7815_v38  ;;  %v8039_v46 = vld [vmem:[#allocation7 + $0x548] sm:$0xf] }
 0x107   : > { %2267 = vmatmul.bf16.gmra.mxu0 %v10669_v48  ;;  %v9595_v47 = vld [vmem:[#allocation7 + $0x564] sm:$0xf0] }
 0x108   : > { %2316 = vmatmul.bf16.gmra.mxu1 %v10671_v49  ;;  %v7527_v0 = vld [vmem:[#allocation7 + $0x148] sm:$0xf]  ;;  %v8040_v2 = vor.u32 %v9595_v47, %v8039_v46 }
 0x109   : > { %2681 = vmatpush.bf16.msra.mxu1 %v7816_v41  ;;  %v9467_v3 = vld [vmem:[#allocation7 + $0x164] sm:$0xf0] }
 0x10a   : > { %2365 = vmatmul.bf16.gmra.mxu2 %v10673_v50  ;;  %v8295_v16 = vld [vmem:[#allocation7 + $0x748] sm:$0xf]  ;;  %v7528_v28 = vor.u32 %v9467_v3, %v7527_v0 }
 0x10b   : > { %v9659_v17 = vld [vmem:[#allocation7 + $0x764] sm:$0xf0]  ;;  %2731 = vmatpush.bf16.msra.mxu2 %v8040_v2 }
 0x10c   : > { %2414 = vmatmul.bf16.gmra.mxu3 %v10675_v51  ;;  %v8296_v29 = vor.u32 %v9659_v17, %v8295_v16  ;;  %2633 = vmatpush.bf16.msra.mxu0 %v7528_v28  ;;  %v7783_v26 = vld [vmem:[#allocation7 + $0x348] sm:$0xf] }
 0x10d   : > { %v9531_v30 = vld [vmem:[#allocation7 + $0x364] sm:$0xf0] }
 0x10e   : > { %2780 = vmatpush.bf16.msra.mxu3 %v8296_v29  ;;  %v7784_v31 = vor.u32 %v9531_v30, %v7783_v26  ;;  %v8007_v47 = vld [vmem:[#allocation7 + $0x508] sm:$0xf] }
 0x10f   : > { %v9587_v0 = vld [vmem:[#allocation7 + $0x524] sm:$0xf0] }
 0x110   : > { %2682 = vmatpush.bf16.msra.mxu1 %v7784_v31  ;;  %v8008_v3 = vor.u32 %v9587_v0, %v8007_v47  ;;  %v9459_v16 = vld [vmem:[#allocation7 + $0x124] sm:$0xf0] }
 0x111   : > { %v8263_v17 = vld [vmem:[#allocation7 + $0x708] sm:$0xf] }
 0x112   : > { %2732 = vmatpush.bf16.msra.mxu2 %v8008_v3  ;;  %v7751_v30 = vld [vmem:[#allocation7 + $0x308] sm:$0xf] }
 0x113   : > { %v9523_v31 = vld [vmem:[#allocation7 + $0x324] sm:$0xf0] }
 0x114   : > { %v7463_v3 = vld [vmem:[#allocation7 + $0xc8] sm:$0xf] }
 0x117   : > { %2272 = vmatmul.bf16.gmra.mxu0 %v10689_v56 }
 0x118   : > { %2321 = vmatmul.bf16.gmra.mxu1 %v10691_v57 }
 0x11a   : > { %2370 = vmatmul.bf16.gmra.mxu2 %v10693_v58 }
 0x11c   : > { %2419 = vmatmul.bf16.gmra.mxu3 %v10695_v59 }
 0x127   : > { %2277 = vmatmul.bf16.gmra.mxu0 %v10709_v4 }
 0x128   : > { %2326 = vmatmul.bf16.gmra.mxu1 %v10711_v5 }
 0x12a   : > { %2375 = vmatmul.bf16.gmra.mxu2 %v10713_v6 }
 0x12c   : > { %2424 = vmatmul.bf16.gmra.mxu3 %v10715_v8 }
 0x137   : > { %2282 = vmatmul.bf16.gmra.mxu0 %v10729_v35 }
 0x138   : > { %2331 = vmatmul.bf16.gmra.mxu1 %v10731_v20 }
 0x13a   : > { %2380 = vmatmul.bf16.gmra.mxu2 %v10733_v21 }
 0x13c   : > { %2429 = vmatmul.bf16.gmra.mxu3 %v10735_v22 }
 0x144   : > { %v2248_v42 = vpop.f32.mrf.mxu0 }
 0x145   : > { %v2249_v43 = vadd.f32 %v2248_v42, %v10744_v40  ;;  %v2297_v44 = vpop.f32.mrf.mxu1 }
 0x147   : > { %v2298_v45 = vadd.f32 %v2297_v44, %v2249_v43  ;;  %2443 = vmatmul.bf16.vlgmr.msrb.gmra.mxu0 %v10581_v7 }
 0x148   : > { %2492 = vmatmul.bf16.vlgmr.msrb.gmra.mxu1 %v10583_v11 }
 0x14a   : > { %2541 = vmatmul.bf16.vlgmr.msrb.gmra.mxu2 %v10585_v12 }
 0x14c   : > { %2590 = vmatmul.bf16.vlgmr.msrb.gmra.mxu3 %v10593_v15  ;;  %v2250_v27 = vpop.f32.mrf.mxu0 }
 0x14d   : > { %v2346_v1 = vpop.f32.mrf.mxu2  ;;  %v2251_v34 = vadd.f32 %v2250_v27, %v10744_v40  ;;  %v2299_v23 = vpop.f32.mrf.mxu1 }
 0x14e   : > { %v2347_v18 = vadd.f32 %v2346_v1, %v2298_v45  ;;  %v7495_v1 = vld [vmem:[#allocation7 + $0x108] sm:$0xf] }
 0x14f   : > { %v2395_v19 = vpop.f32.mrf.mxu3  ;;  %v2300_v25 = vadd.f32 %v2299_v23, %v2251_v34  ;;  %v7496_v29 = vor.u32 %v9459_v16, %v7495_v1  ;;  %v7975_v1 = vld [vmem:[#allocation7 + $0x4c8] sm:$0xf] }
 0x150   : > { %v2396_v24 = vadd.f32 %v2395_v19, %v2347_v18  ;;  %v9651_v18 = vld [vmem:[#allocation7 + $0x724] sm:$0xf0] }
 0x151   : > { %v8264_v34 = vor.u32 %v9651_v18, %v8263_v17  ;;  %2634 = vmatpush.bf16.msra.mxu0 %v7496_v29  ;;  %v9451_v18 = vld [vmem:[#allocation7 + $0xe4] sm:$0xf0] }
 0x152   : > { %v3807_v44 = vmax.f32 %v2396_v24, 0.0 }
 0x153   : > { %2781 = vmatpush.bf16.msra.mxu3 %v8264_v34 }
 0x154   : > { %v2253_v38 = vpop.f32.mrf.mxu0 }
 0x155   : > { %v2348_v32 = vpop.f32.mrf.mxu2  ;;  %v2254_v39 = vadd.f32 %v2253_v38, %v10744_v40  ;;  %v2302_v41 = vpop.f32.mrf.mxu1 }
 0x156   : > { %v2349_v33 = vadd.f32 %v2348_v32, %v2300_v25  ;;  %v7752_v32 = vor.u32 %v9523_v31, %v7751_v30 }
 0x157   : > { %v2397_v36 = vpop.f32.mrf.mxu3  ;;  %v2303_v43 = vadd.f32 %v2302_v41, %v2254_v39  ;;  %2448 = vmatmul.bf16.gmra.mxu0 %v10609_v9 }
 0x158   : > { %v2398_v42 = vadd.f32 %v2397_v36, %v2349_v33  ;;  %2497 = vmatmul.bf16.gmra.mxu1 %v10611_v10 }
 0x159   : > { %2683 = vmatpush.bf16.msra.mxu1 %v7752_v32  ;;  %v7719_v32 = vld [vmem:[#allocation7 + $0x2c8] sm:$0xf] }
 0x15a   : > { %v3815_v45 = vmax.f32 %v2398_v42, 0.0  ;;  %2546 = vmatmul.bf16.gmra.mxu2 %v10613_v13 }
 0x15c   : > { %2595 = vmatmul.bf16.gmra.mxu3 %v10615_v14  ;;  %v10757_v46 = vpack.c.bf16 %v3815_v45, %v3807_v44  ;;  %v2255_v28 = vpop.f32.mrf.mxu0 }
 0x15d   : > { %v2351_v2 = vpop.f32.mrf.mxu2  ;;  %v2256_v23 = vadd.f32 %v2255_v28, %v10744_v40  ;;  %v2304_v24 = vpop.f32.mrf.mxu1 }
 0x15e   : > { %v2352_v19 = vadd.f32 %v2351_v2, %v2303_v43  ;;  %v9579_v2 = vld [vmem:[#allocation7 + $0x4e4] sm:$0xf0] }
 0x15f   : > { %v2400_v27 = vpop.f32.mrf.mxu3  ;;  %v2305_v26 = vadd.f32 %v2304_v24, %v2256_v23  ;;  %v7976_v17 = vor.u32 %v9579_v2, %v7975_v1  ;;  %v7464_v23 = vor.u32 %v9451_v18, %v7463_v3  ;;  %v7431_v18 = vld [vmem:[#allocation7 + $0x88] sm:$0xf] }
 0x160   : > { %v2401_v25 = vadd.f32 %v2400_v27, %v2352_v19  ;;  %v8231_v19 = vld [vmem:[#allocation7 + $0x6c8] sm:$0xf] }
 0x161   : > { %v9643_v27 = vld [vmem:[#allocation7 + $0x6e4] sm:$0xf0]  ;;  %2733 = vmatpush.bf16.msra.mxu2 %v7976_v17  ;;  %2635 = vmatpush.bf16.msra.mxu0 %v7464_v23 }
 0x162   : > { %v3823_v45 = vmax.f32 %v2401_v25, 0.0  ;;  %v8232_v24 = vor.u32 %v9643_v27, %v8231_v19  ;;  %v9571_v17 = vld [vmem:[#allocation7 + $0x4a4] sm:$0xf0] }
 0x164   : > { %v2258_v39 = vpop.f32.mrf.mxu0  ;;  %2782 = vmatpush.bf16.msra.mxu3 %v8232_v24 }
 0x165   : > { %v2353_v33 = vpop.f32.mrf.mxu2  ;;  %v2259_v41 = vadd.f32 %v2258_v39, %v10744_v40  ;;  %v2307_v42 = vpop.f32.mrf.mxu1 }
 0x166   : > { %v2354_v36 = vadd.f32 %v2353_v33, %v2305_v26  ;;  %v9515_v33 = vld [vmem:[#allocation7 + $0x2e4] sm:$0xf0] }
 0x167   : > { %v2402_v38 = vpop.f32.mrf.mxu3  ;;  %v2308_v44 = vadd.f32 %v2307_v42, %v2259_v41  ;;  %2453 = vmatmul.bf16.gmra.mxu0 %v10629_v60 }
 0x168   : > { %v2403_v43 = vadd.f32 %v2402_v38, %v2354_v36  ;;  %2502 = vmatmul.bf16.gmra.mxu1 %v10631_v61  ;;  %v7720_v36 = vor.u32 %v9515_v33, %v7719_v32 }
 0x16a   : > { %v3831_v47 = vmax.f32 %v2403_v43, 0.0  ;;  %2551 = vmatmul.bf16.gmra.mxu2 %v10633_v62  ;;  %2684 = vmatpush.bf16.msra.mxu1 %v7720_v36 }
 0x16c   : > { %2600 = vmatmul.bf16.gmra.mxu3 %v10635_v63  ;;  %v10765_v0 = vpack.c.bf16 %v3831_v47, %v3823_v45  ;;  %v2260_v34 = vpop.f32.mrf.mxu0 }
 0x16d   : > { %v2356_v16 = vpop.f32.mrf.mxu2  ;;  %v2261_v25 = vadd.f32 %v2260_v34, %v10744_v40  ;;  %v2309_v26 = vpop.f32.mrf.mxu1  ;;  %v9635_v34 = vld [vmem:[#allocation7 + $0x6a4] sm:$0xf0] }
 0x16e   : > { %v2357_v28 = vadd.f32 %v2356_v16, %v2308_v44  ;;  %v7943_v16 = vld [vmem:[#allocation7 + $0x488] sm:$0xf] }
 0x16f   : > { %v2405_v29 = vpop.f32.mrf.mxu3  ;;  %v2310_v31 = vadd.f32 %v2309_v26, %v2261_v25  ;;  %v7944_v27 = vor.u32 %v9571_v17, %v7943_v16 }
 0x170   : > { %v2406_v30 = vadd.f32 %v2405_v29, %v2357_v28  ;;  %v9443_v28 = vld [vmem:[#allocation7 + $0xa4] sm:$0xf0] }
 0x171   : > { %v8199_v29 = vld [vmem:[#allocation7 + $0x688] sm:$0xf]  ;;  %v7432_v26 = vor.u32 %v9443_v28, %v7431_v18  ;;  %2734 = vmatpush.bf16.msra.mxu2 %v7944_v27 }
 0x172   : > { %v3839_v1 = vmax.f32 %v2406_v30, 0.0  ;;  %v8200_v30 = vor.u32 %v9635_v34, %v8199_v29  ;;  %v7911_v27 = vld [vmem:[#allocation7 + $0x448] sm:$0xf] }
 0x173   : > { %2636 = vmatpush.bf16.msra.mxu0 %v7432_v26  ;;  %v9563_v28 = vld [vmem:[#allocation7 + $0x464] sm:$0xf0] }
 0x174   : > { %v2263_v42 = vpop.f32.mrf.mxu0  ;;  %2783 = vmatpush.bf16.msra.mxu3 %v8200_v30  ;;  %v7399_v29 = vld [vmem:[#allocation7 + $0x48] sm:$0xf] }
 0x175   : > { %v2358_v38 = vpop.f32.mrf.mxu2  ;;  %v2264_v43 = vadd.f32 %v2263_v42, %v10744_v40  ;;  %v2312_v44 = vpop.f32.mrf.mxu1  ;;  %v9627_v26 = vld [vmem:[#allocation7 + $0x664] sm:$0xf0] }
 0x176   : > { %v2359_v39 = vadd.f32 %v2358_v38, %v2310_v31  ;;  %v7687_v38 = vld [vmem:[#allocation7 + $0x288] sm:$0xf] }
 0x177   : > { %v2407_v41 = vpop.f32.mrf.mxu3  ;;  %v2313_v47 = vadd.f32 %v2312_v44, %v2264_v43  ;;  %2458 = vmatmul.bf16.gmra.mxu0 %v10649_v52 }
 0x178   : > { %v2408_v45 = vadd.f32 %v2407_v41, %v2359_v39  ;;  %2507 = vmatmul.bf16.gmra.mxu1 %v10651_v53  ;;  %v9507_v39 = vld [vmem:[#allocation7 + $0x2a4] sm:$0xf0] }
 0x179   : > { %v7688_v41 = vor.u32 %v9507_v39, %v7687_v38 }
 0x17a   : > { %v3847_v2 = vmax.f32 %v2408_v45, 0.0  ;;  %2556 = vmatmul.bf16.gmra.mxu2 %v10653_v54 }
 0x17b   : > { %2685 = vmatpush.bf16.msra.mxu1 %v7688_v41 }
 0x17c   : > { %2605 = vmatmul.bf16.gmra.mxu3 %v10655_v55  ;;  %v10773_v3 = vpack.c.bf16 %v3847_v2, %v3839_v1  ;;  %v2265_v25 = vpop.f32.mrf.mxu0 }
 0x17d   : > { %v2361_v19 = vpop.f32.mrf.mxu2  ;;  %v2266_v31 = vadd.f32 %v2265_v25, %v10744_v40  ;;  %v2314_v32 = vpop.f32.mrf.mxu1  ;;  %v8167_v25 = vld [vmem:[#allocation7 + $0x648] sm:$0xf] }
 0x17e   : > { %12088 = vst [vmem:[#allocation18_spill] sm:$0xff] %v10773_v3  ;;  %v2362_v23 = vadd.f32 %v2361_v19, %v2313_v47 }
 0x17f   : > { %v2410_v24 = vpop.f32.mrf.mxu3  ;;  %v2315_v36 = vadd.f32 %v2314_v32, %v2266_v31 }
 0x180   : > { %v2411_v33 = vadd.f32 %v2410_v24, %v2362_v23  ;;  %v7912_v23 = vor.u32 %v9563_v28, %v7911_v27  ;;  %v9435_v24 = vld [vmem:[#allocation7 + $0x64] sm:$0xf0] }
 0x182   : > { %v3855_v17 = vmax.f32 %v2411_v33, 0.0  ;;  %v7400_v33 = vor.u32 %v9435_v24, %v7399_v29  ;;  %2735 = vmatpush.bf16.msra.mxu2 %v7912_v23  ;;  %v7879_v24 = vld [vmem:[#allocation7 + $0x408] sm:$0xf] }
 0x184   : > { %v2268_v45 = vpop.f32.mrf.mxu0  ;;  %2637 = vmatpush.bf16.msra.mxu0 %v7400_v33  ;;  %v8135_v33 = vld [vmem:[#allocation7 + $0x608] sm:$0xf] }
 0x185   : > { %v2363_v42 = vpop.f32.mrf.mxu2  ;;  %v2269_v47 = vadd.f32 %v2268_v45, %v10744_v40  ;;  %v2317_v1 = vpop.f32.mrf.mxu1 }
 0x186   : > { %v2364_v43 = vadd.f32 %v2363_v42, %v2315_v36  ;;  %v8168_v36 = vor.u32 %v9627_v26, %v8167_v25  ;;  %v9555_v25 = vld [vmem:[#allocation7 + $0x424] sm:$0xf0] }
 0x187   : > { %v2412_v44 = vpop.f32.mrf.mxu3  ;;  %v2318_v16 = vadd.f32 %v2317_v1, %v2269_v47  ;;  %2463 = vmatmul.bf16.gmra.mxu0 %v10669_v48  ;;  %v7367_v26 = vld [vmem:[#allocation7 + $0x8] sm:$0xf] }
 0x188   : > { %v2413_v2 = vadd.f32 %v2412_v44, %v2364_v43  ;;  %2512 = vmatmul.bf16.gmra.mxu1 %v10671_v49  ;;  %2784 = vmatpush.bf16.msra.mxu3 %v8168_v36  ;;  %v7655_v43 = vld [vmem:[#allocation7 + $0x248] sm:$0xf] }
 0x189   : > { %v9499_v44 = vld [vmem:[#allocation7 + $0x264] sm:$0xf0] }
 0x18a   : > { %v3863_v18 = vmax.f32 %v2413_v2, 0.0  ;;  %2561 = vmatmul.bf16.gmra.mxu2 %v10673_v50  ;;  %v7656_v45 = vor.u32 %v9499_v44, %v7655_v43  ;;  %v9619_v36 = vld [vmem:[#allocation7 + $0x624] sm:$0xf0] }
 0x18b   : > { %v8136_v43 = vor.u32 %v9619_v36, %v8135_v33  ;;  %v9607_v33 = vld [vmem:[#allocation7 + $0x5cc] sm:$0xf] }
 0x18c   : > { %2610 = vmatmul.bf16.gmra.mxu3 %v10675_v51  ;;  %v10781_v19 = vpack.c.bf16 %v3863_v18, %v3855_v17  ;;  %v2270_v32 = vpop.f32.mrf.mxu0  ;;  %2686 = vmatpush.bf16.msra.mxu1 %v7656_v45  ;;  %v8105_v36 = vld [vmem:[#allocation7 + $0x5e8] sm:$0xf0] }
 0x18d   : > { %v2366_v34 = vpop.f32.mrf.mxu2  ;;  %v2271_v38 = vadd.f32 %v2270_v32, %v10744_v40  ;;  %v2319_v39 = vpop.f32.mrf.mxu1  ;;  %v9427_v32 = vld [vmem:[#allocation7 + $0x24] sm:$0xf0]  ;;  %2785 = vmatpush.bf16.msra.mxu3 %v8136_v43  ;;  %v9671_v43 = vld [vmem:[#allocation7 + $0x7cc] sm:$0xf] }
 0x18e   : > { %12089 = vst [vmem:[#allocation19_spill] sm:$0xff] %v10781_v19  ;;  %v2367_v30 = vadd.f32 %v2366_v34, %v2318_v16 }
 0x18f   : > { %v2415_v31 = vpop.f32.mrf.mxu3  ;;  %v2320_v42 = vadd.f32 %v2319_v39, %v2271_v38 }
 0x190   : > { %v2416_v41 = vadd.f32 %v2415_v31, %v2367_v30  ;;  %v7880_v31 = vor.u32 %v9555_v25, %v7879_v24 }
 0x192   : > { %v3871_v29 = vmax.f32 %v2416_v41, 0.0  ;;  %2736 = vmatpush.bf16.msra.mxu2 %v7880_v31 }
 0x194   : > { %v2273_v16 = vpop.f32.mrf.mxu0 }
 0x195   : > { %v2368_v47 = vpop.f32.mrf.mxu2  ;;  %v2274_v17 = vadd.f32 %v2273_v16, %v10744_v40  ;;  %v2322_v18 = vpop.f32.mrf.mxu1  ;;  %v9491_v16 = vld [vmem:[#allocation7 + $0x224] sm:$0xf0] }
 0x196   : > { %v2369_v1 = vadd.f32 %v2368_v47, %v2320_v42  ;;  %v7368_v42 = vor.u32 %v9427_v32, %v7367_v26 }
 0x197   : > { %v2417_v2 = vpop.f32.mrf.mxu3  ;;  %v2323_v28 = vadd.f32 %v2322_v18, %v2274_v17  ;;  %2468 = vmatmul.bf16.gmra.mxu0 %v10689_v56 }
 0x198   : > { %v2418_v27 = vadd.f32 %v2417_v2, %v2369_v1  ;;  %2517 = vmatmul.bf16.gmra.mxu1 %v10691_v57  ;;  %2638 = vmatpush.bf16.msra.mxu0 %v7368_v42  ;;  %v7623_v2 = vld [vmem:[#allocation7 + $0x208] sm:$0xf]  ;;  %v7593_v42 = vld [vmem:[#allocation7 + $0x1e8] sm:$0xf0] }
 0x199   : > { %v7624_v17 = vor.u32 %v9491_v16, %v7623_v2 }
 0x19a   : > { %v3879_v34 = vmax.f32 %v2418_v27, 0.0  ;;  %2566 = vmatmul.bf16.gmra.mxu2 %v10693_v58 }
 0x19b   : > { %2687 = vmatpush.bf16.msra.mxu1 %v7624_v17 }
 0x19c   : > { %2615 = vmatmul.bf16.gmra.mxu3 %v10695_v59  ;;  %v10789_v23 = vpack.c.bf16 %v3879_v34, %v3871_v29  ;;  %v2275_v41 = vpop.f32.mrf.mxu0 }
 0x19d   : > { %v2371_v30 = vpop.f32.mrf.mxu2  ;;  %v2276_v44 = vadd.f32 %v2275_v41, %v10744_v40  ;;  %v2324_v45 = vpop.f32.mrf.mxu1  ;;  %v8108_v41 = vor.u32 %v9607_v33, %v8105_v36 }
 0x19e   : > { %12090 = vst [vmem:[#allocation20_spill] sm:$0xff] %v10789_v23  ;;  %v2372_v38 = vadd.f32 %v2371_v30, %v2323_v28 }
 0x19f   : > { %v2420_v39 = vpop.f32.mrf.mxu3  ;;  %v2325_v1 = vadd.f32 %v2324_v45, %v2276_v44  ;;  %v8361_v44 = vld [vmem:[#allocation7 + $0x7e8] sm:$0xf0]  ;;  %2925 = vmatpush.bf16.msrb.mxu2 %v8108_v41 }
 0x1a0   : > { %v2421_v47 = vadd.f32 %v2420_v39, %v2372_v38  ;;  %v9479_v38 = vld [vmem:[#allocation7 + $0x1cc] sm:$0xf]  ;;  %v8364_v16 = vor.u32 %v9671_v43, %v8361_v44 }
 0x1a1   : > { %v7596_v2 = vor.u32 %v9479_v38, %v7593_v42  ;;  %v9599_v44 = vld [vmem:[#allocation7 + $0x58c] sm:$0xf] }
 0x1a2   : > { %v3887_v30 = vmax.f32 %v2421_v47, 0.0  ;;  %2974 = vmatpush.bf16.msrb.mxu3 %v8364_v16  ;;  %v7561_v16 = vld [vmem:[#allocation7 + $0x1a8] sm:$0xf0] }
 0x1a3   : > { %2827 = vmatpush.bf16.msrb.mxu0 %v7596_v2 }
 0x1a4   : > { %v2278_v28 = vpop.f32.mrf.mxu0 }
 0x1a5   : > { %v2373_v18 = vpop.f32.mrf.mxu2  ;;  %v2279_v34 = vadd.f32 %v2278_v28, %v10744_v40  ;;  %v2327_v24 = vpop.f32.mrf.mxu1  ;;  %v9543_v28 = vld [vmem:[#allocation7 + $0x3cc] sm:$0xf] }
 0x1a6   : > { %v2374_v27 = vadd.f32 %v2373_v18, %v2325_v1 }
 0x1a7   : > { %v2422_v29 = vpop.f32.mrf.mxu3  ;;  %v2328_v26 = vadd.f32 %v2327_v24, %v2279_v34  ;;  %2473 = vmatmul.bf16.gmra.mxu0 %v10709_v4  ;;  %v7849_v34 = vld [vmem:[#allocation7 + $0x3e8] sm:$0xf0] }
 0x1a8   : > { %v2423_v25 = vadd.f32 %v2422_v29, %v2374_v27  ;;  %2522 = vmatmul.bf16.gmra.mxu1 %v10711_v5  ;;  %v7852_v24 = vor.u32 %v9543_v28, %v7849_v34 }
 0x1aa   : > { %v3895_v31 = vmax.f32 %v2423_v25, 0.0  ;;  %2571 = vmatmul.bf16.gmra.mxu2 %v10713_v6  ;;  %2876 = vmatpush.bf16.msrb.mxu1 %v7852_v24 }
 0x1ac   : > { %2620 = vmatmul.bf16.gmra.mxu3 %v10715_v8  ;;  %v10797_v32 = vpack.c.bf16 %v3895_v31, %v3887_v30  ;;  %v2280_v47 = vpop.f32.mrf.mxu0 }
 0x1ad   : > { %v2376_v39 = vpop.f32.mrf.mxu2  ;;  %v2281_v17 = vadd.f32 %v2280_v47, %v10744_v40  ;;  %v2329_v18 = vpop.f32.mrf.mxu1 }
 0x1ae   : > { %12091 = vst [vmem:[#allocation21_spill] sm:$0xff] %v10797_v32  ;;  %v2377_v45 = vadd.f32 %v2376_v39, %v2328_v26 }
 0x1af   : > { %v2425_v1 = vpop.f32.mrf.mxu3  ;;  %v2330_v29 = vadd.f32 %v2329_v18, %v2281_v17  ;;  %v9663_v17 = vld [vmem:[#allocation7 + $0x78c] sm:$0xf] }
 0x1b0   : > { %v2426_v27 = vadd.f32 %v2425_v1, %v2377_v45  ;;  %v8073_v45 = vld [vmem:[#allocation7 + $0x5a8] sm:$0xf0] }
 0x1b1   : > { %v9471_v1 = vld [vmem:[#allocation7 + $0x18c] sm:$0xf]  ;;  %v8076_v2 = vor.u32 %v9599_v44, %v8073_v45 }
 0x1b2   : > { %v3903_v41 = vmax.f32 %v2426_v27, 0.0  ;;  %v8329_v18 = vld [vmem:[#allocation7 + $0x7a8] sm:$0xf0]  ;;  %v7564_v34 = vor.u32 %v9471_v1, %v7561_v16 }
 0x1b3   : > { %v8332_v24 = vor.u32 %v9663_v17, %v8329_v18  ;;  %2926 = vmatpush.bf16.msrb.mxu2 %v8076_v2  ;;  %v9591_v18 = vld [vmem:[#allocation7 + $0x54c] sm:$0xf] }
 0x1b4   : > { %v2283_v26 = vpop.f32.mrf.mxu0  ;;  %2828 = vmatpush.bf16.msrb.mxu0 %v7564_v34 }
 0x1b5   : > { %v2378_v25 = vpop.f32.mrf.mxu2  ;;  %v2284_v33 = vadd.f32 %v2283_v26, %v10744_v40  ;;  %v2332_v36 = vpop.f32.mrf.mxu1  ;;  %2975 = vmatpush.bf16.msrb.mxu3 %v8332_v24  ;;  %v7529_v24 = vld [vmem:[#allocation7 + $0x168] sm:$0xf0] }
 0x1b6   : > { %v2379_v30 = vadd.f32 %v2378_v25, %v2330_v29 }
 0x1b7   : > { %v2427_v31 = vpop.f32.mrf.mxu3  ;;  %v2333_v39 = vadd.f32 %v2332_v36, %v2284_v33  ;;  %2478 = vmatmul.bf16.gmra.mxu0 %v10729_v35  ;;  %v9535_v33 = vld [vmem:[#allocation7 + $0x38c] sm:$0xf] }
 0x1b8   : > { %v2428_v38 = vadd.f32 %v2427_v31, %v2379_v30  ;;  %2527 = vmatmul.bf16.gmra.mxu1 %v10731_v20  ;;  %v7817_v36 = vld [vmem:[#allocation7 + $0x3a8] sm:$0xf0] }
 0x1ba   : > { %v3911_v42 = vmax.f32 %v2428_v38, 0.0  ;;  %2576 = vmatmul.bf16.gmra.mxu2 %v10733_v21  ;;  %v10809_v38 = vperm.slane %v10741_v37, 1 }
 0x1bc   : > { %2625 = vmatmul.bf16.gmra.mxu3 %v10735_v22  ;;  %v10805_v43 = vpack.c.bf16 %v3911_v42, %v3903_v41  ;;  %v2285_v27 = vpop.f32.mrf.mxu0  ;;  %v7820_v41 = vor.u32 %v9535_v33, %v7817_v36 }
 0x1bd   : > { %v2381_v47 = vpop.f32.mrf.mxu2  ;;  %v2286_v25 = vadd.f32 %v2285_v27, %v10744_v40  ;;  %v2334_v30 = vpop.f32.mrf.mxu1 }
 0x1be   : > { %12092 = vst [vmem:[#allocation22_spill] sm:$0xff] %v10805_v43  ;;  %v2382_v29 = vadd.f32 %v2381_v47, %v2333_v39  ;;  %2877 = vmatpush.bf16.msrb.mxu1 %v7820_v41 }
 0x1bf   : > { %v2430_v28 = vpop.f32.mrf.mxu3  ;;  %v2335_v26 = vadd.f32 %v2334_v30, %v2286_v25  ;;  %v9655_v25 = vld [vmem:[#allocation7 + $0x74c] sm:$0xf] }
 0x1c0   : > { %v2431_v31 = vadd.f32 %v2430_v28, %v2382_v29  ;;  %v8041_v29 = vld [vmem:[#allocation7 + $0x568] sm:$0xf0] }
 0x1c1   : > { %v9463_v28 = vld [vmem:[#allocation7 + $0x14c] sm:$0xf]  ;;  %v8044_v34 = vor.u32 %v9591_v18, %v8041_v29 }
 0x1c2   : > { %v3919_v16 = vmax.f32 %v2431_v31, 0.0  ;;  %v8297_v30 = vld [vmem:[#allocation7 + $0x768] sm:$0xf0]  ;;  %v7532_v36 = vor.u32 %v9463_v28, %v7529_v24 }
 0x1c3   : > { %v8300_v41 = vor.u32 %v9655_v25, %v8297_v30  ;;  %2927 = vmatpush.bf16.msrb.mxu2 %v8044_v34 }
 0x1c4   : > { %v2444_v45 = vpop.f32.mrf.mxu0  ;;  %2829 = vmatpush.bf16.msrb.mxu0 %v7532_v36 }
 0x1c5   : > { %v2383_v42 = vpop.f32.mrf.mxu2  ;;  %v2445_v1 = vadd.f32 %v2444_v45, %v10809_v38  ;;  %v2493_v40 = vpop.f32.mrf.mxu1  ;;  %2976 = vmatpush.bf16.msrb.mxu3 %v8300_v41 }
 0x1c6   : > { %v2384_v39 = vadd.f32 %v2383_v42, %v2335_v26 }
 0x1c7   : > { %v2432_v44 = vpop.f32.mrf.mxu3  ;;  %v2494_v2 = vadd.f32 %v2493_v40, %v2445_v1  ;;  %2639 = vmatmul.bf16.vlgmr.msra.gmra.mxu0 %v10581_v7  ;;  %v9527_v1 = vld [vmem:[#allocation7 + $0x34c] sm:$0xf] }
 0x1c8   : > { %v2433_v47 = vadd.f32 %v2432_v44, %v2384_v39  ;;  %2688 = vmatmul.bf16.vlgmr.msra.gmra.mxu1 %v10583_v11  ;;  %v7785_v40 = vld [vmem:[#allocation7 + $0x368] sm:$0xf0] }
 0x1ca   : > { %v3927_v17 = vmax.f32 %v2433_v47, 0.0  ;;  %2737 = vmatmul.bf16.vlgmr.msra.gmra.mxu2 %v10585_v12  ;;  %v7788_v47 = vor.u32 %v9527_v1, %v7785_v40 }
 0x1cc   : > { %2786 = vmatmul.bf16.vlgmr.msra.gmra.mxu3 %v10593_v15  ;;  %v10816_v37 = vpack.c.bf16 %v3927_v17, %v3919_v16  ;;  %v2446_v31 = vpop.f32.mrf.mxu0  ;;  %2878 = vmatpush.bf16.msrb.mxu1 %v7788_v47 }
 0x1cd   : > { %v2542_v27 = vpop.f32.mrf.mxu2  ;;  %v2447_v42 = vadd.f32 %v2446_v31, %v10809_v38  ;;  %v2495_v39 = vpop.f32.mrf.mxu1  ;;  %v9455_v31 = vld [vmem:[#allocation7 + $0x10c] sm:$0xf] }
 0x1ce   : > { %12093 = vst [vmem:[#allocation23_spill] sm:$0xff] %v10816_v37  ;;  %v2543_v26 = vadd.f32 %v2542_v27, %v2494_v2 }
 0x1cf   : > { %v2591_v33 = vpop.f32.mrf.mxu3  ;;  %v2496_v45 = vadd.f32 %v2495_v39, %v2447_v42  ;;  %v7497_v42 = vld [vmem:[#allocation7 + $0x128] sm:$0xf0] }
 0x1d0   : > { %v2592_v44 = vadd.f32 %v2591_v33, %v2543_v26  ;;  %v9583_v26 = vld [vmem:[#allocation7 + $0x50c] sm:$0xf]  ;;  %v7500_v47 = vor.u32 %v9455_v31, %v7497_v42 }
 0x1d1   : > { %v8009_v33 = vld [vmem:[#allocation7 + $0x528] sm:$0xf0] }
 0x1d2   : > { %v3808_v34 = vmax.f32 %v2592_v44, 0.0  ;;  %v8012_v41 = vor.u32 %v9583_v26, %v8009_v33  ;;  %v9647_v39 = vld [vmem:[#allocation7 + $0x70c] sm:$0xf]  ;;  %2830 = vmatpush.bf16.msrb.mxu0 %v7500_v47 }
 0x1d3   : > { %v9447_v47 = vld [vmem:[#allocation7 + $0xcc] sm:$0xf] }
 0x1d4   : > { %v2449_v2 = vpop.f32.mrf.mxu0  ;;  %2928 = vmatpush.bf16.msrb.mxu2 %v8012_v41 }
 0x1d5   : > { %v2544_v16 = vpop.f32.mrf.mxu2  ;;  %v2450_v29 = vadd.f32 %v2449_v2, %v10809_v38  ;;  %v2498_v28 = vpop.f32.mrf.mxu1 }
 0x1d6   : > { %v2545_v17 = vadd.f32 %v2544_v16, %v2496_v45  ;;  %v8265_v45 = vld [vmem:[#allocation7 + $0x728] sm:$0xf0] }
 0x1d7   : > { %v2593_v18 = vpop.f32.mrf.mxu3  ;;  %v2499_v24 = vadd.f32 %v2498_v28, %v2450_v29  ;;  %2644 = vmatmul.bf16.gmra.mxu0 %v10609_v9  ;;  %v8268_v16 = vor.u32 %v9647_v39, %v8265_v45  ;;  %v9519_v28 = vld [vmem:[#allocation7 + $0x30c] sm:$0xf] }
 0x1d8   : > { %v2594_v27 = vadd.f32 %v2593_v18, %v2545_v17  ;;  %2693 = vmatmul.bf16.gmra.mxu1 %v10611_v10 }
 0x1d9   : > { %2977 = vmatpush.bf16.msrb.mxu3 %v8268_v16 }
 0x1da   : > { %v3816_v25 = vmax.f32 %v2594_v27, 0.0  ;;  %2742 = vmatmul.bf16.gmra.mxu2 %v10613_v13  ;;  %v7753_v27 = vld [vmem:[#allocation7 + $0x328] sm:$0xf0] }
 0x1dc   : > { %2791 = vmatmul.bf16.gmra.mxu3 %v10615_v14  ;;  %v10824_v30 = vpack.c.bf16 %v3816_v25, %v3808_v34  ;;  %v2451_v44 = vpop.f32.mrf.mxu0  ;;  %v7756_v34 = vor.u32 %v9519_v28, %v7753_v27  ;;  %v8233_v28 = vld [vmem:[#allocation7 + $0x6e8] sm:$0xf0] }
 0x1dd   : > { %v2547_v36 = vpop.f32.mrf.mxu2  ;;  %v2452_v17 = vadd.f32 %v2451_v44, %v10809_v38  ;;  %v2500_v18 = vpop.f32.mrf.mxu1  ;;  %v7977_v44 = vld [vmem:[#allocation7 + $0x4e8] sm:$0xf0] }
 0x1de   : > { %v2548_v1 = vadd.f32 %v2547_v36, %v2499_v24  ;;  %2879 = vmatpush.bf16.msrb.mxu1 %v7756_v34 }
 0x1df   : > { %v2596_v40 = vpop.f32.mrf.mxu3  ;;  %v2501_v29 = vadd.f32 %v2500_v18, %v2452_v17  ;;  %v7465_v18 = vld [vmem:[#allocation7 + $0xe8] sm:$0xf0] }
 0x1e0   : > { %v2597_v2 = vadd.f32 %v2596_v40, %v2548_v1  ;;  %v9575_v40 = vld [vmem:[#allocation7 + $0x4cc] sm:$0xf] }
 0x1e1   : > { %v7980_v17 = vor.u32 %v9575_v40, %v7977_v44 }
 0x1e2   : > { %v3824_v41 = vmax.f32 %v2597_v2, 0.0 }
 0x1e3   : > { %2929 = vmatpush.bf16.msrb.mxu2 %v7980_v17 }
 0x1e4   : > { %v2454_v24 = vpop.f32.mrf.mxu0 }
 0x1e5   : > { %v2549_v25 = vpop.f32.mrf.mxu2  ;;  %v2455_v36 = vadd.f32 %v2454_v24, %v10809_v38  ;;  %v2503_v31 = vpop.f32.mrf.mxu1 }
 0x1e6   : > { %v2550_v26 = vadd.f32 %v2549_v25, %v2501_v29  ;;  %v9639_v29 = vld [vmem:[#allocation7 + $0x6cc] sm:$0xf]  ;;  %v7468_v25 = vor.u32 %v9447_v47, %v7465_v18 }
 0x1e7   : > { %v2598_v33 = vpop.f32.mrf.mxu3  ;;  %v2504_v39 = vadd.f32 %v2503_v31, %v2455_v36  ;;  %2649 = vmatmul.bf16.gmra.mxu0 %v10629_v60 }
 0x1e8   : > { %v2599_v42 = vadd.f32 %v2598_v33, %v2550_v26  ;;  %2698 = vmatmul.bf16.gmra.mxu1 %v10631_v61  ;;  %v8236_v26 = vor.u32 %v9639_v29, %v8233_v28  ;;  %2831 = vmatpush.bf16.msrb.mxu0 %v7468_v25  ;;  %v9439_v25 = vld [vmem:[#allocation7 + $0x8c] sm:$0xf] }
 0x1ea   : > { %v3832_v45 = vmax.f32 %v2599_v42, 0.0  ;;  %2747 = vmatmul.bf16.gmra.mxu2 %v10633_v62  ;;  %2978 = vmatpush.bf16.msrb.mxu3 %v8236_v26  ;;  %v9511_v42 = vld [vmem:[#allocation7 + $0x2cc] sm:$0xf] }
 0x1ec   : > { %2796 = vmatmul.bf16.gmra.mxu3 %v10635_v63  ;;  %v10832_v1 = vpack.c.bf16 %v3832_v45, %v3824_v41  ;;  %v2456_v2 = vpop.f32.mrf.mxu0  ;;  %v7721_v41 = vld [vmem:[#allocation7 + $0x2e8] sm:$0xf0] }
 0x1ed   : > { %v2552_v16 = vpop.f32.mrf.mxu2  ;;  %v2457_v33 = vadd.f32 %v2456_v2, %v10809_v38  ;;  %v2505_v24 = vpop.f32.mrf.mxu1  ;;  %v7724_v45 = vor.u32 %v9511_v42, %v7721_v41  ;;  %v7945_v2 = vld [vmem:[#allocation7 + $0x4a8] sm:$0xf0] }
 0x1ee   : > { %v2553_v27 = vadd.f32 %v2552_v16, %v2504_v39 }
 0x1ef   : > { %v2601_v34 = vpop.f32.mrf.mxu3  ;;  %v2506_v31 = vadd.f32 %v2505_v24, %v2457_v33  ;;  %2880 = vmatpush.bf16.msrb.mxu1 %v7724_v45  ;;  %v7433_v24 = vld [vmem:[#allocation7 + $0xa8] sm:$0xf0] }
 0x1f0   : > { %v2602_v36 = vadd.f32 %v2601_v34, %v2553_v27  ;;  %v9567_v34 = vld [vmem:[#allocation7 + $0x48c] sm:$0xf]  ;;  %v7436_v45 = vor.u32 %v9439_v25, %v7433_v24 }
 0x1f1   : > { %v7948_v33 = vor.u32 %v9567_v34, %v7945_v2 }
 0x1f2   : > { %v3840_v17 = vmax.f32 %v2602_v36, 0.0  ;;  %2832 = vmatpush.bf16.msrb.mxu0 %v7436_v45  ;;  %v9431_v45 = vld [vmem:[#allocation7 + $0x4c] sm:$0xf] }
 0x1f3   : > { %2930 = vmatpush.bf16.msrb.mxu2 %v7948_v33 }
 0x1f4   : > { %v2459_v39 = vpop.f32.mrf.mxu0 }
 0x1f5   : > { %v2554_v40 = vpop.f32.mrf.mxu2  ;;  %v2460_v16 = vadd.f32 %v2459_v39, %v10809_v38  ;;  %v2508_v47 = vpop.f32.mrf.mxu1 }
 0x1f6   : > { %v2555_v44 = vadd.f32 %v2554_v40, %v2506_v31  ;;  %v8201_v31 = vld [vmem:[#allocation7 + $0x6a8] sm:$0xf0] }
 0x1f7   : > { %v2603_v37 = vpop.f32.mrf.mxu3  ;;  %v2509_v29 = vadd.f32 %v2508_v47, %v2460_v16  ;;  %2654 = vmatmul.bf16.gmra.mxu0 %v10649_v52 }
 0x1f8   : > { %v2604_v18 = vadd.f32 %v2603_v37, %v2555_v44  ;;  %2703 = vmatmul.bf16.gmra.mxu1 %v10651_v53  ;;  %v9631_v37 = vld [vmem:[#allocation7 + $0x68c] sm:$0xf] }
 0x1f9   : > { %v8204_v40 = vor.u32 %v9631_v37, %v8201_v31 }
 0x1fa   : > { %v3848_v28 = vmax.f32 %v2604_v18, 0.0  ;;  %2752 = vmatmul.bf16.gmra.mxu2 %v10653_v54  ;;  %v9503_v18 = vld [vmem:[#allocation7 + $0x28c] sm:$0xf] }
 0x1fb   : > { %2979 = vmatpush.bf16.msrb.mxu3 %v8204_v40 }
 0x1fc   : > { %2801 = vmatmul.bf16.gmra.mxu3 %v10655_v55  ;;  %v10840_v27 = vpack.c.bf16 %v3848_v28, %v3840_v17  ;;  %v2461_v36 = vpop.f32.mrf.mxu0  ;;  %v7689_v17 = vld [vmem:[#allocation7 + $0x2a8] sm:$0xf0] }
 0x1fd   : > { %v2557_v26 = vpop.f32.mrf.mxu2  ;;  %v2462_v44 = vadd.f32 %v2461_v36, %v10809_v38  ;;  %v2510_v39 = vpop.f32.mrf.mxu1  ;;  %v7692_v28 = vor.u32 %v9503_v18, %v7689_v17  ;;  %v7913_v36 = vld [vmem:[#allocation7 + $0x468] sm:$0xf0] }
 0x1fe   : > { %12094 = vst [vmem:[#allocation24_spill] sm:$0xff] %v10840_v27  ;;  %v2558_v42 = vadd.f32 %v2557_v26, %v2509_v29 }
 0x1ff   : > { %v2606_v41 = vpop.f32.mrf.mxu3  ;;  %v2511_v47 = vadd.f32 %v2510_v39, %v2462_v44  ;;  %2881 = vmatpush.bf16.msrb.mxu1 %v7692_v28  ;;  %v7401_v39 = vld [vmem:[#allocation7 + $0x68] sm:$0xf0] }
 0x200   : > { %v2607_v16 = vadd.f32 %v2606_v41, %v2558_v42  ;;  %v9559_v41 = vld [vmem:[#allocation7 + $0x44c] sm:$0xf]  ;;  %v7404_v28 = vor.u32 %v9431_v45, %v7401_v39 }
 0x201   : > { %v7916_v44 = vor.u32 %v9559_v41, %v7913_v36 }
 0x202   : > { %v3856_v33 = vmax.f32 %v2607_v16, 0.0  ;;  %2833 = vmatpush.bf16.msrb.mxu0 %v7404_v28  ;;  %v9423_v28 = vld [vmem:[#allocation7 + $0xc] sm:$0xf] }
 0x203   : > { %2931 = vmatpush.bf16.msrb.mxu2 %v7916_v44 }
 0x204   : > { %v2464_v29 = vpop.f32.mrf.mxu0 }
 0x205   : > { %v2559_v34 = vpop.f32.mrf.mxu2  ;;  %v2465_v26 = vadd.f32 %v2464_v29, %v10809_v38  ;;  %v2513_v25 = vpop.f32.mrf.mxu1 }
 0x206   : > { %v2560_v2 = vadd.f32 %v2559_v34, %v2511_v47  ;;  %v8169_v47 = vld [vmem:[#allocation7 + $0x668] sm:$0xf0] }
 0x207   : > { %v2608_v43 = vpop.f32.mrf.mxu3  ;;  %v2514_v37 = vadd.f32 %v2513_v25, %v2465_v26  ;;  %2659 = vmatmul.bf16.gmra.mxu0 %v10669_v48 }
 0x208   : > { %v2609_v24 = vadd.f32 %v2608_v43, %v2560_v2  ;;  %2708 = vmatmul.bf16.gmra.mxu1 %v10671_v49  ;;  %v9623_v43 = vld [vmem:[#allocation7 + $0x64c] sm:$0xf] }
 0x209   : > { %v8172_v34 = vor.u32 %v9623_v43, %v8169_v47 }
 0x20a   : > { %v3864_v31 = vmax.f32 %v2609_v24, 0.0  ;;  %2757 = vmatmul.bf16.gmra.mxu2 %v10673_v50  ;;  %v9495_v24 = vld [vmem:[#allocation7 + $0x24c] sm:$0xf] }
 0x20b   : > { %2980 = vmatpush.bf16.msrb.mxu3 %v8172_v34 }
 0x20c   : > { %2806 = vmatmul.bf16.gmra.mxu3 %v10675_v51  ;;  %v10848_v42 = vpack.c.bf16 %v3864_v31, %v3856_v33  ;;  %v2466_v16 = vpop.f32.mrf.mxu0  ;;  %v7657_v33 = vld [vmem:[#allocation7 + $0x268] sm:$0xf0] }
 0x20d   : > { %v2562_v40 = vpop.f32.mrf.mxu2  ;;  %v2467_v2 = vadd.f32 %v2466_v16, %v10809_v38  ;;  %v2515_v29 = vpop.f32.mrf.mxu1  ;;  %v7660_v31 = vor.u32 %v9495_v24, %v7657_v33  ;;  %v7881_v16 = vld [vmem:[#allocation7 + $0x428] sm:$0xf0] }
 0x20e   : > { %12095 = vst [vmem:[#allocation25_spill] sm:$0xff] %v10848_v42  ;;  %v2563_v18 = vadd.f32 %v2562_v40, %v2514_v37 }
 0x20f   : > { %v2611_v17 = vpop.f32.mrf.mxu3  ;;  %v2516_v25 = vadd.f32 %v2515_v29, %v2467_v2  ;;  %2882 = vmatpush.bf16.msrb.mxu1 %v7660_v31  ;;  %v7369_v29 = vld [vmem:[#allocation7 + $0x28] sm:$0xf0] }
 0x210   : > { %v2612_v26 = vadd.f32 %v2611_v17, %v2563_v18  ;;  %v9551_v17 = vld [vmem:[#allocation7 + $0x40c] sm:$0xf]  ;;  %v7372_v31 = vor.u32 %v9423_v28, %v7369_v29 }
 0x211   : > { %v7884_v2 = vor.u32 %v9551_v17, %v7881_v16 }
 0x212   : > { %v3872_v44 = vmax.f32 %v2612_v26, 0.0  ;;  %2834 = vmatpush.bf16.msrb.mxu0 %v7372_v31  ;;  %v7599_v31 = vld [vmem:[#allocation7 + $0x1d0] sm:$0xf] }
 0x213   : > { %2932 = vmatpush.bf16.msrb.mxu2 %v7884_v2 }
 0x214   : > { %v2469_v37 = vpop.f32.mrf.mxu0 }
 0x215   : > { %v2564_v41 = vpop.f32.mrf.mxu2  ;;  %v2470_v40 = vadd.f32 %v2469_v37, %v10809_v38  ;;  %v2518_v45 = vpop.f32.mrf.mxu1 }
 0x216   : > { %v2565_v36 = vadd.f32 %v2564_v41, %v2516_v25  ;;  %v8137_v25 = vld [vmem:[#allocation7 + $0x628] sm:$0xf0] }
 0x217   : > { %v2613_v32 = vpop.f32.mrf.mxu3  ;;  %v2519_v43 = vadd.f32 %v2518_v45, %v2470_v40  ;;  %2664 = vmatmul.bf16.gmra.mxu0 %v10689_v56 }
 0x218   : > { %v2614_v39 = vadd.f32 %v2613_v32, %v2565_v36  ;;  %2713 = vmatmul.bf16.gmra.mxu1 %v10691_v57  ;;  %v9615_v32 = vld [vmem:[#allocation7 + $0x60c] sm:$0xf] }
 0x219   : > { %v8140_v41 = vor.u32 %v9615_v32, %v8137_v25 }
 0x21a   : > { %v3880_v47 = vmax.f32 %v2614_v39, 0.0  ;;  %2762 = vmatmul.bf16.gmra.mxu2 %v10693_v58  ;;  %v9487_v39 = vld [vmem:[#allocation7 + $0x20c] sm:$0xf] }
 0x21b   : > { %2981 = vmatpush.bf16.msrb.mxu3 %v8140_v41 }
 0x21c   : > { %2811 = vmatmul.bf16.gmra.mxu3 %v10695_v59  ;;  %v10856_v18 = vpack.c.bf16 %v3880_v47, %v3872_v44  ;;  %v2471_v26 = vpop.f32.mrf.mxu0  ;;  %v7625_v44 = vld [vmem:[#allocation7 + $0x228] sm:$0xf0] }
 0x21d   : > { %v2567_v34 = vpop.f32.mrf.mxu2  ;;  %v2472_v36 = vadd.f32 %v2471_v26, %v10809_v38  ;;  %v2520_v37 = vpop.f32.mrf.mxu1  ;;  %v7628_v47 = vor.u32 %v9487_v39, %v7625_v44  ;;  %v9612_v26 = vld [vmem:[#allocation7 + $0x5ec] sm:$0xf0] }
 0x21e   : > { %12096 = vst [vmem:[#allocation26_spill] sm:$0xff] %v10856_v18  ;;  %v2568_v24 = vadd.f32 %v2567_v34, %v2519_v43 }
 0x21f   : > { %v2616_v33 = vpop.f32.mrf.mxu3  ;;  %v2521_v45 = vadd.f32 %v2520_v37, %v2472_v36  ;;  %2883 = vmatpush.bf16.msrb.mxu1 %v7628_v47  ;;  %v9484_v37 = vld [vmem:[#allocation7 + $0x1ec] sm:$0xf0] }
 0x220   : > { %v2617_v40 = vadd.f32 %v2616_v33, %v2568_v24  ;;  %v8111_v33 = vld [vmem:[#allocation7 + $0x5d0] sm:$0xf]  ;;  %v7600_v47 = vor.u32 %v9484_v37, %v7599_v31 }
 0x221   : > { %v8112_v36 = vor.u32 %v9612_v26, %v8111_v33 }
 0x222   : > { %v3888_v2 = vmax.f32 %v2617_v40, 0.0  ;;  %3023 = vmatpush.bf16.msra.mxu0 %v7600_v47  ;;  %v7567_v47 = vld [vmem:[#allocation7 + $0x190] sm:$0xf] }
 0x223   : > { %3121 = vmatpush.bf16.msra.mxu2 %v8112_v36 }
 0x224   : > { %v2474_v43 = vpop.f32.mrf.mxu0 }
 0x225   : > { %v2569_v17 = vpop.f32.mrf.mxu2  ;;  %v2475_v34 = vadd.f32 %v2474_v43, %v10809_v38  ;;  %v2523_v28 = vpop.f32.mrf.mxu1 }
 0x226   : > { %v2570_v16 = vadd.f32 %v2569_v17, %v2521_v45  ;;  %v9676_v45 = vld [vmem:[#allocation7 + $0x7ec] sm:$0xf0] }
 0x227   : > { %v2618_v18 = vpop.f32.mrf.mxu3  ;;  %v2524_v32 = vadd.f32 %v2523_v28, %v2475_v34  ;;  %2669 = vmatmul.bf16.gmra.mxu0 %v10709_v4 }
 0x228   : > { %v2619_v29 = vadd.f32 %v2618_v18, %v2570_v16  ;;  %2718 = vmatmul.bf16.gmra.mxu1 %v10711_v5  ;;  %v8367_v18 = vld [vmem:[#allocation7 + $0x7d0] sm:$0xf] }
 0x229   : > { %v8368_v17 = vor.u32 %v9676_v45, %v8367_v18 }
 0x22a   : > { %v3896_v25 = vmax.f32 %v2619_v29, 0.0  ;;  %2767 = vmatmul.bf16.gmra.mxu2 %v10713_v6  ;;  %v7855_v29 = vld [vmem:[#allocation7 + $0x3d0] sm:$0xf] }
 0x22b   : > { %3170 = vmatpush.bf16.msra.mxu3 %v8368_v17 }
 0x22c   : > { %2816 = vmatmul.bf16.gmra.mxu3 %v10715_v8  ;;  %v10864_v24 = vpack.c.bf16 %v3896_v25, %v3888_v2  ;;  %v2476_v40 = vpop.f32.mrf.mxu0  ;;  %v9548_v2 = vld [vmem:[#allocation7 + $0x3ec] sm:$0xf0] }
 0x22d   : > { %v2572_v41 = vpop.f32.mrf.mxu2  ;;  %v2477_v16 = vadd.f32 %v2476_v40, %v10809_v38  ;;  %v2525_v43 = vpop.f32.mrf.mxu1  ;;  %v7856_v25 = vor.u32 %v9548_v2, %v7855_v29  ;;  %v9604_v40 = vld [vmem:[#allocation7 + $0x5ac] sm:$0xf0] }
 0x22e   : > { %12097 = vst [vmem:[#allocation27_spill] sm:$0xff] %v10864_v24  ;;  %v2573_v39 = vadd.f32 %v2572_v41, %v2524_v32 }
 0x22f   : > { %v2621_v44 = vpop.f32.mrf.mxu3  ;;  %v2526_v28 = vadd.f32 %v2525_v43, %v2477_v16  ;;  %3072 = vmatpush.bf16.msra.mxu1 %v7856_v25  ;;  %v9476_v43 = vld [vmem:[#allocation7 + $0x1ac] sm:$0xf0] }
 0x230   : > { %v2622_v34 = vadd.f32 %v2621_v44, %v2573_v39  ;;  %v8079_v44 = vld [vmem:[#allocation7 + $0x590] sm:$0xf]  ;;  %v7568_v25 = vor.u32 %v9476_v43, %v7567_v47 }
 0x231   : > { %v8080_v16 = vor.u32 %v9604_v40, %v8079_v44 }
 0x232   : > { %v3904_v36 = vmax.f32 %v2622_v34, 0.0  ;;  %3024 = vmatpush.bf16.msra.mxu0 %v7568_v25  ;;  %v8047_v25 = vld [vmem:[#allocation7 + $0x550] sm:$0xf] }
 0x233   : > { %3122 = vmatpush.bf16.msra.mxu2 %v8080_v16 }
 0x234   : > { %v2479_v32 = vpop.f32.mrf.mxu0 }
 0x235   : > { %v2574_v33 = vpop.f32.mrf.mxu2  ;;  %v2480_v41 = vadd.f32 %v2479_v32, %v10809_v38  ;;  %v2528_v31 = vpop.f32.mrf.mxu1 }
 0x236   : > { %v2575_v26 = vadd.f32 %v2574_v33, %v2526_v28  ;;  %v9668_v28 = vld [vmem:[#allocation7 + $0x7ac] sm:$0xf0] }
 0x237   : > { %v2623_v24 = vpop.f32.mrf.mxu3  ;;  %v2529_v18 = vadd.f32 %v2528_v31, %v2480_v41  ;;  %2674 = vmatmul.bf16.gmra.mxu0 %v10729_v35 }
 0x238   : > { %v2624_v37 = vadd.f32 %v2623_v24, %v2575_v26  ;;  %2723 = vmatmul.bf16.gmra.mxu1 %v10731_v20  ;;  %v8335_v24 = vld [vmem:[#allocation7 + $0x790] sm:$0xf] }
 0x239   : > { %v8336_v33 = vor.u32 %v9668_v28, %v8335_v24 }
 0x23a   : > { %v3912_v45 = vmax.f32 %v2624_v37, 0.0  ;;  %2772 = vmatmul.bf16.gmra.mxu2 %v10733_v21  ;;  %v7823_v37 = vld [vmem:[#allocation7 + $0x390] sm:$0xf] }
 0x23b   : > { %3171 = vmatpush.bf16.msra.mxu3 %v8336_v33  ;;  %v9596_v33 = vld [vmem:[#allocation7 + $0x56c] sm:$0xf0] }
 0x23c   : > { %2821 = vmatmul.bf16.gmra.mxu3 %v10735_v22  ;;  %v10872_v39 = vpack.c.bf16 %v3912_v45, %v3904_v36  ;;  %v2481_v34 = vpop.f32.mrf.mxu0  ;;  %v9540_v36 = vld [vmem:[#allocation7 + $0x3ac] sm:$0xf0]  ;;  %v10875_v45 = vld [vmem:[#allocation8] sm:$0xff] }
 0x23d   : > { %v2577_v17 = vpop.f32.mrf.mxu2  ;;  %v2482_v26 = vadd.f32 %v2481_v34, %v10809_v38  ;;  %v2530_v32 = vpop.f32.mrf.mxu1  ;;  %v10878_v44 = vperm.slane %v10875_v45, 2 }
 0x23e   : > { %12098 = vst [vmem:[#allocation28_spill] sm:$0xff] %v10872_v39  ;;  %v2578_v29 = vadd.f32 %v2577_v17, %v2529_v18  ;;  %v7824_v18 = vor.u32 %v9540_v36, %v7823_v37  ;;  %v9468_v37 = vld [vmem:[#allocation7 + $0x16c] sm:$0xf0] }
 0x23f   : > { %v2626_v2 = vpop.f32.mrf.mxu3  ;;  %v2531_v31 = vadd.f32 %v2530_v32, %v2482_v26  ;;  %v7535_v26 = vld [vmem:[#allocation7 + $0x150] sm:$0xf] }
 0x240   : > { %v2627_v41 = vadd.f32 %v2626_v2, %v2578_v29  ;;  %3073 = vmatpush.bf16.msra.mxu1 %v7824_v18  ;;  %v8303_v36 = vld [vmem:[#allocation7 + $0x750] sm:$0xf] }
 0x241   : > { %v9660_v18 = vld [vmem:[#allocation7 + $0x76c] sm:$0xf0] }
 0x242   : > { %v3920_v29 = vmax.f32 %v2627_v41, 0.0 }
 0x244   : > { %v2640_v43 = vpop.f32.mrf.mxu0 }
 0x245   : > { %v2579_v40 = vpop.f32.mrf.mxu2  ;;  %v2641_v38 = vadd.f32 %v2640_v43, %v10878_v44  ;;  %v2689_v16 = vpop.f32.mrf.mxu1  ;;  %v8304_v43 = vor.u32 %v9660_v18, %v8303_v36 }
 0x246   : > { %v2580_v47 = vadd.f32 %v2579_v40, %v2531_v31  ;;  %v8048_v31 = vor.u32 %v9596_v33, %v8047_v25 }
 0x247   : > { %v2628_v17 = vpop.f32.mrf.mxu3  ;;  %v2690_v28 = vadd.f32 %v2689_v16, %v2641_v38  ;;  %2835 = vmatmul.bf16.vlgmr.msrb.gmra.mxu0 %v10581_v7  ;;  %3172 = vmatpush.bf16.msra.mxu3 %v8304_v43  ;;  %v9460_v43 = vld [vmem:[#allocation7 + $0x12c] sm:$0xf0] }
 0x248   : > { %v2629_v24 = vadd.f32 %v2628_v17, %v2580_v47  ;;  %2884 = vmatmul.bf16.vlgmr.msrb.gmra.mxu1 %v10583_v11  ;;  %v7536_v17 = vor.u32 %v9468_v37, %v7535_v26  ;;  %3123 = vmatpush.bf16.msra.mxu2 %v8048_v31 }
 0x24a   : > { %v3928_v2 = vmax.f32 %v2629_v24, 0.0  ;;  %2933 = vmatmul.bf16.vlgmr.msrb.gmra.mxu2 %v10585_v12  ;;  %3025 = vmatpush.bf16.msra.mxu0 %v7536_v17 }
 0x24c   : > { %2982 = vmatmul.bf16.vlgmr.msrb.gmra.mxu3 %v10593_v15  ;;  %v10885_v34 = vpack.c.bf16 %v3928_v2, %v3920_v29  ;;  %v2642_v41 = vpop.f32.mrf.mxu0  ;;  %v7791_v2 = vld [vmem:[#allocation7 + $0x350] sm:$0xf] }
 0x24d   : > { %v2738_v32 = vpop.f32.mrf.mxu2  ;;  %v2643_v38 = vadd.f32 %v2642_v41, %v10878_v44  ;;  %v2691_v16 = vpop.f32.mrf.mxu1 }
 0x24e   : > { %12099 = vst [vmem:[#allocation29_spill] sm:$0xff] %v10885_v34  ;;  %v2739_v40 = vadd.f32 %v2738_v32, %v2690_v28  ;;  %v9532_v34 = vld [vmem:[#allocation7 + $0x36c] sm:$0xf0] }
 0x24f   : > { %v2787_v47 = vpop.f32.mrf.mxu3  ;;  %v2692_v29 = vadd.f32 %v2691_v16, %v2643_v38  ;;  %v7792_v39 = vor.u32 %v9532_v34, %v7791_v2  ;;  %v9652_v38 = vld [vmem:[#allocation7 + $0x72c] sm:$0xf0] }
 0x250   : > { %v2788_v24 = vadd.f32 %v2787_v47, %v2739_v40  ;;  %v9588_v40 = vld [vmem:[#allocation7 + $0x52c] sm:$0xf0] }
 0x251   : > { %3074 = vmatpush.bf16.msra.mxu1 %v7792_v39  ;;  %v8015_v39 = vld [vmem:[#allocation7 + $0x510] sm:$0xf] }
 0x252   : > { %v3809_v31 = vmax.f32 %v2788_v24, 0.0  ;;  %v7503_v47 = vld [vmem:[#allocation7 + $0x110] sm:$0xf]  ;;  %v8016_v17 = vor.u32 %v9588_v40, %v8015_v39 }
 0x253   : > { %v7504_v2 = vor.u32 %v9460_v43, %v7503_v47 }
 0x254   : > { %v2645_v28 = vpop.f32.mrf.mxu0  ;;  %3124 = vmatpush.bf16.msra.mxu2 %v8016_v17 }
 0x255   : > { %v2740_v25 = vpop.f32.mrf.mxu2  ;;  %v2646_v32 = vadd.f32 %v2645_v28, %v10878_v44  ;;  %v2694_v26 = vpop.f32.mrf.mxu1  ;;  %3026 = vmatpush.bf16.msra.mxu0 %v7504_v2  ;;  %v7471_v2 = vld [vmem:[#allocation7 + $0xd0] sm:$0xf] }
 0x256   : > { %v2741_v33 = vadd.f32 %v2740_v25, %v2692_v29 }
 0x257   : > { %v2789_v23 = vpop.f32.mrf.mxu3  ;;  %v2695_v36 = vadd.f32 %v2694_v26, %v2646_v32  ;;  %2840 = vmatmul.bf16.gmra.mxu0 %v10609_v9 }
 0x258   : > { %v2790_v37 = vadd.f32 %v2789_v23, %v2741_v33  ;;  %2889 = vmatmul.bf16.gmra.mxu1 %v10611_v10  ;;  %v8271_v23 = vld [vmem:[#allocation7 + $0x710] sm:$0xf] }
 0x259   : > { %v8272_v25 = vor.u32 %v9652_v38, %v8271_v23 }
 0x25a   : > { %v3817_v18 = vmax.f32 %v2790_v37, 0.0  ;;  %2938 = vmatmul.bf16.gmra.mxu2 %v10613_v13  ;;  %v7759_v37 = vld [vmem:[#allocation7 + $0x310] sm:$0xf] }
 0x25b   : > { %3173 = vmatpush.bf16.msra.mxu3 %v8272_v25 }
 0x25c   : > { %2987 = vmatmul.bf16.gmra.mxu3 %v10615_v14  ;;  %v10893_v34 = vpack.c.bf16 %v3817_v18, %v3809_v31  ;;  %v2647_v24 = vpop.f32.mrf.mxu0  ;;  %v9524_v31 = vld [vmem:[#allocation7 + $0x32c] sm:$0xf0] }
 0x25d   : > { %v2743_v41 = vpop.f32.mrf.mxu2  ;;  %v2648_v33 = vadd.f32 %v2647_v24, %v10878_v44  ;;  %v2696_v28 = vpop.f32.mrf.mxu1  ;;  %v7760_v18 = vor.u32 %v9524_v31, %v7759_v37  ;;  %v9580_v24 = vld [vmem:[#allocation7 + $0x4ec] sm:$0xf0] }
 0x25e   : > { %v2744_v16 = vadd.f32 %v2743_v41, %v2695_v36 }
 0x25f   : > { %v2792_v29 = vpop.f32.mrf.mxu3  ;;  %v2697_v26 = vadd.f32 %v2696_v28, %v2648_v33  ;;  %3075 = vmatpush.bf16.msra.mxu1 %v7760_v18  ;;  %v9452_v28 = vld [vmem:[#allocation7 + $0xec] sm:$0xf0] }
 0x260   : > { %v2793_v32 = vadd.f32 %v2792_v29, %v2744_v16  ;;  %v7983_v29 = vld [vmem:[#allocation7 + $0x4d0] sm:$0xf]  ;;  %v7472_v18 = vor.u32 %v9452_v28, %v7471_v2 }
 0x261   : > { %v7984_v33 = vor.u32 %v9580_v24, %v7983_v29 }
 0x262   : > { %v3825_v17 = vmax.f32 %v2793_v32, 0.0  ;;  %3027 = vmatpush.bf16.msra.mxu0 %v7472_v18  ;;  %v7439_v18 = vld [vmem:[#allocation7 + $0x90] sm:$0xf] }
 0x263   : > { %3125 = vmatpush.bf16.msra.mxu2 %v7984_v33 }
 0x264   : > { %v2650_v36 = vpop.f32.mrf.mxu0 }
 0x265   : > { %v2745_v39 = vpop.f32.mrf.mxu2  ;;  %v2651_v41 = vadd.f32 %v2650_v36, %v10878_v44  ;;  %v2699_v47 = vpop.f32.mrf.mxu1 }
 0x266   : > { %v2746_v40 = vadd.f32 %v2745_v39, %v2697_v26  ;;  %v9644_v26 = vld [vmem:[#allocation7 + $0x6ec] sm:$0xf0] }
 0x267   : > { %v2794_v42 = vpop.f32.mrf.mxu3  ;;  %v2700_v23 = vadd.f32 %v2699_v47, %v2651_v41  ;;  %2845 = vmatmul.bf16.gmra.mxu0 %v10629_v60 }
 0x268   : > { %v2795_v43 = vadd.f32 %v2794_v42, %v2746_v40  ;;  %2894 = vmatmul.bf16.gmra.mxu1 %v10631_v61  ;;  %v8239_v42 = vld [vmem:[#allocation7 + $0x6d0] sm:$0xf] }
 0x269   : > { %v8240_v39 = vor.u32 %v9644_v26, %v8239_v42 }
 0x26a   : > { %v3833_v38 = vmax.f32 %v2795_v43, 0.0  ;;  %2943 = vmatmul.bf16.gmra.mxu2 %v10633_v62  ;;  %v7727_v43 = vld [vmem:[#allocation7 + $0x2d0] sm:$0xf] }
 0x26b   : > { %3174 = vmatpush.bf16.msra.mxu3 %v8240_v39 }
 0x26c   : > { %2992 = vmatmul.bf16.gmra.mxu3 %v10635_v63  ;;  %v10901_v16 = vpack.c.bf16 %v3833_v38, %v3825_v17  ;;  %v2652_v32 = vpop.f32.mrf.mxu0  ;;  %v9516_v17 = vld [vmem:[#allocation7 + $0x2ec] sm:$0xf0] }
 0x26d   : > { %v2748_v25 = vpop.f32.mrf.mxu2  ;;  %v2653_v40 = vadd.f32 %v2652_v32, %v10878_v44  ;;  %v2701_v36 = vpop.f32.mrf.mxu1  ;;  %v7728_v38 = vor.u32 %v9516_v17, %v7727_v43  ;;  %v9572_v32 = vld [vmem:[#allocation7 + $0x4ac] sm:$0xf0] }
 0x26e   : > { %v2749_v37 = vadd.f32 %v2748_v25, %v2700_v23 }
 0x26f   : > { %v2797_v31 = vpop.f32.mrf.mxu3  ;;  %v2702_v47 = vadd.f32 %v2701_v36, %v2653_v40  ;;  %3076 = vmatpush.bf16.msra.mxu1 %v7728_v38  ;;  %v9444_v36 = vld [vmem:[#allocation7 + $0xac] sm:$0xf0] }
 0x270   : > { %v2798_v41 = vadd.f32 %v2797_v31, %v2749_v37  ;;  %v7951_v31 = vld [vmem:[#allocation7 + $0x490] sm:$0xf]  ;;  %v7440_v38 = vor.u32 %v9444_v36, %v7439_v18 }
 0x271   : > { %v7952_v40 = vor.u32 %v9572_v32, %v7951_v31 }
 0x272   : > { %v3841_v33 = vmax.f32 %v2798_v41, 0.0  ;;  %3028 = vmatpush.bf16.msra.mxu0 %v7440_v38  ;;  %v7407_v38 = vld [vmem:[#allocation7 + $0x50] sm:$0xf] }
 0x273   : > { %3126 = vmatpush.bf16.msra.mxu2 %v7952_v40 }
 0x274   : > { %v2655_v23 = vpop.f32.mrf.mxu0 }
 0x275   : > { %v2750_v29 = vpop.f32.mrf.mxu2  ;;  %v2656_v25 = vadd.f32 %v2655_v23, %v10878_v44  ;;  %v2704_v2 = vpop.f32.mrf.mxu1 }
 0x276   : > { %v2751_v24 = vadd.f32 %v2750_v29, %v2702_v47  ;;  %v9636_v47 = vld [vmem:[#allocation7 + $0x6ac] sm:$0xf0] }
 0x277   : > { %v2799_v19 = vpop.f32.mrf.mxu3  ;;  %v2705_v42 = vadd.f32 %v2704_v2, %v2656_v25  ;;  %2850 = vmatmul.bf16.gmra.mxu0 %v10649_v52 }
 0x278   : > { %v2800_v28 = vadd.f32 %v2799_v19, %v2751_v24  ;;  %2899 = vmatmul.bf16.gmra.mxu1 %v10651_v53  ;;  %v8207_v19 = vld [vmem:[#allocation7 + $0x690] sm:$0xf] }
 0x279   : > { %v8208_v29 = vor.u32 %v9636_v47, %v8207_v19 }
 0x27a   : > { %v3849_v26 = vmax.f32 %v2800_v28, 0.0  ;;  %2948 = vmatmul.bf16.gmra.mxu2 %v10653_v54  ;;  %v7695_v28 = vld [vmem:[#allocation7 + $0x290] sm:$0xf] }
 0x27b   : > { %3175 = vmatpush.bf16.msra.mxu3 %v8208_v29 }
 0x27c   : > { %2997 = vmatmul.bf16.gmra.mxu3 %v10655_v55  ;;  %v10909_v37 = vpack.c.bf16 %v3849_v26, %v3841_v33  ;;  %v2657_v41 = vpop.f32.mrf.mxu0  ;;  %v9508_v33 = vld [vmem:[#allocation7 + $0x2ac] sm:$0xf0] }
 0x27d   : > { %v2753_v39 = vpop.f32.mrf.mxu2  ;;  %v2658_v24 = vadd.f32 %v2657_v41, %v10878_v44  ;;  %v2706_v23 = vpop.f32.mrf.mxu1  ;;  %v7696_v26 = vor.u32 %v9508_v33, %v7695_v28  ;;  %v9564_v41 = vld [vmem:[#allocation7 + $0x46c] sm:$0xf0] }
 0x27e   : > { %12100 = vst [vmem:[#allocation30_spill] sm:$0xff] %v10909_v37  ;;  %v2754_v43 = vadd.f32 %v2753_v39, %v2705_v42 }
 0x27f   : > { %v2802_v17 = vpop.f32.mrf.mxu3  ;;  %v2707_v2 = vadd.f32 %v2706_v23, %v2658_v24  ;;  %3077 = vmatpush.bf16.msra.mxu1 %v7696_v26  ;;  %v9436_v23 = vld [vmem:[#allocation7 + $0x6c] sm:$0xf0] }
 0x280   : > { %v2803_v25 = vadd.f32 %v2802_v17, %v2754_v43  ;;  %v7919_v17 = vld [vmem:[#allocation7 + $0x450] sm:$0xf]  ;;  %v7408_v26 = vor.u32 %v9436_v23, %v7407_v38 }
 0x281   : > { %v7920_v24 = vor.u32 %v9564_v41, %v7919_v17 }
 0x282   : > { %v3857_v40 = vmax.f32 %v2803_v25, 0.0  ;;  %3029 = vmatpush.bf16.msra.mxu0 %v7408_v26  ;;  %v7375_v26 = vld [vmem:[#allocation7 + $0x10] sm:$0xf] }
 0x283   : > { %3127 = vmatpush.bf16.msra.mxu2 %v7920_v24 }
 0x284   : > { %v2660_v42 = vpop.f32.mrf.mxu0 }
 0x285   : > { %v2755_v31 = vpop.f32.mrf.mxu2  ;;  %v2661_v39 = vadd.f32 %v2660_v42, %v10878_v44  ;;  %v2709_v18 = vpop.f32.mrf.mxu1 }
 0x286   : > { %v2756_v32 = vadd.f32 %v2755_v31, %v2707_v2  ;;  %v9628_v2 = vld [vmem:[#allocation7 + $0x66c] sm:$0xf0] }
 0x287   : > { %v2804_v37 = vpop.f32.mrf.mxu3  ;;  %v2710_v19 = vadd.f32 %v2709_v18, %v2661_v39  ;;  %2855 = vmatmul.bf16.gmra.mxu0 %v10669_v48 }
 0x288   : > { %v2805_v36 = vadd.f32 %v2804_v37, %v2756_v32  ;;  %2904 = vmatmul.bf16.gmra.mxu1 %v10671_v49  ;;  %v8175_v37 = vld [vmem:[#allocation7 + $0x650] sm:$0xf] }
 0x289   : > { %v8176_v31 = vor.u32 %v9628_v2, %v8175_v37 }
 0x28a   : > { %v3865_v47 = vmax.f32 %v2805_v36, 0.0  ;;  %2953 = vmatmul.bf16.gmra.mxu2 %v10673_v50  ;;  %v7663_v36 = vld [vmem:[#allocation7 + $0x250] sm:$0xf] }
 0x28b   : > { %3176 = vmatpush.bf16.msra.mxu3 %v8176_v31 }
 0x28c   : > { %3002 = vmatmul.bf16.gmra.mxu3 %v10675_v51  ;;  %v10917_v43 = vpack.c.bf16 %v3865_v47, %v3857_v40  ;;  %v2662_v25 = vpop.f32.mrf.mxu0  ;;  %v9500_v40 = vld [vmem:[#allocation7 + $0x26c] sm:$0xf0] }
 0x28d   : > { %v2758_v29 = vpop.f32.mrf.mxu2  ;;  %v2663_v32 = vadd.f32 %v2662_v25, %v10878_v44  ;;  %v2711_v42 = vpop.f32.mrf.mxu1  ;;  %v7664_v47 = vor.u32 %v9500_v40, %v7663_v36  ;;  %v9556_v25 = vld [vmem:[#allocation7 + $0x42c] sm:$0xf0] }
 0x28e   : > { %12101 = vst [vmem:[#allocation31_spill] sm:$0xff] %v10917_v43  ;;  %v2759_v28 = vadd.f32 %v2758_v29, %v2710_v19 }
 0x28f   : > { %v2807_v33 = vpop.f32.mrf.mxu3  ;;  %v2712_v18 = vadd.f32 %v2711_v42, %v2663_v32  ;;  %3078 = vmatpush.bf16.msra.mxu1 %v7664_v47  ;;  %v9428_v42 = vld [vmem:[#allocation7 + $0x2c] sm:$0xf0] }
 0x290   : > { %v2808_v39 = vadd.f32 %v2807_v33, %v2759_v28  ;;  %v7887_v33 = vld [vmem:[#allocation7 + $0x410] sm:$0xf]  ;;  %v7376_v47 = vor.u32 %v9428_v42, %v7375_v26 }
 0x291   : > { %v7888_v32 = vor.u32 %v9556_v25, %v7887_v33 }
 0x292   : > { %v3873_v24 = vmax.f32 %v2808_v39, 0.0  ;;  %3030 = vmatpush.bf16.msra.mxu0 %v7376_v47  ;;  %v9480_v47 = vld [vmem:[#allocation7 + $0x1d4] sm:$0xf] }
 0x293   : > { %3128 = vmatpush.bf16.msra.mxu2 %v7888_v32 }
 0x294   : > { %v2665_v19 = vpop.f32.mrf.mxu0 }
 0x295   : > { %v2760_v17 = vpop.f32.mrf.mxu2  ;;  %v2666_v29 = vadd.f32 %v2665_v19, %v10878_v44  ;;  %v2714_v38 = vpop.f32.mrf.mxu1 }
 0x296   : > { %v2761_v41 = vadd.f32 %v2760_v17, %v2712_v18  ;;  %v9620_v18 = vld [vmem:[#allocation7 + $0x62c] sm:$0xf0] }
 0x297   : > { %v2809_v43 = vpop.f32.mrf.mxu3  ;;  %v2715_v37 = vadd.f32 %v2714_v38, %v2666_v29  ;;  %2860 = vmatmul.bf16.gmra.mxu0 %v10689_v56 }
 0x298   : > { %v2810_v23 = vadd.f32 %v2809_v43, %v2761_v41  ;;  %2909 = vmatmul.bf16.gmra.mxu1 %v10691_v57  ;;  %v8143_v43 = vld [vmem:[#allocation7 + $0x610] sm:$0xf] }
 0x299   : > { %v8144_v17 = vor.u32 %v9620_v18, %v8143_v43 }
 0x29a   : > { %v3881_v2 = vmax.f32 %v2810_v23, 0.0  ;;  %2958 = vmatmul.bf16.gmra.mxu2 %v10693_v58  ;;  %v7631_v23 = vld [vmem:[#allocation7 + $0x210] sm:$0xf] }
 0x29b   : > { %3177 = vmatpush.bf16.msra.mxu3 %v8144_v17 }
 0x29c   : > { %3007 = vmatmul.bf16.gmra.mxu3 %v10695_v59  ;;  %v10925_v28 = vpack.c.bf16 %v3881_v2, %v3873_v24  ;;  %v2667_v39 = vpop.f32.mrf.mxu0  ;;  %v9492_v24 = vld [vmem:[#allocation7 + $0x22c] sm:$0xf0] }
 0x29d   : > { %v2763_v31 = vpop.f32.mrf.mxu2  ;;  %v2668_v41 = vadd.f32 %v2667_v39, %v10878_v44  ;;  %v2716_v19 = vpop.f32.mrf.mxu1  ;;  %v7632_v2 = vor.u32 %v9492_v24, %v7631_v23  ;;  %v8113_v39 = vld [vmem:[#allocation7 + $0x5f0] sm:$0xf0] }
 0x29e   : > { %12102 = vst [vmem:[#allocation32_spill] sm:$0xff] %v10925_v28  ;;  %v2764_v36 = vadd.f32 %v2763_v31, %v2715_v37 }
 0x29f   : > { %v2812_v40 = vpop.f32.mrf.mxu3  ;;  %v2717_v38 = vadd.f32 %v2716_v19, %v2668_v41  ;;  %3079 = vmatpush.bf16.msra.mxu1 %v7632_v2  ;;  %v7601_v19 = vld [vmem:[#allocation7 + $0x1f0] sm:$0xf0] }
 0x2a0   : > { %v2813_v29 = vadd.f32 %v2812_v40, %v2764_v36  ;;  %v9608_v40 = vld [vmem:[#allocation7 + $0x5d4] sm:$0xf]  ;;  %v7604_v2 = vor.u32 %v9480_v47, %v7601_v19 }
 0x2a1   : > { %v8116_v41 = vor.u32 %v9608_v40, %v8113_v39 }
 0x2a2   : > { %v3889_v32 = vmax.f32 %v2813_v29, 0.0  ;;  %3219 = vmatpush.bf16.msrb.mxu0 %v7604_v2  ;;  %v9472_v2 = vld [vmem:[#allocation7 + $0x194] sm:$0xf] }
 0x2a3   : > { %3317 = vmatpush.bf16.msrb.mxu2 %v8116_v41 }
 0x2a4   : > { %v2670_v37 = vpop.f32.mrf.mxu0 }
 0x2a5   : > { %v2765_v33 = vpop.f32.mrf.mxu2  ;;  %v2671_v31 = vadd.f32 %v2670_v37, %v10878_v44  ;;  %v2719_v26 = vpop.f32.mrf.mxu1 }
 0x2a6   : > { %v2766_v25 = vadd.f32 %v2765_v33, %v2717_v38  ;;  %v8369_v38 = vld [vmem:[#allocation7 + $0x7f0] sm:$0xf0] }
 0x2a7   : > { %v2814_v28 = vpop.f32.mrf.mxu3  ;;  %v2720_v43 = vadd.f32 %v2719_v26, %v2671_v31  ;;  %2865 = vmatmul.bf16.gmra.mxu0 %v10709_v4 }
 0x2a8   : > { %v2815_v42 = vadd.f32 %v2814_v28, %v2766_v25  ;;  %2914 = vmatmul.bf16.gmra.mxu1 %v10711_v5  ;;  %v9672_v28 = vld [vmem:[#allocation7 + $0x7d4] sm:$0xf] }
 0x2a9   : > { %v8372_v33 = vor.u32 %v9672_v28, %v8369_v38 }
 0x2aa   : > { %v3897_v18 = vmax.f32 %v2815_v42, 0.0  ;;  %2963 = vmatmul.bf16.gmra.mxu2 %v10713_v6  ;;  %v9544_v42 = vld [vmem:[#allocation7 + $0x3d4] sm:$0xf] }
 0x2ab   : > { %3366 = vmatpush.bf16.msrb.mxu3 %v8372_v33 }
 0x2ac   : > { %3012 = vmatmul.bf16.gmra.mxu3 %v10715_v8  ;;  %v10933_v36 = vpack.c.bf16 %v3897_v18, %v3889_v32  ;;  %v2672_v29 = vpop.f32.mrf.mxu0  ;;  %v7857_v32 = vld [vmem:[#allocation7 + $0x3f0] sm:$0xf0] }
 0x2ad   : > { %v2768_v17 = vpop.f32.mrf.mxu2  ;;  %v2673_v25 = vadd.f32 %v2672_v29, %v10878_v44  ;;  %v2721_v37 = vpop.f32.mrf.mxu1  ;;  %v7860_v18 = vor.u32 %v9544_v42, %v7857_v32  ;;  %v8081_v29 = vld [vmem:[#allocation7 + $0x5b0] sm:$0xf0] }
 0x2ae   : > { %12103 = vst [vmem:[#allocation33_spill] sm:$0xff] %v10933_v36  ;;  %v2769_v23 = vadd.f32 %v2768_v17, %v2720_v43 }
 0x2af   : > { %v2817_v24 = vpop.f32.mrf.mxu3  ;;  %v2722_v26 = vadd.f32 %v2721_v37, %v2673_v25  ;;  %3268 = vmatpush.bf16.msrb.mxu1 %v7860_v18  ;;  %v7569_v37 = vld [vmem:[#allocation7 + $0x1b0] sm:$0xf0] }
 0x2b0   : > { %v2818_v31 = vadd.f32 %v2817_v24, %v2769_v23  ;;  %v9600_v24 = vld [vmem:[#allocation7 + $0x594] sm:$0xf]  ;;  %v7572_v18 = vor.u32 %v9472_v2, %v7569_v37 }
 0x2b1   : > { %v8084_v25 = vor.u32 %v9600_v24, %v8081_v29 }
 0x2b2   : > { %v3905_v41 = vmax.f32 %v2818_v31, 0.0  ;;  %3220 = vmatpush.bf16.msrb.mxu0 %v7572_v18  ;;  %v9464_v18 = vld [vmem:[#allocation7 + $0x154] sm:$0xf] }
 0x2b3   : > { %3318 = vmatpush.bf16.msrb.mxu2 %v8084_v25 }
 0x2b4   : > { %v2675_v43 = vpop.f32.mrf.mxu0 }
 0x2b5   : > { %v2770_v40 = vpop.f32.mrf.mxu2  ;;  %v2676_v17 = vadd.f32 %v2675_v43, %v10878_v44  ;;  %v2724_v47 = vpop.f32.mrf.mxu1 }
 0x2b6   : > { %v2771_v39 = vadd.f32 %v2770_v40, %v2722_v26  ;;  %v8337_v26 = vld [vmem:[#allocation7 + $0x7b0] sm:$0xf0] }
 0x2b7   : > { %v2819_v36 = vpop.f32.mrf.mxu3  ;;  %v2725_v28 = vadd.f32 %v2724_v47, %v2676_v17  ;;  %2870 = vmatmul.bf16.gmra.mxu0 %v10729_v35 }
 0x2b8   : > { %v2820_v19 = vadd.f32 %v2819_v36, %v2771_v39  ;;  %2919 = vmatmul.bf16.gmra.mxu1 %v10731_v20  ;;  %v9664_v36 = vld [vmem:[#allocation7 + $0x794] sm:$0xf] }
 0x2b9   : > { %v8340_v40 = vor.u32 %v9664_v36, %v8337_v26 }
 0x2ba   : > { %v3913_v38 = vmax.f32 %v2820_v19, 0.0  ;;  %2968 = vmatmul.bf16.gmra.mxu2 %v10733_v21  ;;  %v9536_v19 = vld [vmem:[#allocation7 + $0x394] sm:$0xf] }
 0x2bb   : > { %3367 = vmatpush.bf16.msrb.mxu3 %v8340_v40 }
 0x2bc   : > { %3017 = vmatmul.bf16.gmra.mxu3 %v10735_v22  ;;  %v10941_v23 = vpack.c.bf16 %v3913_v38, %v3905_v41  ;;  %v2677_v31 = vpop.f32.mrf.mxu0  ;;  %v7825_v41 = vld [vmem:[#allocation7 + $0x3b0] sm:$0xf0]  ;;  %v10945_v38 = vperm.slane %v10875_v45, 3 }
 0x2bd   : > { %v2773_v33 = vpop.f32.mrf.mxu2  ;;  %v2678_v39 = vadd.f32 %v2677_v31, %v10878_v44  ;;  %v2726_v43 = vpop.f32.mrf.mxu1  ;;  %v7828_v24 = vor.u32 %v9536_v19, %v7825_v41  ;;  %v8049_v31 = vld [vmem:[#allocation7 + $0x570] sm:$0xf0] }
 0x2be   : > { %12104 = vst [vmem:[#allocation34_spill] sm:$0xff] %v10941_v23  ;;  %v2774_v42 = vadd.f32 %v2773_v33, %v2725_v28  ;;  %v8305_v19 = vld [vmem:[#allocation7 + $0x770] sm:$0xf0] }
 0x2bf   : > { %v2822_v32 = vpop.f32.mrf.mxu3  ;;  %v2727_v47 = vadd.f32 %v2726_v43, %v2678_v39  ;;  %3269 = vmatpush.bf16.msrb.mxu1 %v7828_v24  ;;  %v7537_v43 = vld [vmem:[#allocation7 + $0x170] sm:$0xf0] }
 0x2c0   : > { %v2823_v17 = vadd.f32 %v2822_v32, %v2774_v42  ;;  %v9592_v32 = vld [vmem:[#allocation7 + $0x554] sm:$0xf] }
 0x2c1   : > { %v8052_v39 = vor.u32 %v9592_v32, %v8049_v31 }
 0x2c2   : > { %v3921_v26 = vmax.f32 %v2823_v17, 0.0 }
 0x2c3   : > { %3319 = vmatpush.bf16.msrb.mxu2 %v8052_v39 }
 0x2c4   : > { %v2836_v2 = vpop.f32.mrf.mxu0 }
 0x2c5   : > { %v2775_v29 = vpop.f32.mrf.mxu2  ;;  %v2837_v37 = vadd.f32 %v2836_v2, %v10945_v38  ;;  %v2885_v44 = vpop.f32.mrf.mxu1 }
 0x2c6   : > { %v2776_v28 = vadd.f32 %v2775_v29, %v2727_v47  ;;  %v9656_v47 = vld [vmem:[#allocation7 + $0x754] sm:$0xf]  ;;  %v7540_v29 = vor.u32 %v9464_v18, %v7537_v43 }
 0x2c7   : > { %v2824_v33 = vpop.f32.mrf.mxu3  ;;  %v2886_v25 = vadd.f32 %v2885_v44, %v2837_v37  ;;  %3031 = vmatmul.bf16.vlgmr.msra.gmra.mxu0 %v10581_v7 }
 0x2c8   : > { %v2825_v36 = vadd.f32 %v2824_v33, %v2776_v28  ;;  %3080 = vmatmul.bf16.vlgmr.msra.gmra.mxu1 %v10583_v11  ;;  %v8308_v28 = vor.u32 %v9656_v47, %v8305_v19  ;;  %3221 = vmatpush.bf16.msrb.mxu0 %v7540_v29  ;;  %v9456_v29 = vld [vmem:[#allocation7 + $0x114] sm:$0xf] }
 0x2ca   : > { %v3929_v42 = vmax.f32 %v2825_v36, 0.0  ;;  %3129 = vmatmul.bf16.vlgmr.msra.gmra.mxu2 %v10585_v12  ;;  %3368 = vmatpush.bf16.msrb.mxu3 %v8308_v28  ;;  %v9528_v36 = vld [vmem:[#allocation7 + $0x354] sm:$0xf] }
 0x2cc   : > { %3178 = vmatmul.bf16.vlgmr.msra.gmra.mxu3 %v10593_v15  ;;  %v10952_v45 = vpack.c.bf16 %v3929_v42, %v3921_v26  ;;  %v2838_v17 = vpop.f32.mrf.mxu0  ;;  %v7793_v26 = vld [vmem:[#allocation7 + $0x370] sm:$0xf0] }
 0x2cd   : > { %v2934_v40 = vpop.f32.mrf.mxu2  ;;  %v2839_v33 = vadd.f32 %v2838_v17, %v10945_v38  ;;  %v2887_v2 = vpop.f32.mrf.mxu1  ;;  %v7796_v42 = vor.u32 %v9528_v36, %v7793_v26  ;;  %v8017_v17 = vld [vmem:[#allocation7 + $0x530] sm:$0xf0] }
 0x2ce   : > { %12105 = vst [vmem:[#allocation35_spill] sm:$0xff] %v10952_v45  ;;  %v2935_v41 = vadd.f32 %v2934_v40, %v2886_v25 }
 0x2cf   : > { %v2983_v24 = vpop.f32.mrf.mxu3  ;;  %v2888_v44 = vadd.f32 %v2887_v2, %v2839_v33  ;;  %3270 = vmatpush.bf16.msrb.mxu1 %v7796_v42  ;;  %v7505_v2 = vld [vmem:[#allocation7 + $0x130] sm:$0xf0] }
 0x2d0   : > { %v2984_v37 = vadd.f32 %v2983_v24, %v2935_v41  ;;  %v9584_v24 = vld [vmem:[#allocation7 + $0x514] sm:$0xf]  ;;  %v7508_v42 = vor.u32 %v9456_v29, %v7505_v2 }
 0x2d1   : > { %v8020_v33 = vor.u32 %v9584_v24, %v8017_v17 }
 0x2d2   : > { %v3810_v39 = vmax.f32 %v2984_v37, 0.0  ;;  %3222 = vmatpush.bf16.msrb.mxu0 %v7508_v42  ;;  %v9448_v42 = vld [vmem:[#allocation7 + $0xd4] sm:$0xf] }
 0x2d3   : > { %3320 = vmatpush.bf16.msrb.mxu2 %v8020_v33 }
 0x2d4   : > { %v2841_v25 = vpop.f32.mrf.mxu0 }
 0x2d5   : > { %v2936_v32 = vpop.f32.mrf.mxu2  ;;  %v2842_v40 = vadd.f32 %v2841_v25, %v10945_v38  ;;  %v2890_v18 = vpop.f32.mrf.mxu1 }
 0x2d6   : > { %v2937_v31 = vadd.f32 %v2936_v32, %v2888_v44  ;;  %v8273_v44 = vld [vmem:[#allocation7 + $0x730] sm:$0xf0] }
 0x2d7   : > { %v2985_v45 = vpop.f32.mrf.mxu3  ;;  %v2891_v47 = vadd.f32 %v2890_v18, %v2842_v40  ;;  %3036 = vmatmul.bf16.gmra.mxu0 %v10609_v9 }
 0x2d8   : > { %v2986_v43 = vadd.f32 %v2985_v45, %v2937_v31  ;;  %3085 = vmatmul.bf16.gmra.mxu1 %v10611_v10  ;;  %v9648_v45 = vld [vmem:[#allocation7 + $0x714] sm:$0xf] }
 0x2d9   : > { %v8276_v32 = vor.u32 %v9648_v45, %v8273_v44 }
 0x2da   : > { %v3818_v19 = vmax.f32 %v2986_v43, 0.0  ;;  %3134 = vmatmul.bf16.gmra.mxu2 %v10613_v13  ;;  %v9520_v43 = vld [vmem:[#allocation7 + $0x314] sm:$0xf] }
 0x2db   : > { %3369 = vmatpush.bf16.msrb.mxu3 %v8276_v32 }
 0x2dc   : > { %3183 = vmatmul.bf16.gmra.mxu3 %v10615_v14  ;;  %v10960_v41 = vpack.c.bf16 %v3818_v19, %v3810_v39  ;;  %v2843_v37 = vpop.f32.mrf.mxu0  ;;  %v7761_v39 = vld [vmem:[#allocation7 + $0x330] sm:$0xf0] }
 0x2dd   : > { %v2939_v28 = vpop.f32.mrf.mxu2  ;;  %v2844_v31 = vadd.f32 %v2843_v37, %v10945_v38  ;;  %v2892_v25 = vpop.f32.mrf.mxu1  ;;  %v7764_v19 = vor.u32 %v9520_v43, %v7761_v39  ;;  %v7985_v37 = vld [vmem:[#allocation7 + $0x4f0] sm:$0xf0] }
 0x2de   : > { %v2940_v36 = vadd.f32 %v2939_v28, %v2891_v47 }
 0x2df   : > { %v2988_v26 = vpop.f32.mrf.mxu3  ;;  %v2893_v18 = vadd.f32 %v2892_v25, %v2844_v31  ;;  %3271 = vmatpush.bf16.msrb.mxu1 %v7764_v19  ;;  %v7473_v25 = vld [vmem:[#allocation7 + $0xf0] sm:$0xf0] }
 0x2e0   : > { %v2989_v40 = vadd.f32 %v2988_v26, %v2940_v36  ;;  %v9576_v26 = vld [vmem:[#allocation7 + $0x4d4] sm:$0xf]  ;;  %v7476_v19 = vor.u32 %v9448_v42, %v7473_v25 }
 0x2e1   : > { %v7988_v31 = vor.u32 %v9576_v26, %v7985_v37 }
 0x2e2   : > { %v3826_v33 = vmax.f32 %v2989_v40, 0.0  ;;  %3223 = vmatpush.bf16.msrb.mxu0 %v7476_v19  ;;  %v9440_v19 = vld [vmem:[#allocation7 + $0x94] sm:$0xf] }
 0x2e3   : > { %3321 = vmatpush.bf16.msrb.mxu2 %v7988_v31 }
 0x2e4   : > { %v2846_v47 = vpop.f32.mrf.mxu0 }
 0x2e5   : > { %v2941_v24 = vpop.f32.mrf.mxu2  ;;  %v2847_v28 = vadd.f32 %v2846_v47, %v10945_v38  ;;  %v2895_v29 = vpop.f32.mrf.mxu1 }
 0x2e6   : > { %v2942_v17 = vadd.f32 %v2941_v24, %v2893_v18  ;;  %v8241_v18 = vld [vmem:[#allocation7 + $0x6f0] sm:$0xf0] }
 0x2e7   : > { %v2990_v23 = vpop.f32.mrf.mxu3  ;;  %v2896_v45 = vadd.f32 %v2895_v29, %v2847_v28  ;;  %3041 = vmatmul.bf16.gmra.mxu0 %v10629_v60 }
 0x2e8   : > { %v2991_v2 = vadd.f32 %v2990_v23, %v2942_v17  ;;  %3090 = vmatmul.bf16.gmra.mxu1 %v10631_v61  ;;  %v9640_v23 = vld [vmem:[#allocation7 + $0x6d4] sm:$0xf] }
 0x2e9   : > { %v8244_v24 = vor.u32 %v9640_v23, %v8241_v18 }
 0x2ea   : > { %v3834_v44 = vmax.f32 %v2991_v2, 0.0  ;;  %3139 = vmatmul.bf16.gmra.mxu2 %v10633_v62  ;;  %v9512_v2 = vld [vmem:[#allocation7 + $0x2d4] sm:$0xf] }
 0x2eb   : > { %3370 = vmatpush.bf16.msrb.mxu3 %v8244_v24 }
 0x2ec   : > { %3188 = vmatmul.bf16.gmra.mxu3 %v10635_v63  ;;  %v10968_v36 = vpack.c.bf16 %v3834_v44, %v3826_v33  ;;  %v2848_v40 = vpop.f32.mrf.mxu0  ;;  %v7729_v33 = vld [vmem:[#allocation7 + $0x2f0] sm:$0xf0] }
 0x2ed   : > { %v2944_v32 = vpop.f32.mrf.mxu2  ;;  %v2849_v17 = vadd.f32 %v2848_v40, %v10945_v38  ;;  %v2897_v47 = vpop.f32.mrf.mxu1  ;;  %v7732_v44 = vor.u32 %v9512_v2, %v7729_v33  ;;  %v7953_v40 = vld [vmem:[#allocation7 + $0x4b0] sm:$0xf0] }
 0x2ee   : > { %v2945_v43 = vadd.f32 %v2944_v32, %v2896_v45 }
 0x2ef   : > { %v2993_v39 = vpop.f32.mrf.mxu3  ;;  %v2898_v29 = vadd.f32 %v2897_v47, %v2849_v17  ;;  %3272 = vmatpush.bf16.msrb.mxu1 %v7732_v44  ;;  %v7441_v47 = vld [vmem:[#allocation7 + $0xb0] sm:$0xf0] }
 0x2f0   : > { %v2994_v28 = vadd.f32 %v2993_v39, %v2945_v43  ;;  %v9568_v39 = vld [vmem:[#allocation7 + $0x494] sm:$0xf]  ;;  %v7444_v44 = vor.u32 %v9440_v19, %v7441_v47 }
 0x2f1   : > { %v7956_v17 = vor.u32 %v9568_v39, %v7953_v40 }
 0x2f2   : > { %v3842_v31 = vmax.f32 %v2994_v28, 0.0  ;;  %3224 = vmatpush.bf16.msrb.mxu0 %v7444_v44  ;;  %v9432_v44 = vld [vmem:[#allocation7 + $0x54] sm:$0xf] }
 0x2f3   : > { %3322 = vmatpush.bf16.msrb.mxu2 %v7956_v17 }
 0x2f4   : > { %v2851_v45 = vpop.f32.mrf.mxu0 }
 0x2f5   : > { %v2946_v26 = vpop.f32.mrf.mxu2  ;;  %v2852_v32 = vadd.f32 %v2851_v45, %v10945_v38  ;;  %v2900_v42 = vpop.f32.mrf.mxu1 }
 0x2f6   : > { %v2947_v37 = vadd.f32 %v2946_v26, %v2898_v29  ;;  %v8209_v29 = vld [vmem:[#allocation7 + $0x6b0] sm:$0xf0] }
 0x2f7   : > { %v2995_v27 = vpop.f32.mrf.mxu3  ;;  %v2901_v23 = vadd.f32 %v2900_v42, %v2852_v32  ;;  %3046 = vmatmul.bf16.gmra.mxu0 %v10649_v52 }
 0x2f8   : > { %v2996_v25 = vadd.f32 %v2995_v27, %v2947_v37  ;;  %3095 = vmatmul.bf16.gmra.mxu1 %v10651_v53  ;;  %v9632_v27 = vld [vmem:[#allocation7 + $0x694] sm:$0xf] }
 0x2f9   : > { %v8212_v26 = vor.u32 %v9632_v27, %v8209_v29 }
 0x2fa   : > { %v3850_v18 = vmax.f32 %v2996_v25, 0.0  ;;  %3144 = vmatmul.bf16.gmra.mxu2 %v10653_v54  ;;  %v9504_v25 = vld [vmem:[#allocation7 + $0x294] sm:$0xf] }
 0x2fb   : > { %3371 = vmatpush.bf16.msrb.mxu3 %v8212_v26 }
 0x2fc   : > { %3193 = vmatmul.bf16.gmra.mxu3 %v10655_v55  ;;  %v10976_v43 = vpack.c.bf16 %v3850_v18, %v3842_v31  ;;  %v2853_v28 = vpop.f32.mrf.mxu0  ;;  %v7697_v31 = vld [vmem:[#allocation7 + $0x2b0] sm:$0xf0] }
 0x2fd   : > { %v2949_v24 = vpop.f32.mrf.mxu2  ;;  %v2854_v37 = vadd.f32 %v2853_v28, %v10945_v38  ;;  %v2902_v45 = vpop.f32.mrf.mxu1  ;;  %v7700_v18 = vor.u32 %v9504_v25, %v7697_v31  ;;  %v7921_v28 = vld [vmem:[#allocation7 + $0x470] sm:$0xf0] }
 0x2fe   : > { %12106 = vst [vmem:[#allocation36_spill] sm:$0xff] %v10976_v43  ;;  %v2950_v2 = vadd.f32 %v2949_v24, %v2901_v23 }
 0x2ff   : > { %v2998_v33 = vpop.f32.mrf.mxu3  ;;  %v2903_v42 = vadd.f32 %v2902_v45, %v2854_v37  ;;  %3273 = vmatpush.bf16.msrb.mxu1 %v7700_v18  ;;  %v7409_v45 = vld [vmem:[#allocation7 + $0x70] sm:$0xf0] }
 0x300   : > { %v2999_v32 = vadd.f32 %v2998_v33, %v2950_v2  ;;  %v9560_v33 = vld [vmem:[#allocation7 + $0x454] sm:$0xf]  ;;  %v7412_v18 = vor.u32 %v9432_v44, %v7409_v45 }
 0x301   : > { %v7924_v37 = vor.u32 %v9560_v33, %v7921_v28 }
 0x302   : > { %v3858_v17 = vmax.f32 %v2999_v32, 0.0  ;;  %3225 = vmatpush.bf16.msrb.mxu0 %v7412_v18  ;;  %v9424_v18 = vld [vmem:[#allocation7 + $0x14] sm:$0xf] }
 0x303   : > { %3323 = vmatpush.bf16.msrb.mxu2 %v7924_v37 }
 0x304   : > { %v2856_v23 = vpop.f32.mrf.mxu0 }
 0x305   : > { %v2951_v39 = vpop.f32.mrf.mxu2  ;;  %v2857_v24 = vadd.f32 %v2856_v23, %v10945_v38  ;;  %v2905_v19 = vpop.f32.mrf.mxu1 }
 0x306   : > { %v2952_v40 = vadd.f32 %v2951_v39, %v2903_v42  ;;  %v8177_v42 = vld [vmem:[#allocation7 + $0x670] sm:$0xf0] }
 0x307   : > { %v3000_v43 = vpop.f32.mrf.mxu3  ;;  %v2906_v27 = vadd.f32 %v2905_v19, %v2857_v24  ;;  %3051 = vmatmul.bf16.gmra.mxu0 %v10669_v48 }
 0x308   : > { %v3001_v47 = vadd.f32 %v3000_v43, %v2952_v40  ;;  %3100 = vmatmul.bf16.gmra.mxu1 %v10671_v49  ;;  %v9624_v43 = vld [vmem:[#allocation7 + $0x654] sm:$0xf] }
 0x309   : > { %v8180_v39 = vor.u32 %v9624_v43, %v8177_v42 }
 0x30a   : > { %v3866_v29 = vmax.f32 %v3001_v47, 0.0  ;;  %3149 = vmatmul.bf16.gmra.mxu2 %v10673_v50  ;;  %v9496_v47 = vld [vmem:[#allocation7 + $0x254] sm:$0xf] }
 0x30b   : > { %3372 = vmatpush.bf16.msrb.mxu3 %v8180_v39 }
 0x30c   : > { %3198 = vmatmul.bf16.gmra.mxu3 %v10675_v51  ;;  %v10984_v2 = vpack.c.bf16 %v3866_v29, %v3858_v17  ;;  %v2858_v32 = vpop.f32.mrf.mxu0  ;;  %v7665_v17 = vld [vmem:[#allocation7 + $0x270] sm:$0xf0] }
 0x30d   : > { %v2954_v26 = vpop.f32.mrf.mxu2  ;;  %v2859_v40 = vadd.f32 %v2858_v32, %v10945_v38  ;;  %v2907_v23 = vpop.f32.mrf.mxu1  ;;  %v7668_v29 = vor.u32 %v9496_v47, %v7665_v17  ;;  %v7889_v32 = vld [vmem:[#allocation7 + $0x430] sm:$0xf0] }
 0x30e   : > { %12107 = vst [vmem:[#allocation37_spill] sm:$0xff] %v10984_v2  ;;  %v2955_v25 = vadd.f32 %v2954_v26, %v2906_v27 }
 0x30f   : > { %v3003_v31 = vpop.f32.mrf.mxu3  ;;  %v2908_v19 = vadd.f32 %v2907_v23, %v2859_v40  ;;  %3274 = vmatpush.bf16.msrb.mxu1 %v7668_v29  ;;  %v7377_v23 = vld [vmem:[#allocation7 + $0x30] sm:$0xf0] }
 0x310   : > { %v3004_v24 = vadd.f32 %v3003_v31, %v2955_v25  ;;  %v9552_v31 = vld [vmem:[#allocation7 + $0x414] sm:$0xf]  ;;  %v7380_v29 = vor.u32 %v9424_v18, %v7377_v23 }
 0x311   : > { %v7892_v40 = vor.u32 %v9552_v31, %v7889_v32 }
 0x312   : > { %v3874_v37 = vmax.f32 %v3004_v24, 0.0  ;;  %3226 = vmatpush.bf16.msrb.mxu0 %v7380_v29  ;;  %v7607_v29 = vld [vmem:[#allocation7 + $0x1d8] sm:$0xf] }
 0x313   : > { %3324 = vmatpush.bf16.msrb.mxu2 %v7892_v40 }
 0x314   : > { %v2861_v27 = vpop.f32.mrf.mxu0 }
 0x315   : > { %v2956_v33 = vpop.f32.mrf.mxu2  ;;  %v2862_v26 = vadd.f32 %v2861_v27, %v10945_v38  ;;  %v2910_v44 = vpop.f32.mrf.mxu1 }
 0x316   : > { %v2957_v28 = vadd.f32 %v2956_v33, %v2908_v19  ;;  %v8145_v19 = vld [vmem:[#allocation7 + $0x630] sm:$0xf0] }
 0x317   : > { %v3005_v2 = vpop.f32.mrf.mxu3  ;;  %v2911_v43 = vadd.f32 %v2910_v44, %v2862_v26  ;;  %3056 = vmatmul.bf16.gmra.mxu0 %v10689_v56 }
 0x318   : > { %v3006_v45 = vadd.f32 %v3005_v2, %v2957_v28  ;;  %3105 = vmatmul.bf16.gmra.mxu1 %v10691_v57  ;;  %v9616_v2 = vld [vmem:[#allocation7 + $0x614] sm:$0xf] }
 0x319   : > { %v8148_v33 = vor.u32 %v9616_v2, %v8145_v19 }
 0x31a   : > { %v3882_v42 = vmax.f32 %v3006_v45, 0.0  ;;  %3154 = vmatmul.bf16.gmra.mxu2 %v10693_v58  ;;  %v9488_v45 = vld [vmem:[#allocation7 + $0x214] sm:$0xf] }
 0x31b   : > { %3373 = vmatpush.bf16.msrb.mxu3 %v8148_v33 }
 0x31c   : > { %3203 = vmatmul.bf16.gmra.mxu3 %v10695_v59  ;;  %v10992_v25 = vpack.c.bf16 %v3882_v42, %v3874_v37  ;;  %v2863_v24 = vpop.f32.mrf.mxu0  ;;  %v7633_v37 = vld [vmem:[#allocation7 + $0x230] sm:$0xf0] }
 0x31d   : > { %v2959_v39 = vpop.f32.mrf.mxu2  ;;  %v2864_v28 = vadd.f32 %v2863_v24, %v10945_v38  ;;  %v2912_v27 = vpop.f32.mrf.mxu1  ;;  %v7636_v42 = vor.u32 %v9488_v45, %v7633_v37  ;;  %v9613_v24 = vld [vmem:[#allocation7 + $0x5f4] sm:$0xf0] }
 0x31e   : > { %12108 = vst [vmem:[#allocation38_spill] sm:$0xff] %v10992_v25  ;;  %v2960_v47 = vadd.f32 %v2959_v39, %v2911_v43 }
 0x31f   : > { %v3008_v17 = vpop.f32.mrf.mxu3  ;;  %v2913_v44 = vadd.f32 %v2912_v27, %v2864_v28  ;;  %3275 = vmatpush.bf16.msrb.mxu1 %v7636_v42  ;;  %v9485_v27 = vld [vmem:[#allocation7 + $0x1f4] sm:$0xf0] }
 0x320   : > { %v3009_v26 = vadd.f32 %v3008_v17, %v2960_v47  ;;  %v8119_v17 = vld [vmem:[#allocation7 + $0x5d8] sm:$0xf]  ;;  %v7608_v42 = vor.u32 %v9485_v27, %v7607_v29 }
 0x321   : > { %v8120_v28 = vor.u32 %v9613_v24, %v8119_v17 }
 0x322   : > { %v3890_v40 = vmax.f32 %v3009_v26, 0.0  ;;  %3415 = vmatpush.bf16.msra.mxu0 %v7608_v42  ;;  %v7575_v42 = vld [vmem:[#allocation7 + $0x198] sm:$0xf] }
 0x323   : > { %3513 = vmatpush.bf16.msra.mxu2 %v8120_v28 }
 0x324   : > { %v2866_v43 = vpop.f32.mrf.mxu0 }
 0x325   : > { %v2961_v31 = vpop.f32.mrf.mxu2  ;;  %v2867_v39 = vadd.f32 %v2866_v43, %v10945_v38  ;;  %v2915_v18 = vpop.f32.mrf.mxu1 }
 0x326   : > { %v2962_v32 = vadd.f32 %v2961_v31, %v2913_v44  ;;  %v9677_v44 = vld [vmem:[#allocation7 + $0x7f4] sm:$0xf0] }
 0x327   : > { %v3010_v25 = vpop.f32.mrf.mxu3  ;;  %v2916_v2 = vadd.f32 %v2915_v18, %v2867_v39  ;;  %3061 = vmatmul.bf16.gmra.mxu0 %v10709_v4 }
 0x328   : > { %v3011_v23 = vadd.f32 %v3010_v25, %v2962_v32  ;;  %3110 = vmatmul.bf16.gmra.mxu1 %v10711_v5  ;;  %v8375_v25 = vld [vmem:[#allocation7 + $0x7d8] sm:$0xf] }
 0x329   : > { %v8376_v31 = vor.u32 %v9677_v44, %v8375_v25 }
 0x32a   : > { %v3898_v19 = vmax.f32 %v3011_v23, 0.0  ;;  %3159 = vmatmul.bf16.gmra.mxu2 %v10713_v6  ;;  %v7863_v23 = vld [vmem:[#allocation7 + $0x3d8] sm:$0xf] }
 0x32b   : > { %3562 = vmatpush.bf16.msra.mxu3 %v8376_v31 }
 0x32c   : > { %3208 = vmatmul.bf16.gmra.mxu3 %v10715_v8  ;;  %v11000_v47 = vpack.c.bf16 %v3898_v19, %v3890_v40  ;;  %v2868_v26 = vpop.f32.mrf.mxu0  ;;  %v9549_v40 = vld [vmem:[#allocation7 + $0x3f4] sm:$0xf0] }
 0x32d   : > { %v2964_v33 = vpop.f32.mrf.mxu2  ;;  %v2869_v32 = vadd.f32 %v2868_v26, %v10945_v38  ;;  %v2917_v43 = vpop.f32.mrf.mxu1  ;;  %v7864_v19 = vor.u32 %v9549_v40, %v7863_v23  ;;  %v9605_v26 = vld [vmem:[#allocation7 + $0x5b4] sm:$0xf0] }
 0x32e   : > { %12109 = vst [vmem:[#allocation39_spill] sm:$0xff] %v11000_v47  ;;  %v2965_v45 = vadd.f32 %v2964_v33, %v2916_v2 }
 0x32f   : > { %v3013_v37 = vpop.f32.mrf.mxu3  ;;  %v2918_v18 = vadd.f32 %v2917_v43, %v2869_v32  ;;  %3464 = vmatpush.bf16.msra.mxu1 %v7864_v19  ;;  %v9477_v43 = vld [vmem:[#allocation7 + $0x1b4] sm:$0xf0] }
 0x330   : > { %v3014_v39 = vadd.f32 %v3013_v37, %v2965_v45  ;;  %v8087_v37 = vld [vmem:[#allocation7 + $0x598] sm:$0xf]  ;;  %v7576_v19 = vor.u32 %v9477_v43, %v7575_v42 }
 0x331   : > { %v8088_v32 = vor.u32 %v9605_v26, %v8087_v37 }
 0x332   : > { %v3906_v28 = vmax.f32 %v3014_v39, 0.0  ;;  %3416 = vmatpush.bf16.msra.mxu0 %v7576_v19  ;;  %v8055_v19 = vld [vmem:[#allocation7 + $0x558] sm:$0xf] }
 0x333   : > { %3514 = vmatpush.bf16.msra.mxu2 %v8088_v32 }
 0x334   : > { %v2871_v2 = vpop.f32.mrf.mxu0 }
 0x335   : > { %v2966_v17 = vpop.f32.mrf.mxu2  ;;  %v2872_v33 = vadd.f32 %v2871_v2, %v10945_v38  ;;  %v2920_v29 = vpop.f32.mrf.mxu1 }
 0x336   : > { %v2967_v24 = vadd.f32 %v2966_v17, %v2918_v18  ;;  %v9669_v18 = vld [vmem:[#allocation7 + $0x7b4] sm:$0xf0] }
 0x337   : > { %v3015_v47 = vpop.f32.mrf.mxu3  ;;  %v2921_v25 = vadd.f32 %v2920_v29, %v2872_v33  ;;  %3066 = vmatmul.bf16.gmra.mxu0 %v10729_v35 }
 0x338   : > { %v3016_v27 = vadd.f32 %v3015_v47, %v2967_v24  ;;  %3115 = vmatmul.bf16.gmra.mxu1 %v10731_v20  ;;  %v8343_v47 = vld [vmem:[#allocation7 + $0x798] sm:$0xf] }
 0x339   : > { %v8344_v17 = vor.u32 %v9669_v18, %v8343_v47 }
 0x33a   : > { %v3914_v44 = vmax.f32 %v3016_v27, 0.0  ;;  %3164 = vmatmul.bf16.gmra.mxu2 %v10733_v21  ;;  %v7831_v27 = vld [vmem:[#allocation7 + $0x398] sm:$0xf] }
 0x33b   : > { %3563 = vmatpush.bf16.msra.mxu3 %v8344_v17  ;;  %v9597_v17 = vld [vmem:[#allocation7 + $0x574] sm:$0xf0] }
 0x33c   : > { %3213 = vmatmul.bf16.gmra.mxu3 %v10735_v22  ;;  %v11008_v45 = vpack.c.bf16 %v3914_v44, %v3906_v28  ;;  %v2873_v39 = vpop.f32.mrf.mxu0  ;;  %v9541_v28 = vld [vmem:[#allocation7 + $0x3b4] sm:$0xf0]  ;;  %v11011_v44 = vld [vmem:[#allocation8] sm:$0xff] }
 0x33d   : > { %v2969_v31 = vpop.f32.mrf.mxu2  ;;  %v2874_v24 = vadd.f32 %v2873_v39, %v10945_v38  ;;  %v2922_v2 = vpop.f32.mrf.mxu1  ;;  %v11014_v37 = vperm.slane %v11011_v44, 4 }
 0x33e   : > { %12110 = vst [vmem:[#allocation40_spill] sm:$0xff] %v11008_v45  ;;  %v2970_v23 = vadd.f32 %v2969_v31, %v2921_v25  ;;  %v7832_v25 = vor.u32 %v9541_v28, %v7831_v27  ;;  %v9469_v27 = vld [vmem:[#allocation7 + $0x174] sm:$0xf0] }
 0x33f   : > { %v3018_v40 = vpop.f32.mrf.mxu3  ;;  %v2923_v29 = vadd.f32 %v2922_v2, %v2874_v24  ;;  %v7543_v24 = vld [vmem:[#allocation7 + $0x158] sm:$0xf] }
 0x340   : > { %v3019_v33 = vadd.f32 %v3018_v40, %v2970_v23  ;;  %3465 = vmatpush.bf16.msra.mxu1 %v7832_v25  ;;  %v8311_v28 = vld [vmem:[#allocation7 + $0x758] sm:$0xf] }
 0x341   : > { %v9661_v25 = vld [vmem:[#allocation7 + $0x774] sm:$0xf0] }
 0x342   : > { %v3922_v23 = vmax.f32 %v3019_v33, 0.0 }
 0x344   : > { %v3032_v43 = vpop.f32.mrf.mxu0 }
 0x345   : > { %v2971_v26 = vpop.f32.mrf.mxu2  ;;  %v3033_v38 = vadd.f32 %v3032_v43, %v11014_v37  ;;  %v3081_v32 = vpop.f32.mrf.mxu1  ;;  %v8312_v43 = vor.u32 %v9661_v25, %v8311_v28 }
 0x346   : > { %v2972_v42 = vadd.f32 %v2971_v26, %v2923_v29  ;;  %v8056_v29 = vor.u32 %v9597_v17, %v8055_v19 }
 0x347   : > { %v3020_v31 = vpop.f32.mrf.mxu3  ;;  %v3082_v18 = vadd.f32 %v3081_v32, %v3033_v38  ;;  %3227 = vmatmul.bf16.vlgmr.msrb.gmra.mxu0 %v10581_v7  ;;  %3564 = vmatpush.bf16.msra.mxu3 %v8312_v43  ;;  %v9461_v43 = vld [vmem:[#allocation7 + $0x134] sm:$0xf0] }
 0x348   : > { %v3021_v47 = vadd.f32 %v3020_v31, %v2972_v42  ;;  %3276 = vmatmul.bf16.vlgmr.msrb.gmra.mxu1 %v10583_v11  ;;  %v7544_v31 = vor.u32 %v9469_v27, %v7543_v24  ;;  %3515 = vmatpush.bf16.msra.mxu2 %v8056_v29 }
 0x34a   : > { %v3930_v40 = vmax.f32 %v3021_v47, 0.0  ;;  %3325 = vmatmul.bf16.vlgmr.msrb.gmra.mxu2 %v10585_v12  ;;  %3417 = vmatpush.bf16.msra.mxu0 %v7544_v31 }
 0x34c   : > { %3374 = vmatmul.bf16.vlgmr.msrb.gmra.mxu3 %v10593_v15  ;;  %v11021_v39 = vpack.c.bf16 %v3930_v40, %v3922_v23  ;;  %v3034_v33 = vpop.f32.mrf.mxu0  ;;  %v7799_v40 = vld [vmem:[#allocation7 + $0x358] sm:$0xf] }
 0x34d   : > { %v3130_v2 = vpop.f32.mrf.mxu2  ;;  %v3035_v38 = vadd.f32 %v3034_v33, %v11014_v37  ;;  %v3083_v32 = vpop.f32.mrf.mxu1 }
 0x34e   : > { %12111 = vst [vmem:[#allocation41_spill] sm:$0xff] %v11021_v39  ;;  %v3131_v26 = vadd.f32 %v3130_v2, %v3082_v18  ;;  %v9533_v39 = vld [vmem:[#allocation7 + $0x374] sm:$0xf0] }
 0x34f   : > { %v3179_v42 = vpop.f32.mrf.mxu3  ;;  %v3084_v23 = vadd.f32 %v3083_v32, %v3035_v38  ;;  %v7800_v45 = vor.u32 %v9533_v39, %v7799_v40  ;;  %v9653_v38 = vld [vmem:[#allocation7 + $0x734] sm:$0xf0] }
 0x350   : > { %v3180_v47 = vadd.f32 %v3179_v42, %v3131_v26  ;;  %v9589_v26 = vld [vmem:[#allocation7 + $0x534] sm:$0xf0] }
 0x351   : > { %3466 = vmatpush.bf16.msra.mxu1 %v7800_v45  ;;  %v8023_v45 = vld [vmem:[#allocation7 + $0x518] sm:$0xf] }
 0x352   : > { %v3811_v29 = vmax.f32 %v3180_v47, 0.0  ;;  %v7511_v42 = vld [vmem:[#allocation7 + $0x118] sm:$0xf]  ;;  %v8024_v31 = vor.u32 %v9589_v26, %v8023_v45 }
 0x353   : > { %v7512_v40 = vor.u32 %v9461_v43, %v7511_v42 }
 0x354   : > { %v3037_v18 = vpop.f32.mrf.mxu0  ;;  %3516 = vmatpush.bf16.msra.mxu2 %v8024_v31 }
 0x355   : > { %v3132_v19 = vpop.f32.mrf.mxu2  ;;  %v3038_v2 = vadd.f32 %v3037_v18, %v11014_v37  ;;  %v3086_v24 = vpop.f32.mrf.mxu1  ;;  %3418 = vmatpush.bf16.msra.mxu0 %v7512_v40  ;;  %v7479_v40 = vld [vmem:[#allocation7 + $0xd8] sm:$0xf] }
 0x356   : > { %v3133_v17 = vadd.f32 %v3132_v19, %v3084_v23 }
 0x357   : > { %v3181_v3 = vpop.f32.mrf.mxu3  ;;  %v3087_v28 = vadd.f32 %v3086_v24, %v3038_v2  ;;  %3232 = vmatmul.bf16.gmra.mxu0 %v10609_v9 }
 0x358   : > { %v3182_v27 = vadd.f32 %v3181_v3, %v3133_v17  ;;  %3281 = vmatmul.bf16.gmra.mxu1 %v10611_v10  ;;  %v8279_v3 = vld [vmem:[#allocation7 + $0x718] sm:$0xf] }
 0x359   : > { %v8280_v19 = vor.u32 %v9653_v38, %v8279_v3 }
 0x35a   : > { %v3819_v25 = vmax.f32 %v3182_v27, 0.0  ;;  %3330 = vmatmul.bf16.gmra.mxu2 %v10613_v13  ;;  %v7767_v27 = vld [vmem:[#allocation7 + $0x318] sm:$0xf] }
 0x35b   : > { %3565 = vmatpush.bf16.msra.mxu3 %v8280_v19 }
 0x35c   : > { %3379 = vmatmul.bf16.gmra.mxu3 %v10615_v14  ;;  %v11029_v39 = vpack.c.bf16 %v3819_v25, %v3811_v29  ;;  %v3039_v47 = vpop.f32.mrf.mxu0  ;;  %v9525_v29 = vld [vmem:[#allocation7 + $0x334] sm:$0xf0] }
 0x35d   : > { %v3135_v33 = vpop.f32.mrf.mxu2  ;;  %v3040_v17 = vadd.f32 %v3039_v47, %v11014_v37  ;;  %v3088_v18 = vpop.f32.mrf.mxu1  ;;  %v7768_v25 = vor.u32 %v9525_v29, %v7767_v27  ;;  %v9581_v47 = vld [vmem:[#allocation7 + $0x4f4] sm:$0xf0] }
 0x35e   : > { %12112 = vst [vmem:[#allocation42_spill] sm:$0xff] %v11029_v39  ;;  %v3136_v32 = vadd.f32 %v3135_v33, %v3087_v28 }
 0x35f   : > { %v3184_v23 = vpop.f32.mrf.mxu3  ;;  %v3089_v24 = vadd.f32 %v3088_v18, %v3040_v17  ;;  %3467 = vmatpush.bf16.msra.mxu1 %v7768_v25  ;;  %v9453_v18 = vld [vmem:[#allocation7 + $0xf4] sm:$0xf0] }
 0x360   : > { %v3185_v2 = vadd.f32 %v3184_v23, %v3136_v32  ;;  %v7991_v23 = vld [vmem:[#allocation7 + $0x4d8] sm:$0xf]  ;;  %v7480_v25 = vor.u32 %v9453_v18, %v7479_v40 }
 0x361   : > { %v7992_v17 = vor.u32 %v9581_v47, %v7991_v23 }
 0x362   : > { %v3827_v31 = vmax.f32 %v3185_v2, 0.0  ;;  %3419 = vmatpush.bf16.msra.mxu0 %v7480_v25  ;;  %v7447_v25 = vld [vmem:[#allocation7 + $0x98] sm:$0xf] }
 0x363   : > { %3517 = vmatpush.bf16.msra.mxu2 %v7992_v17 }
 0x364   : > { %v3042_v28 = vpop.f32.mrf.mxu0 }
 0x365   : > { %v3137_v45 = vpop.f32.mrf.mxu2  ;;  %v3043_v33 = vadd.f32 %v3042_v28, %v11014_v37  ;;  %v3091_v42 = vpop.f32.mrf.mxu1 }
 0x366   : > { %v3138_v26 = vadd.f32 %v3137_v45, %v3089_v24  ;;  %v9645_v24 = vld [vmem:[#allocation7 + $0x6f4] sm:$0xf0] }
 0x367   : > { %v3186_v39 = vpop.f32.mrf.mxu3  ;;  %v3092_v3 = vadd.f32 %v3091_v42, %v3043_v33  ;;  %3237 = vmatmul.bf16.gmra.mxu0 %v10629_v60 }
 0x368   : > { %v3187_v43 = vadd.f32 %v3186_v39, %v3138_v26  ;;  %3286 = vmatmul.bf16.gmra.mxu1 %v10631_v61  ;;  %v8247_v39 = vld [vmem:[#allocation7 + $0x6d8] sm:$0xf] }
 0x369   : > { %v8248_v45 = vor.u32 %v9645_v24, %v8247_v39 }
 0x36a   : > { %v3835_v38 = vmax.f32 %v3187_v43, 0.0  ;;  %3335 = vmatmul.bf16.gmra.mxu2 %v10633_v62  ;;  %v7735_v43 = vld [vmem:[#allocation7 + $0x2d8] sm:$0xf] }
 0x36b   : > { %3566 = vmatpush.bf16.msra.mxu3 %v8248_v45 }
 0x36c   : > { %3384 = vmatmul.bf16.gmra.mxu3 %v10635_v63  ;;  %v11037_v32 = vpack.c.bf16 %v3835_v38, %v3827_v31  ;;  %v3044_v2 = vpop.f32.mrf.mxu0  ;;  %v9517_v31 = vld [vmem:[#allocation7 + $0x2f4] sm:$0xf0] }
 0x36d   : > { %v3140_v19 = vpop.f32.mrf.mxu2  ;;  %v3045_v26 = vadd.f32 %v3044_v2, %v11014_v37  ;;  %v3093_v28 = vpop.f32.mrf.mxu1  ;;  %v7736_v38 = vor.u32 %v9517_v31, %v7735_v43  ;;  %v9573_v2 = vld [vmem:[#allocation7 + $0x4b4] sm:$0xf0] }
 0x36e   : > { %12113 = vst [vmem:[#allocation43_spill] sm:$0xff] %v11037_v32  ;;  %v3141_v27 = vadd.f32 %v3140_v19, %v3092_v3 }
 0x36f   : > { %v3189_v29 = vpop.f32.mrf.mxu3  ;;  %v3094_v42 = vadd.f32 %v3093_v28, %v3045_v26  ;;  %3468 = vmatpush.bf16.msra.mxu1 %v7736_v38  ;;  %v9445_v28 = vld [vmem:[#allocation7 + $0xb4] sm:$0xf0] }
 0x370   : > { %v3190_v33 = vadd.f32 %v3189_v29, %v3141_v27  ;;  %v7959_v29 = vld [vmem:[#allocation7 + $0x498] sm:$0xf]  ;;  %v7448_v38 = vor.u32 %v9445_v28, %v7447_v25 }
 0x371   : > { %v7960_v26 = vor.u32 %v9573_v2, %v7959_v29 }
 0x372   : > { %v3843_v17 = vmax.f32 %v3190_v33, 0.0  ;;  %3420 = vmatpush.bf16.msra.mxu0 %v7448_v38  ;;  %v7415_v38 = vld [vmem:[#allocation7 + $0x58] sm:$0xf] }
 0x373   : > { %3518 = vmatpush.bf16.msra.mxu2 %v7960_v26 }
 0x374   : > { %v3047_v3 = vpop.f32.mrf.mxu0 }
 0x375   : > { %v3142_v23 = vpop.f32.mrf.mxu2  ;;  %v3048_v19 = vadd.f32 %v3047_v3, %v11014_v37  ;;  %v3096_v40 = vpop.f32.mrf.mxu1 }
 0x376   : > { %v3143_v47 = vadd.f32 %v3142_v23, %v3094_v42  ;;  %v9637_v42 = vld [vmem:[#allocation7 + $0x6b4] sm:$0xf0] }
 0x377   : > { %v3191_v32 = vpop.f32.mrf.mxu3  ;;  %v3097_v39 = vadd.f32 %v3096_v40, %v3048_v19  ;;  %3242 = vmatmul.bf16.gmra.mxu0 %v10649_v52 }
 0x378   : > { %v3192_v18 = vadd.f32 %v3191_v32, %v3143_v47  ;;  %3291 = vmatmul.bf16.gmra.mxu1 %v10651_v53  ;;  %v8215_v32 = vld [vmem:[#allocation7 + $0x698] sm:$0xf] }
 0x379   : > { %v8216_v23 = vor.u32 %v9637_v42, %v8215_v32 }
 0x37a   : > { %v3851_v24 = vmax.f32 %v3192_v18, 0.0  ;;  %3340 = vmatmul.bf16.gmra.mxu2 %v10653_v54  ;;  %v7703_v18 = vld [vmem:[#allocation7 + $0x298] sm:$0xf] }
 0x37b   : > { %3567 = vmatpush.bf16.msra.mxu3 %v8216_v23 }
 0x37c   : > { %3389 = vmatmul.bf16.gmra.mxu3 %v10655_v55  ;;  %v11045_v27 = vpack.c.bf16 %v3851_v24, %v3843_v17  ;;  %v3049_v33 = vpop.f32.mrf.mxu0  ;;  %v9509_v17 = vld [vmem:[#allocation7 + $0x2b4] sm:$0xf0] }
 0x37d   : > { %v3145_v45 = vpop.f32.mrf.mxu2  ;;  %v3050_v47 = vadd.f32 %v3049_v33, %v11014_v37  ;;  %v3098_v3 = vpop.f32.mrf.mxu1  ;;  %v7704_v24 = vor.u32 %v9509_v17, %v7703_v18  ;;  %v9565_v33 = vld [vmem:[#allocation7 + $0x474] sm:$0xf0] }
 0x37e   : > { %12114 = vst [vmem:[#allocation44_spill] sm:$0xff] %v11045_v27  ;;  %v3146_v43 = vadd.f32 %v3145_v45, %v3097_v39 }
 0x37f   : > { %v3194_v31 = vpop.f32.mrf.mxu3  ;;  %v3099_v40 = vadd.f32 %v3098_v3, %v3050_v47  ;;  %3469 = vmatpush.bf16.msra.mxu1 %v7704_v24  ;;  %v9437_v3 = vld [vmem:[#allocation7 + $0x74] sm:$0xf0] }
 0x380   : > { %v3195_v19 = vadd.f32 %v3194_v31, %v3146_v43  ;;  %v7927_v31 = vld [vmem:[#allocation7 + $0x458] sm:$0xf]  ;;  %v7416_v24 = vor.u32 %v9437_v3, %v7415_v38 }
 0x381   : > { %v7928_v47 = vor.u32 %v9565_v33, %v7927_v31 }
 0x382   : > { %v3859_v26 = vmax.f32 %v3195_v19, 0.0  ;;  %3421 = vmatpush.bf16.msra.mxu0 %v7416_v24  ;;  %v7383_v24 = vld [vmem:[#allocation7 + $0x18] sm:$0xf] }
 0x383   : > { %3519 = vmatpush.bf16.msra.mxu2 %v7928_v47 }
 0x384   : > { %v3052_v39 = vpop.f32.mrf.mxu0 }
 0x385   : > { %v3147_v29 = vpop.f32.mrf.mxu2  ;;  %v3053_v45 = vadd.f32 %v3052_v39, %v11014_v37  ;;  %v3101_v25 = vpop.f32.mrf.mxu1 }
 0x386   : > { %v3148_v2 = vadd.f32 %v3147_v29, %v3099_v40  ;;  %v9629_v40 = vld [vmem:[#allocation7 + $0x674] sm:$0xf0] }
 0x387   : > { %v3196_v27 = vpop.f32.mrf.mxu3  ;;  %v3102_v32 = vadd.f32 %v3101_v25, %v3053_v45  ;;  %3247 = vmatmul.bf16.gmra.mxu0 %v10669_v48 }
 0x388   : > { %v3197_v28 = vadd.f32 %v3196_v27, %v3148_v2  ;;  %3296 = vmatmul.bf16.gmra.mxu1 %v10671_v49  ;;  %v8183_v27 = vld [vmem:[#allocation7 + $0x658] sm:$0xf] }
 0x389   : > { %v8184_v29 = vor.u32 %v9629_v40, %v8183_v27 }
 0x38a   : > { %v3867_v42 = vmax.f32 %v3197_v28, 0.0  ;;  %3345 = vmatmul.bf16.gmra.mxu2 %v10673_v50  ;;  %v7671_v28 = vld [vmem:[#allocation7 + $0x258] sm:$0xf] }
 0x38b   : > { %3568 = vmatpush.bf16.msra.mxu3 %v8184_v29 }
 0x38c   : > { %3394 = vmatmul.bf16.gmra.mxu3 %v10675_v51  ;;  %v11053_v43 = vpack.c.bf16 %v3867_v42, %v3859_v26  ;;  %v3054_v19 = vpop.f32.mrf.mxu0  ;;  %v9501_v26 = vld [vmem:[#allocation7 + $0x274] sm:$0xf0] }
 0x38d   : > { %v3150_v23 = vpop.f32.mrf.mxu2  ;;  %v3055_v2 = vadd.f32 %v3054_v19, %v11014_v37  ;;  %v3103_v39 = vpop.f32.mrf.mxu1  ;;  %v7672_v42 = vor.u32 %v9501_v26, %v7671_v28  ;;  %v9557_v19 = vld [vmem:[#allocation7 + $0x434] sm:$0xf0] }
 0x38e   : > { %12115 = vst [vmem:[#allocation45_spill] sm:$0xff] %v11053_v43  ;;  %v3151_v18 = vadd.f32 %v3150_v23, %v3102_v32 }
 0x38f   : > { %v3199_v17 = vpop.f32.mrf.mxu3  ;;  %v3104_v25 = vadd.f32 %v3103_v39, %v3055_v2  ;;  %3470 = vmatpush.bf16.msra.mxu1 %v7672_v42  ;;  %v9429_v39 = vld [vmem:[#allocation7 + $0x34] sm:$0xf0] }
 0x390   : > { %v3200_v45 = vadd.f32 %v3199_v17, %v3151_v18  ;;  %v7895_v17 = vld [vmem:[#allocation7 + $0x418] sm:$0xf]  ;;  %v7384_v42 = vor.u32 %v9429_v39, %v7383_v24 }
 0x391   : > { %v7896_v2 = vor.u32 %v9557_v19, %v7895_v17 }
 0x392   : > { %v3875_v47 = vmax.f32 %v3200_v45, 0.0  ;;  %3422 = vmatpush.bf16.msra.mxu0 %v7384_v42  ;;  %v9481_v42 = vld [vmem:[#allocation7 + $0x1dc] sm:$0xf] }
 0x393   : > { %3520 = vmatpush.bf16.msra.mxu2 %v7896_v2 }
 0x394   : > { %v3057_v32 = vpop.f32.mrf.mxu0 }
 0x395   : > { %v3152_v31 = vpop.f32.mrf.mxu2  ;;  %v3058_v23 = vadd.f32 %v3057_v32, %v11014_v37  ;;  %v3106_v38 = vpop.f32.mrf.mxu1 }
 0x396   : > { %v3153_v33 = vadd.f32 %v3152_v31, %v3104_v25  ;;  %v9621_v25 = vld [vmem:[#allocation7 + $0x634] sm:$0xf0] }
 0x397   : > { %v3201_v43 = vpop.f32.mrf.mxu3  ;;  %v3107_v27 = vadd.f32 %v3106_v38, %v3058_v23  ;;  %3252 = vmatmul.bf16.gmra.mxu0 %v10689_v56 }
 0x398   : > { %v3202_v3 = vadd.f32 %v3201_v43, %v3153_v33  ;;  %3301 = vmatmul.bf16.gmra.mxu1 %v10691_v57  ;;  %v8151_v43 = vld [vmem:[#allocation7 + $0x618] sm:$0xf] }
 0x399   : > { %v8152_v31 = vor.u32 %v9621_v25, %v8151_v43 }
 0x39a   : > { %v3883_v40 = vmax.f32 %v3202_v3, 0.0  ;;  %3350 = vmatmul.bf16.gmra.mxu2 %v10693_v58  ;;  %v7639_v3 = vld [vmem:[#allocation7 + $0x218] sm:$0xf] }
 0x39b   : > { %3569 = vmatpush.bf16.msra.mxu3 %v8152_v31 }
 0x39c   : > { %3399 = vmatmul.bf16.gmra.mxu3 %v10695_v59  ;;  %v11061_v18 = vpack.c.bf16 %v3883_v40, %v3875_v47  ;;  %v3059_v45 = vpop.f32.mrf.mxu0  ;;  %v9493_v47 = vld [vmem:[#allocation7 + $0x234] sm:$0xf0] }
 0x39d   : > { %v3155_v29 = vpop.f32.mrf.mxu2  ;;  %v3060_v33 = vadd.f32 %v3059_v45, %v11014_v37  ;;  %v3108_v32 = vpop.f32.mrf.mxu1  ;;  %v7640_v40 = vor.u32 %v9493_v47, %v7639_v3  ;;  %v8121_v45 = vld [vmem:[#allocation7 + $0x5f8] sm:$0xf0] }
 0x39e   : > { %12116 = vst [vmem:[#allocation46_spill] sm:$0xff] %v11061_v18  ;;  %v3156_v28 = vadd.f32 %v3155_v29, %v3107_v27 }
 0x39f   : > { %v3204_v26 = vpop.f32.mrf.mxu3  ;;  %v3109_v38 = vadd.f32 %v3108_v32, %v3060_v33  ;;  %3471 = vmatpush.bf16.msra.mxu1 %v7640_v40  ;;  %v7609_v32 = vld [vmem:[#allocation7 + $0x1f8] sm:$0xf0] }
 0x3a0   : > { %v3205_v23 = vadd.f32 %v3204_v26, %v3156_v28  ;;  %v9609_v26 = vld [vmem:[#allocation7 + $0x5dc] sm:$0xf]  ;;  %v7612_v40 = vor.u32 %v9481_v42, %v7609_v32 }
 0x3a1   : > { %v8124_v33 = vor.u32 %v9609_v26, %v8121_v45 }
 0x3a2   : > { %v3891_v2 = vmax.f32 %v3205_v23, 0.0  ;;  %3611 = vmatpush.bf16.msrb.mxu0 %v7612_v40  ;;  %v9473_v40 = vld [vmem:[#allocation7 + $0x19c] sm:$0xf] }
 0x3a3   : > { %3709 = vmatpush.bf16.msrb.mxu2 %v8124_v33 }
 0x3a4   : > { %v3062_v27 = vpop.f32.mrf.mxu0 }
 0x3a5   : > { %v3157_v17 = vpop.f32.mrf.mxu2  ;;  %v3063_v29 = vadd.f32 %v3062_v27, %v11014_v37  ;;  %v3111_v24 = vpop.f32.mrf.mxu1 }
 0x3a6   : > { %v3158_v19 = vadd.f32 %v3157_v17, %v3109_v38  ;;  %v8377_v38 = vld [vmem:[#allocation7 + $0x7f8] sm:$0xf0] }
 0x3a7   : > { %v3206_v18 = vpop.f32.mrf.mxu3  ;;  %v3112_v43 = vadd.f32 %v3111_v24, %v3063_v29  ;;  %3257 = vmatmul.bf16.gmra.mxu0 %v10709_v4 }
 0x3a8   : > { %v3207_v39 = vadd.f32 %v3206_v18, %v3158_v19  ;;  %3306 = vmatmul.bf16.gmra.mxu1 %v10711_v5  ;;  %v9673_v18 = vld [vmem:[#allocation7 + $0x7dc] sm:$0xf] }
 0x3a9   : > { %v8380_v17 = vor.u32 %v9673_v18, %v8377_v38 }
 0x3aa   : > { %v3899_v25 = vmax.f32 %v3207_v39, 0.0  ;;  %3355 = vmatmul.bf16.gmra.mxu2 %v10713_v6  ;;  %v9545_v39 = vld [vmem:[#allocation7 + $0x3dc] sm:$0xf] }
 0x3ab   : > { %3758 = vmatpush.bf16.msrb.mxu3 %v8380_v17 }
 0x3ac   : > { %3404 = vmatmul.bf16.gmra.mxu3 %v10715_v8  ;;  %v11069_v28 = vpack.c.bf16 %v3899_v25, %v3891_v2  ;;  %v3064_v23 = vpop.f32.mrf.mxu0  ;;  %v7865_v2 = vld [vmem:[#allocation7 + $0x3f8] sm:$0xf0] }
 0x3ad   : > { %v3160_v31 = vpop.f32.mrf.mxu2  ;;  %v3065_v19 = vadd.f32 %v3064_v23, %v11014_v37  ;;  %v3113_v27 = vpop.f32.mrf.mxu1  ;;  %v7868_v25 = vor.u32 %v9545_v39, %v7865_v2  ;;  %v8089_v23 = vld [vmem:[#allocation7 + $0x5b8] sm:$0xf0] }
 0x3ae   : > { %12117 = vst [vmem:[#allocation47_spill] sm:$0xff] %v11069_v28  ;;  %v3161_v3 = vadd.f32 %v3160_v31, %v3112_v43 }
 0x3af   : > { %v3209_v47 = vpop.f32.mrf.mxu3  ;;  %v3114_v24 = vadd.f32 %v3113_v27, %v3065_v19  ;;  %3660 = vmatpush.bf16.msrb.mxu1 %v7868_v25  ;;  %v7577_v27 = vld [vmem:[#allocation7 + $0x1b8] sm:$0xf0] }
 0x3b0   : > { %v3210_v29 = vadd.f32 %v3209_v47, %v3161_v3  ;;  %v9601_v47 = vld [vmem:[#allocation7 + $0x59c] sm:$0xf]  ;;  %v7580_v25 = vor.u32 %v9473_v40, %v7577_v27 }
 0x3b1   : > { %v8092_v19 = vor.u32 %v9601_v47, %v8089_v23 }
 0x3b2   : > { %v3907_v33 = vmax.f32 %v3210_v29, 0.0  ;;  %3612 = vmatpush.bf16.msrb.mxu0 %v7580_v25  ;;  %v9465_v25 = vld [vmem:[#allocation7 + $0x15c] sm:$0xf] }
 0x3b3   : > { %3710 = vmatpush.bf16.msrb.mxu2 %v8092_v19 }
 0x3b4   : > { %v3067_v43 = vpop.f32.mrf.mxu0 }
 0x3b5   : > { %v3162_v26 = vpop.f32.mrf.mxu2  ;;  %v3068_v31 = vadd.f32 %v3067_v43, %v11014_v37  ;;  %v3116_v42 = vpop.f32.mrf.mxu1 }
 0x3b6   : > { %v3163_v45 = vadd.f32 %v3162_v26, %v3114_v24  ;;  %v8345_v24 = vld [vmem:[#allocation7 + $0x7b8] sm:$0xf0] }
 0x3b7   : > { %v3211_v28 = vpop.f32.mrf.mxu3  ;;  %v3117_v18 = vadd.f32 %v3116_v42, %v3068_v31  ;;  %3262 = vmatmul.bf16.gmra.mxu0 %v10729_v35 }
 0x3b8   : > { %v3212_v32 = vadd.f32 %v3211_v28, %v3163_v45  ;;  %3311 = vmatmul.bf16.gmra.mxu1 %v10731_v20  ;;  %v9665_v28 = vld [vmem:[#allocation7 + $0x79c] sm:$0xf] }
 0x3b9   : > { %v8348_v26 = vor.u32 %v9665_v28, %v8345_v24 }
 0x3ba   : > { %v3915_v38 = vmax.f32 %v3212_v32, 0.0  ;;  %3360 = vmatmul.bf16.gmra.mxu2 %v10733_v21  ;;  %v9537_v32 = vld [vmem:[#allocation7 + $0x39c] sm:$0xf] }
 0x3bb   : > { %3759 = vmatpush.bf16.msrb.mxu3 %v8348_v26 }
 0x3bc   : > { %3409 = vmatmul.bf16.gmra.mxu3 %v10735_v22  ;;  %v11077_v3 = vpack.c.bf16 %v3915_v38, %v3907_v33  ;;  %v3069_v29 = vpop.f32.mrf.mxu0  ;;  %v7833_v33 = vld [vmem:[#allocation7 + $0x3b8] sm:$0xf0]  ;;  %v11081_v38 = vperm.slane %v11011_v44, 5 }
 0x3bd   : > { %v3165_v17 = vpop.f32.mrf.mxu2  ;;  %v3070_v45 = vadd.f32 %v3069_v29, %v11014_v37  ;;  %v3118_v43 = vpop.f32.mrf.mxu1  ;;  %v7836_v47 = vor.u32 %v9537_v32, %v7833_v33  ;;  %v8057_v29 = vld [vmem:[#allocation7 + $0x578] sm:$0xf0] }
 0x3be   : > { %12118 = vst [vmem:[#allocation48_spill] sm:$0xff] %v11077_v3  ;;  %v3166_v39 = vadd.f32 %v3165_v17, %v3117_v18  ;;  %v8313_v32 = vld [vmem:[#allocation7 + $0x778] sm:$0xf0] }
 0x3bf   : > { %v3214_v2 = vpop.f32.mrf.mxu3  ;;  %v3119_v42 = vadd.f32 %v3118_v43, %v3070_v45  ;;  %3661 = vmatpush.bf16.msrb.mxu1 %v7836_v47  ;;  %v7545_v43 = vld [vmem:[#allocation7 + $0x178] sm:$0xf0] }
 0x3c0   : > { %v3215_v31 = vadd.f32 %v3214_v2, %v3166_v39  ;;  %v9593_v2 = vld [vmem:[#allocation7 + $0x55c] sm:$0xf] }
 0x3c1   : > { %v8060_v45 = vor.u32 %v9593_v2, %v8057_v29 }
 0x3c2   : > { %v3923_v24 = vmax.f32 %v3215_v31, 0.0 }
 0x3c3   : > { %3711 = vmatpush.bf16.msrb.mxu2 %v8060_v45 }
 0x3c4   : > { %v3228_v40 = vpop.f32.mrf.mxu0 }
 0x3c5   : > { %v3167_v23 = vpop.f32.mrf.mxu2  ;;  %v3229_v27 = vadd.f32 %v3228_v40, %v11081_v38  ;;  %v3277_v37 = vpop.f32.mrf.mxu1 }
 0x3c6   : > { %v3168_v18 = vadd.f32 %v3167_v23, %v3119_v42  ;;  %v9657_v42 = vld [vmem:[#allocation7 + $0x75c] sm:$0xf]  ;;  %v7548_v23 = vor.u32 %v9465_v25, %v7545_v43 }
 0x3c7   : > { %v3216_v17 = vpop.f32.mrf.mxu3  ;;  %v3278_v19 = vadd.f32 %v3277_v37, %v3229_v27  ;;  %3423 = vmatmul.bf16.vlgmr.msra.gmra.mxu0 %v10581_v7 }
 0x3c8   : > { %v3217_v28 = vadd.f32 %v3216_v17, %v3168_v18  ;;  %3472 = vmatmul.bf16.vlgmr.msra.gmra.mxu1 %v10583_v11  ;;  %v8316_v18 = vor.u32 %v9657_v42, %v8313_v32  ;;  %3613 = vmatpush.bf16.msrb.mxu0 %v7548_v23  ;;  %v9457_v23 = vld [vmem:[#allocation7 + $0x11c] sm:$0xf] }
 0x3ca   : > { %v3931_v39 = vmax.f32 %v3217_v28, 0.0  ;;  %3521 = vmatmul.bf16.vlgmr.msra.gmra.mxu2 %v10585_v12  ;;  %3760 = vmatpush.bf16.msrb.mxu3 %v8316_v18  ;;  %v9529_v28 = vld [vmem:[#allocation7 + $0x35c] sm:$0xf] }
 0x3cc   : > { %3570 = vmatmul.bf16.vlgmr.msra.gmra.mxu3 %v10593_v15  ;;  %v11088_v44 = vpack.c.bf16 %v3931_v39, %v3923_v24  ;;  %v3230_v31 = vpop.f32.mrf.mxu0  ;;  %v7801_v24 = vld [vmem:[#allocation7 + $0x378] sm:$0xf0] }
 0x3cd   : > { %v3326_v26 = vpop.f32.mrf.mxu2  ;;  %v3231_v17 = vadd.f32 %v3230_v31, %v11081_v38  ;;  %v3279_v40 = vpop.f32.mrf.mxu1  ;;  %v7804_v39 = vor.u32 %v9529_v28, %v7801_v24  ;;  %v8025_v31 = vld [vmem:[#allocation7 + $0x538] sm:$0xf0] }
 0x3ce   : > { %12119 = vst [vmem:[#allocation49_spill] sm:$0xff] %v11088_v44  ;;  %v3327_v33 = vadd.f32 %v3326_v26, %v3278_v19 }
 0x3cf   : > { %v3375_v47 = vpop.f32.mrf.mxu3  ;;  %v3280_v37 = vadd.f32 %v3279_v40, %v3231_v17  ;;  %3662 = vmatpush.bf16.msrb.mxu1 %v7804_v39  ;;  %v7513_v40 = vld [vmem:[#allocation7 + $0x138] sm:$0xf0] }
 0x3d0   : > { %v3376_v27 = vadd.f32 %v3375_v47, %v3327_v33  ;;  %v9585_v47 = vld [vmem:[#allocation7 + $0x51c] sm:$0xf]  ;;  %v7516_v39 = vor.u32 %v9457_v23, %v7513_v40 }
 0x3d1   : > { %v8028_v17 = vor.u32 %v9585_v47, %v8025_v31 }
 0x3d2   : > { %v3812_v45 = vmax.f32 %v3376_v27, 0.0  ;;  %3614 = vmatpush.bf16.msrb.mxu0 %v7516_v39  ;;  %v9449_v39 = vld [vmem:[#allocation7 + $0xdc] sm:$0xf] }
 0x3d3   : > { %3712 = vmatpush.bf16.msrb.mxu2 %v8028_v17 }
 0x3d4   : > { %v3233_v19 = vpop.f32.mrf.mxu0 }
 0x3d5   : > { %v3328_v2 = vpop.f32.mrf.mxu2  ;;  %v3234_v26 = vadd.f32 %v3233_v19, %v11081_v38  ;;  %v3282_v25 = vpop.f32.mrf.mxu1 }
 0x3d6   : > { %v3329_v29 = vadd.f32 %v3328_v2, %v3280_v37  ;;  %v8281_v37 = vld [vmem:[#allocation7 + $0x738] sm:$0xf0] }
 0x3d7   : > { %v3377_v44 = vpop.f32.mrf.mxu3  ;;  %v3283_v42 = vadd.f32 %v3282_v25, %v3234_v26  ;;  %3428 = vmatmul.bf16.gmra.mxu0 %v10609_v9 }
 0x3d8   : > { %v3378_v43 = vadd.f32 %v3377_v44, %v3329_v29  ;;  %3477 = vmatmul.bf16.gmra.mxu1 %v10611_v10  ;;  %v9649_v44 = vld [vmem:[#allocation7 + $0x71c] sm:$0xf] }
 0x3d9   : > { %v8284_v2 = vor.u32 %v9649_v44, %v8281_v37 }
 0x3da   : > { %v3820_v32 = vmax.f32 %v3378_v43, 0.0  ;;  %3526 = vmatmul.bf16.gmra.mxu2 %v10613_v13  ;;  %v9521_v43 = vld [vmem:[#allocation7 + $0x31c] sm:$0xf] }
 0x3db   : > { %3761 = vmatpush.bf16.msrb.mxu3 %v8284_v2 }
 0x3dc   : > { %3575 = vmatmul.bf16.gmra.mxu3 %v10615_v14  ;;  %v11096_v33 = vpack.c.bf16 %v3820_v32, %v3812_v45  ;;  %v3235_v27 = vpop.f32.mrf.mxu0  ;;  %v7769_v45 = vld [vmem:[#allocation7 + $0x338] sm:$0xf0] }
 0x3dd   : > { %v3331_v18 = vpop.f32.mrf.mxu2  ;;  %v3236_v29 = vadd.f32 %v3235_v27, %v11081_v38  ;;  %v3284_v19 = vpop.f32.mrf.mxu1  ;;  %v7772_v32 = vor.u32 %v9521_v43, %v7769_v45  ;;  %v7993_v27 = vld [vmem:[#allocation7 + $0x4f8] sm:$0xf0] }
 0x3de   : > { %12120 = vst [vmem:[#allocation50_spill] sm:$0xff] %v11096_v33  ;;  %v3332_v28 = vadd.f32 %v3331_v18, %v3283_v42 }
 0x3df   : > { %v3380_v24 = vpop.f32.mrf.mxu3  ;;  %v3285_v25 = vadd.f32 %v3284_v19, %v3236_v29  ;;  %3663 = vmatpush.bf16.msrb.mxu1 %v7772_v32  ;;  %v7481_v19 = vld [vmem:[#allocation7 + $0xf8] sm:$0xf0] }
 0x3e0   : > { %v3381_v26 = vadd.f32 %v3380_v24, %v3332_v28  ;;  %v9577_v24 = vld [vmem:[#allocation7 + $0x4dc] sm:$0xf]  ;;  %v7484_v32 = vor.u32 %v9449_v39, %v7481_v19 }
 0x3e1   : > { %v7996_v29 = vor.u32 %v9577_v24, %v7993_v27 }
 0x3e2   : > { %v3828_v17 = vmax.f32 %v3381_v26, 0.0  ;;  %3615 = vmatpush.bf16.msrb.mxu0 %v7484_v32  ;;  %v9441_v32 = vld [vmem:[#allocation7 + $0x9c] sm:$0xf] }
 0x3e3   : > { %3713 = vmatpush.bf16.msrb.mxu2 %v7996_v29 }
 0x3e4   : > { %v3238_v42 = vpop.f32.mrf.mxu0 }
 0x3e5   : > { %v3333_v47 = vpop.f32.mrf.mxu2  ;;  %v3239_v18 = vadd.f32 %v3238_v42, %v11081_v38  ;;  %v3287_v23 = vpop.f32.mrf.mxu1 }
 0x3e6   : > { %v3334_v31 = vadd.f32 %v3333_v47, %v3285_v25  ;;  %v8249_v25 = vld [vmem:[#allocation7 + $0x6f8] sm:$0xf0] }
 0x3e7   : > { %v3382_v3 = vpop.f32.mrf.mxu3  ;;  %v3288_v44 = vadd.f32 %v3287_v23, %v3239_v18  ;;  %3433 = vmatmul.bf16.gmra.mxu0 %v10629_v60 }
 0x3e8   : > { %v3383_v40 = vadd.f32 %v3382_v3, %v3334_v31  ;;  %3482 = vmatmul.bf16.gmra.mxu1 %v10631_v61  ;;  %v9641_v3 = vld [vmem:[#allocation7 + $0x6dc] sm:$0xf] }
 0x3e9   : > { %v8252_v47 = vor.u32 %v9641_v3, %v8249_v25 }
 0x3ea   : > { %v3836_v37 = vmax.f32 %v3383_v40, 0.0  ;;  %3531 = vmatmul.bf16.gmra.mxu2 %v10633_v62  ;;  %v9513_v40 = vld [vmem:[#allocation7 + $0x2dc] sm:$0xf] }
 0x3eb   : > { %3762 = vmatpush.bf16.msrb.mxu3 %v8252_v47 }
 0x3ec   : > { %3580 = vmatmul.bf16.gmra.mxu3 %v10635_v63  ;;  %v11104_v28 = vpack.c.bf16 %v3836_v37, %v3828_v17  ;;  %v3240_v26 = vpop.f32.mrf.mxu0  ;;  %v7737_v17 = vld [vmem:[#allocation7 + $0x2f8] sm:$0xf0] }
 0x3ed   : > { %v3336_v2 = vpop.f32.mrf.mxu2  ;;  %v3241_v31 = vadd.f32 %v3240_v26, %v11081_v38  ;;  %v3289_v42 = vpop.f32.mrf.mxu1  ;;  %v7740_v37 = vor.u32 %v9513_v40, %v7737_v17  ;;  %v7961_v26 = vld [vmem:[#allocation7 + $0x4b8] sm:$0xf0] }
 0x3ee   : > { %12121 = vst [vmem:[#allocation51_spill] sm:$0xff] %v11104_v28  ;;  %v3337_v43 = vadd.f32 %v3336_v2, %v3288_v44 }
 0x3ef   : > { %v3385_v45 = vpop.f32.mrf.mxu3  ;;  %v3290_v23 = vadd.f32 %v3289_v42, %v3241_v31  ;;  %3664 = vmatpush.bf16.msrb.mxu1 %v7740_v37  ;;  %v7449_v42 = vld [vmem:[#allocation7 + $0xb8] sm:$0xf0] }
 0x3f0   : > { %v3386_v18 = vadd.f32 %v3385_v45, %v3337_v43  ;;  %v9569_v45 = vld [vmem:[#allocation7 + $0x49c] sm:$0xf]  ;;  %v7452_v37 = vor.u32 %v9441_v32, %v7449_v42 }
 0x3f1   : > { %v7964_v31 = vor.u32 %v9569_v45, %v7961_v26 }
 0x3f2   : > { %v3844_v29 = vmax.f32 %v3386_v18, 0.0  ;;  %3616 = vmatpush.bf16.msrb.mxu0 %v7452_v37  ;;  %v9433_v37 = vld [vmem:[#allocation7 + $0x5c] sm:$0xf] }
 0x3f3   : > { %3714 = vmatpush.bf16.msrb.mxu2 %v7964_v31 }
 0x3f4   : > { %v3243_v44 = vpop.f32.mrf.mxu0 }
 0x3f5   : > { %v3338_v24 = vpop.f32.mrf.mxu2  ;;  %v3244_v2 = vadd.f32 %v3243_v44, %v11081_v38  ;;  %v3292_v39 = vpop.f32.mrf.mxu1 }
 0x3f6   : > { %v3339_v27 = vadd.f32 %v3338_v24, %v3290_v23  ;;  %v8217_v23 = vld [vmem:[#allocation7 + $0x6b8] sm:$0xf0] }
 0x3f7   : > { %v3387_v28 = vpop.f32.mrf.mxu3  ;;  %v3293_v3 = vadd.f32 %v3292_v39, %v3244_v2  ;;  %3438 = vmatmul.bf16.gmra.mxu0 %v10649_v52 }
 0x3f8   : > { %v3388_v19 = vadd.f32 %v3387_v28, %v3339_v27  ;;  %3487 = vmatmul.bf16.gmra.mxu1 %v10651_v53  ;;  %v9633_v28 = vld [vmem:[#allocation7 + $0x69c] sm:$0xf] }
 0x3f9   : > { %v8220_v24 = vor.u32 %v9633_v28, %v8217_v23 }
 0x3fa   : > { %v3852_v25 = vmax.f32 %v3388_v19, 0.0  ;;  %3536 = vmatmul.bf16.gmra.mxu2 %v10653_v54  ;;  %v9505_v19 = vld [vmem:[#allocation7 + $0x29c] sm:$0xf] }
 0x3fb   : > { %3763 = vmatpush.bf16.msrb.mxu3 %v8220_v24 }
 0x3fc   : > { %3585 = vmatmul.bf16.gmra.mxu3 %v10655_v55  ;;  %v11112_v43 = vpack.c.bf16 %v3852_v25, %v3844_v29  ;;  %v3245_v18 = vpop.f32.mrf.mxu0  ;;  %v7705_v29 = vld [vmem:[#allocation7 + $0x2b8] sm:$0xf0] }
 0x3fd   : > { %v3341_v47 = vpop.f32.mrf.mxu2  ;;  %v3246_v27 = vadd.f32 %v3245_v18, %v11081_v38  ;;  %v3294_v44 = vpop.f32.mrf.mxu1  ;;  %v7708_v25 = vor.u32 %v9505_v19, %v7705_v29  ;;  %v7929_v18 = vld [vmem:[#allocation7 + $0x478] sm:$0xf0] }
 0x3fe   : > { %12122 = vst [vmem:[#allocation52_spill] sm:$0xff] %v11112_v43  ;;  %v3342_v40 = vadd.f32 %v3341_v47, %v3293_v3 }
 0x3ff   : > { %v3390_v17 = vpop.f32.mrf.mxu3  ;;  %v3295_v39 = vadd.f32 %v3294_v44, %v3246_v27  ;;  %3665 = vmatpush.bf16.msrb.mxu1 %v7708_v25  ;;  %v7417_v44 = vld [vmem:[#allocation7 + $0x78] sm:$0xf0] }
 0x400   : > { %v3391_v2 = vadd.f32 %v3390_v17, %v3342_v40  ;;  %v9561_v17 = vld [vmem:[#allocation7 + $0x45c] sm:$0xf]  ;;  %v7420_v25 = vor.u32 %v9433_v37, %v7417_v44 }
 0x401   : > { %v7932_v27 = vor.u32 %v9561_v17, %v7929_v18 }
 0x402   : > { %v3860_v31 = vmax.f32 %v3391_v2, 0.0  ;;  %3617 = vmatpush.bf16.msrb.mxu0 %v7420_v25  ;;  %v9425_v25 = vld [vmem:[#allocation7 + $0x1c] sm:$0xf] }
 0x403   : > { %3715 = vmatpush.bf16.msrb.mxu2 %v7932_v27 }
 0x404   : > { %v3248_v3 = vpop.f32.mrf.mxu0 }
 0x405   : > { %v3343_v45 = vpop.f32.mrf.mxu2  ;;  %v3249_v47 = vadd.f32 %v3248_v3, %v11081_v38  ;;  %v3297_v32 = vpop.f32.mrf.mxu1 }
 0x406   : > { %v3344_v26 = vadd.f32 %v3343_v45, %v3295_v39  ;;  %v8185_v39 = vld [vmem:[#allocation7 + $0x678] sm:$0xf0] }
 0x407   : > { %v3392_v43 = vpop.f32.mrf.mxu3  ;;  %v3298_v28 = vadd.f32 %v3297_v32, %v3249_v47  ;;  %3443 = vmatmul.bf16.gmra.mxu0 %v10669_v48 }
 0x408   : > { %v3393_v42 = vadd.f32 %v3392_v43, %v3344_v26  ;;  %3492 = vmatmul.bf16.gmra.mxu1 %v10671_v49  ;;  %v9625_v43 = vld [vmem:[#allocation7 + $0x65c] sm:$0xf] }
 0x409   : > { %v8188_v45 = vor.u32 %v9625_v43, %v8185_v39 }
 0x40a   : > { %v3868_v23 = vmax.f32 %v3393_v42, 0.0  ;;  %3541 = vmatmul.bf16.gmra.mxu2 %v10673_v50  ;;  %v9497_v42 = vld [vmem:[#allocation7 + $0x25c] sm:$0xf] }
 0x40b   : > { %3764 = vmatpush.bf16.msrb.mxu3 %v8188_v45 }
 0x40c   : > { %3590 = vmatmul.bf16.gmra.mxu3 %v10675_v51  ;;  %v11120_v40 = vpack.c.bf16 %v3868_v23, %v3860_v31  ;;  %v3250_v2 = vpop.f32.mrf.mxu0  ;;  %v7673_v31 = vld [vmem:[#allocation7 + $0x278] sm:$0xf0] }
 0x40d   : > { %v3346_v24 = vpop.f32.mrf.mxu2  ;;  %v3251_v26 = vadd.f32 %v3250_v2, %v11081_v38  ;;  %v3299_v3 = vpop.f32.mrf.mxu1  ;;  %v7676_v23 = vor.u32 %v9497_v42, %v7673_v31  ;;  %v7897_v2 = vld [vmem:[#allocation7 + $0x438] sm:$0xf0] }
 0x40e   : > { %12123 = vst [vmem:[#allocation53_spill] sm:$0xff] %v11120_v40  ;;  %v3347_v19 = vadd.f32 %v3346_v24, %v3298_v28 }
 0x40f   : > { %v3395_v29 = vpop.f32.mrf.mxu3  ;;  %v3300_v32 = vadd.f32 %v3299_v3, %v3251_v26  ;;  %3666 = vmatpush.bf16.msrb.mxu1 %v7676_v23  ;;  %v7385_v3 = vld [vmem:[#allocation7 + $0x38] sm:$0xf0] }
 0x410   : > { %v3396_v47 = vadd.f32 %v3395_v29, %v3347_v19  ;;  %v9553_v29 = vld [vmem:[#allocation7 + $0x41c] sm:$0xf]  ;;  %v7388_v23 = vor.u32 %v9425_v25, %v7385_v3 }
 0x411   : > { %v7900_v26 = vor.u32 %v9553_v29, %v7897_v2 }
 0x412   : > { %v3876_v27 = vmax.f32 %v3396_v47, 0.0  ;;  %3618 = vmatpush.bf16.msrb.mxu0 %v7388_v23  ;;  %v8495_v23 = vld [vmem:[#allocation10 + $0xe0] sm:$0xf] }
 0x413   : > { %3716 = vmatpush.bf16.msrb.mxu2 %v7900_v26 }
 0x414   : > { %v3253_v28 = vpop.f32.mrf.mxu0 }
 0x415   : > { %v3348_v17 = vpop.f32.mrf.mxu2  ;;  %v3254_v24 = vadd.f32 %v3253_v28, %v11081_v38  ;;  %v3302_v37 = vpop.f32.mrf.mxu1 }
 0x416   : > { %v3349_v18 = vadd.f32 %v3348_v17, %v3300_v32  ;;  %v8153_v32 = vld [vmem:[#allocation7 + $0x638] sm:$0xf0] }
 0x417   : > { %v3397_v40 = vpop.f32.mrf.mxu3  ;;  %v3303_v43 = vadd.f32 %v3302_v37, %v3254_v24  ;;  %3448 = vmatmul.bf16.gmra.mxu0 %v10689_v56 }
 0x418   : > { %v3398_v44 = vadd.f32 %v3397_v40, %v3349_v18  ;;  %3497 = vmatmul.bf16.gmra.mxu1 %v10691_v57  ;;  %v9617_v40 = vld [vmem:[#allocation7 + $0x61c] sm:$0xf] }
 0x419   : > { %v8156_v17 = vor.u32 %v9617_v40, %v8153_v32 }
 0x41a   : > { %v3884_v39 = vmax.f32 %v3398_v44, 0.0  ;;  %3546 = vmatmul.bf16.gmra.mxu2 %v10693_v58  ;;  %v9489_v44 = vld [vmem:[#allocation7 + $0x21c] sm:$0xf] }
 0x41b   : > { %3765 = vmatpush.bf16.msrb.mxu3 %v8156_v17 }
 0x41c   : > { %3595 = vmatmul.bf16.gmra.mxu3 %v10695_v59  ;;  %v11128_v19 = vpack.c.bf16 %v3884_v39, %v3876_v27  ;;  %v3255_v47 = vpop.f32.mrf.mxu0  ;;  %v7641_v27 = vld [vmem:[#allocation7 + $0x238] sm:$0xf0] }
 0x41d   : > { %v3351_v45 = vpop.f32.mrf.mxu2  ;;  %v3256_v18 = vadd.f32 %v3255_v47, %v11081_v38  ;;  %v3304_v28 = vpop.f32.mrf.mxu1  ;;  %v7644_v39 = vor.u32 %v9489_v44, %v7641_v27  ;;  %v9772_v47 = vld [vmem:[#allocation10 + $0x2ec] sm:$0xf0] }
 0x41e   : > { %12124 = vst [vmem:[#allocation54_spill] sm:$0xff] %v11128_v19  ;;  %v3352_v42 = vadd.f32 %v3351_v45, %v3303_v43 }
 0x41f   : > { %v3400_v31 = vpop.f32.mrf.mxu3  ;;  %v3305_v37 = vadd.f32 %v3304_v28, %v3256_v18  ;;  %3667 = vmatpush.bf16.msrb.mxu1 %v7644_v39  ;;  %v9708_v28 = vld [vmem:[#allocation10 + $0xec] sm:$0xf0] }
 0x420   : > { %v3401_v24 = vadd.f32 %v3400_v31, %v3352_v42  ;;  %v8751_v31 = vld [vmem:[#allocation10 + $0x2e0] sm:$0xf]  ;;  %v8496_v39 = vor.u32 %v9708_v28, %v8495_v23 }
 0x421   : > { %v8752_v18 = vor.u32 %v9772_v47, %v8751_v31 }
 0x422   : > { %v3892_v26 = vmax.f32 %v3401_v24, 0.0  ;;  %5545 = vmatpush.bf16.msra.mxu0 %v8496_v39  ;;  %v8479_v39 = vld [vmem:[#allocation10 + $0xc0] sm:$0xf] }
 0x423   : > { %5643 = vmatpush.bf16.msra.mxu2 %v8752_v18 }
 0x424   : > { %v3258_v43 = vpop.f32.mrf.mxu0 }
 0x425   : > { %v3353_v29 = vpop.f32.mrf.mxu2  ;;  %v3259_v45 = vadd.f32 %v3258_v43, %v11081_v38  ;;  %v3307_v25 = vpop.f32.mrf.mxu1 }
 0x426   : > { %v3354_v2 = vadd.f32 %v3353_v29, %v3305_v37  ;;  %v9804_v37 = vld [vmem:[#allocation10 + $0x3ec] sm:$0xf0] }
 0x427   : > { %v3402_v19 = vpop.f32.mrf.mxu3  ;;  %v3308_v40 = vadd.f32 %v3307_v25, %v3259_v45  ;;  %3453 = vmatmul.bf16.gmra.mxu0 %v10709_v4 }
 0x428   : > { %v3403_v3 = vadd.f32 %v3402_v19, %v3354_v2  ;;  %3502 = vmatmul.bf16.gmra.mxu1 %v10711_v5  ;;  %v8879_v19 = vld [vmem:[#allocation10 + $0x3e0] sm:$0xf] }
 0x429   : > { %v8880_v29 = vor.u32 %v9804_v37, %v8879_v19 }
 0x42a   : > { %v3900_v32 = vmax.f32 %v3403_v3, 0.0  ;;  %3551 = vmatmul.bf16.gmra.mxu2 %v10713_v6  ;;  %v8623_v3 = vld [vmem:[#allocation10 + $0x1e0] sm:$0xf] }
 0x42b   : > { %5692 = vmatpush.bf16.msra.mxu3 %v8880_v29 }
 0x42c   : > { %3600 = vmatmul.bf16.gmra.mxu3 %v10715_v8  ;;  %v11136_v42 = vpack.c.bf16 %v3900_v32, %v3892_v26  ;;  %v3260_v24 = vpop.f32.mrf.mxu0  ;;  %v9740_v26 = vld [vmem:[#allocation10 + $0x1ec] sm:$0xf0] }
 0x42d   : > { %v3356_v17 = vpop.f32.mrf.mxu2  ;;  %v3261_v2 = vadd.f32 %v3260_v24, %v11081_v38  ;;  %v3309_v43 = vpop.f32.mrf.mxu1  ;;  %v8624_v32 = vor.u32 %v9740_v26, %v8623_v3  ;;  %v9768_v24 = vld [vmem:[#allocation10 + $0x2cc] sm:$0xf0] }
 0x42e   : > { %12125 = vst [vmem:[#allocation55_spill] sm:$0xff] %v11136_v42  ;;  %v3357_v44 = vadd.f32 %v3356_v17, %v3308_v40 }
 0x42f   : > { %v3405_v27 = vpop.f32.mrf.mxu3  ;;  %v3310_v25 = vadd.f32 %v3309_v43, %v3261_v2  ;;  %5594 = vmatpush.bf16.msra.mxu1 %v8624_v32  ;;  %v9704_v43 = vld [vmem:[#allocation10 + $0xcc] sm:$0xf0] }
 0x430   : > { %v3406_v45 = vadd.f32 %v3405_v27, %v3357_v44  ;;  %v8735_v27 = vld [vmem:[#allocation10 + $0x2c0] sm:$0xf]  ;;  %v8480_v32 = vor.u32 %v9704_v43, %v8479_v39 }
 0x431   : > { %v8736_v2 = vor.u32 %v9768_v24, %v8735_v27 }
 0x432   : > { %v3908_v18 = vmax.f32 %v3406_v45, 0.0  ;;  %5546 = vmatpush.bf16.msra.mxu0 %v8480_v32  ;;  %v8719_v32 = vld [vmem:[#allocation10 + $0x2a0] sm:$0xf] }
 0x433   : > { %5644 = vmatpush.bf16.msra.mxu2 %v8736_v2 }
 0x434   : > { %v3263_v40 = vpop.f32.mrf.mxu0 }
 0x435   : > { %v3358_v31 = vpop.f32.mrf.mxu2  ;;  %v3264_v17 = vadd.f32 %v3263_v40, %v11081_v38  ;;  %v3312_v23 = vpop.f32.mrf.mxu1 }
 0x436   : > { %v3359_v47 = vadd.f32 %v3358_v31, %v3310_v25  ;;  %v9800_v25 = vld [vmem:[#allocation10 + $0x3cc] sm:$0xf0] }
 0x437   : > { %v3407_v42 = vpop.f32.mrf.mxu3  ;;  %v3313_v19 = vadd.f32 %v3312_v23, %v3264_v17  ;;  %3458 = vmatmul.bf16.gmra.mxu0 %v10729_v35 }
 0x438   : > { %v3408_v28 = vadd.f32 %v3407_v42, %v3359_v47  ;;  %3507 = vmatmul.bf16.gmra.mxu1 %v10731_v20  ;;  %v8863_v42 = vld [vmem:[#allocation10 + $0x3c0] sm:$0xf] }
 0x439   : > { %v8864_v31 = vor.u32 %v9800_v25, %v8863_v42 }
 0x43a   : > { %v3916_v37 = vmax.f32 %v3408_v28, 0.0  ;;  %3556 = vmatmul.bf16.gmra.mxu2 %v10733_v21  ;;  %v8607_v28 = vld [vmem:[#allocation10 + $0x1c0] sm:$0xf] }
 0x43b   : > { %5693 = vmatpush.bf16.msra.mxu3 %v8864_v31  ;;  %v9764_v31 = vld [vmem:[#allocation10 + $0x2ac] sm:$0xf0] }
 0x43c   : > { %3605 = vmatmul.bf16.gmra.mxu3 %v10735_v22  ;;  %v11144_v44 = vpack.c.bf16 %v3916_v37, %v3908_v18  ;;  %v3265_v45 = vpop.f32.mrf.mxu0  ;;  %v9736_v18 = vld [vmem:[#allocation10 + $0x1cc] sm:$0xf0]  ;;  %v11147_v37 = vld [vmem:[#allocation8] sm:$0xff] }
 0x43d   : > { %v3361_v29 = vpop.f32.mrf.mxu2  ;;  %v3266_v47 = vadd.f32 %v3265_v45, %v11081_v38  ;;  %v3314_v40 = vpop.f32.mrf.mxu1  ;;  %v11150_v27 = vperm.slane %v11147_v37, 6 }
 0x43e   : > { %12126 = vst [vmem:[#allocation56_spill] sm:$0xff] %v11144_v44  ;;  %v3362_v3 = vadd.f32 %v3361_v29, %v3313_v19  ;;  %v8608_v19 = vor.u32 %v9736_v18, %v8607_v28  ;;  %v9700_v28 = vld [vmem:[#allocation10 + $0xac] sm:$0xf0]  ;;  %v8847_v18 = vld [vmem:[#allocation10 + $0x3a0] sm:$0xf] }
 0x43f   : > { %v3410_v26 = vpop.f32.mrf.mxu3  ;;  %v3315_v23 = vadd.f32 %v3314_v40, %v3266_v47  ;;  %v8463_v47 = vld [vmem:[#allocation10 + $0xa0] sm:$0xf] }
 0x440   : > { %v3411_v17 = vadd.f32 %v3410_v26, %v3362_v3  ;;  %5595 = vmatpush.bf16.msra.mxu1 %v8608_v19  ;;  %v9796_v19 = vld [vmem:[#allocation10 + $0x3ac] sm:$0xf0] }
 0x442   : > { %v3924_v3 = vmax.f32 %v3411_v17, 0.0 }
 0x444   : > { %v3424_v43 = vpop.f32.mrf.mxu0 }
 0x445   : > { %v3363_v24 = vpop.f32.mrf.mxu2  ;;  %v3425_v38 = vadd.f32 %v3424_v43, %v11150_v27  ;;  %v3473_v2 = vpop.f32.mrf.mxu1 }
 0x446   : > { %v3364_v39 = vadd.f32 %v3363_v24, %v3315_v23  ;;  %v8720_v23 = vor.u32 %v9764_v31, %v8719_v32 }
 0x447   : > { %v3412_v29 = vpop.f32.mrf.mxu3  ;;  %v3474_v25 = vadd.f32 %v3473_v2, %v3425_v38  ;;  %3619 = vmatmul.bf16.vlgmr.msrb.gmra.mxu0 %v10581_v7  ;;  %v8591_v38 = vld [vmem:[#allocation10 + $0x1a0] sm:$0xf]  ;;  %v9732_v2 = vld [vmem:[#allocation10 + $0x1ac] sm:$0xf0] }
 0x448   : > { %v3413_v42 = vadd.f32 %v3412_v29, %v3364_v39  ;;  %3668 = vmatmul.bf16.vlgmr.msrb.gmra.mxu1 %v10583_v11  ;;  %v8464_v39 = vor.u32 %v9700_v28, %v8463_v47  ;;  %v8848_v29 = vor.u32 %v9796_v19, %v8847_v18  ;;  %5645 = vmatpush.bf16.msra.mxu2 %v8720_v23 }
 0x44a   : > { %v3932_v26 = vmax.f32 %v3413_v42, 0.0  ;;  %3717 = vmatmul.bf16.vlgmr.msrb.gmra.mxu2 %v10585_v12  ;;  %5547 = vmatpush.bf16.msra.mxu0 %v8464_v39  ;;  %v8592_v42 = vor.u32 %v9732_v2, %v8591_v38 }
 0x44b   : > { %5694 = vmatpush.bf16.msra.mxu3 %v8848_v29 }
 0x44c   : > { %3766 = vmatmul.bf16.vlgmr.msrb.gmra.mxu3 %v10593_v15  ;;  %v11157_v45 = vpack.c.bf16 %v3932_v26, %v3924_v3  ;;  %v3426_v17 = vpop.f32.mrf.mxu0  ;;  %5596 = vmatpush.bf16.msra.mxu1 %v8592_v42 }
 0x44d   : > { %v3522_v40 = vpop.f32.mrf.mxu2  ;;  %v3427_v11 = vadd.f32 %v3426_v17, %v11150_v27  ;;  %v3475_v12 = vpop.f32.mrf.mxu1  ;;  %v8447_v17 = vld [vmem:[#allocation10 + $0x80] sm:$0xf] }
 0x44e   : > { %12127 = vst [vmem:[#allocation57_spill] sm:$0xff] %v11157_v45  ;;  %v3523_v24 = vadd.f32 %v3522_v40, %v3474_v25 }
 0x44f   : > { %v3571_v7 = vpop.f32.mrf.mxu3  ;;  %v3476_v43 = vadd.f32 %v3475_v12, %v3427_v11  ;;  %v9696_v11 = vld [vmem:[#allocation10 + $0x8c] sm:$0xf0]  ;;  %v8831_v12 = vld [vmem:[#allocation10 + $0x380] sm:$0xf] }
 0x450   : > { %v3572_v15 = vadd.f32 %v3571_v7, %v3523_v24  ;;  %v8703_v24 = vld [vmem:[#allocation10 + $0x280] sm:$0xf]  ;;  %v9760_v7 = vld [vmem:[#allocation10 + $0x28c] sm:$0xf0]  ;;  %v8448_v2 = vor.u32 %v9696_v11, %v8447_v17 }
 0x451   : > { %v8704_v29 = vor.u32 %v9760_v7, %v8703_v24  ;;  %v8687_v11 = vld [vmem:[#allocation10 + $0x260] sm:$0xf] }
 0x452   : > { %v3813_v23 = vmax.f32 %v3572_v15, 0.0  ;;  %5548 = vmatpush.bf16.msra.mxu0 %v8448_v2  ;;  %v8815_v2 = vld [vmem:[#allocation10 + $0x360] sm:$0xf] }
 0x453   : > { %5646 = vmatpush.bf16.msra.mxu2 %v8704_v29 }
 0x454   : > { %v3429_v25 = vpop.f32.mrf.mxu0 }
 0x455   : > { %v3524_v3 = vpop.f32.mrf.mxu2  ;;  %v3430_v31 = vadd.f32 %v3429_v25, %v11150_v27  ;;  %v3478_v47 = vpop.f32.mrf.mxu1 }
 0x456   : > { %v3525_v26 = vadd.f32 %v3524_v3, %v3476_v43  ;;  %v9792_v43 = vld [vmem:[#allocation10 + $0x38c] sm:$0xf0] }
 0x457   : > { %v3573_v32 = vpop.f32.mrf.mxu3  ;;  %v3479_v28 = vadd.f32 %v3478_v47, %v3430_v31  ;;  %3624 = vmatmul.bf16.gmra.mxu0 %v10609_v9  ;;  %v8832_v42 = vor.u32 %v9792_v43, %v8831_v12  ;;  %v9756_v12 = vld [vmem:[#allocation10 + $0x26c] sm:$0xf0]  ;;  %v8431_v43 = vld [vmem:[#allocation10 + $0x60] sm:$0xf] }
 0x458   : > { %v3574_v40 = vadd.f32 %v3573_v32, %v3525_v26  ;;  %3673 = vmatmul.bf16.gmra.mxu1 %v10611_v10  ;;  %v8575_v26 = vld [vmem:[#allocation10 + $0x180] sm:$0xf]  ;;  %v9728_v32 = vld [vmem:[#allocation10 + $0x18c] sm:$0xf0] }
 0x459   : > { %5695 = vmatpush.bf16.msra.mxu3 %v8832_v42  ;;  %v8576_v25 = vor.u32 %v9728_v32, %v8575_v26  ;;  %v9788_v42 = vld [vmem:[#allocation10 + $0x36c] sm:$0xf0]  ;;  %v8559_v32 = vld [vmem:[#allocation10 + $0x160] sm:$0xf] }
 0x45a   : > { %v3821_v18 = vmax.f32 %v3574_v40, 0.0  ;;  %3722 = vmatmul.bf16.gmra.mxu2 %v10613_v13 }
 0x45b   : > { %5597 = vmatpush.bf16.msra.mxu1 %v8576_v25  ;;  %v9724_v25 = vld [vmem:[#allocation10 + $0x16c] sm:$0xf0] }
 0x45c   : > { %3771 = vmatmul.bf16.gmra.mxu3 %v10615_v14  ;;  %v11165_v19 = vpack.c.bf16 %v3821_v18, %v3813_v23  ;;  %v3431_v15 = vpop.f32.mrf.mxu0 }
 0x45d   : > { %v3527_v39 = vpop.f32.mrf.mxu2  ;;  %v3432_v10 = vadd.f32 %v3431_v15, %v11150_v27  ;;  %v3480_v13 = vpop.f32.mrf.mxu1  ;;  %v9692_v15 = vld [vmem:[#allocation10 + $0x6c] sm:$0xf0] }
 0x45e   : > { %12128 = vst [vmem:[#allocation58_spill] sm:$0xff] %v11165_v19  ;;  %v3528_v38 = vadd.f32 %v3527_v39, %v3479_v28 }
 0x45f   : > { %v3576_v9 = vpop.f32.mrf.mxu3  ;;  %v3481_v3 = vadd.f32 %v3480_v13, %v3432_v10 }
 0x460   : > { %v3577_v14 = vadd.f32 %v3576_v9, %v3528_v38  ;;  %v8688_v9 = vor.u32 %v9756_v12, %v8687_v11 }
 0x462   : > { %v3829_v17 = vmax.f32 %v3577_v14, 0.0  ;;  %v8432_v14 = vor.u32 %v9692_v15, %v8431_v43  ;;  %5647 = vmatpush.bf16.msra.mxu2 %v8688_v9  ;;  %v8671_v43 = vld [vmem:[#allocation10 + $0x240] sm:$0xf] }
 0x463   : > { %v8415_v9 = vld [vmem:[#allocation10 + $0x40] sm:$0xf] }
 0x464   : > { %v3434_v28 = vpop.f32.mrf.mxu0  ;;  %5549 = vmatpush.bf16.msra.mxu0 %v8432_v14 }
 0x465   : > { %v3529_v31 = vpop.f32.mrf.mxu2  ;;  %v3435_v23 = vadd.f32 %v3434_v28, %v11150_v27  ;;  %v3483_v18 = vpop.f32.mrf.mxu1 }
 0x466   : > { %v3530_v47 = vadd.f32 %v3529_v31, %v3481_v3  ;;  %v8816_v3 = vor.u32 %v9788_v42, %v8815_v2  ;;  %v8560_v31 = vor.u32 %v9724_v25, %v8559_v32  ;;  %v9688_v42 = vld [vmem:[#allocation10 + $0x4c] sm:$0xf0] }
 0x467   : > { %v3578_v40 = vpop.f32.mrf.mxu3  ;;  %v3484_v7 = vadd.f32 %v3483_v18, %v3435_v23  ;;  %3629 = vmatmul.bf16.gmra.mxu0 %v10629_v60 }
 0x468   : > { %v3579_v24 = vadd.f32 %v3578_v40, %v3530_v47  ;;  %3678 = vmatmul.bf16.gmra.mxu1 %v10631_v61  ;;  %5696 = vmatpush.bf16.msra.mxu3 %v8816_v3  ;;  %v8416_v3 = vor.u32 %v9688_v42, %v8415_v9  ;;  %v8783_v42 = vld [vmem:[#allocation10 + $0x320] sm:$0xf] }
 0x469   : > { %5598 = vmatpush.bf16.msra.mxu1 %v8560_v31 }
 0x46a   : > { %v3837_v39 = vmax.f32 %v3579_v24, 0.0  ;;  %3727 = vmatmul.bf16.gmra.mxu2 %v10633_v62  ;;  %5550 = vmatpush.bf16.msra.mxu0 %v8416_v3 }
 0x46c   : > { %3776 = vmatmul.bf16.gmra.mxu3 %v10635_v63  ;;  %v11173_v29 = vpack.c.bf16 %v3837_v39, %v3829_v17  ;;  %v3436_v13 = vpop.f32.mrf.mxu0 }
 0x46d   : > { %v3532_v38 = vpop.f32.mrf.mxu2  ;;  %v3437_v61 = vadd.f32 %v3436_v13, %v11150_v27  ;;  %v3485_v62 = vpop.f32.mrf.mxu1 }
 0x46e   : > { %12129 = vst [vmem:[#allocation59_spill] sm:$0xff] %v11173_v29  ;;  %v3533_v10 = vadd.f32 %v3532_v38, %v3484_v7  ;;  %v9752_v38 = vld [vmem:[#allocation10 + $0x24c] sm:$0xf0] }
 0x46f   : > { %v3581_v60 = vpop.f32.mrf.mxu3  ;;  %v3486_v26 = vadd.f32 %v3485_v62, %v3437_v61  ;;  %v8672_v2 = vor.u32 %v9752_v38, %v8671_v43  ;;  %v9748_v43 = vld [vmem:[#allocation10 + $0x22c] sm:$0xf0]  ;;  %v8399_v38 = vld [vmem:[#allocation10 + $0x20] sm:$0xf] }
 0x470   : > { %v3582_v63 = vadd.f32 %v3581_v60, %v3533_v10  ;;  %v8799_v10 = vld [vmem:[#allocation10 + $0x340] sm:$0xf]  ;;  %v9784_v60 = vld [vmem:[#allocation10 + $0x34c] sm:$0xf0] }
 0x471   : > { %v8800_v61 = vor.u32 %v9784_v60, %v8799_v10  ;;  %5648 = vmatpush.bf16.msra.mxu2 %v8672_v2  ;;  %v9684_v2 = vld [vmem:[#allocation10 + $0x2c] sm:$0xf0] }
 0x472   : > { %v3845_v39 = vmax.f32 %v3582_v63, 0.0  ;;  %v8543_v63 = vld [vmem:[#allocation10 + $0x140] sm:$0xf]  ;;  %v9780_v10 = vld [vmem:[#allocation10 + $0x32c] sm:$0xf0] }
 0x473   : > { %5697 = vmatpush.bf16.msra.mxu3 %v8800_v61  ;;  %v8527_v61 = vld [vmem:[#allocation10 + $0x120] sm:$0xf] }
 0x474   : > { %v3439_v23 = vpop.f32.mrf.mxu0 }
 0x475   : > { %v3534_v47 = vpop.f32.mrf.mxu2  ;;  %v3440_v18 = vadd.f32 %v3439_v23, %v11150_v27  ;;  %v3488_v24 = vpop.f32.mrf.mxu1 }
 0x476   : > { %v3535_v40 = vadd.f32 %v3534_v47, %v3486_v26  ;;  %v9720_v26 = vld [vmem:[#allocation10 + $0x14c] sm:$0xf0] }
 0x477   : > { %v3583_v28 = vpop.f32.mrf.mxu3  ;;  %v3489_v17 = vadd.f32 %v3488_v24, %v3440_v18  ;;  %3634 = vmatmul.bf16.gmra.mxu0 %v10649_v52  ;;  %v8544_v32 = vor.u32 %v9720_v26, %v8543_v63 }
 0x478   : > { %v3584_v7 = vadd.f32 %v3583_v28, %v3535_v40  ;;  %3683 = vmatmul.bf16.gmra.mxu1 %v10651_v53 }
 0x479   : > { %5599 = vmatpush.bf16.msra.mxu1 %v8544_v32 }
 0x47a   : > { %v3853_v11 = vmax.f32 %v3584_v7, 0.0  ;;  %3732 = vmatmul.bf16.gmra.mxu2 %v10653_v54 }
 0x47c   : > { %3781 = vmatmul.bf16.gmra.mxu3 %v10655_v55  ;;  %v11181_v12 = vpack.c.bf16 %v3853_v11, %v3845_v39  ;;  %v3441_v14 = vpop.f32.mrf.mxu0  ;;  %v8655_v11 = vld [vmem:[#allocation10 + $0x220] sm:$0xf] }
 0x47d   : > { %v3537_v15 = vpop.f32.mrf.mxu2  ;;  %v3442_v53 = vadd.f32 %v3441_v14, %v11150_v27  ;;  %v3490_v54 = vpop.f32.mrf.mxu1  ;;  %v8784_v14 = vor.u32 %v9780_v10, %v8783_v42 }
 0x47e   : > { %12130 = vst [vmem:[#allocation60_spill] sm:$0xff] %v11181_v12  ;;  %v3538_v13 = vadd.f32 %v3537_v15, %v3489_v17  ;;  %v8656_v15 = vor.u32 %v9748_v43, %v8655_v11  ;;  %v9680_v43 = vld [vmem:[#allocation10 + $0xc] sm:$0xf0] }
 0x47f   : > { %v3586_v52 = vpop.f32.mrf.mxu3  ;;  %v3491_v62 = vadd.f32 %v3490_v54, %v3442_v53  ;;  %5698 = vmatpush.bf16.msra.mxu3 %v8784_v14  ;;  %v9716_v53 = vld [vmem:[#allocation10 + $0x12c] sm:$0xf0] }
 0x480   : > { %v3587_v55 = vadd.f32 %v3586_v52, %v3538_v13  ;;  %v8400_v52 = vor.u32 %v9684_v2, %v8399_v38  ;;  %5649 = vmatpush.bf16.msra.mxu2 %v8656_v15  ;;  %v8528_v54 = vor.u32 %v9716_v53, %v8527_v61  ;;  %v8767_v38 = vld [vmem:[#allocation10 + $0x300] sm:$0xf] }
 0x482   : > { %v3861_v7 = vmax.f32 %v3587_v55, 0.0  ;;  %5551 = vmatpush.bf16.msra.mxu0 %v8400_v52  ;;  %5600 = vmatpush.bf16.msra.mxu1 %v8528_v54 }
 0x484   : > { %v3444_v40 = vpop.f32.mrf.mxu0 }
 0x485   : > { %v3539_v25 = vpop.f32.mrf.mxu2  ;;  %v3445_v28 = vadd.f32 %v3444_v40, %v11150_v27  ;;  %v3493_v23 = vpop.f32.mrf.mxu1 }
 0x486   : > { %v3540_v31 = vadd.f32 %v3539_v25, %v3491_v62 }
 0x487   : > { %v3588_v47 = vpop.f32.mrf.mxu3  ;;  %v3494_v24 = vadd.f32 %v3493_v23, %v3445_v28  ;;  %3639 = vmatmul.bf16.gmra.mxu0 %v10669_v48 }
 0x488   : > { %v3589_v18 = vadd.f32 %v3588_v47, %v3540_v31  ;;  %3688 = vmatmul.bf16.gmra.mxu1 %v10671_v49 }
 0x48a   : > { %v3869_v17 = vmax.f32 %v3589_v18, 0.0  ;;  %3737 = vmatmul.bf16.gmra.mxu2 %v10673_v50  ;;  %v8639_v18 = vld [vmem:[#allocation10 + $0x200] sm:$0xf] }
 0x48c   : > { %3786 = vmatmul.bf16.gmra.mxu3 %v10675_v51  ;;  %v11189_v39 = vpack.c.bf16 %v3869_v17, %v3861_v7  ;;  %v3446_v13 = vpop.f32.mrf.mxu0  ;;  %v8383_v7 = vld [vmem:[#allocation10] sm:$0xf] }
 0x48d   : > { %v3542_v9 = vpop.f32.mrf.mxu2  ;;  %v3447_v49 = vadd.f32 %v3446_v13, %v11150_v27  ;;  %v3495_v50 = vpop.f32.mrf.mxu1  ;;  %v8384_v42 = vor.u32 %v9680_v43, %v8383_v7  ;;  %v9712_v13 = vld [vmem:[#allocation10 + $0x10c] sm:$0xf0] }
 0x48e   : > { %12131 = vst [vmem:[#allocation61_spill] sm:$0xff] %v11189_v39  ;;  %v3543_v60 = vadd.f32 %v3542_v9, %v3494_v24  ;;  %v9744_v24 = vld [vmem:[#allocation10 + $0x20c] sm:$0xf0] }
 0x48f   : > { %v3591_v48 = vpop.f32.mrf.mxu3  ;;  %v3496_v3 = vadd.f32 %v3495_v50, %v3447_v49  ;;  %v8640_v11 = vor.u32 %v9744_v24, %v8639_v18  ;;  %v9776_v9 = vld [vmem:[#allocation10 + $0x30c] sm:$0xf0]  ;;  %5552 = vmatpush.bf16.msra.mxu0 %v8384_v42 }
 0x490   : > { %v3592_v51 = vadd.f32 %v3591_v48, %v3543_v60  ;;  %v8768_v10 = vor.u32 %v9776_v9, %v8767_v38  ;;  %v8511_v48 = vld [vmem:[#allocation10 + $0x100] sm:$0xf]  ;;  %v9932_v18 = vld [vmem:[#allocation10 + $0x7ec] sm:$0xf0] }
 0x491   : > { %5650 = vmatpush.bf16.msra.mxu2 %v8640_v11  ;;  %v8512_v52 = vor.u32 %v9712_v13, %v8511_v48  ;;  %v9135_v38 = vld [vmem:[#allocation10 + $0x5e0] sm:$0xf]  ;;  %v9868_v9 = vld [vmem:[#allocation10 + $0x5ec] sm:$0xf0] }
 0x492   : > { %v3877_v40 = vmax.f32 %v3592_v51, 0.0  ;;  %5699 = vmatpush.bf16.msra.mxu3 %v8768_v10 }
 0x493   : > { %5601 = vmatpush.bf16.msra.mxu1 %v8512_v52 }
 0x494   : > { %v3449_v26 = vpop.f32.mrf.mxu0 }
 0x495   : > { %v3544_v55 = vpop.f32.mrf.mxu2  ;;  %v3450_v32 = vadd.f32 %v3449_v26, %v11150_v27  ;;  %v3498_v25 = vpop.f32.mrf.mxu1  ;;  %v9263_v26 = vld [vmem:[#allocation10 + $0x6e0] sm:$0xf] }
 0x496   : > { %v3545_v62 = vadd.f32 %v3544_v55, %v3496_v3 }
 0x497   : > { %v3593_v63 = vpop.f32.mrf.mxu3  ;;  %v3499_v47 = vadd.f32 %v3498_v25, %v3450_v32  ;;  %3644 = vmatmul.bf16.gmra.mxu0 %v10689_v56  ;;  %v9900_v32 = vld [vmem:[#allocation10 + $0x6ec] sm:$0xf0]  ;;  %v9007_v25 = vld [vmem:[#allocation10 + $0x4e0] sm:$0xf] }
 0x498   : > { %v3594_v31 = vadd.f32 %v3593_v63, %v3545_v62  ;;  %3693 = vmatmul.bf16.gmra.mxu1 %v10691_v57 }
 0x49a   : > { %v3885_v28 = vmax.f32 %v3594_v31, 0.0  ;;  %3742 = vmatmul.bf16.gmra.mxu2 %v10693_v58 }
 0x49c   : > { %3791 = vmatmul.bf16.gmra.mxu3 %v10695_v59  ;;  %v11197_v23 = vpack.c.bf16 %v3885_v28, %v3877_v40  ;;  %v3451_v2 = vpop.f32.mrf.mxu0  ;;  %v9836_v40 = vld [vmem:[#allocation10 + $0x4ec] sm:$0xf0]  ;;  %v9391_v28 = vld [vmem:[#allocation10 + $0x7e0] sm:$0xf] }
 0x49d   : > { %v3547_v17 = vpop.f32.mrf.mxu2  ;;  %v3452_v57 = vadd.f32 %v3451_v2, %v11150_v27  ;;  %v3500_v58 = vpop.f32.mrf.mxu1  ;;  %v9392_v11 = vor.u32 %v9932_v18, %v9391_v28 }
 0x49e   : > { %12132 = vst [vmem:[#allocation62_spill] sm:$0xff] %v11197_v23  ;;  %v3548_v15 = vadd.f32 %v3547_v17, %v3499_v47  ;;  %v9264_v47 = vor.u32 %v9900_v32, %v9263_v26  ;;  %v9008_v17 = vor.u32 %v9836_v40, %v9007_v25  ;;  %v11217_v40 = vperm.slane %v11147_v37, 7 }
 0x49f   : > { %v3596_v56 = vpop.f32.mrf.mxu3  ;;  %v3501_v60 = vadd.f32 %v3500_v58, %v3452_v57  ;;  %5888 = vmatpush.bf16.msrb.mxu3 %v9392_v11 }
 0x4a0   : > { %v3597_v59 = vadd.f32 %v3596_v56, %v3548_v15  ;;  %5839 = vmatpush.bf16.msrb.mxu2 %v9264_v47  ;;  %5741 = vmatpush.bf16.msrb.mxu0 %v9008_v17  ;;  %v9136_v15 = vor.u32 %v9868_v9, %v9135_v38  ;;  %v9864_v47 = vld [vmem:[#allocation10 + $0x5cc] sm:$0xf0]  ;;  %v8975_v9 = vld [vmem:[#allocation10 + $0x4a0] sm:$0xf] }
 0x4a1   : > { %v9892_v38 = vld [vmem:[#allocation10 + $0x6ac] sm:$0xf0] }
 0x4a2   : > { %v3893_v55 = vmax.f32 %v3597_v59, 0.0  ;;  %5790 = vmatpush.bf16.msrb.mxu1 %v9136_v15 }
 0x4a4   : > { %v3454_v51 = vpop.f32.mrf.mxu0 }
 0x4a5   : > { %v3549_v14 = vpop.f32.mrf.mxu2  ;;  %v3455_v3 = vadd.f32 %v3454_v51, %v11150_v27  ;;  %v3503_v61 = vpop.f32.mrf.mxu1 }
 0x4a6   : > { %v3550_v49 = vadd.f32 %v3549_v14, %v3501_v60  ;;  %v9247_v14 = vld [vmem:[#allocation10 + $0x6c0] sm:$0xf] }
 0x4a7   : > { %v3598_v50 = vpop.f32.mrf.mxu3  ;;  %v3504_v54 = vadd.f32 %v3503_v61, %v3455_v3  ;;  %3649 = vmatmul.bf16.gmra.mxu0 %v10709_v4  ;;  %v9832_v61 = vld [vmem:[#allocation10 + $0x4cc] sm:$0xf0] }
 0x4a8   : > { %v3599_v53 = vadd.f32 %v3598_v50, %v3550_v49  ;;  %3698 = vmatmul.bf16.gmra.mxu1 %v10711_v5  ;;  %v9896_v49 = vld [vmem:[#allocation10 + $0x6cc] sm:$0xf0]  ;;  %v8991_v50 = vld [vmem:[#allocation10 + $0x4c0] sm:$0xf] }
 0x4a9   : > { %v9248_v3 = vor.u32 %v9896_v49, %v9247_v14  ;;  %v8992_v26 = vor.u32 %v9832_v61, %v8991_v50 }
 0x4aa   : > { %v3901_v62 = vmax.f32 %v3599_v53, 0.0  ;;  %3747 = vmatmul.bf16.gmra.mxu2 %v10713_v6  ;;  %v9375_v53 = vld [vmem:[#allocation10 + $0x7c0] sm:$0xf] }
 0x4ab   : > { %5840 = vmatpush.bf16.msrb.mxu2 %v9248_v3  ;;  %5742 = vmatpush.bf16.msrb.mxu0 %v8992_v26  ;;  %v9860_v3 = vld [vmem:[#allocation10 + $0x5ac] sm:$0xf0] }
 0x4ac   : > { %3796 = vmatmul.bf16.gmra.mxu3 %v10715_v8  ;;  %v11205_v63 = vpack.c.bf16 %v3901_v62, %v3893_v55  ;;  %v3456_v7 = vpop.f32.mrf.mxu0 }
 0x4ad   : > { %v3552_v31 = vpop.f32.mrf.mxu2  ;;  %v3457_v5 = vadd.f32 %v3456_v7, %v11150_v27  ;;  %v3505_v6 = vpop.f32.mrf.mxu1 }
 0x4ae   : > { %12133 = vst [vmem:[#allocation63_spill] sm:$0xff] %v11205_v63  ;;  %v3553_v24 = vadd.f32 %v3552_v31, %v3504_v54  ;;  %v9928_v54 = vld [vmem:[#allocation10 + $0x7cc] sm:$0xf0]  ;;  %v9119_v31 = vld [vmem:[#allocation10 + $0x5c0] sm:$0xf] }
 0x4af   : > { %v3601_v4 = vpop.f32.mrf.mxu3  ;;  %v3506_v43 = vadd.f32 %v3505_v6, %v3457_v5  ;;  %v9376_v32 = vor.u32 %v9928_v54, %v9375_v53  ;;  %v9120_v28 = vor.u32 %v9864_v47, %v9119_v31  ;;  %v9215_v31 = vld [vmem:[#allocation10 + $0x680] sm:$0xf]  ;;  %v9888_v47 = vld [vmem:[#allocation10 + $0x68c] sm:$0xf0] }
 0x4b0   : > { %v3602_v8 = vadd.f32 %v3601_v4, %v3553_v24 }
 0x4b1   : > { %5889 = vmatpush.bf16.msrb.mxu3 %v9376_v32  ;;  %5791 = vmatpush.bf16.msrb.mxu1 %v9120_v28  ;;  %v8959_v28 = vld [vmem:[#allocation10 + $0x480] sm:$0xf] }
 0x4b2   : > { %v3909_v48 = vmax.f32 %v3602_v8, 0.0 }
 0x4b4   : > { %v3459_v10 = vpop.f32.mrf.mxu0 }
 0x4b5   : > { %v3554_v56 = vpop.f32.mrf.mxu2  ;;  %v3460_v57 = vadd.f32 %v3459_v10, %v11150_v27  ;;  %v3508_v58 = vpop.f32.mrf.mxu1  ;;  %v9924_v10 = vld [vmem:[#allocation10 + $0x7ac] sm:$0xf0] }
 0x4b6   : > { %v3555_v2 = vadd.f32 %v3554_v56, %v3506_v43  ;;  %v9231_v43 = vld [vmem:[#allocation10 + $0x6a0] sm:$0xf] }
 0x4b7   : > { %v3603_v42 = vpop.f32.mrf.mxu3  ;;  %v3509_v60 = vadd.f32 %v3508_v58, %v3460_v57  ;;  %3654 = vmatmul.bf16.gmra.mxu0 %v10729_v35  ;;  %v9232_v56 = vor.u32 %v9892_v38, %v9231_v43 }
 0x4b8   : > { %v3604_v59 = vadd.f32 %v3603_v42, %v3555_v2  ;;  %3703 = vmatmul.bf16.gmra.mxu1 %v10731_v20  ;;  %v9828_v2 = vld [vmem:[#allocation10 + $0x4ac] sm:$0xf0]  ;;  %v9359_v42 = vld [vmem:[#allocation10 + $0x7a0] sm:$0xf] }
 0x4b9   : > { %5841 = vmatpush.bf16.msrb.mxu2 %v9232_v56  ;;  %v9087_v56 = vld [vmem:[#allocation10 + $0x580] sm:$0xf] }
 0x4ba   : > { %v3917_v13 = vmax.f32 %v3604_v59, 0.0  ;;  %3752 = vmatmul.bf16.gmra.mxu2 %v10733_v21 }
 0x4bc   : > { %3801 = vmatmul.bf16.gmra.mxu3 %v10735_v22  ;;  %v11213_v52 = vpack.c.bf16 %v3917_v13, %v3909_v48  ;;  %v3461_v62 = vpop.f32.mrf.mxu0  ;;  %v9360_v48 = vor.u32 %v9924_v10, %v9359_v42 }
 0x4bd   : > { %v3557_v51 = vpop.f32.mrf.mxu2  ;;  %v3462_v20 = vadd.f32 %v3461_v62, %v11150_v27  ;;  %v3510_v21 = vpop.f32.mrf.mxu1 }
 0x4be   : > { %12134 = vst [vmem:[#allocation64_spill] sm:$0xff] %v11213_v52  ;;  %v3558_v55 = vadd.f32 %v3557_v51, %v3509_v60  ;;  %v8976_v60 = vor.u32 %v9828_v2, %v8975_v9  ;;  %5890 = vmatpush.bf16.msrb.mxu3 %v9360_v48  ;;  %v9103_v51 = vld [vmem:[#allocation10 + $0x5a0] sm:$0xf]  ;;  %v9856_v2 = vld [vmem:[#allocation10 + $0x58c] sm:$0xf0] }
 0x4bf   : > { %v3606_v35 = vpop.f32.mrf.mxu3  ;;  %v3511_v25 = vadd.f32 %v3510_v21, %v3462_v20  ;;  %v9104_v61 = vor.u32 %v9860_v3, %v9103_v51  ;;  %v9088_v42 = vor.u32 %v9856_v2, %v9087_v56  ;;  %v12138_v3 = vld [vmem:[#allocation24_spill] sm:$0xff] }
 0x4c0   : > { %v3607_v22 = vadd.f32 %v3606_v35, %v3558_v55  ;;  %5743 = vmatpush.bf16.msrb.mxu0 %v8976_v60 }
 0x4c1   : > { %5792 = vmatpush.bf16.msrb.mxu1 %v9104_v61  ;;  %v12139_v61 = vld [vmem:[#allocation30_spill] sm:$0xff] }
 0x4c2   : > { %v3925_v6 = vmax.f32 %v3607_v22, 0.0 }
 0x4c4   : > { %v3620_v7 = vpop.f32.mrf.mxu0 }
 0x4c5   : > { %v3559_v18 = vpop.f32.mrf.mxu2  ;;  %v3621_v17 = vadd.f32 %v3620_v7, %v11217_v40  ;;  %v3669_v27 = vpop.f32.mrf.mxu1  ;;  %v9343_v7 = vld [vmem:[#allocation10 + $0x780] sm:$0xf]  ;;  %5793 = vmatpush.bf16.msrb.mxu1 %v9088_v42 }
 0x4c6   : > { %v3560_v24 = vadd.f32 %v3559_v18, %v3511_v25 }
 0x4c7   : > { %v3608_v4 = vpop.f32.mrf.mxu3  ;;  %v3670_v5 = vadd.f32 %v3669_v27, %v3621_v17  ;;  %5553 = vmatmul.bf16.vlgmr.msra.gmra.mxu0 %v10757_v46  ;;  %v9920_v17 = vld [vmem:[#allocation10 + $0x78c] sm:$0xf0] }
 0x4c8   : > { %v3609_v11 = vadd.f32 %v3608_v4, %v3560_v24  ;;  %5602 = vmatmul.bf16.vlgmr.msra.gmra.mxu1 %v10824_v30  ;;  %v9216_v24 = vor.u32 %v9888_v47, %v9215_v31  ;;  %v9824_v4 = vld [vmem:[#allocation10 + $0x48c] sm:$0xf0] }
 0x4ca   : > { %v3933_v8 = vmax.f32 %v3609_v11, 0.0  ;;  %5651 = vmatmul.bf16.vlgmr.msra.gmra.mxu2 %v10893_v34 }
 0x4cb   : > { %5842 = vmatpush.bf16.msrb.mxu2 %v9216_v24 }
 0x4cc   : > { %5700 = vmatmul.bf16.vlgmr.msra.gmra.mxu3 %v10960_v41  ;;  %v11224_v37 = vpack.c.bf16 %v3933_v8, %v3925_v6  ;;  %v3622_v59 = vpop.f32.mrf.mxu0  ;;  %v8960_v6 = vor.u32 %v9824_v4, %v8959_v28  ;;  %v9344_v8 = vor.u32 %v9920_v17, %v9343_v7 }
 0x4cd   : > { %v3718_v15 = vpop.f32.mrf.mxu2  ;;  %v3623_v13 = vadd.f32 %v3622_v59, %v11217_v40  ;;  %v3671_v14 = vpop.f32.mrf.mxu1 }
 0x4ce   : > { %12135 = vst [vmem:[#allocation65_spill] sm:$0xff] %v11224_v37  ;;  %v3719_v57 = vadd.f32 %v3718_v15, %v3670_v5  ;;  %5744 = vmatpush.bf16.msrb.mxu0 %v8960_v6  ;;  %5891 = vmatpush.bf16.msrb.mxu3 %v9344_v8 }
 0x4cf   : > { %v3767_v58 = vpop.f32.mrf.mxu3  ;;  %v3672_v50 = vadd.f32 %v3671_v14, %v3623_v13 }
 0x4d0   : > { %v3768_v49 = vadd.f32 %v3767_v58, %v3719_v57 }
 0x4d2   : > { %v3814_v21 = vmax.f32 %v3768_v49, 0.0  ;;  %v12137_v49 = vld [vmem:[#allocation18_spill] sm:$0xff] }
 0x4d4   : > { %v3625_v35 = vpop.f32.mrf.mxu0 }
 0x4d5   : > { %v3720_v53 = vpop.f32.mrf.mxu2  ;;  %v3626_v62 = vadd.f32 %v3625_v35, %v11217_v40  ;;  %v3674_v26 = vpop.f32.mrf.mxu1  ;;  %v9884_v35 = vld [vmem:[#allocation10 + $0x66c] sm:$0xf0] }
 0x4d6   : > { %v3721_v54 = vadd.f32 %v3720_v53, %v3672_v50  ;;  %v12140_v53 = vld [vmem:[#allocation36_spill] sm:$0xff] }
 0x4d7   : > { %v3769_v55 = vpop.f32.mrf.mxu3  ;;  %v3675_v20 = vadd.f32 %v3674_v26, %v3626_v62  ;;  %5558 = vmatmul.bf16.gmra.mxu0 %v10765_v0  ;;  %v8943_v62 = vld [vmem:[#allocation10 + $0x460] sm:$0xf] }
 0x4d8   : > { %v3770_v32 = vadd.f32 %v3769_v55, %v3721_v54  ;;  %5607 = vmatmul.bf16.gmra.mxu1 %v10832_v1  ;;  %v9199_v55 = vld [vmem:[#allocation10 + $0x660] sm:$0xf] }
 0x4da   : > { %v3822_v22 = vmax.f32 %v3770_v32, 0.0  ;;  %5656 = vmatmul.bf16.gmra.mxu2 %v10901_v16  ;;  %v9200_v32 = vor.u32 %v9884_v35, %v9199_v55 }
 0x4dc   : > { %5705 = vmatmul.bf16.gmra.mxu3 %v10968_v36  ;;  %v11232_v25 = vpack.c.bf16 %v3822_v22, %v3814_v21  ;;  %v3627_v5 = vpop.f32.mrf.mxu0  ;;  %v9327_v21 = vld [vmem:[#allocation10 + $0x760] sm:$0xf]  ;;  %v9916_v22 = vld [vmem:[#allocation10 + $0x76c] sm:$0xf0]  ;;  %5843 = vmatpush.bf16.msrb.mxu2 %v9200_v32 }
 0x4dd   : > { %v3723_v18 = vpop.f32.mrf.mxu2  ;;  %v3628_v43 = vadd.f32 %v3627_v5, %v11217_v40  ;;  %v3676_v38 = vpop.f32.mrf.mxu1  ;;  %v9328_v24 = vor.u32 %v9916_v22, %v9327_v21  ;;  %v9852_v5 = vld [vmem:[#allocation10 + $0x56c] sm:$0xf0] }
 0x4de   : > { %12136 = vst [vmem:[#allocation66_spill] sm:$0xff] %v11232_v25  ;;  %v3724_v27 = vadd.f32 %v3723_v18, %v3675_v20  ;;  %v9820_v20 = vld [vmem:[#allocation10 + $0x46c] sm:$0xf0] }
 0x4df   : > { %v3772_v11 = vpop.f32.mrf.mxu3  ;;  %v3677_v15 = vadd.f32 %v3676_v38, %v3628_v43  ;;  %v8944_v18 = vor.u32 %v9820_v20, %v8943_v62  ;;  %5892 = vmatpush.bf16.msrb.mxu3 %v9328_v24  ;;  %v9816_v62 = vld [vmem:[#allocation10 + $0x44c] sm:$0xf0] }
 0x4e0   : > { %v3773_v9 = vadd.f32 %v3772_v11, %v3724_v27  ;;  %v9071_v11 = vld [vmem:[#allocation10 + $0x560] sm:$0xf]  ;;  %v9912_v32 = vld [vmem:[#allocation10 + $0x74c] sm:$0xf0] }
 0x4e1   : > { %5745 = vmatpush.bf16.msrb.mxu0 %v8944_v18  ;;  %v9072_v6 = vor.u32 %v9852_v5, %v9071_v11 }
 0x4e2   : > { %v3830_v50 = vmax.f32 %v3773_v9, 0.0 }
 0x4e3   : > { %5794 = vmatpush.bf16.msrb.mxu1 %v9072_v6 }
 0x4e4   : > { %v3630_v59 = vpop.f32.mrf.mxu0 }
 0x4e5   : > { %v3725_v10 = vpop.f32.mrf.mxu2  ;;  %v3631_v60 = vadd.f32 %v3630_v59, %v11217_v40  ;;  %v3679_v48 = vpop.f32.mrf.mxu1  ;;  %v12143_v59 = vld [vmem:[#allocation25_spill] sm:$0xff] }
 0x4e6   : > { %v3726_v57 = vadd.f32 %v3725_v10, %v3677_v15  ;;  %v12142_v10 = vld [vmem:[#allocation19_spill] sm:$0xff] }
 0x4e7   : > { %v3774_v58 = vpop.f32.mrf.mxu3  ;;  %v3680_v14 = vadd.f32 %v3679_v48, %v3631_v60  ;;  %5563 = vmatmul.bf16.gmra.mxu0 %v12137_v49  ;;  %v12144_v60 = vld [vmem:[#allocation31_spill] sm:$0xff]  ;;  %v12145_v48 = vld [vmem:[#allocation37_spill] sm:$0xff] }
 0x4e8   : > { %v3775_v13 = vadd.f32 %v3774_v58, %v3726_v57  ;;  %5612 = vmatmul.bf16.gmra.mxu1 %v12138_v3 }
 0x4ea   : > { %v3838_v51 = vmax.f32 %v3775_v13, 0.0  ;;  %5661 = vmatmul.bf16.gmra.mxu2 %v12139_v61 }
 0x4ec   : > { %5710 = vmatmul.bf16.gmra.mxu3 %v12140_v53  ;;  %v11240_v54 = vpack.c.bf16 %v3838_v51, %v3830_v50  ;;  %v3632_v28 = vpop.f32.mrf.mxu0  ;;  %v9880_v50 = vld [vmem:[#allocation10 + $0x64c] sm:$0xf0]  ;;  %v8927_v51 = vld [vmem:[#allocation10 + $0x440] sm:$0xf] }
 0x4ed   : > { %v3728_v26 = vpop.f32.mrf.mxu2  ;;  %v3633_v4 = vadd.f32 %v3632_v28, %v11217_v40  ;;  %v3681_v7 = vpop.f32.mrf.mxu1 }
 0x4ee   : > { %12141 = vst [vmem:[#allocation18_spill] sm:$0xff] %v11240_v54  ;;  %v3729_v31 = vadd.f32 %v3728_v26, %v3680_v14  ;;  %v9183_v14 = vld [vmem:[#allocation10 + $0x640] sm:$0xf] }
 0x4ef   : > { %v3777_v47 = vpop.f32.mrf.mxu3  ;;  %v3682_v27 = vadd.f32 %v3681_v7, %v3633_v4  ;;  %v9184_v35 = vor.u32 %v9880_v50, %v9183_v14  ;;  %v9311_v26 = vld [vmem:[#allocation10 + $0x740] sm:$0xf] }
 0x4f0   : > { %v3778_v17 = vadd.f32 %v3777_v47, %v3729_v31  ;;  %v8928_v31 = vor.u32 %v9816_v62, %v8927_v51  ;;  %v9312_v47 = vor.u32 %v9912_v32, %v9311_v26  ;;  %v9055_v7 = vld [vmem:[#allocation10 + $0x540] sm:$0xf]  ;;  %v9812_v32 = vld [vmem:[#allocation10 + $0x42c] sm:$0xf0] }
 0x4f1   : > { %5844 = vmatpush.bf16.msrb.mxu2 %v9184_v35  ;;  %v12150_v14 = vld [vmem:[#allocation38_spill] sm:$0xff] }
 0x4f2   : > { %v3846_v57 = vmax.f32 %v3778_v17, 0.0  ;;  %5746 = vmatpush.bf16.msrb.mxu0 %v8928_v31  ;;  %5893 = vmatpush.bf16.msrb.mxu3 %v9312_v47  ;;  %v9848_v17 = vld [vmem:[#allocation10 + $0x54c] sm:$0xf0]  ;;  %v9167_v51 = vld [vmem:[#allocation10 + $0x620] sm:$0xf] }
 0x4f3   : > { %v8911_v35 = vld [vmem:[#allocation10 + $0x420] sm:$0xf] }
 0x4f4   : > { %v3635_v9 = vpop.f32.mrf.mxu0 }
 0x4f5   : > { %v3730_v8 = vpop.f32.mrf.mxu2  ;;  %v3636_v15 = vadd.f32 %v3635_v9, %v11217_v40  ;;  %v3684_v56 = vpop.f32.mrf.mxu1 }
 0x4f6   : > { %v3731_v43 = vadd.f32 %v3730_v8, %v3682_v27  ;;  %v9056_v27 = vor.u32 %v9848_v17, %v9055_v7 }
 0x4f7   : > { %v3779_v38 = vpop.f32.mrf.mxu3  ;;  %v3685_v42 = vadd.f32 %v3684_v56, %v3636_v15  ;;  %5568 = vmatmul.bf16.gmra.mxu0 %v12142_v10  ;;  %v12147_v56 = vld [vmem:[#allocation20_spill] sm:$0xff] }
 0x4f8   : > { %v3780_v2 = vadd.f32 %v3779_v38, %v3731_v43  ;;  %5617 = vmatmul.bf16.gmra.mxu1 %v12143_v59 }
 0x4f9   : > { %5795 = vmatpush.bf16.msrb.mxu1 %v9056_v27  ;;  %v9039_v27 = vld [vmem:[#allocation10 + $0x520] sm:$0xf] }
 0x4fa   : > { %v3854_v58 = vmax.f32 %v3780_v2, 0.0  ;;  %5666 = vmatmul.bf16.gmra.mxu2 %v12144_v60 }
 0x4fc   : > { %5715 = vmatmul.bf16.gmra.mxu3 %v12145_v48  ;;  %v11248_v13 = vpack.c.bf16 %v3854_v58, %v3846_v57  ;;  %v3637_v22 = vpop.f32.mrf.mxu0  ;;  %v12148_v57 = vld [vmem:[#allocation26_spill] sm:$0xff]  ;;  %v12149_v58 = vld [vmem:[#allocation32_spill] sm:$0xff] }
 0x4fd   : > { %v3733_v55 = vpop.f32.mrf.mxu2  ;;  %v3638_v28 = vadd.f32 %v3637_v22, %v11217_v40  ;;  %v3686_v18 = vpop.f32.mrf.mxu1 }
 0x4fe   : > { %12146 = vst [vmem:[#allocation24_spill] sm:$0xff] %v11248_v13  ;;  %v3734_v20 = vadd.f32 %v3733_v55, %v3685_v42  ;;  %v9876_v55 = vld [vmem:[#allocation10 + $0x62c] sm:$0xf0] }
 0x4ff   : > { %v3782_v21 = vpop.f32.mrf.mxu3  ;;  %v3687_v4 = vadd.f32 %v3686_v18, %v3638_v28  ;;  %v9168_v26 = vor.u32 %v9876_v55, %v9167_v51  ;;  %v8912_v28 = vor.u32 %v9812_v32, %v8911_v35  ;;  %v12152_v51 = vld [vmem:[#allocation21_spill] sm:$0xff]  ;;  %v12155_v32 = vld [vmem:[#allocation39_spill] sm:$0xff] }
 0x500   : > { %v3783_v24 = vadd.f32 %v3782_v21, %v3734_v20  ;;  %v9295_v20 = vld [vmem:[#allocation10 + $0x720] sm:$0xf]  ;;  %v9908_v21 = vld [vmem:[#allocation10 + $0x72c] sm:$0xf0] }
 0x501   : > { %v9296_v18 = vor.u32 %v9908_v21, %v9295_v20  ;;  %5845 = vmatpush.bf16.msrb.mxu2 %v9168_v26  ;;  %5747 = vmatpush.bf16.msrb.mxu0 %v8912_v28  ;;  %v12154_v26 = vld [vmem:[#allocation33_spill] sm:$0xff]  ;;  %v9151_v21 = vld [vmem:[#allocation10 + $0x600] sm:$0xf] }
 0x502   : > { %v3862_v2 = vmax.f32 %v3783_v24, 0.0 }
 0x503   : > { %5894 = vmatpush.bf16.msrb.mxu3 %v9296_v18  ;;  %v9808_v18 = vld [vmem:[#allocation10 + $0x40c] sm:$0xf0] }
 0x504   : > { %v3640_v8 = vpop.f32.mrf.mxu0 }
 0x505   : > { %v3735_v11 = vpop.f32.mrf.mxu2  ;;  %v3641_v43 = vadd.f32 %v3640_v8, %v11217_v40  ;;  %v3689_v38 = vpop.f32.mrf.mxu1 }
 0x506   : > { %v3736_v5 = vadd.f32 %v3735_v11, %v3687_v4  ;;  %v9844_v11 = vld [vmem:[#allocation10 + $0x52c] sm:$0xf0] }
 0x507   : > { %v3784_v6 = vpop.f32.mrf.mxu3  ;;  %v3690_v15 = vadd.f32 %v3689_v38, %v3641_v43  ;;  %5573 = vmatmul.bf16.gmra.mxu0 %v12147_v56 }
 0x508   : > { %v3785_v9 = vadd.f32 %v3784_v6, %v3736_v5  ;;  %5622 = vmatmul.bf16.gmra.mxu1 %v12148_v57  ;;  %v9040_v5 = vor.u32 %v9844_v11, %v9039_v27 }
 0x50a   : > { %v3870_v42 = vmax.f32 %v3785_v9, 0.0  ;;  %5671 = vmatmul.bf16.gmra.mxu2 %v12149_v58  ;;  %5796 = vmatpush.bf16.msrb.mxu1 %v9040_v5 }
 0x50c   : > { %5720 = vmatmul.bf16.gmra.mxu3 %v12150_v14  ;;  %v11256_v50 = vpack.c.bf16 %v3870_v42, %v3862_v2  ;;  %v3642_v47 = vpop.f32.mrf.mxu0 }
 0x50d   : > { %v3738_v62 = vpop.f32.mrf.mxu2  ;;  %v3643_v24 = vadd.f32 %v3642_v47, %v11217_v40  ;;  %v3691_v4 = vpop.f32.mrf.mxu1 }
 0x50e   : > { %12151 = vst [vmem:[#allocation30_spill] sm:$0xff] %v11256_v50  ;;  %v3739_v22 = vadd.f32 %v3738_v62, %v3690_v15  ;;  %v12153_v62 = vld [vmem:[#allocation27_spill] sm:$0xff] }
 0x50f   : > { %v3787_v31 = vpop.f32.mrf.mxu3  ;;  %v3692_v17 = vadd.f32 %v3691_v4, %v3643_v24  ;;  %v9279_v24 = vld [vmem:[#allocation10 + $0x700] sm:$0xf]  ;;  %v9904_v4 = vld [vmem:[#allocation10 + $0x70c] sm:$0xf0] }
 0x510   : > { %v3788_v7 = vadd.f32 %v3787_v31, %v3739_v22  ;;  %v9872_v22 = vld [vmem:[#allocation10 + $0x60c] sm:$0xf0]  ;;  %v8895_v31 = vld [vmem:[#allocation10 + $0x400] sm:$0xf]  ;;  %v9280_v5 = vor.u32 %v9904_v4, %v9279_v24 }
 0x511   : > { %v9152_v28 = vor.u32 %v9872_v22, %v9151_v21  ;;  %v8896_v11 = vor.u32 %v9808_v18, %v8895_v31  ;;  %v12157_v24 = vld [vmem:[#allocation22_spill] sm:$0xff] }
 0x512   : > { %v3878_v55 = vmax.f32 %v3788_v7, 0.0  ;;  %5895 = vmatpush.bf16.msrb.mxu3 %v9280_v5  ;;  %v9770_v5 = vld [vmem:[#allocation10 + $0x2e4] sm:$0xf] }
 0x513   : > { %5846 = vmatpush.bf16.msrb.mxu2 %v9152_v28  ;;  %5748 = vmatpush.bf16.msrb.mxu0 %v8896_v11 }
 0x514   : > { %v3645_v38 = vpop.f32.mrf.mxu0 }
 0x515   : > { %v3740_v6 = vpop.f32.mrf.mxu2  ;;  %v3646_v9 = vadd.f32 %v3645_v38, %v11217_v40  ;;  %v3694_v15 = vpop.f32.mrf.mxu1 }
 0x516   : > { %v3741_v8 = vadd.f32 %v3740_v6, %v3692_v17 }
 0x517   : > { %v3789_v43 = vpop.f32.mrf.mxu3  ;;  %v3695_v42 = vadd.f32 %v3694_v15, %v3646_v9  ;;  %5578 = vmatmul.bf16.gmra.mxu0 %v12152_v51  ;;  %v9023_v9 = vld [vmem:[#allocation10 + $0x500] sm:$0xf]  ;;  %v9840_v15 = vld [vmem:[#allocation10 + $0x50c] sm:$0xf0] }
 0x518   : > { %v3790_v2 = vadd.f32 %v3789_v43, %v3741_v8  ;;  %5627 = vmatmul.bf16.gmra.mxu1 %v12153_v62 }
 0x51a   : > { %v3886_v35 = vmax.f32 %v3790_v2, 0.0  ;;  %5676 = vmatmul.bf16.gmra.mxu2 %v12154_v26  ;;  %v9024_v2 = vor.u32 %v9840_v15, %v9023_v9  ;;  %v8497_v15 = vld [vmem:[#allocation10 + $0xf0] sm:$0xf0] }
 0x51c   : > { %5725 = vmatmul.bf16.gmra.mxu3 %v12155_v32  ;;  %v11264_v20 = vpack.c.bf16 %v3886_v35, %v3878_v55  ;;  %v3647_v7 = vpop.f32.mrf.mxu0  ;;  %5797 = vmatpush.bf16.msrb.mxu1 %v9024_v2  ;;  %v9802_v2 = vld [vmem:[#allocation10 + $0x3e4] sm:$0xf] }
 0x51d   : > { %v3743_v47 = vpop.f32.mrf.mxu2  ;;  %v3648_v6 = vadd.f32 %v3647_v7, %v11217_v40  ;;  %v3696_v8 = vpop.f32.mrf.mxu1  ;;  %v12160_v7 = vld [vmem:[#allocation40_spill] sm:$0xff] }
 0x51e   : > { %12156 = vst [vmem:[#allocation36_spill] sm:$0xff] %v11264_v20  ;;  %v3744_v17 = vadd.f32 %v3743_v47, %v3695_v42 }
 0x51f   : > { %v3792_v27 = vpop.f32.mrf.mxu3  ;;  %v3697_v38 = vadd.f32 %v3696_v8, %v3648_v6  ;;  %v8753_v6 = vld [vmem:[#allocation10 + $0x2f0] sm:$0xf0]  ;;  %v9706_v8 = vld [vmem:[#allocation10 + $0xe4] sm:$0xf] }
 0x520   : > { %v3793_v43 = vadd.f32 %v3792_v27, %v3744_v17  ;;  %v12158_v17 = vld [vmem:[#allocation28_spill] sm:$0xff]  ;;  %v12159_v27 = vld [vmem:[#allocation34_spill] sm:$0xff]  ;;  %v8756_v9 = vor.u32 %v9770_v5, %v8753_v6 }
 0x522   : > { %v3894_v28 = vmax.f32 %v3793_v43, 0.0  ;;  %6035 = vmatpush.bf16.msra.mxu2 %v8756_v9 }
 0x524   : > { %v3650_v42 = vpop.f32.mrf.mxu0 }
 0x525   : > { %v3745_v55 = vpop.f32.mrf.mxu2  ;;  %v3651_v22 = vadd.f32 %v3650_v42, %v11217_v40  ;;  %v3699_v31 = vpop.f32.mrf.mxu1  ;;  %v8500_v42 = vor.u32 %v9706_v8, %v8497_v15 }
 0x526   : > { %v3746_v35 = vadd.f32 %v3745_v55, %v3697_v38  ;;  %v8881_v55 = vld [vmem:[#allocation10 + $0x3f0] sm:$0xf0] }
 0x527   : > { %v3794_v21 = vpop.f32.mrf.mxu3  ;;  %v3700_v18 = vadd.f32 %v3699_v31, %v3651_v22  ;;  %5583 = vmatmul.bf16.gmra.mxu0 %v12157_v24  ;;  %v8884_v22 = vor.u32 %v9802_v2, %v8881_v55  ;;  %v12162_v55 = vld [vmem:[#allocation23_spill] sm:$0xff] }
 0x528   : > { %v3795_v47 = vadd.f32 %v3794_v21, %v3746_v35  ;;  %5632 = vmatmul.bf16.gmra.mxu1 %v12158_v17  ;;  %5937 = vmatpush.bf16.msra.mxu0 %v8500_v42  ;;  %v12165_v42 = vld [vmem:[#allocation41_spill] sm:$0xff] }
 0x529   : > { %6084 = vmatpush.bf16.msra.mxu3 %v8884_v22  ;;  %v8737_v22 = vld [vmem:[#allocation10 + $0x2d0] sm:$0xf0] }
 0x52a   : > { %v3902_v4 = vmax.f32 %v3795_v47, 0.0  ;;  %5681 = vmatmul.bf16.gmra.mxu2 %v12159_v27 }
 0x52c   : > { %5730 = vmatmul.bf16.gmra.mxu3 %v12160_v7  ;;  %v11272_v11 = vpack.c.bf16 %v3902_v4, %v3894_v28  ;;  %v3652_v43 = vpop.f32.mrf.mxu0  ;;  %v9738_v28 = vld [vmem:[#allocation10 + $0x1e4] sm:$0xf]  ;;  %v8625_v4 = vld [vmem:[#allocation10 + $0x1f0] sm:$0xf0] }
 0x52d   : > { %v3748_v38 = vpop.f32.mrf.mxu2  ;;  %v3653_v31 = vadd.f32 %v3652_v43, %v11217_v40  ;;  %v3701_v47 = vpop.f32.mrf.mxu1  ;;  %v8628_v17 = vor.u32 %v9738_v28, %v8625_v4  ;;  %v12164_v43 = vld [vmem:[#allocation35_spill] sm:$0xff]  ;;  %v8481_v28 = vld [vmem:[#allocation10 + $0xd0] sm:$0xf0]  ;;  %v9798_v4 = vld [vmem:[#allocation10 + $0x3c4] sm:$0xf] }
 0x52e   : > { %12161 = vst [vmem:[#allocation19_spill] sm:$0xff] %v11272_v11  ;;  %v3749_v35 = vadd.f32 %v3748_v38, %v3700_v18 }
 0x52f   : > { %v3797_v21 = vpop.f32.mrf.mxu3  ;;  %v3702_v27 = vadd.f32 %v3701_v47, %v3653_v31  ;;  %5986 = vmatpush.bf16.msra.mxu1 %v8628_v17  ;;  %v9766_v17 = vld [vmem:[#allocation10 + $0x2c4] sm:$0xf] }
 0x530   : > { %v3798_v7 = vadd.f32 %v3797_v21, %v3749_v35  ;;  %v12163_v21 = vld [vmem:[#allocation29_spill] sm:$0xff]  ;;  %v8740_v47 = vor.u32 %v9766_v17, %v8737_v22  ;;  %v8609_v17 = vld [vmem:[#allocation10 + $0x1d0] sm:$0xf0] }
 0x532   : > { %v3910_v9 = vmax.f32 %v3798_v7, 0.0  ;;  %6036 = vmatpush.bf16.msra.mxu2 %v8740_v47 }
 0x534   : > { %v3655_v18 = vpop.f32.mrf.mxu0 }
 0x535   : > { %v3750_v5 = vpop.f32.mrf.mxu2  ;;  %v3656_v38 = vadd.f32 %v3655_v18, %v11217_v40  ;;  %v3704_v8 = vpop.f32.mrf.mxu1 }
 0x536   : > { %v3751_v6 = vadd.f32 %v3750_v5, %v3702_v27  ;;  %v9702_v27 = vld [vmem:[#allocation10 + $0xc4] sm:$0xf] }
 0x537   : > { %v3799_v24 = vpop.f32.mrf.mxu3  ;;  %v3705_v2 = vadd.f32 %v3704_v8, %v3656_v38  ;;  %5588 = vmatmul.bf16.gmra.mxu0 %v12162_v55 }
 0x538   : > { %v3800_v15 = vadd.f32 %v3799_v24, %v3751_v6  ;;  %5637 = vmatmul.bf16.gmra.mxu1 %v12163_v21  ;;  %v8865_v24 = vld [vmem:[#allocation10 + $0x3d0] sm:$0xf0]  ;;  %v8484_v6 = vor.u32 %v9702_v27, %v8481_v28 }
 0x539   : > { %v8868_v18 = vor.u32 %v9798_v4, %v8865_v24 }
 0x53a   : > { %v3918_v35 = vmax.f32 %v3800_v15, 0.0  ;;  %5686 = vmatmul.bf16.gmra.mxu2 %v12164_v43  ;;  %5938 = vmatpush.bf16.msra.mxu0 %v8484_v6 }
 0x53b   : > { %6085 = vmatpush.bf16.msra.mxu3 %v8868_v18  ;;  %v12167_v18 = vld [vmem:[#allocation42_spill] sm:$0xff] }
 0x53c   : > { %5735 = vmatmul.bf16.gmra.mxu3 %v12165_v42  ;;  %v11280_v31 = vpack.c.bf16 %v3918_v35, %v3910_v9  ;;  %v3657_v8 = vpop.f32.mrf.mxu0  ;;  %v4255_v9 = vld [vmem:[%s11983_s5] sm:$0xf]  ;;  %v9734_v35 = vld [vmem:[#allocation10 + $0x1c4] sm:$0xf] }
 0x53d   : > { %v3753_v5 = vpop.f32.mrf.mxu2  ;;  %v3658_v15 = vadd.f32 %v3657_v8, %v11217_v40  ;;  %v3706_v43 = vpop.f32.mrf.mxu1  ;;  %v8612_v21 = vor.u32 %v9734_v35, %v8609_v17  ;;  %v11286_v27 = vperm.slane %v4255_v9, 0  ;;  %v9698_v8 = vld [vmem:[#allocation10 + $0xa4] sm:$0xf]  ;;  %v8465_v35 = vld [vmem:[#allocation10 + $0xb0] sm:$0xf0] }
 0x53e   : > { %12166 = vst [vmem:[#allocation25_spill] sm:$0xff] %v11280_v31  ;;  %v3754_v7 = vadd.f32 %v3753_v5, %v3705_v2  ;;  %v9794_v17 = vld [vmem:[#allocation10 + $0x3a4] sm:$0xf] }
 0x53f   : > { %v3802_v38 = vpop.f32.mrf.mxu3  ;;  %v3707_v22 = vadd.f32 %v3706_v43, %v3658_v15  ;;  %5987 = vmatpush.bf16.msra.mxu1 %v8612_v21  ;;  %v9762_v21 = vld [vmem:[#allocation10 + $0x2a4] sm:$0xf]  ;;  %v8721_v43 = vld [vmem:[#allocation10 + $0x2b0] sm:$0xf0] }
 0x540   : > { %v3803_v42 = vadd.f32 %v3802_v38, %v3754_v7  ;;  %v8724_v9 = vor.u32 %v9762_v21, %v8721_v43 }
 0x542   : > { %v3926_v7 = vmax.f32 %v3803_v42, 0.0  ;;  %6037 = vmatpush.bf16.msra.mxu2 %v8724_v9 }
 0x544   : > { %v5554_v4 = vpop.f32.mrf.mxu0 }
 0x545   : > { %v3755_v2 = vpop.f32.mrf.mxu2  ;;  %v5555_v40 = vadd.f32 %v5554_v4, %v11286_v27  ;;  %v5603_v24 = vpop.f32.mrf.mxu1 }
 0x546   : > { %v3756_v28 = vadd.f32 %v3755_v2, %v3707_v22  ;;  %v8849_v22 = vld [vmem:[#allocation10 + $0x3b0] sm:$0xf0] }
 0x547   : > { %v3804_v47 = vpop.f32.mrf.mxu3  ;;  %v5604_v6 = vadd.f32 %v5603_v24, %v5555_v40  ;;  %5749 = vmatmul.bf16.vlgmr.msrb.gmra.mxu0 %v12167_v18 }
 0x548   : > { %v3805_v5 = vadd.f32 %v3804_v47, %v3756_v28  ;;  %5798 = vmatmul.bf16.vlgmr.msrb.gmra.mxu1 %v11096_v33  ;;  %v8468_v28 = vor.u32 %v9698_v8, %v8465_v35  ;;  %v8852_v47 = vor.u32 %v9794_v17, %v8849_v22 }
 0x54a   : > { %v3934_v38 = vmax.f32 %v3805_v5, 0.0  ;;  %5847 = vmatmul.bf16.vlgmr.msrb.gmra.mxu2 %v11165_v19  ;;  %5939 = vmatpush.bf16.msra.mxu0 %v8468_v28  ;;  %v12170_v28 = vld [vmem:[#allocation51_spill] sm:$0xff] }
 0x54b   : > { %6086 = vmatpush.bf16.msra.mxu3 %v8852_v47  ;;  %v9758_v47 = vld [vmem:[#allocation10 + $0x284] sm:$0xf] }
 0x54c   : > { %5896 = vmatmul.bf16.vlgmr.msrb.gmra.mxu3 %v11232_v25  ;;  %v11293_v15 = vpack.c.bf16 %v3934_v38, %v3926_v7  ;;  %v5556_v40 = vpop.f32.mrf.mxu0  ;;  %v9730_v7 = vld [vmem:[#allocation10 + $0x1a4] sm:$0xf]  ;;  %v8593_v38 = vld [vmem:[#allocation10 + $0x1b0] sm:$0xf0] }
 0x54d   : > { %v5652_v2 = vpop.f32.mrf.mxu2  ;;  %v5557_v24 = vadd.f32 %v5556_v40, %v11286_v27  ;;  %v5605_v5 = vpop.f32.mrf.mxu1  ;;  %v8596_v43 = vor.u32 %v9730_v7, %v8593_v38  ;;  %v8449_v40 = vld [vmem:[#allocation10 + $0x90] sm:$0xf0] }
 0x54e   : > { %12168 = vst [vmem:[#allocation31_spill] sm:$0xff] %v11293_v15  ;;  %v5653_v42 = vadd.f32 %v5652_v2, %v5604_v6  ;;  %v12169_v2 = vld [vmem:[#allocation43_spill] sm:$0xff] }
 0x54f   : > { %v5701_v4 = vpop.f32.mrf.mxu3  ;;  %v5606_v21 = vadd.f32 %v5605_v5, %v5557_v24  ;;  %5988 = vmatpush.bf16.msra.mxu1 %v8596_v43  ;;  %v9790_v24 = vld [vmem:[#allocation10 + $0x384] sm:$0xf]  ;;  %v8833_v5 = vld [vmem:[#allocation10 + $0x390] sm:$0xf0] }
 0x550   : > { %v11296_v25 = vadd.f32 %v5701_v4, %v5653_v42  ;;  %v8705_v42 = vld [vmem:[#allocation10 + $0x290] sm:$0xf0]  ;;  %v9694_v4 = vld [vmem:[#allocation10 + $0x84] sm:$0xf] }
 0x551   : > { %v8452_v38 = vor.u32 %v9694_v4, %v8449_v40 }
 0x553   : > { %5940 = vmatpush.bf16.msra.mxu0 %v8452_v38  ;;  %v12172_v38 = vld [vmem:[#allocation52_spill] sm:$0xff] }
 0x554   : > { %v5559_v35 = vpop.f32.mrf.mxu0 }
 0x555   : > { %v5654_v19 = vpop.f32.mrf.mxu2  ;;  %v5560_v6 = vadd.f32 %v5559_v35, %v11286_v27  ;;  %v5608_v17 = vpop.f32.mrf.mxu1 }
 0x556   : > { %v5655_v33 = vadd.f32 %v5654_v19, %v5606_v21  ;;  %v8708_v19 = vor.u32 %v9758_v47, %v8705_v42 }
 0x557   : > { %v5703_v8 = vpop.f32.mrf.mxu3  ;;  %v5609_v22 = vadd.f32 %v5608_v17, %v5560_v6  ;;  %5754 = vmatmul.bf16.gmra.mxu0 %v12169_v2 }
 0x558   : > { %v11299_v9 = vadd.f32 %v5703_v8, %v5655_v33  ;;  %5803 = vmatmul.bf16.gmra.mxu1 %v12170_v28  ;;  %v8836_v33 = vor.u32 %v9790_v24, %v8833_v5  ;;  %6038 = vmatpush.bf16.msra.mxu2 %v8708_v19 }
 0x55a   : > { %5852 = vmatmul.bf16.gmra.mxu2 %v11173_v29  ;;  %6087 = vmatpush.bf16.msra.mxu3 %v8836_v33  ;;  %v8577_v29 = vld [vmem:[#allocation10 + $0x190] sm:$0xf0]  ;;  %v9690_v33 = vld [vmem:[#allocation10 + $0x64] sm:$0xf] }
 0x55c   : > { %5901 = vmatmul.bf16.gmra.mxu3 %v11240_v54  ;;  %v5561_v8 = vpop.f32.mrf.mxu0  ;;  %v9726_v54 = vld [vmem:[#allocation10 + $0x184] sm:$0xf] }
 0x55d   : > { %v5657_v7 = vpop.f32.mrf.mxu2  ;;  %v5562_v35 = vadd.f32 %v5561_v8, %v11286_v27  ;;  %v5610_v6 = vpop.f32.mrf.mxu1  ;;  %v8580_v42 = vor.u32 %v9726_v54, %v8577_v29  ;;  %v9754_v29 = vld [vmem:[#allocation10 + $0x264] sm:$0xf]  ;;  %v8689_v54 = vld [vmem:[#allocation10 + $0x270] sm:$0xf0] }
 0x55e   : > { %v5658_v21 = vadd.f32 %v5657_v7, %v5609_v22  ;;  %v12171_v7 = vld [vmem:[#allocation44_spill] sm:$0xff] }
 0x55f   : > { %v5706_v43 = vpop.f32.mrf.mxu3  ;;  %v5611_v47 = vadd.f32 %v5610_v6, %v5562_v35  ;;  %5989 = vmatpush.bf16.msra.mxu1 %v8580_v42  ;;  %v8817_v8 = vld [vmem:[#allocation10 + $0x370] sm:$0xf0] }
 0x560   : > { %v11306_v17 = vadd.f32 %v5706_v43, %v5658_v21  ;;  %v8433_v21 = vld [vmem:[#allocation10 + $0x70] sm:$0xf0]  ;;  %v9786_v43 = vld [vmem:[#allocation10 + $0x364] sm:$0xf] }
 0x561   : > { %v8436_v6 = vor.u32 %v9690_v33, %v8433_v21 }
 0x563   : > { %5941 = vmatpush.bf16.msra.mxu0 %v8436_v6  ;;  %v12174_v6 = vld [vmem:[#allocation53_spill] sm:$0xff] }
 0x564   : > { %v5564_v40 = vpop.f32.mrf.mxu0 }
 0x565   : > { %v5659_v28 = vpop.f32.mrf.mxu2  ;;  %v5565_v22 = vadd.f32 %v5564_v40, %v11286_v27  ;;  %v5613_v24 = vpop.f32.mrf.mxu1 }
 0x566   : > { %v5660_v2 = vadd.f32 %v5659_v28, %v5611_v47  ;;  %v8692_v28 = vor.u32 %v9754_v29, %v8689_v54 }
 0x567   : > { %v5708_v4 = vpop.f32.mrf.mxu3  ;;  %v5614_v5 = vadd.f32 %v5613_v24, %v5565_v22  ;;  %5759 = vmatmul.bf16.gmra.mxu0 %v12171_v7 }
 0x568   : > { %v11309_v19 = vadd.f32 %v5708_v4, %v5660_v2  ;;  %5808 = vmatmul.bf16.gmra.mxu1 %v12172_v38  ;;  %v8820_v2 = vor.u32 %v9786_v43, %v8817_v8  ;;  %6039 = vmatpush.bf16.msra.mxu2 %v8692_v28 }
 0x56a   : > { %5857 = vmatmul.bf16.gmra.mxu2 %v11181_v12  ;;  %6088 = vmatpush.bf16.msra.mxu3 %v8820_v2  ;;  %v8561_v12 = vld [vmem:[#allocation10 + $0x170] sm:$0xf0]  ;;  %v9686_v2 = vld [vmem:[#allocation10 + $0x44] sm:$0xf] }
 0x56c   : > { %5906 = vmatmul.bf16.gmra.mxu3 %v11248_v13  ;;  %v5566_v4 = vpop.f32.mrf.mxu0  ;;  %v9722_v13 = vld [vmem:[#allocation10 + $0x164] sm:$0xf] }
 0x56d   : > { %v5662_v35 = vpop.f32.mrf.mxu2  ;;  %v5567_v40 = vadd.f32 %v5566_v4, %v11286_v27  ;;  %v5615_v22 = vpop.f32.mrf.mxu1  ;;  %v8564_v54 = vor.u32 %v9722_v13, %v8561_v12  ;;  %v9750_v12 = vld [vmem:[#allocation10 + $0x244] sm:$0xf]  ;;  %v8673_v13 = vld [vmem:[#allocation10 + $0x250] sm:$0xf0] }
 0x56e   : > { %v5663_v47 = vadd.f32 %v5662_v35, %v5614_v5  ;;  %v12173_v35 = vld [vmem:[#allocation45_spill] sm:$0xff]  ;;  %v8801_v4 = vld [vmem:[#allocation10 + $0x350] sm:$0xf0] }
 0x56f   : > { %v5711_v42 = vpop.f32.mrf.mxu3  ;;  %v5616_v29 = vadd.f32 %v5615_v22, %v5567_v40  ;;  %5990 = vmatpush.bf16.msra.mxu1 %v8564_v54 }
 0x570   : > { %v11316_v24 = vadd.f32 %v5711_v42, %v5663_v47  ;;  %v8417_v47 = vld [vmem:[#allocation10 + $0x50] sm:$0xf0]  ;;  %v9782_v42 = vld [vmem:[#allocation10 + $0x344] sm:$0xf] }
 0x571   : > { %v8420_v22 = vor.u32 %v9686_v2, %v8417_v47 }
 0x573   : > { %5942 = vmatpush.bf16.msra.mxu0 %v8420_v22  ;;  %v12176_v22 = vld [vmem:[#allocation54_spill] sm:$0xff] }
 0x574   : > { %v5569_v21 = vpop.f32.mrf.mxu0 }
 0x575   : > { %v5664_v38 = vpop.f32.mrf.mxu2  ;;  %v5570_v5 = vadd.f32 %v5569_v21, %v11286_v27  ;;  %v5618_v43 = vpop.f32.mrf.mxu1 }
 0x576   : > { %v5665_v7 = vadd.f32 %v5664_v38, %v5616_v29  ;;  %v8676_v38 = vor.u32 %v9750_v12, %v8673_v13 }
 0x577   : > { %v5713_v33 = vpop.f32.mrf.mxu3  ;;  %v5619_v8 = vadd.f32 %v5618_v43, %v5570_v5  ;;  %5764 = vmatmul.bf16.gmra.mxu0 %v12173_v35 }
 0x578   : > { %v11319_v28 = vadd.f32 %v5713_v33, %v5665_v7  ;;  %5813 = vmatmul.bf16.gmra.mxu1 %v12174_v6  ;;  %v8804_v7 = vor.u32 %v9782_v42, %v8801_v4  ;;  %6040 = vmatpush.bf16.msra.mxu2 %v8676_v38 }
 0x57a   : > { %5862 = vmatmul.bf16.gmra.mxu2 %v11189_v39  ;;  %6089 = vmatpush.bf16.msra.mxu3 %v8804_v7  ;;  %v8545_v39 = vld [vmem:[#allocation10 + $0x150] sm:$0xf0]  ;;  %v9682_v7 = vld [vmem:[#allocation10 + $0x24] sm:$0xf] }
 0x57c   : > { %5911 = vmatmul.bf16.gmra.mxu3 %v11256_v50  ;;  %v5571_v33 = vpop.f32.mrf.mxu0  ;;  %v9718_v50 = vld [vmem:[#allocation10 + $0x144] sm:$0xf] }
 0x57d   : > { %v5667_v40 = vpop.f32.mrf.mxu2  ;;  %v5572_v21 = vadd.f32 %v5571_v33, %v11286_v27  ;;  %v5620_v5 = vpop.f32.mrf.mxu1  ;;  %v8548_v13 = vor.u32 %v9718_v50, %v8545_v39  ;;  %v9746_v39 = vld [vmem:[#allocation10 + $0x224] sm:$0xf]  ;;  %v8657_v50 = vld [vmem:[#allocation10 + $0x230] sm:$0xf0] }
 0x57e   : > { %v5668_v29 = vadd.f32 %v5667_v40, %v5619_v8  ;;  %v12175_v40 = vld [vmem:[#allocation46_spill] sm:$0xff]  ;;  %v8785_v33 = vld [vmem:[#allocation10 + $0x330] sm:$0xf0] }
 0x57f   : > { %v5716_v54 = vpop.f32.mrf.mxu3  ;;  %v5621_v12 = vadd.f32 %v5620_v5, %v5572_v21  ;;  %5991 = vmatpush.bf16.msra.mxu1 %v8548_v13 }
 0x580   : > { %v11326_v43 = vadd.f32 %v5716_v54, %v5668_v29  ;;  %v8401_v29 = vld [vmem:[#allocation10 + $0x30] sm:$0xf0]  ;;  %v9778_v54 = vld [vmem:[#allocation10 + $0x324] sm:$0xf] }
 0x581   : > { %v8404_v5 = vor.u32 %v9682_v7, %v8401_v29 }
 0x583   : > { %5943 = vmatpush.bf16.msra.mxu0 %v8404_v5  ;;  %v12178_v5 = vld [vmem:[#allocation55_spill] sm:$0xff] }
 0x584   : > { %v5574_v47 = vpop.f32.mrf.mxu0 }
 0x585   : > { %v5669_v6 = vpop.f32.mrf.mxu2  ;;  %v5575_v8 = vadd.f32 %v5574_v47, %v11286_v27  ;;  %v5623_v42 = vpop.f32.mrf.mxu1 }
 0x586   : > { %v5670_v35 = vadd.f32 %v5669_v6, %v5621_v12  ;;  %v8660_v6 = vor.u32 %v9746_v39, %v8657_v50 }
 0x587   : > { %v5718_v2 = vpop.f32.mrf.mxu3  ;;  %v5624_v4 = vadd.f32 %v5623_v42, %v5575_v8  ;;  %5769 = vmatmul.bf16.gmra.mxu0 %v12175_v40 }
 0x588   : > { %v11329_v38 = vadd.f32 %v5718_v2, %v5670_v35  ;;  %5818 = vmatmul.bf16.gmra.mxu1 %v12176_v22  ;;  %v8788_v35 = vor.u32 %v9778_v54, %v8785_v33  ;;  %6041 = vmatpush.bf16.msra.mxu2 %v8660_v6 }
 0x58a   : > { %5867 = vmatmul.bf16.gmra.mxu2 %v11197_v23  ;;  %6090 = vmatpush.bf16.msra.mxu3 %v8788_v35  ;;  %v8529_v23 = vld [vmem:[#allocation10 + $0x130] sm:$0xf0]  ;;  %v9678_v35 = vld [vmem:[#allocation10 + $0x4] sm:$0xf] }
 0x58c   : > { %5916 = vmatmul.bf16.gmra.mxu3 %v11264_v20  ;;  %v5576_v2 = vpop.f32.mrf.mxu0  ;;  %v9714_v20 = vld [vmem:[#allocation10 + $0x124] sm:$0xf] }
 0x58d   : > { %v5672_v21 = vpop.f32.mrf.mxu2  ;;  %v5577_v47 = vadd.f32 %v5576_v2, %v11286_v27  ;;  %v5625_v8 = vpop.f32.mrf.mxu1  ;;  %v8532_v50 = vor.u32 %v9714_v20, %v8529_v23  ;;  %v9742_v23 = vld [vmem:[#allocation10 + $0x204] sm:$0xf]  ;;  %v8641_v20 = vld [vmem:[#allocation10 + $0x210] sm:$0xf0] }
 0x58e   : > { %v5673_v12 = vadd.f32 %v5672_v21, %v5624_v4  ;;  %v12177_v21 = vld [vmem:[#allocation47_spill] sm:$0xff]  ;;  %v8769_v2 = vld [vmem:[#allocation10 + $0x310] sm:$0xf0] }
 0x58f   : > { %v5721_v13 = vpop.f32.mrf.mxu3  ;;  %v5626_v39 = vadd.f32 %v5625_v8, %v5577_v47  ;;  %5992 = vmatpush.bf16.msra.mxu1 %v8532_v50 }
 0x590   : > { %v11336_v42 = vadd.f32 %v5721_v13, %v5673_v12  ;;  %v8385_v12 = vld [vmem:[#allocation10 + $0x10] sm:$0xf0]  ;;  %v9774_v13 = vld [vmem:[#allocation10 + $0x304] sm:$0xf] }
 0x591   : > { %v8388_v8 = vor.u32 %v9678_v35, %v8385_v12 }
 0x593   : > { %5944 = vmatpush.bf16.msra.mxu0 %v8388_v8  ;;  %v9834_v8 = vld [vmem:[#allocation10 + $0x4e4] sm:$0xf] }
 0x594   : > { %v5579_v29 = vpop.f32.mrf.mxu0 }
 0x595   : > { %v5674_v22 = vpop.f32.mrf.mxu2  ;;  %v5580_v4 = vadd.f32 %v5579_v29, %v11286_v27  ;;  %v5628_v54 = vpop.f32.mrf.mxu1 }
 0x596   : > { %v5675_v40 = vadd.f32 %v5674_v22, %v5626_v39  ;;  %v8644_v22 = vor.u32 %v9742_v23, %v8641_v20 }
 0x597   : > { %v5723_v7 = vpop.f32.mrf.mxu3  ;;  %v5629_v33 = vadd.f32 %v5628_v54, %v5580_v4  ;;  %5774 = vmatmul.bf16.gmra.mxu0 %v12177_v21 }
 0x598   : > { %v11339_v6 = vadd.f32 %v5723_v7, %v5675_v40  ;;  %5823 = vmatmul.bf16.gmra.mxu1 %v12178_v5  ;;  %v8772_v40 = vor.u32 %v9774_v13, %v8769_v2  ;;  %6042 = vmatpush.bf16.msra.mxu2 %v8644_v22 }
 0x59a   : > { %5872 = vmatmul.bf16.gmra.mxu2 %v11205_v63  ;;  %6091 = vmatpush.bf16.msra.mxu3 %v8772_v40  ;;  %v8513_v63 = vld [vmem:[#allocation10 + $0x110] sm:$0xf0] }
 0x59b   : > { %v9009_v40 = vld [vmem:[#allocation10 + $0x4f0] sm:$0xf0] }
 0x59c   : > { %5921 = vmatmul.bf16.gmra.mxu3 %v11272_v11  ;;  %v5581_v7 = vpop.f32.mrf.mxu0  ;;  %v9710_v11 = vld [vmem:[#allocation10 + $0x104] sm:$0xf] }
 0x59d   : > { %v5677_v47 = vpop.f32.mrf.mxu2  ;;  %v5582_v29 = vadd.f32 %v5581_v7, %v11286_v27  ;;  %v5630_v4 = vpop.f32.mrf.mxu1  ;;  %v8516_v20 = vor.u32 %v9710_v11, %v8513_v63  ;;  %v9898_v63 = vld [vmem:[#allocation10 + $0x6e4] sm:$0xf]  ;;  %v9265_v11 = vld [vmem:[#allocation10 + $0x6f0] sm:$0xf0] }
 0x59e   : > { %v5678_v39 = vadd.f32 %v5677_v47, %v5629_v33  ;;  %v12179_v47 = vld [vmem:[#allocation48_spill] sm:$0xff] }
 0x59f   : > { %v5726_v50 = vpop.f32.mrf.mxu3  ;;  %v5631_v23 = vadd.f32 %v5630_v4, %v5582_v29  ;;  %5993 = vmatpush.bf16.msra.mxu1 %v8516_v20  ;;  %v9012_v29 = vor.u32 %v9834_v8, %v9009_v40 }
 0x5a0   : > { %v11346_v54 = vadd.f32 %v5726_v50, %v5678_v39  ;;  %v9930_v39 = vld [vmem:[#allocation10 + $0x7e4] sm:$0xf]  ;;  %v9393_v50 = vld [vmem:[#allocation10 + $0x7f0] sm:$0xf0] }
 0x5a1   : > { %6133 = vmatpush.bf16.msrb.mxu0 %v9012_v29  ;;  %v9249_v29 = vld [vmem:[#allocation10 + $0x6d0] sm:$0xf0] }
 0x5a4   : > { %v5584_v12 = vpop.f32.mrf.mxu0 }
 0x5a5   : > { %v5679_v5 = vpop.f32.mrf.mxu2  ;;  %v5585_v33 = vadd.f32 %v5584_v12, %v11286_v27  ;;  %v5633_v13 = vpop.f32.mrf.mxu1 }
 0x5a6   : > { %v5680_v21 = vadd.f32 %v5679_v5, %v5631_v23  ;;  %v9268_v5 = vor.u32 %v9898_v63, %v9265_v11 }
 0x5a7   : > { %v5728_v35 = vpop.f32.mrf.mxu3  ;;  %v5634_v2 = vadd.f32 %v5633_v13, %v5585_v33  ;;  %5779 = vmatmul.bf16.gmra.mxu0 %v12179_v47  ;;  %v9866_v13 = vld [vmem:[#allocation10 + $0x5e4] sm:$0xf] }
 0x5a8   : > { %v11349_v22 = vadd.f32 %v5728_v35, %v5680_v21  ;;  %5828 = vmatmul.bf16.gmra.mxu1 %v11144_v44  ;;  %v9396_v21 = vor.u32 %v9930_v39, %v9393_v50  ;;  %6231 = vmatpush.bf16.msrb.mxu2 %v9268_v5 }
 0x5aa   : > { %5877 = vmatmul.bf16.gmra.mxu2 %v11213_v52  ;;  %6280 = vmatpush.bf16.msrb.mxu3 %v9396_v21  ;;  %v9830_v21 = vld [vmem:[#allocation10 + $0x4c4] sm:$0xf] }
 0x5ac   : > { %5926 = vmatmul.bf16.gmra.mxu3 %v11280_v31  ;;  %v5586_v20 = vpop.f32.mrf.mxu0  ;;  %v9137_v31 = vld [vmem:[#allocation10 + $0x5f0] sm:$0xf0] }
 0x5ad   : > { %v5682_v7 = vpop.f32.mrf.mxu2  ;;  %v5587_v35 = vadd.f32 %v5586_v20, %v11286_v27  ;;  %v5635_v12 = vpop.f32.mrf.mxu1  ;;  %v9140_v11 = vor.u32 %v9866_v13, %v9137_v31  ;;  %v9894_v31 = vld [vmem:[#allocation10 + $0x6c4] sm:$0xf]  ;;  %v9377_v20 = vld [vmem:[#allocation10 + $0x7d0] sm:$0xf0] }
 0x5ae   : > { %v5683_v4 = vadd.f32 %v5682_v7, %v5634_v2  ;;  %v12180_v7 = vld [vmem:[#allocation49_spill] sm:$0xff] }
 0x5af   : > { %v5731_v23 = vpop.f32.mrf.mxu3  ;;  %v5636_v63 = vadd.f32 %v5635_v12, %v5587_v35  ;;  %6182 = vmatpush.bf16.msrb.mxu1 %v9140_v11 }
 0x5b0   : > { %v11356_v33 = vadd.f32 %v5731_v23, %v5683_v4  ;;  %v8993_v4 = vld [vmem:[#allocation10 + $0x4d0] sm:$0xf0]  ;;  %v9926_v23 = vld [vmem:[#allocation10 + $0x7c4] sm:$0xf] }
 0x5b1   : > { %v8996_v12 = vor.u32 %v9830_v21, %v8993_v4 }
 0x5b3   : > { %6134 = vmatpush.bf16.msrb.mxu0 %v8996_v12  ;;  %v8977_v12 = vld [vmem:[#allocation10 + $0x4b0] sm:$0xf0] }
 0x5b4   : > { %v5589_v40 = vpop.f32.mrf.mxu0 }
 0x5b5   : > { %v5684_v52 = vpop.f32.mrf.mxu2  ;;  %v5590_v2 = vadd.f32 %v5589_v40, %v11286_v27  ;;  %v5638_v39 = vpop.f32.mrf.mxu1 }
 0x5b6   : > { %v5685_v44 = vadd.f32 %v5684_v52, %v5636_v63  ;;  %v9252_v52 = vor.u32 %v9894_v31, %v9249_v29 }
 0x5b7   : > { %v5733_v8 = vpop.f32.mrf.mxu3  ;;  %v5639_v50 = vadd.f32 %v5638_v39, %v5590_v2  ;;  %5784 = vmatmul.bf16.gmra.mxu0 %v12180_v7  ;;  %v9862_v39 = vld [vmem:[#allocation10 + $0x5c4] sm:$0xf] }
 0x5b8   : > { %v11359_v5 = vadd.f32 %v5733_v8, %v5685_v44  ;;  %5833 = vmatmul.bf16.gmra.mxu1 %v11157_v45  ;;  %v9380_v44 = vor.u32 %v9926_v23, %v9377_v20  ;;  %6232 = vmatpush.bf16.msrb.mxu2 %v9252_v52  ;;  %v9233_v20 = vld [vmem:[#allocation10 + $0x6b0] sm:$0xf0] }
 0x5ba   : > { %5882 = vmatmul.bf16.gmra.mxu2 %v11224_v37  ;;  %6281 = vmatpush.bf16.msrb.mxu3 %v9380_v44  ;;  %v9922_v44 = vld [vmem:[#allocation10 + $0x7a4] sm:$0xf] }
 0x5bc   : > { %5931 = vmatmul.bf16.gmra.mxu3 %v11293_v15  ;;  %v5591_v11 = vpop.f32.mrf.mxu0  ;;  %v9121_v15 = vld [vmem:[#allocation10 + $0x5d0] sm:$0xf0] }
 0x5bd   : > { %v5687_v35 = vpop.f32.mrf.mxu2  ;;  %v5592_v8 = vadd.f32 %v5591_v11, %v11286_v27  ;;  %v5640_v40 = vpop.f32.mrf.mxu1  ;;  %v9124_v29 = vor.u32 %v9862_v39, %v9121_v15  ;;  %v9890_v15 = vld [vmem:[#allocation10 + $0x6a4] sm:$0xf] }
 0x5be   : > { %v5688_v13 = vadd.f32 %v5687_v35, %v5639_v50  ;;  %v9826_v35 = vld [vmem:[#allocation10 + $0x4a4] sm:$0xf] }
 0x5bf   : > { %v5736_v63 = vpop.f32.mrf.mxu3  ;;  %v5641_v31 = vadd.f32 %v5640_v40, %v5592_v8  ;;  %6183 = vmatpush.bf16.msrb.mxu1 %v9124_v29 }
 0x5c0   : > { %v11366_v2 = vadd.f32 %v5736_v63, %v5688_v13  ;;  %v9361_v13 = vld [vmem:[#allocation10 + $0x7b0] sm:$0xf0]  ;;  %v8980_v63 = vor.u32 %v9826_v35, %v8977_v12 }
 0x5c2   : > { %6135 = vmatpush.bf16.msrb.mxu0 %v8980_v63  ;;  %v9822_v63 = vld [vmem:[#allocation10 + $0x484] sm:$0xf] }
 0x5c4   : > { %v5750_v4 = vpop.f32.mrf.mxu0 }
 0x5c5   : > { %v5689_v37 = vpop.f32.mrf.mxu2  ;;  %v5751_v50 = vadd.f32 %v5750_v4, %v11296_v25  ;;  %v5799_v23 = vpop.f32.mrf.mxu1  ;;  %v9105_v4 = vld [vmem:[#allocation10 + $0x5b0] sm:$0xf0] }
 0x5c6   : > { %v5690_v45 = vadd.f32 %v5689_v37, %v5641_v31  ;;  %v9236_v37 = vor.u32 %v9890_v15, %v9233_v20 }
 0x5c7   : > { %v5738_v21 = vpop.f32.mrf.mxu3  ;;  %v5800_v27 = vadd.f32 %v5799_v23, %v5751_v50  ;;  %5945 = vmatmul.bf16.vlgmr.msra.gmra.mxu0 %v10757_v46 }
 0x5c8   : > { %v11369_v52 = vadd.f32 %v5738_v21, %v5690_v45  ;;  %5994 = vmatmul.bf16.vlgmr.msra.gmra.mxu1 %v10824_v30  ;;  %v9364_v45 = vor.u32 %v9922_v44, %v9361_v13  ;;  %6233 = vmatpush.bf16.msrb.mxu2 %v9236_v37  ;;  %v9858_v21 = vld [vmem:[#allocation10 + $0x5a4] sm:$0xf] }
 0x5c9   : > { %v9108_v23 = vor.u32 %v9858_v21, %v9105_v4  ;;  %v9886_v13 = vld [vmem:[#allocation10 + $0x684] sm:$0xf] }
 0x5ca   : > { %6043 = vmatmul.bf16.vlgmr.msra.gmra.mxu2 %v10893_v34  ;;  %6282 = vmatpush.bf16.msrb.mxu3 %v9364_v45 }
 0x5cb   : > { %6184 = vmatpush.bf16.msrb.mxu1 %v9108_v23 }
 0x5cc   : > { %6092 = vmatmul.bf16.vlgmr.msra.gmra.mxu3 %v10960_v41  ;;  %v5752_v40 = vpop.f32.mrf.mxu0 }
 0x5cd   : > { %v5848_v25 = vpop.f32.mrf.mxu2  ;;  %v5753_v39 = vadd.f32 %v5752_v40, %v11299_v9  ;;  %v5801_v31 = vpop.f32.mrf.mxu1  ;;  %v9345_v40 = vld [vmem:[#allocation10 + $0x790] sm:$0xf0] }
 0x5ce   : > { %v5849_v11 = vadd.f32 %v5848_v25, %v5800_v27  ;;  %v9217_v25 = vld [vmem:[#allocation10 + $0x690] sm:$0xf0] }
 0x5cf   : > { %v5897_v8 = vpop.f32.mrf.mxu3  ;;  %v5802_v50 = vadd.f32 %v5801_v31, %v5753_v39  ;;  %v9220_v45 = vor.u32 %v9886_v13, %v9217_v25 }
 0x5d0   : > { %v11376_v29 = vadd.f32 %v5897_v8, %v5849_v11  ;;  %v8961_v11 = vld [vmem:[#allocation10 + $0x490] sm:$0xf0]  ;;  %v9918_v8 = vld [vmem:[#allocation10 + $0x784] sm:$0xf] }
 0x5d1   : > { %v8964_v39 = vor.u32 %v9822_v63, %v8961_v11  ;;  %v9348_v31 = vor.u32 %v9918_v8, %v9345_v40  ;;  %6234 = vmatpush.bf16.msrb.mxu2 %v9220_v45  ;;  %v9882_v40 = vld [vmem:[#allocation10 + $0x664] sm:$0xf] }
 0x5d3   : > { %6136 = vmatpush.bf16.msrb.mxu0 %v8964_v39  ;;  %6283 = vmatpush.bf16.msrb.mxu3 %v9348_v31  ;;  %v9818_v39 = vld [vmem:[#allocation10 + $0x464] sm:$0xf] }
 0x5d4   : > { %v5755_v12 = vpop.f32.mrf.mxu0 }
 0x5d5   : > { %v5850_v15 = vpop.f32.mrf.mxu2  ;;  %v5756_v27 = vadd.f32 %v5755_v12, %v11306_v17  ;;  %v5804_v44 = vpop.f32.mrf.mxu1  ;;  %v9089_v12 = vld [vmem:[#allocation10 + $0x590] sm:$0xf0] }
 0x5d6   : > { %v5851_v20 = vadd.f32 %v5850_v15, %v5802_v50 }
 0x5d7   : > { %v5899_v35 = vpop.f32.mrf.mxu3  ;;  %v5805_v9 = vadd.f32 %v5804_v44, %v5756_v27  ;;  %5950 = vmatmul.bf16.gmra.mxu0 %v10765_v0 }
 0x5d8   : > { %v11379_v37 = vadd.f32 %v5899_v35, %v5851_v20  ;;  %5999 = vmatmul.bf16.gmra.mxu1 %v10832_v1  ;;  %v9854_v35 = vld [vmem:[#allocation10 + $0x584] sm:$0xf] }
 0x5d9   : > { %v9092_v44 = vor.u32 %v9854_v35, %v9089_v12 }
 0x5da   : > { %6048 = vmatmul.bf16.gmra.mxu2 %v10901_v16 }
 0x5db   : > { %6185 = vmatpush.bf16.msrb.mxu1 %v9092_v44 }
 0x5dc   : > { %6097 = vmatmul.bf16.gmra.mxu3 %v10968_v36  ;;  %v5757_v50 = vpop.f32.mrf.mxu0 }
 0x5dd   : > { %v5853_v17 = vpop.f32.mrf.mxu2  ;;  %v5758_v23 = vadd.f32 %v5757_v50, %v11309_v19  ;;  %v5806_v15 = vpop.f32.mrf.mxu1  ;;  %v9329_v50 = vld [vmem:[#allocation10 + $0x770] sm:$0xf0] }
 0x5de   : > { %v5854_v21 = vadd.f32 %v5853_v17, %v5805_v9  ;;  %v9201_v17 = vld [vmem:[#allocation10 + $0x670] sm:$0xf0] }
 0x5df   : > { %v5902_v4 = vpop.f32.mrf.mxu3  ;;  %v5807_v27 = vadd.f32 %v5806_v15, %v5758_v23  ;;  %v9204_v31 = vor.u32 %v9882_v40, %v9201_v17 }
 0x5e0   : > { %v11386_v20 = vadd.f32 %v5902_v4, %v5854_v21  ;;  %v8945_v21 = vld [vmem:[#allocation10 + $0x470] sm:$0xf0]  ;;  %v9914_v4 = vld [vmem:[#allocation10 + $0x764] sm:$0xf] }
 0x5e1   : > { %v8948_v23 = vor.u32 %v9818_v39, %v8945_v21  ;;  %v9332_v15 = vor.u32 %v9914_v4, %v9329_v50  ;;  %6235 = vmatpush.bf16.msrb.mxu2 %v9204_v31  ;;  %v9878_v50 = vld [vmem:[#allocation10 + $0x644] sm:$0xf] }
 0x5e3   : > { %6137 = vmatpush.bf16.msrb.mxu0 %v8948_v23  ;;  %6284 = vmatpush.bf16.msrb.mxu3 %v9332_v15  ;;  %v9814_v23 = vld [vmem:[#allocation10 + $0x444] sm:$0xf] }
 0x5e4   : > { %v5760_v11 = vpop.f32.mrf.mxu0 }
 0x5e5   : > { %v5855_v13 = vpop.f32.mrf.mxu2  ;;  %v5761_v9 = vadd.f32 %v5760_v11, %v11316_v24  ;;  %v5809_v8 = vpop.f32.mrf.mxu1  ;;  %v9073_v11 = vld [vmem:[#allocation10 + $0x570] sm:$0xf0] }
 0x5e6   : > { %v5856_v25 = vadd.f32 %v5855_v13, %v5807_v27 }
 0x5e7   : > { %v5904_v63 = vpop.f32.mrf.mxu3  ;;  %v5810_v19 = vadd.f32 %v5809_v8, %v5761_v9  ;;  %5955 = vmatmul.bf16.gmra.mxu0 %v12137_v49 }
 0x5e8   : > { %v11389_v45 = vadd.f32 %v5904_v63, %v5856_v25  ;;  %6004 = vmatmul.bf16.gmra.mxu1 %v12138_v3  ;;  %v9850_v63 = vld [vmem:[#allocation10 + $0x564] sm:$0xf] }
 0x5e9   : > { %v9076_v8 = vor.u32 %v9850_v63, %v9073_v11 }
 0x5ea   : > { %6053 = vmatmul.bf16.gmra.mxu2 %v12139_v61 }
 0x5eb   : > { %6186 = vmatpush.bf16.msrb.mxu1 %v9076_v8 }
 0x5ec   : > { %6102 = vmatmul.bf16.gmra.mxu3 %v12140_v53  ;;  %v5762_v27 = vpop.f32.mrf.mxu0 }
 0x5ed   : > { %v5858_v24 = vpop.f32.mrf.mxu2  ;;  %v5763_v44 = vadd.f32 %v5762_v27, %v11319_v28  ;;  %v5811_v13 = vpop.f32.mrf.mxu1  ;;  %v9313_v27 = vld [vmem:[#allocation10 + $0x750] sm:$0xf0] }
 0x5ee   : > { %v5859_v35 = vadd.f32 %v5858_v24, %v5810_v19  ;;  %v9185_v24 = vld [vmem:[#allocation10 + $0x650] sm:$0xf0] }
 0x5ef   : > { %v5907_v12 = vpop.f32.mrf.mxu3  ;;  %v5812_v9 = vadd.f32 %v5811_v13, %v5763_v44  ;;  %v9188_v15 = vor.u32 %v9878_v50, %v9185_v24 }
 0x5f0   : > { %v11396_v25 = vadd.f32 %v5907_v12, %v5859_v35  ;;  %v8929_v35 = vld [vmem:[#allocation10 + $0x450] sm:$0xf0]  ;;  %v9910_v12 = vld [vmem:[#allocation10 + $0x744] sm:$0xf] }
 0x5f1   : > { %v8932_v44 = vor.u32 %v9814_v23, %v8929_v35  ;;  %v9316_v13 = vor.u32 %v9910_v12, %v9313_v27  ;;  %6236 = vmatpush.bf16.msrb.mxu2 %v9188_v15  ;;  %v9874_v27 = vld [vmem:[#allocation10 + $0x624] sm:$0xf] }
 0x5f3   : > { %6138 = vmatpush.bf16.msrb.mxu0 %v8932_v44  ;;  %6285 = vmatpush.bf16.msrb.mxu3 %v9316_v13  ;;  %v9810_v44 = vld [vmem:[#allocation10 + $0x424] sm:$0xf] }
 0x5f4   : > { %v5765_v21 = vpop.f32.mrf.mxu0 }
 0x5f5   : > { %v5860_v40 = vpop.f32.mrf.mxu2  ;;  %v5766_v19 = vadd.f32 %v5765_v21, %v11326_v43  ;;  %v5814_v4 = vpop.f32.mrf.mxu1  ;;  %v9057_v21 = vld [vmem:[#allocation10 + $0x550] sm:$0xf0] }
 0x5f6   : > { %v5861_v17 = vadd.f32 %v5860_v40, %v5812_v9 }
 0x5f7   : > { %v5909_v39 = vpop.f32.mrf.mxu3  ;;  %v5815_v28 = vadd.f32 %v5814_v4, %v5766_v19  ;;  %5960 = vmatmul.bf16.gmra.mxu0 %v12142_v10 }
 0x5f8   : > { %v11399_v31 = vadd.f32 %v5909_v39, %v5861_v17  ;;  %6009 = vmatmul.bf16.gmra.mxu1 %v12143_v59  ;;  %v9846_v39 = vld [vmem:[#allocation10 + $0x544] sm:$0xf] }
 0x5f9   : > { %v9060_v4 = vor.u32 %v9846_v39, %v9057_v21 }
 0x5fa   : > { %6058 = vmatmul.bf16.gmra.mxu2 %v12144_v60 }
 0x5fb   : > { %6187 = vmatpush.bf16.msrb.mxu1 %v9060_v4 }
 0x5fc   : > { %6107 = vmatmul.bf16.gmra.mxu3 %v12145_v48  ;;  %v5767_v9 = vpop.f32.mrf.mxu0 }
 0x5fd   : > { %v5863_v43 = vpop.f32.mrf.mxu2  ;;  %v5768_v8 = vadd.f32 %v5767_v9, %v11329_v38  ;;  %v5816_v40 = vpop.f32.mrf.mxu1  ;;  %v9297_v9 = vld [vmem:[#allocation10 + $0x730] sm:$0xf0] }
 0x5fe   : > { %v5864_v63 = vadd.f32 %v5863_v43, %v5815_v28  ;;  %v9169_v43 = vld [vmem:[#allocation10 + $0x630] sm:$0xf0] }
 0x5ff   : > { %v5912_v11 = vpop.f32.mrf.mxu3  ;;  %v5817_v19 = vadd.f32 %v5816_v40, %v5768_v8  ;;  %v9172_v13 = vor.u32 %v9874_v27, %v9169_v43 }
 0x600   : > { %v11406_v17 = vadd.f32 %v5912_v11, %v5864_v63  ;;  %v8913_v63 = vld [vmem:[#allocation10 + $0x430] sm:$0xf0]  ;;  %v9906_v11 = vld [vmem:[#allocation10 + $0x724] sm:$0xf] }
 0x601   : > { %v8916_v8 = vor.u32 %v9810_v44, %v8913_v63  ;;  %v9300_v40 = vor.u32 %v9906_v11, %v9297_v9  ;;  %6237 = vmatpush.bf16.msrb.mxu2 %v9172_v13  ;;  %v9870_v9 = vld [vmem:[#allocation10 + $0x604] sm:$0xf] }
 0x603   : > { %6139 = vmatpush.bf16.msrb.mxu0 %v8916_v8  ;;  %6286 = vmatpush.bf16.msrb.mxu3 %v9300_v40  ;;  %v9806_v8 = vld [vmem:[#allocation10 + $0x404] sm:$0xf] }
 0x604   : > { %v5770_v35 = vpop.f32.mrf.mxu0 }
 0x605   : > { %v5865_v50 = vpop.f32.mrf.mxu2  ;;  %v5771_v28 = vadd.f32 %v5770_v35, %v11336_v42  ;;  %v5819_v12 = vpop.f32.mrf.mxu1  ;;  %v9041_v35 = vld [vmem:[#allocation10 + $0x530] sm:$0xf0] }
 0x606   : > { %v5866_v24 = vadd.f32 %v5865_v50, %v5817_v19 }
 0x607   : > { %v5914_v23 = vpop.f32.mrf.mxu3  ;;  %v5820_v38 = vadd.f32 %v5819_v12, %v5771_v28  ;;  %5965 = vmatmul.bf16.gmra.mxu0 %v12147_v56 }
 0x608   : > { %v11409_v15 = vadd.f32 %v5914_v23, %v5866_v24  ;;  %6014 = vmatmul.bf16.gmra.mxu1 %v12148_v57  ;;  %v9842_v23 = vld [vmem:[#allocation10 + $0x524] sm:$0xf] }
 0x609   : > { %v9044_v12 = vor.u32 %v9842_v23, %v9041_v35 }
 0x60a   : > { %6063 = vmatmul.bf16.gmra.mxu2 %v12149_v58 }
 0x60b   : > { %6188 = vmatpush.bf16.msrb.mxu1 %v9044_v12 }
 0x60c   : > { %6112 = vmatmul.bf16.gmra.mxu3 %v12150_v14  ;;  %v5772_v19 = vpop.f32.mrf.mxu0 }
 0x60d   : > { %v5868_v42 = vpop.f32.mrf.mxu2  ;;  %v5773_v4 = vadd.f32 %v5772_v19, %v11339_v6  ;;  %v5821_v50 = vpop.f32.mrf.mxu1  ;;  %v9281_v19 = vld [vmem:[#allocation10 + $0x710] sm:$0xf0] }
 0x60e   : > { %v5869_v39 = vadd.f32 %v5868_v42, %v5820_v38  ;;  %v9153_v42 = vld [vmem:[#allocation10 + $0x610] sm:$0xf0] }
 0x60f   : > { %v5917_v21 = vpop.f32.mrf.mxu3  ;;  %v5822_v28 = vadd.f32 %v5821_v50, %v5773_v4  ;;  %v9156_v40 = vor.u32 %v9870_v9, %v9153_v42 }
 0x610   : > { %v11416_v24 = vadd.f32 %v5917_v21, %v5869_v39  ;;  %v8897_v39 = vld [vmem:[#allocation10 + $0x410] sm:$0xf0]  ;;  %v9902_v21 = vld [vmem:[#allocation10 + $0x704] sm:$0xf] }
 0x611   : > { %v8900_v4 = vor.u32 %v9806_v8, %v8897_v39  ;;  %v9284_v50 = vor.u32 %v9902_v21, %v9281_v19  ;;  %6238 = vmatpush.bf16.msrb.mxu2 %v9156_v40  ;;  %v12184_v19 = vld [vmem:[#allocation22_spill] sm:$0xff] }
 0x613   : > { %6140 = vmatpush.bf16.msrb.mxu0 %v8900_v4  ;;  %6287 = vmatpush.bf16.msrb.mxu3 %v9284_v50  ;;  %v12186_v4 = vld [vmem:[#allocation34_spill] sm:$0xff]  ;;  %v12187_v50 = vld [vmem:[#allocation40_spill] sm:$0xff] }
 0x614   : > { %v5775_v63 = vpop.f32.mrf.mxu0 }
 0x615   : > { %v5870_v27 = vpop.f32.mrf.mxu2  ;;  %v5776_v38 = vadd.f32 %v5775_v63, %v11346_v54  ;;  %v5824_v11 = vpop.f32.mrf.mxu1  ;;  %v9025_v63 = vld [vmem:[#allocation10 + $0x510] sm:$0xf0] }
 0x616   : > { %v5871_v43 = vadd.f32 %v5870_v27, %v5822_v28 }
 0x617   : > { %v5919_v44 = vpop.f32.mrf.mxu3  ;;  %v5825_v6 = vadd.f32 %v5824_v11, %v5776_v38  ;;  %5970 = vmatmul.bf16.gmra.mxu0 %v12152_v51 }
 0x618   : > { %v11419_v13 = vadd.f32 %v5919_v44, %v5871_v43  ;;  %6019 = vmatmul.bf16.gmra.mxu1 %v12153_v62  ;;  %v9838_v44 = vld [vmem:[#allocation10 + $0x504] sm:$0xf] }
 0x619   : > { %v9028_v11 = vor.u32 %v9838_v44, %v9025_v63  ;;  %v8887_v44 = vld [vmem:[#allocation10 + $0x3e8] sm:$0xf]  ;;  %v9805_v63 = vld [vmem:[#allocation10 + $0x3f4] sm:$0xf0] }
 0x61a   : > { %12181 = vst [vmem:[#allocation37_spill] sm:$0xff] %v11419_v13  ;;  %6068 = vmatmul.bf16.gmra.mxu2 %v12154_v26 }
 0x61b   : > { %6189 = vmatpush.bf16.msrb.mxu1 %v9028_v11  ;;  %v8888_v11 = vor.u32 %v9805_v63, %v8887_v44  ;;  %v12190_v63 = vld [vmem:[#allocation29_spill] sm:$0xff] }
 0x61c   : > { %6117 = vmatmul.bf16.gmra.mxu3 %v12155_v32  ;;  %v5777_v28 = vpop.f32.mrf.mxu0 }
 0x61d   : > { %v5873_v54 = vpop.f32.mrf.mxu2  ;;  %v5778_v12 = vadd.f32 %v5777_v28, %v11349_v22  ;;  %v5826_v27 = vpop.f32.mrf.mxu1  ;;  %v8503_v28 = vld [vmem:[#allocation10 + $0xe8] sm:$0xf]  ;;  %6476 = vmatpush.bf16.msra.mxu3 %v8888_v11 }
 0x61e   : > { %v5874_v23 = vadd.f32 %v5873_v54, %v5825_v6  ;;  %v12185_v54 = vld [vmem:[#allocation28_spill] sm:$0xff]  ;;  %v8487_v11 = vld [vmem:[#allocation10 + $0xc8] sm:$0xf] }
 0x61f   : > { %v5922_v35 = vpop.f32.mrf.mxu3  ;;  %v5827_v38 = vadd.f32 %v5826_v27, %v5778_v12  ;;  %v9709_v27 = vld [vmem:[#allocation10 + $0xf4] sm:$0xf0] }
 0x620   : > { %v11426_v43 = vadd.f32 %v5922_v35, %v5874_v23  ;;  %v8759_v23 = vld [vmem:[#allocation10 + $0x2e8] sm:$0xf]  ;;  %v9773_v35 = vld [vmem:[#allocation10 + $0x2f4] sm:$0xf0] }
 0x621   : > { %v8760_v12 = vor.u32 %v9773_v35, %v8759_v23 }
 0x622   : > { %12182 = vst [vmem:[#allocation20_spill] sm:$0xff] %v11426_v43 }
 0x623   : > { %6427 = vmatpush.bf16.msra.mxu2 %v8760_v12 }
 0x624   : > { %v5780_v39 = vpop.f32.mrf.mxu0 }
 0x625   : > { %v5875_v9 = vpop.f32.mrf.mxu2  ;;  %v5781_v6 = vadd.f32 %v5780_v39, %v11356_v33  ;;  %v5829_v21 = vpop.f32.mrf.mxu1 }
 0x626   : > { %v5876_v42 = vadd.f32 %v5875_v9, %v5827_v38  ;;  %v8504_v38 = vor.u32 %v9709_v27, %v8503_v28 }
 0x627   : > { %v5924_v8 = vpop.f32.mrf.mxu3  ;;  %v5830_v22 = vadd.f32 %v5829_v21, %v5781_v6  ;;  %5975 = vmatmul.bf16.gmra.mxu0 %v12184_v19 }
 0x628   : > { %v11429_v40 = vadd.f32 %v5924_v8, %v5876_v42  ;;  %6024 = vmatmul.bf16.gmra.mxu1 %v12185_v54  ;;  %6329 = vmatpush.bf16.msra.mxu0 %v8504_v38  ;;  %v12192_v38 = vld [vmem:[#allocation41_spill] sm:$0xff] }
 0x62a   : > { %12183 = vst [vmem:[#allocation26_spill] sm:$0xff] %v11429_v40  ;;  %6073 = vmatmul.bf16.gmra.mxu2 %v12186_v4  ;;  %v9741_v4 = vld [vmem:[#allocation10 + $0x1f4] sm:$0xf0] }
 0x62c   : > { %6122 = vmatmul.bf16.gmra.mxu3 %v12187_v50  ;;  %v5782_v8 = vpop.f32.mrf.mxu0  ;;  %v8631_v50 = vld [vmem:[#allocation10 + $0x1e8] sm:$0xf] }
 0x62d   : > { %v5878_v33 = vpop.f32.mrf.mxu2  ;;  %v5783_v39 = vadd.f32 %v5782_v8, %v11359_v5  ;;  %v5831_v6 = vpop.f32.mrf.mxu1  ;;  %v8632_v35 = vor.u32 %v9741_v4, %v8631_v50  ;;  %v8743_v4 = vld [vmem:[#allocation10 + $0x2c8] sm:$0xf]  ;;  %v9769_v50 = vld [vmem:[#allocation10 + $0x2d4] sm:$0xf0] }
 0x62e   : > { %v5879_v9 = vadd.f32 %v5878_v33, %v5830_v22  ;;  %v12191_v33 = vld [vmem:[#allocation35_spill] sm:$0xff]  ;;  %v9801_v8 = vld [vmem:[#allocation10 + $0x3d4] sm:$0xf0] }
 0x62f   : > { %v5927_v42 = vpop.f32.mrf.mxu3  ;;  %v5832_v23 = vadd.f32 %v5831_v6, %v5783_v39  ;;  %6378 = vmatpush.bf16.msra.mxu1 %v8632_v35 }
 0x630   : > { %v11436_v21 = vadd.f32 %v5927_v42, %v5879_v9  ;;  %v9705_v9 = vld [vmem:[#allocation10 + $0xd4] sm:$0xf0]  ;;  %v8871_v42 = vld [vmem:[#allocation10 + $0x3c8] sm:$0xf] }
 0x631   : > { %v8488_v39 = vor.u32 %v9705_v9, %v8487_v11  ;;  %v10021_v11 = vld [vmem:[%s11983_s5] sm:$0xf] }
 0x632   : > { %12188 = vst [vmem:[#allocation32_spill] sm:$0xff] %v11436_v21  ;;  %v11451_v9 = vperm.slane %v10021_v11, 1  ;;  %v9797_v11 = vld [vmem:[#allocation10 + $0x3b4] sm:$0xf0] }
 0x633   : > { %6330 = vmatpush.bf16.msra.mxu0 %v8488_v39 }
 0x634   : > { %v5785_v27 = vpop.f32.mrf.mxu0 }
 0x635   : > { %v5880_v54 = vpop.f32.mrf.mxu2  ;;  %v5786_v22 = vadd.f32 %v5785_v27, %v11366_v2  ;;  %v5834_v44 = vpop.f32.mrf.mxu1 }
 0x636   : > { %v5881_v40 = vadd.f32 %v5880_v54, %v5832_v23  ;;  %v8744_v54 = vor.u32 %v9769_v50, %v8743_v4 }
 0x637   : > { %v5929_v28 = vpop.f32.mrf.mxu3  ;;  %v5835_v5 = vadd.f32 %v5834_v44, %v5786_v22  ;;  %5980 = vmatmul.bf16.gmra.mxu0 %v12162_v55  ;;  %v8615_v44 = vld [vmem:[#allocation10 + $0x1c8] sm:$0xf] }
 0x638   : > { %v11439_v12 = vadd.f32 %v5929_v28, %v5881_v40  ;;  %6029 = vmatmul.bf16.gmra.mxu1 %v12190_v63  ;;  %v8872_v40 = vor.u32 %v9801_v8, %v8871_v42  ;;  %6428 = vmatpush.bf16.msra.mxu2 %v8744_v54 }
 0x63a   : > { %12189 = vst [vmem:[#allocation38_spill] sm:$0xff] %v11439_v12  ;;  %6078 = vmatmul.bf16.gmra.mxu2 %v12191_v33  ;;  %6477 = vmatpush.bf16.msra.mxu3 %v8872_v40 }
 0x63c   : > { %6127 = vmatmul.bf16.gmra.mxu3 %v12192_v38  ;;  %v5787_v35 = vpop.f32.mrf.mxu0  ;;  %v9737_v38 = vld [vmem:[#allocation10 + $0x1d4] sm:$0xf0] }
 0x63d   : > { %v5883_v2 = vpop.f32.mrf.mxu2  ;;  %v5788_v28 = vadd.f32 %v5787_v35, %v11369_v52  ;;  %v5836_v27 = vpop.f32.mrf.mxu1  ;;  %v8616_v50 = vor.u32 %v9737_v38, %v8615_v44  ;;  %v12195_v38 = vld [vmem:[#allocation50_spill] sm:$0xff]  ;;  %v8727_v35 = vld [vmem:[#allocation10 + $0x2a8] sm:$0xf] }
 0x63e   : > { %v5884_v6 = vadd.f32 %v5883_v2, %v5835_v5 }
 0x63f   : > { %v5932_v23 = vpop.f32.mrf.mxu3  ;;  %v5837_v4 = vadd.f32 %v5836_v27, %v5788_v28  ;;  %6379 = vmatpush.bf16.msra.mxu1 %v8616_v50  ;;  %v9765_v28 = vld [vmem:[#allocation10 + $0x2b4] sm:$0xf0]  ;;  %v8471_v27 = vld [vmem:[#allocation10 + $0xa8] sm:$0xf] }
 0x640   : > { %v11446_v22 = vadd.f32 %v5932_v23, %v5884_v6  ;;  %v12196_v6 = vld [vmem:[#allocation58_spill] sm:$0xff]  ;;  %v8728_v44 = vor.u32 %v9765_v28, %v8727_v35  ;;  %v8855_v50 = vld [vmem:[#allocation10 + $0x3a8] sm:$0xf] }
 0x641   : > { %v12197_v23 = vld [vmem:[#allocation66_spill] sm:$0xff] }
 0x642   : > { %12193 = vst [vmem:[#allocation67_spill] sm:$0xff] %v11446_v22  ;;  %6429 = vmatpush.bf16.msra.mxu2 %v8728_v44 }
 0x644   : > { %v5946_v52 = vpop.f32.mrf.mxu0 }
 0x645   : > { %v5885_v5 = vpop.f32.mrf.mxu2  ;;  %v5947_v8 = vadd.f32 %v5946_v52, %v11451_v9  ;;  %v5995_v2 = vpop.f32.mrf.mxu1 }
 0x646   : > { %v5886_v54 = vadd.f32 %v5885_v5, %v5837_v4  ;;  %v9701_v4 = vld [vmem:[#allocation10 + $0xb4] sm:$0xf0] }
 0x647   : > { %v5934_v42 = vpop.f32.mrf.mxu3  ;;  %v5996_v40 = vadd.f32 %v5995_v2, %v5947_v8  ;;  %6141 = vmatmul.bf16.vlgmr.msrb.gmra.mxu0 %v12167_v18  ;;  %v8472_v52 = vor.u32 %v9701_v4, %v8471_v27  ;;  %v9733_v18 = vld [vmem:[#allocation10 + $0x1b4] sm:$0xf0] }
 0x648   : > { %v11454_v39 = vadd.f32 %v5934_v42, %v5886_v54  ;;  %6190 = vmatmul.bf16.vlgmr.msrb.gmra.mxu1 %v12195_v38  ;;  %v8856_v54 = vor.u32 %v9797_v11, %v8855_v50 }
 0x649   : > { %6331 = vmatpush.bf16.msra.mxu0 %v8472_v52  ;;  %v12199_v52 = vld [vmem:[#allocation51_spill] sm:$0xff] }
 0x64a   : > { %12194 = vst [vmem:[#allocation68_spill] sm:$0xff] %v11454_v39  ;;  %6239 = vmatmul.bf16.vlgmr.msrb.gmra.mxu2 %v12196_v6  ;;  %6478 = vmatpush.bf16.msra.mxu3 %v8856_v54  ;;  %v8599_v6 = vld [vmem:[#allocation10 + $0x1a8] sm:$0xf] }
 0x64b   : > { %v8600_v28 = vor.u32 %v9733_v18, %v8599_v6  ;;  %v12200_v54 = vld [vmem:[#allocation59_spill] sm:$0xff]  ;;  %v9697_v6 = vld [vmem:[#allocation10 + $0x94] sm:$0xf0] }
 0x64c   : > { %6288 = vmatmul.bf16.vlgmr.msrb.gmra.mxu3 %v12197_v23  ;;  %v5948_v2 = vpop.f32.mrf.mxu0  ;;  %v8711_v18 = vld [vmem:[#allocation10 + $0x288] sm:$0xf] }
 0x64d   : > { %v6044_v5 = vpop.f32.mrf.mxu2  ;;  %v5949_v38 = vadd.f32 %v5948_v2, %v11451_v9  ;;  %v5997_v39 = vpop.f32.mrf.mxu1  ;;  %6380 = vmatpush.bf16.msra.mxu1 %v8600_v28  ;;  %v9793_v2 = vld [vmem:[#allocation10 + $0x394] sm:$0xf0] }
 0x64e   : > { %v6045_v42 = vadd.f32 %v6044_v5, %v5996_v40  ;;  %v12198_v5 = vld [vmem:[#allocation43_spill] sm:$0xff] }
 0x64f   : > { %v6093_v8 = vpop.f32.mrf.mxu3  ;;  %v5998_v35 = vadd.f32 %v5997_v39, %v5949_v38  ;;  %v9761_v39 = vld [vmem:[#allocation10 + $0x294] sm:$0xf0]  ;;  %v8455_v38 = vld [vmem:[#allocation10 + $0x88] sm:$0xf] }
 0x650   : > { %v11461_v23 = vadd.f32 %v6093_v8, %v6045_v42  ;;  %v12201_v42 = vld [vmem:[#allocation18_spill] sm:$0xff]  ;;  %v8839_v8 = vld [vmem:[#allocation10 + $0x388] sm:$0xf]  ;;  %v8456_v28 = vor.u32 %v9697_v6, %v8455_v38 }
 0x652   : > { %6332 = vmatpush.bf16.msra.mxu0 %v8456_v28  ;;  %v12203_v28 = vld [vmem:[#allocation52_spill] sm:$0xff] }
 0x654   : > { %v5951_v4 = vpop.f32.mrf.mxu0 }
 0x655   : > { %v6046_v22 = vpop.f32.mrf.mxu2  ;;  %v5952_v40 = vadd.f32 %v5951_v4, %v11451_v9  ;;  %v6000_v50 = vpop.f32.mrf.mxu1 }
 0x656   : > { %v6047_v33 = vadd.f32 %v6046_v22, %v5998_v35  ;;  %v8712_v22 = vor.u32 %v9761_v39, %v8711_v18 }
 0x657   : > { %v6095_v27 = vpop.f32.mrf.mxu3  ;;  %v6001_v11 = vadd.f32 %v6000_v50, %v5952_v40  ;;  %6146 = vmatmul.bf16.gmra.mxu0 %v12198_v5  ;;  %v9729_v5 = vld [vmem:[#allocation10 + $0x194] sm:$0xf0] }
 0x658   : > { %v11464_v44 = vadd.f32 %v6095_v27, %v6047_v33  ;;  %6195 = vmatmul.bf16.gmra.mxu1 %v12199_v52  ;;  %v8840_v33 = vor.u32 %v9793_v2, %v8839_v8  ;;  %6430 = vmatpush.bf16.msra.mxu2 %v8712_v22 }
 0x65a   : > { %6244 = vmatmul.bf16.gmra.mxu2 %v12200_v54  ;;  %6479 = vmatpush.bf16.msra.mxu3 %v8840_v33  ;;  %v8583_v54 = vld [vmem:[#allocation10 + $0x188] sm:$0xf]  ;;  %v12204_v33 = vld [vmem:[#allocation60_spill] sm:$0xff] }
 0x65b   : > { %v8584_v39 = vor.u32 %v9729_v5, %v8583_v54  ;;  %v8695_v5 = vld [vmem:[#allocation10 + $0x268] sm:$0xf] }
 0x65c   : > { %6293 = vmatmul.bf16.gmra.mxu3 %v12201_v42  ;;  %v5953_v40 = vpop.f32.mrf.mxu0  ;;  %v8439_v54 = vld [vmem:[#allocation10 + $0x68] sm:$0xf] }
 0x65d   : > { %v6049_v35 = vpop.f32.mrf.mxu2  ;;  %v5954_v50 = vadd.f32 %v5953_v40, %v11451_v9  ;;  %v6002_v52 = vpop.f32.mrf.mxu1  ;;  %6381 = vmatpush.bf16.msra.mxu1 %v8584_v39  ;;  %v8823_v40 = vld [vmem:[#allocation10 + $0x368] sm:$0xf] }
 0x65e   : > { %v6050_v27 = vadd.f32 %v6049_v35, %v6001_v11  ;;  %v12202_v35 = vld [vmem:[#allocation44_spill] sm:$0xff] }
 0x65f   : > { %v6098_v4 = vpop.f32.mrf.mxu3  ;;  %v6003_v18 = vadd.f32 %v6002_v52, %v5954_v50  ;;  %v9757_v52 = vld [vmem:[#allocation10 + $0x274] sm:$0xf0] }
 0x660   : > { %v11471_v42 = vadd.f32 %v6098_v4, %v6050_v27  ;;  %v12205_v27 = vld [vmem:[#allocation24_spill] sm:$0xff]  ;;  %v9693_v4 = vld [vmem:[#allocation10 + $0x74] sm:$0xf0] }
 0x661   : > { %v9789_v50 = vld [vmem:[#allocation10 + $0x374] sm:$0xf0]  ;;  %v8440_v39 = vor.u32 %v9693_v4, %v8439_v54 }
 0x663   : > { %6333 = vmatpush.bf16.msra.mxu0 %v8440_v39  ;;  %v12207_v39 = vld [vmem:[#allocation53_spill] sm:$0xff] }
 0x664   : > { %v5956_v6 = vpop.f32.mrf.mxu0 }
 0x665   : > { %v6051_v63 = vpop.f32.mrf.mxu2  ;;  %v5957_v11 = vadd.f32 %v5956_v6, %v11451_v9  ;;  %v6005_v8 = vpop.f32.mrf.mxu1 }
 0x666   : > { %v6052_v12 = vadd.f32 %v6051_v63, %v6003_v18  ;;  %v8696_v63 = vor.u32 %v9757_v52, %v8695_v5 }
 0x667   : > { %v6100_v38 = vpop.f32.mrf.mxu3  ;;  %v6006_v2 = vadd.f32 %v6005_v8, %v5957_v11  ;;  %6151 = vmatmul.bf16.gmra.mxu0 %v12202_v35  ;;  %v9725_v35 = vld [vmem:[#allocation10 + $0x174] sm:$0xf0] }
 0x668   : > { %v11474_v22 = vadd.f32 %v6100_v38, %v6052_v12  ;;  %6200 = vmatmul.bf16.gmra.mxu1 %v12203_v28  ;;  %v8824_v12 = vor.u32 %v9789_v50, %v8823_v40  ;;  %6431 = vmatpush.bf16.msra.mxu2 %v8696_v63 }
 0x66a   : > { %6249 = vmatmul.bf16.gmra.mxu2 %v12204_v33  ;;  %6480 = vmatpush.bf16.msra.mxu3 %v8824_v12  ;;  %v8567_v33 = vld [vmem:[#allocation10 + $0x168] sm:$0xf]  ;;  %v12208_v12 = vld [vmem:[#allocation61_spill] sm:$0xff] }
 0x66b   : > { %v8568_v52 = vor.u32 %v9725_v35, %v8567_v33  ;;  %v8679_v35 = vld [vmem:[#allocation10 + $0x248] sm:$0xf] }
 0x66c   : > { %6298 = vmatmul.bf16.gmra.mxu3 %v12205_v27  ;;  %v5958_v11 = vpop.f32.mrf.mxu0  ;;  %v8423_v33 = vld [vmem:[#allocation10 + $0x48] sm:$0xf] }
 0x66d   : > { %v6054_v18 = vpop.f32.mrf.mxu2  ;;  %v5959_v8 = vadd.f32 %v5958_v11, %v11451_v9  ;;  %v6007_v28 = vpop.f32.mrf.mxu1  ;;  %6382 = vmatpush.bf16.msra.mxu1 %v8568_v52  ;;  %v8807_v11 = vld [vmem:[#allocation10 + $0x348] sm:$0xf] }
 0x66e   : > { %v6055_v38 = vadd.f32 %v6054_v18, %v6006_v2  ;;  %v12206_v18 = vld [vmem:[#allocation45_spill] sm:$0xff] }
 0x66f   : > { %v6103_v6 = vpop.f32.mrf.mxu3  ;;  %v6008_v5 = vadd.f32 %v6007_v28, %v5959_v8  ;;  %v9753_v28 = vld [vmem:[#allocation10 + $0x254] sm:$0xf0] }
 0x670   : > { %v11481_v27 = vadd.f32 %v6103_v6, %v6055_v38  ;;  %v12209_v38 = vld [vmem:[#allocation30_spill] sm:$0xff]  ;;  %v9689_v6 = vld [vmem:[#allocation10 + $0x54] sm:$0xf0] }
 0x671   : > { %v9785_v8 = vld [vmem:[#allocation10 + $0x354] sm:$0xf0]  ;;  %v8424_v52 = vor.u32 %v9689_v6, %v8423_v33 }
 0x673   : > { %6334 = vmatpush.bf16.msra.mxu0 %v8424_v52  ;;  %v12211_v52 = vld [vmem:[#allocation54_spill] sm:$0xff] }
 0x674   : > { %v5961_v4 = vpop.f32.mrf.mxu0 }
 0x675   : > { %v6056_v55 = vpop.f32.mrf.mxu2  ;;  %v5962_v2 = vadd.f32 %v5961_v4, %v11451_v9  ;;  %v6010_v40 = vpop.f32.mrf.mxu1 }
 0x676   : > { %v6057_v21 = vadd.f32 %v6056_v55, %v6008_v5  ;;  %v8680_v55 = vor.u32 %v9753_v28, %v8679_v35 }
 0x677   : > { %v6105_v54 = vpop.f32.mrf.mxu3  ;;  %v6011_v50 = vadd.f32 %v6010_v40, %v5962_v2  ;;  %6156 = vmatmul.bf16.gmra.mxu0 %v12206_v18  ;;  %v9721_v18 = vld [vmem:[#allocation10 + $0x154] sm:$0xf0] }
 0x678   : > { %v11484_v63 = vadd.f32 %v6105_v54, %v6057_v21  ;;  %6205 = vmatmul.bf16.gmra.mxu1 %v12207_v39  ;;  %v8808_v21 = vor.u32 %v9785_v8, %v8807_v11  ;;  %6432 = vmatpush.bf16.msra.mxu2 %v8680_v55 }
 0x67a   : > { %6254 = vmatmul.bf16.gmra.mxu2 %v12208_v12  ;;  %6481 = vmatpush.bf16.msra.mxu3 %v8808_v21  ;;  %v8551_v12 = vld [vmem:[#allocation10 + $0x148] sm:$0xf]  ;;  %v12212_v21 = vld [vmem:[#allocation62_spill] sm:$0xff] }
 0x67b   : > { %v8552_v28 = vor.u32 %v9721_v18, %v8551_v12  ;;  %v8663_v18 = vld [vmem:[#allocation10 + $0x228] sm:$0xf] }
 0x67c   : > { %6303 = vmatmul.bf16.gmra.mxu3 %v12209_v38  ;;  %v5963_v2 = vpop.f32.mrf.mxu0  ;;  %v8407_v12 = vld [vmem:[#allocation10 + $0x28] sm:$0xf] }
 0x67d   : > { %v6059_v5 = vpop.f32.mrf.mxu2  ;;  %v5964_v40 = vadd.f32 %v5963_v2, %v11451_v9  ;;  %v6012_v39 = vpop.f32.mrf.mxu1  ;;  %6383 = vmatpush.bf16.msra.mxu1 %v8552_v28  ;;  %v8791_v2 = vld [vmem:[#allocation10 + $0x328] sm:$0xf] }
 0x67e   : > { %v6060_v54 = vadd.f32 %v6059_v5, %v6011_v50  ;;  %v12210_v5 = vld [vmem:[#allocation46_spill] sm:$0xff] }
 0x67f   : > { %v6108_v4 = vpop.f32.mrf.mxu3  ;;  %v6013_v35 = vadd.f32 %v6012_v39, %v5964_v40  ;;  %v9749_v39 = vld [vmem:[#allocation10 + $0x234] sm:$0xf0] }
 0x680   : > { %v11491_v38 = vadd.f32 %v6108_v4, %v6060_v54  ;;  %v12213_v54 = vld [vmem:[#allocation36_spill] sm:$0xff]  ;;  %v9685_v4 = vld [vmem:[#allocation10 + $0x34] sm:$0xf0] }
 0x681   : > { %v9781_v40 = vld [vmem:[#allocation10 + $0x334] sm:$0xf0]  ;;  %v8408_v28 = vor.u32 %v9685_v4, %v8407_v12 }
 0x683   : > { %6335 = vmatpush.bf16.msra.mxu0 %v8408_v28  ;;  %v12215_v28 = vld [vmem:[#allocation55_spill] sm:$0xff] }
 0x684   : > { %v5966_v6 = vpop.f32.mrf.mxu0 }
 0x685   : > { %v6061_v19 = vpop.f32.mrf.mxu2  ;;  %v5967_v50 = vadd.f32 %v5966_v6, %v11451_v9  ;;  %v6015_v11 = vpop.f32.mrf.mxu1 }
 0x686   : > { %v6062_v43 = vadd.f32 %v6061_v19, %v6013_v35  ;;  %v8664_v19 = vor.u32 %v9749_v39, %v8663_v18 }
 0x687   : > { %v6110_v33 = vpop.f32.mrf.mxu3  ;;  %v6016_v8 = vadd.f32 %v6015_v11, %v5967_v50  ;;  %6161 = vmatmul.bf16.gmra.mxu0 %v12210_v5  ;;  %v9717_v5 = vld [vmem:[#allocation10 + $0x134] sm:$0xf0] }
 0x688   : > { %v11494_v55 = vadd.f32 %v6110_v33, %v6062_v43  ;;  %6210 = vmatmul.bf16.gmra.mxu1 %v12211_v52  ;;  %v8792_v43 = vor.u32 %v9781_v40, %v8791_v2  ;;  %6433 = vmatpush.bf16.msra.mxu2 %v8664_v19 }
 0x68a   : > { %6259 = vmatmul.bf16.gmra.mxu2 %v12212_v21  ;;  %6482 = vmatpush.bf16.msra.mxu3 %v8792_v43  ;;  %v8535_v21 = vld [vmem:[#allocation10 + $0x128] sm:$0xf] }
 0x68b   : > { %v8536_v39 = vor.u32 %v9717_v5, %v8535_v21  ;;  %v12216_v43 = vld [vmem:[#allocation63_spill] sm:$0xff] }
 0x68c   : > { %6308 = vmatmul.bf16.gmra.mxu3 %v12213_v54  ;;  %v5968_v50 = vpop.f32.mrf.mxu0  ;;  %v8647_v5 = vld [vmem:[#allocation10 + $0x208] sm:$0xf] }
 0x68d   : > { %v6064_v35 = vpop.f32.mrf.mxu2  ;;  %v5969_v11 = vadd.f32 %v5968_v50, %v11451_v9  ;;  %v6017_v52 = vpop.f32.mrf.mxu1  ;;  %6384 = vmatpush.bf16.msra.mxu1 %v8536_v39  ;;  %v8391_v21 = vld [vmem:[#allocation10 + $0x8] sm:$0xf] }
 0x68e   : > { %v6065_v33 = vadd.f32 %v6064_v35, %v6016_v8  ;;  %v12214_v35 = vld [vmem:[#allocation47_spill] sm:$0xff] }
 0x68f   : > { %v6113_v6 = vpop.f32.mrf.mxu3  ;;  %v6018_v18 = vadd.f32 %v6017_v52, %v5969_v11  ;;  %v9745_v52 = vld [vmem:[#allocation10 + $0x214] sm:$0xf0]  ;;  %v8775_v50 = vld [vmem:[#allocation10 + $0x308] sm:$0xf] }
 0x690   : > { %v11501_v54 = vadd.f32 %v6113_v6, %v6065_v33  ;;  %v12217_v33 = vld [vmem:[#allocation19_spill] sm:$0xff]  ;;  %v9681_v6 = vld [vmem:[#allocation10 + $0x14] sm:$0xf0] }
 0x691   : > { %v9777_v11 = vld [vmem:[#allocation10 + $0x314] sm:$0xf0]  ;;  %v8392_v39 = vor.u32 %v9681_v6, %v8391_v21 }
 0x693   : > { %6336 = vmatpush.bf16.msra.mxu0 %v8392_v39  ;;  %v12220_v39 = vld [vmem:[#allocation64_spill] sm:$0xff] }
 0x694   : > { %v5971_v4 = vpop.f32.mrf.mxu0 }
 0x695   : > { %v6066_v32 = vpop.f32.mrf.mxu2  ;;  %v5972_v8 = vadd.f32 %v5971_v4, %v11451_v9  ;;  %v6020_v2 = vpop.f32.mrf.mxu1 }
 0x696   : > { %v6067_v26 = vadd.f32 %v6066_v32, %v6018_v18  ;;  %v8648_v32 = vor.u32 %v9745_v52, %v8647_v5 }
 0x697   : > { %v6115_v12 = vpop.f32.mrf.mxu3  ;;  %v6021_v40 = vadd.f32 %v6020_v2, %v5972_v8  ;;  %6166 = vmatmul.bf16.gmra.mxu0 %v12214_v35  ;;  %v9713_v35 = vld [vmem:[#allocation10 + $0x114] sm:$0xf0] }
 0x698   : > { %v11504_v19 = vadd.f32 %v6115_v12, %v6067_v26  ;;  %6215 = vmatmul.bf16.gmra.mxu1 %v12215_v28  ;;  %v8776_v26 = vor.u32 %v9777_v11, %v8775_v50  ;;  %6434 = vmatpush.bf16.msra.mxu2 %v8648_v32 }
 0x69a   : > { %6264 = vmatmul.bf16.gmra.mxu2 %v12216_v43  ;;  %6483 = vmatpush.bf16.msra.mxu3 %v8776_v26  ;;  %v8519_v43 = vld [vmem:[#allocation10 + $0x108] sm:$0xf]  ;;  %v12221_v26 = vld [vmem:[#allocation25_spill] sm:$0xff] }
 0x69b   : > { %v8520_v52 = vor.u32 %v9713_v35, %v8519_v43  ;;  %v9271_v35 = vld [vmem:[#allocation10 + $0x6e8] sm:$0xf] }
 0x69c   : > { %6313 = vmatmul.bf16.gmra.mxu3 %v12217_v33  ;;  %v5973_v8 = vpop.f32.mrf.mxu0  ;;  %v9015_v43 = vld [vmem:[#allocation10 + $0x4e8] sm:$0xf] }
 0x69d   : > { %v6069_v18 = vpop.f32.mrf.mxu2  ;;  %v5974_v2 = vadd.f32 %v5973_v8, %v11451_v9  ;;  %v6022_v28 = vpop.f32.mrf.mxu1  ;;  %6385 = vmatpush.bf16.msra.mxu1 %v8520_v52  ;;  %v9933_v8 = vld [vmem:[#allocation10 + $0x7f4] sm:$0xf0] }
 0x69e   : > { %v6070_v12 = vadd.f32 %v6069_v18, %v6021_v40  ;;  %v12219_v18 = vld [vmem:[#allocation56_spill] sm:$0xff] }
 0x69f   : > { %v6118_v4 = vpop.f32.mrf.mxu3  ;;  %v6023_v5 = vadd.f32 %v6022_v28, %v5974_v2  ;;  %v9901_v28 = vld [vmem:[#allocation10 + $0x6f4] sm:$0xf0] }
 0x6a0   : > { %v11511_v33 = vadd.f32 %v6118_v4, %v6070_v12  ;;  %v9837_v12 = vld [vmem:[#allocation10 + $0x4f4] sm:$0xf0]  ;;  %v9399_v4 = vld [vmem:[#allocation10 + $0x7e8] sm:$0xf] }
 0x6a4   : > { %v5976_v6 = vpop.f32.mrf.mxu0 }
 0x6a5   : > { %v6071_v62 = vpop.f32.mrf.mxu2  ;;  %v5977_v40 = vadd.f32 %v5976_v6, %v11451_v9  ;;  %v6025_v50 = vpop.f32.mrf.mxu1 }
 0x6a6   : > { %v6072_v13 = vadd.f32 %v6071_v62, %v6023_v5  ;;  %v9272_v62 = vor.u32 %v9901_v28, %v9271_v35  ;;  %v9016_v5 = vor.u32 %v9837_v12, %v9015_v43  ;;  %v9869_v35 = vld [vmem:[#allocation10 + $0x5f4] sm:$0xf0] }
 0x6a7   : > { %v6120_v21 = vpop.f32.mrf.mxu3  ;;  %v6026_v11 = vadd.f32 %v6025_v50, %v5977_v40  ;;  %6171 = vmatmul.bf16.gmra.mxu0 %v12179_v47 }
 0x6a8   : > { %v11514_v32 = vadd.f32 %v6120_v21, %v6072_v13  ;;  %6220 = vmatmul.bf16.gmra.mxu1 %v12219_v18  ;;  %v9400_v13 = vor.u32 %v9933_v8, %v9399_v4  ;;  %6623 = vmatpush.bf16.msrb.mxu2 %v9272_v62  ;;  %v9143_v18 = vld [vmem:[#allocation10 + $0x5e8] sm:$0xf]  ;;  %v12223_v8 = vld [vmem:[#allocation57_spill] sm:$0xff] }
 0x6a9   : > { %6525 = vmatpush.bf16.msrb.mxu0 %v9016_v5  ;;  %v9144_v47 = vor.u32 %v9869_v35, %v9143_v18  ;;  %v12225_v5 = vld [vmem:[#allocation31_spill] sm:$0xff]  ;;  %v9897_v18 = vld [vmem:[#allocation10 + $0x6d4] sm:$0xf0] }
 0x6aa   : > { %12218 = vst [vmem:[#allocation69_spill] sm:$0xff] %v11514_v32  ;;  %6269 = vmatmul.bf16.gmra.mxu2 %v12220_v39  ;;  %6672 = vmatpush.bf16.msrb.mxu3 %v9400_v13  ;;  %v9255_v13 = vld [vmem:[#allocation10 + $0x6c8] sm:$0xf] }
 0x6ab   : > { %6574 = vmatpush.bf16.msrb.mxu1 %v9144_v47 }
 0x6ac   : > { %6318 = vmatmul.bf16.gmra.mxu3 %v12221_v26  ;;  %v5978_v6 = vpop.f32.mrf.mxu0 }
 0x6ad   : > { %v6074_v2 = vpop.f32.mrf.mxu2  ;;  %v5979_v40 = vadd.f32 %v5978_v6, %v11451_v9  ;;  %v6027_v50 = vpop.f32.mrf.mxu1  ;;  %v9833_v6 = vld [vmem:[#allocation10 + $0x4d4] sm:$0xf0] }
 0x6ae   : > { %v6075_v52 = vadd.f32 %v6074_v2, %v6026_v11  ;;  %v12224_v2 = vld [vmem:[#allocation65_spill] sm:$0xff] }
 0x6af   : > { %v6123_v21 = vpop.f32.mrf.mxu3  ;;  %v6028_v39 = vadd.f32 %v6027_v50, %v5979_v40  ;;  %v9383_v40 = vld [vmem:[#allocation10 + $0x7c8] sm:$0xf]  ;;  %v9929_v50 = vld [vmem:[#allocation10 + $0x7d4] sm:$0xf0] }
 0x6b0   : > { %v11521_v26 = vadd.f32 %v6123_v21, %v6075_v52  ;;  %v9256_v21 = vor.u32 %v9897_v18, %v9255_v13 }
 0x6b2   : > { %6624 = vmatpush.bf16.msrb.mxu2 %v9256_v21 }
 0x6b4   : > { %v5981_v43 = vpop.f32.mrf.mxu0 }
 0x6b5   : > { %v6076_v28 = vpop.f32.mrf.mxu2  ;;  %v5982_v11 = vadd.f32 %v5981_v43, %v11451_v9  ;;  %v6030_v12 = vpop.f32.mrf.mxu1 }
 0x6b6   : > { %v6077_v32 = vadd.f32 %v6076_v28, %v6028_v39  ;;  %v8999_v39 = vld [vmem:[#allocation10 + $0x4c8] sm:$0xf]  ;;  %v9384_v28 = vor.u32 %v9929_v50, %v9383_v40  ;;  %v9829_v50 = vld [vmem:[#allocation10 + $0x4b4] sm:$0xf0] }
 0x6b7   : > { %v6125_v51 = vpop.f32.mrf.mxu3  ;;  %v6031_v4 = vadd.f32 %v6030_v12, %v5982_v11  ;;  %6176 = vmatmul.bf16.gmra.mxu0 %v12180_v7  ;;  %v9000_v35 = vor.u32 %v9833_v6, %v8999_v39  ;;  %v9239_v6 = vld [vmem:[#allocation10 + $0x6a8] sm:$0xf] }
 0x6b8   : > { %v11524_v62 = vadd.f32 %v6125_v51, %v6077_v32  ;;  %6225 = vmatmul.bf16.gmra.mxu1 %v12223_v8  ;;  %6673 = vmatpush.bf16.msrb.mxu3 %v9384_v28  ;;  %v9865_v8 = vld [vmem:[#allocation10 + $0x5d4] sm:$0xf0] }
 0x6b9   : > { %6526 = vmatpush.bf16.msrb.mxu0 %v9000_v35 }
 0x6ba   : > { %12222 = vst [vmem:[#allocation70_spill] sm:$0xff] %v11524_v62  ;;  %6274 = vmatmul.bf16.gmra.mxu2 %v12224_v2  ;;  %v9127_v2 = vld [vmem:[#allocation10 + $0x5c8] sm:$0xf] }
 0x6bb   : > { %v9128_v18 = vor.u32 %v9865_v8, %v9127_v2  ;;  %v9893_v8 = vld [vmem:[#allocation10 + $0x6b4] sm:$0xf0]  ;;  %v8983_v2 = vld [vmem:[#allocation10 + $0x4a8] sm:$0xf] }
 0x6bc   : > { %6323 = vmatmul.bf16.gmra.mxu3 %v12225_v5  ;;  %v5983_v32 = vpop.f32.mrf.mxu0  ;;  %v9240_v40 = vor.u32 %v9893_v8, %v9239_v6 }
 0x6bd   : > { %v6079_v52 = vpop.f32.mrf.mxu2  ;;  %v5984_v43 = vadd.f32 %v5983_v32, %v11451_v9  ;;  %v6032_v11 = vpop.f32.mrf.mxu1  ;;  %6575 = vmatpush.bf16.msrb.mxu1 %v9128_v18  ;;  %v8984_v32 = vor.u32 %v9829_v50, %v8983_v2 }
 0x6be   : > { %v6080_v47 = vadd.f32 %v6079_v52, %v6031_v4  ;;  %6625 = vmatpush.bf16.msrb.mxu2 %v9240_v40 }
 0x6bf   : > { %v6128_v51 = vpop.f32.mrf.mxu3  ;;  %v6033_v5 = vadd.f32 %v6032_v11, %v5984_v43  ;;  %6527 = vmatpush.bf16.msrb.mxu0 %v8984_v32  ;;  %v9825_v32 = vld [vmem:[#allocation10 + $0x494] sm:$0xf0] }
 0x6c0   : > { %v11531_v12 = vadd.f32 %v6128_v51, %v6080_v47 }
 0x6c4   : > { %v6142_v4 = vpop.f32.mrf.mxu0 }
 0x6c5   : > { %v6081_v13 = vpop.f32.mrf.mxu2  ;;  %v6191_v52 = vpop.f32.mrf.mxu1  ;;  %v6143_v9 = vadd.f32 %v6142_v4, %v11461_v23  ;;  %v9111_v4 = vld [vmem:[#allocation10 + $0x5a8] sm:$0xf] }
 0x6c6   : > { %v6082_v7 = vadd.f32 %v6081_v13, %v6033_v5 }
 0x6c7   : > { %v6130_v62 = vpop.f32.mrf.mxu3  ;;  %6337 = vmatmul.bf16.vlgmr.msra.gmra.mxu0 %v10757_v46  ;;  %v6192_v21 = vadd.f32 %v6191_v52, %v6143_v9  ;;  %v9861_v52 = vld [vmem:[#allocation10 + $0x5b4] sm:$0xf0] }
 0x6c8   : > { %v11533_v39 = vadd.f32 %v6130_v62, %v6082_v7  ;;  %6386 = vmatmul.bf16.vlgmr.msra.gmra.mxu1 %v10824_v30  ;;  %v9367_v7 = vld [vmem:[#allocation10 + $0x7a8] sm:$0xf]  ;;  %v9925_v62 = vld [vmem:[#allocation10 + $0x7b4] sm:$0xf0] }
 0x6c9   : > { %v9368_v35 = vor.u32 %v9925_v62, %v9367_v7  ;;  %v9223_v7 = vld [vmem:[#allocation10 + $0x688] sm:$0xf]  ;;  %v9889_v62 = vld [vmem:[#allocation10 + $0x694] sm:$0xf0] }
 0x6ca   : > { %6435 = vmatmul.bf16.vlgmr.msra.gmra.mxu2 %v10893_v34 }
 0x6cb   : > { %6674 = vmatpush.bf16.msrb.mxu3 %v9368_v35 }
 0x6cc   : > { %6484 = vmatmul.bf16.vlgmr.msra.gmra.mxu3 %v10960_v41  ;;  %v6144_v51 = vpop.f32.mrf.mxu0 }
 0x6cd   : > { %v6240_v5 = vpop.f32.mrf.mxu2  ;;  %v6193_v28 = vpop.f32.mrf.mxu1  ;;  %v6145_v11 = vadd.f32 %v6144_v51, %v11464_v44  ;;  %v8967_v51 = vld [vmem:[#allocation10 + $0x488] sm:$0xf] }
 0x6ce   : > { %v6241_v47 = vadd.f32 %v6240_v5, %v6192_v21  ;;  %v9112_v21 = vor.u32 %v9861_v52, %v9111_v4 }
 0x6cf   : > { %v6289_v23 = vpop.f32.mrf.mxu3  ;;  %v6194_v18 = vadd.f32 %v6193_v28, %v6145_v11  ;;  %v9921_v11 = vld [vmem:[#allocation10 + $0x794] sm:$0xf0] }
 0x6d0   : > { %v6290_v43 = vadd.f32 %v6289_v23, %v6241_v47  ;;  %6576 = vmatpush.bf16.msrb.mxu1 %v9112_v21  ;;  %v9224_v23 = vor.u32 %v9889_v62, %v9223_v7 }
 0x6d2   : > { %v7113_v13 = vpack.c.bf16 %v6290_v43, %v11376_v29  ;;  %6626 = vmatpush.bf16.msrb.mxu2 %v9224_v23  ;;  %v9885_v23 = vld [vmem:[#allocation10 + $0x674] sm:$0xf0] }
 0x6d4   : > { %7145 = vst [vmem:[%s11543_s28] sm:$0xff] %v7113_v13  ;;  %v6147_v2 = vpop.f32.mrf.mxu0 }
 0x6d5   : > { %v6242_v9 = vpop.f32.mrf.mxu2  ;;  %v6196_v5 = vpop.f32.mrf.mxu1  ;;  %v6148_v40 = vadd.f32 %v6147_v2, %v11471_v42  ;;  %v9351_v42 = vld [vmem:[#allocation10 + $0x788] sm:$0xf] }
 0x6d6   : > { %v6243_v6 = vadd.f32 %v6242_v9, %v6194_v18  ;;  %v9352_v18 = vor.u32 %v9921_v11, %v9351_v42  ;;  %v8951_v42 = vld [vmem:[#allocation10 + $0x468] sm:$0xf]  ;;  %v9917_v11 = vld [vmem:[#allocation10 + $0x774] sm:$0xf0] }
 0x6d7   : > { %v6291_v8 = vpop.f32.mrf.mxu3  ;;  %6342 = vmatmul.bf16.gmra.mxu0 %v10765_v0  ;;  %v6197_v50 = vadd.f32 %v6196_v5, %v6148_v40 }
 0x6d8   : > { %v6292_v44 = vadd.f32 %v6291_v8, %v6243_v6  ;;  %6391 = vmatmul.bf16.gmra.mxu1 %v10832_v1  ;;  %6675 = vmatpush.bf16.msrb.mxu3 %v9352_v18  ;;  %v9095_v6 = vld [vmem:[#allocation10 + $0x588] sm:$0xf]  ;;  %v9857_v8 = vld [vmem:[#allocation10 + $0x594] sm:$0xf0] }
 0x6d9   : > { %v9096_v5 = vor.u32 %v9857_v8, %v9095_v6  ;;  %v9079_v6 = vld [vmem:[#allocation10 + $0x568] sm:$0xf]  ;;  %v9853_v8 = vld [vmem:[#allocation10 + $0x574] sm:$0xf0] }
 0x6da   : > { %v7115_v29 = vpack.c.bf16 %v6292_v44, %v11379_v37  ;;  %6440 = vmatmul.bf16.gmra.mxu2 %v10901_v16  ;;  %v8968_v37 = vor.u32 %v9825_v32, %v8967_v51 }
 0x6db   : > { %6577 = vmatpush.bf16.msrb.mxu1 %v9096_v5  ;;  %v9080_v5 = vor.u32 %v9853_v8, %v9079_v6 }
 0x6dc   : > { %6489 = vmatmul.bf16.gmra.mxu3 %v10968_v36  ;;  %7147 = vst [vmem:[%s11543_s28 + $0x10] sm:$0xff] %v7115_v29  ;;  %v6149_v43 = vpop.f32.mrf.mxu0  ;;  %6528 = vmatpush.bf16.msrb.mxu0 %v8968_v37 }
 0x6dd   : > { %v6245_v47 = vpop.f32.mrf.mxu2  ;;  %v6198_v13 = vpop.f32.mrf.mxu1  ;;  %v6150_v52 = vadd.f32 %v6149_v43, %v11474_v22 }
 0x6de   : > { %v6246_v35 = vadd.f32 %v6245_v47, %v6197_v50  ;;  %v9207_v47 = vld [vmem:[#allocation10 + $0x668] sm:$0xf] }
 0x6df   : > { %v6294_v28 = vpop.f32.mrf.mxu3  ;;  %v6199_v21 = vadd.f32 %v6198_v13, %v6150_v52  ;;  %v9208_v32 = vor.u32 %v9885_v23, %v9207_v47  ;;  %6578 = vmatpush.bf16.msrb.mxu1 %v9080_v5 }
 0x6e0   : > { %v6295_v4 = vadd.f32 %v6294_v28, %v6246_v35  ;;  %v9821_v35 = vld [vmem:[#allocation10 + $0x474] sm:$0xf0] }
 0x6e1   : > { %6627 = vmatpush.bf16.msrb.mxu2 %v9208_v32  ;;  %v9817_v32 = vld [vmem:[#allocation10 + $0x454] sm:$0xf0] }
 0x6e2   : > { %v7117_v9 = vpack.c.bf16 %v6295_v4, %v11386_v20 }
 0x6e4   : > { %7149 = vst [vmem:[%s11543_s28 + $0x20] sm:$0xff] %v7117_v9  ;;  %v6152_v29 = vpop.f32.mrf.mxu0 }
 0x6e5   : > { %v6247_v2 = vpop.f32.mrf.mxu2  ;;  %v6201_v50 = vpop.f32.mrf.mxu1  ;;  %v6153_v62 = vadd.f32 %v6152_v29, %v11481_v27  ;;  %v9335_v27 = vld [vmem:[#allocation10 + $0x768] sm:$0xf] }
 0x6e6   : > { %v6248_v44 = vadd.f32 %v6247_v2, %v6199_v21  ;;  %v9336_v18 = vor.u32 %v9917_v11, %v9335_v27 }
 0x6e7   : > { %v6296_v40 = vpop.f32.mrf.mxu3  ;;  %6347 = vmatmul.bf16.gmra.mxu0 %v12137_v49  ;;  %v6202_v20 = vadd.f32 %v6201_v50, %v6153_v62 }
 0x6e8   : > { %v6297_v7 = vadd.f32 %v6296_v40, %v6248_v44  ;;  %6396 = vmatmul.bf16.gmra.mxu1 %v12138_v3  ;;  %6676 = vmatpush.bf16.msrb.mxu3 %v9336_v18 }
 0x6ea   : > { %v7119_v22 = vpack.c.bf16 %v6297_v7, %v11389_v45  ;;  %6445 = vmatmul.bf16.gmra.mxu2 %v12139_v61  ;;  %v8952_v45 = vor.u32 %v9821_v35, %v8951_v42 }
 0x6ec   : > { %6494 = vmatmul.bf16.gmra.mxu3 %v12140_v53  ;;  %7151 = vst [vmem:[%s11543_s28 + $0x30] sm:$0xff] %v7119_v22  ;;  %v6154_v37 = vpop.f32.mrf.mxu0  ;;  %6529 = vmatpush.bf16.msrb.mxu0 %v8952_v45  ;;  %v9191_v22 = vld [vmem:[#allocation10 + $0x648] sm:$0xf] }
 0x6ed   : > { %v6250_v51 = vpop.f32.mrf.mxu2  ;;  %v6203_v13 = vpop.f32.mrf.mxu1  ;;  %v6155_v52 = vadd.f32 %v6154_v37, %v11484_v63 }
 0x6ee   : > { %v6251_v28 = vadd.f32 %v6250_v51, %v6202_v20  ;;  %v9881_v20 = vld [vmem:[#allocation10 + $0x654] sm:$0xf0]  ;;  %v8935_v51 = vld [vmem:[#allocation10 + $0x448] sm:$0xf] }
 0x6ef   : > { %v6299_v43 = vpop.f32.mrf.mxu3  ;;  %v6204_v21 = vadd.f32 %v6203_v13, %v6155_v52  ;;  %v9192_v23 = vor.u32 %v9881_v20, %v9191_v22  ;;  %v9849_v52 = vld [vmem:[#allocation10 + $0x554] sm:$0xf0] }
 0x6f0   : > { %v6300_v4 = vadd.f32 %v6299_v43, %v6251_v28  ;;  %v9913_v28 = vld [vmem:[#allocation10 + $0x754] sm:$0xf0] }
 0x6f1   : > { %6628 = vmatpush.bf16.msrb.mxu2 %v9192_v23  ;;  %v9909_v23 = vld [vmem:[#allocation10 + $0x734] sm:$0xf0] }
 0x6f2   : > { %v7121_v9 = vpack.c.bf16 %v6300_v4, %v11396_v25  ;;  %v9063_v4 = vld [vmem:[#allocation10 + $0x548] sm:$0xf] }
 0x6f4   : > { %7153 = vst [vmem:[%s11543_s28 + $0x40] sm:$0xff] %v7121_v9  ;;  %v6157_v29 = vpop.f32.mrf.mxu0 }
 0x6f5   : > { %v6252_v2 = vpop.f32.mrf.mxu2  ;;  %v6206_v50 = vpop.f32.mrf.mxu1  ;;  %v6158_v62 = vadd.f32 %v6157_v29, %v11491_v38  ;;  %v9319_v38 = vld [vmem:[#allocation10 + $0x748] sm:$0xf] }
 0x6f6   : > { %v6253_v44 = vadd.f32 %v6252_v2, %v6204_v21  ;;  %v9320_v37 = vor.u32 %v9913_v28, %v9319_v38  ;;  %v9064_v21 = vor.u32 %v9849_v52, %v9063_v4  ;;  %v9175_v29 = vld [vmem:[#allocation10 + $0x628] sm:$0xf]  ;;  %v9845_v28 = vld [vmem:[#allocation10 + $0x534] sm:$0xf0] }
 0x6f7   : > { %v6301_v40 = vpop.f32.mrf.mxu3  ;;  %6352 = vmatmul.bf16.gmra.mxu0 %v12142_v10  ;;  %v6207_v25 = vadd.f32 %v6206_v50, %v6158_v62  ;;  %v9877_v50 = vld [vmem:[#allocation10 + $0x634] sm:$0xf0] }
 0x6f8   : > { %v6302_v7 = vadd.f32 %v6301_v40, %v6253_v44  ;;  %6401 = vmatmul.bf16.gmra.mxu1 %v12143_v59  ;;  %6677 = vmatpush.bf16.msrb.mxu3 %v9320_v37  ;;  %v9176_v62 = vor.u32 %v9877_v50, %v9175_v29  ;;  %v9809_v29 = vld [vmem:[#allocation10 + $0x414] sm:$0xf0] }
 0x6f9   : > { %6579 = vmatpush.bf16.msrb.mxu1 %v9064_v21 }
 0x6fa   : > { %v7123_v63 = vpack.c.bf16 %v6302_v7, %v11399_v31  ;;  %6450 = vmatmul.bf16.gmra.mxu2 %v12144_v60  ;;  %v8936_v31 = vor.u32 %v9817_v32, %v8935_v51 }
 0x6fb   : > { %6629 = vmatpush.bf16.msrb.mxu2 %v9176_v62 }
 0x6fc   : > { %6499 = vmatmul.bf16.gmra.mxu3 %v12145_v48  ;;  %7155 = vst [vmem:[%s11543_s28 + $0x50] sm:$0xff] %v7123_v63  ;;  %v6159_v27 = vpop.f32.mrf.mxu0  ;;  %6530 = vmatpush.bf16.msrb.mxu0 %v8936_v31  ;;  %v8919_v63 = vld [vmem:[#allocation10 + $0x428] sm:$0xf] }
 0x6fd   : > { %v6255_v47 = vpop.f32.mrf.mxu2  ;;  %v6208_v43 = vpop.f32.mrf.mxu1  ;;  %v6160_v11 = vadd.f32 %v6159_v27, %v11494_v55  ;;  %v9047_v31 = vld [vmem:[#allocation10 + $0x528] sm:$0xf] }
 0x6fe   : > { %v6256_v42 = vadd.f32 %v6255_v47, %v6207_v25  ;;  %v9813_v25 = vld [vmem:[#allocation10 + $0x434] sm:$0xf0]  ;;  %v9048_v37 = vor.u32 %v9845_v28, %v9047_v31 }
 0x6ff   : > { %v6304_v35 = vpop.f32.mrf.mxu3  ;;  %v6209_v18 = vadd.f32 %v6208_v43, %v6160_v11 }
 0x700   : > { %v6305_v45 = vadd.f32 %v6304_v35, %v6256_v42  ;;  %6580 = vmatpush.bf16.msrb.mxu1 %v9048_v37 }
 0x702   : > { %v7125_v13 = vpack.c.bf16 %v6305_v45, %v11406_v17 }
 0x704   : > { %7157 = vst [vmem:[%s11543_s28 + $0x60] sm:$0xff] %v7125_v13  ;;  %v6162_v2 = vpop.f32.mrf.mxu0 }
 0x705   : > { %v6257_v9 = vpop.f32.mrf.mxu2  ;;  %v6211_v5 = vpop.f32.mrf.mxu1  ;;  %v6163_v40 = vadd.f32 %v6162_v2, %v11501_v54  ;;  %v9303_v54 = vld [vmem:[#allocation10 + $0x728] sm:$0xf] }
 0x706   : > { %v6258_v6 = vadd.f32 %v6257_v9, %v6209_v18  ;;  %v9304_v32 = vor.u32 %v9909_v23, %v9303_v54  ;;  %v12227_v9 = vld [vmem:[#allocation37_spill] sm:$0xff]  ;;  %v12232_v23 = vld [vmem:[#allocation20_spill] sm:$0xff] }
 0x707   : > { %v6306_v8 = vpop.f32.mrf.mxu3  ;;  %6357 = vmatmul.bf16.gmra.mxu0 %v12147_v56  ;;  %v6212_v17 = vadd.f32 %v6211_v5, %v6163_v40  ;;  %v9159_v5 = vld [vmem:[#allocation10 + $0x608] sm:$0xf] }
 0x708   : > { %v6307_v44 = vadd.f32 %v6306_v8, %v6258_v6  ;;  %6406 = vmatmul.bf16.gmra.mxu1 %v12148_v57  ;;  %6678 = vmatpush.bf16.msrb.mxu3 %v9304_v32  ;;  %v12229_v6 = vld [vmem:[#allocation33_spill] sm:$0xff]  ;;  %v12230_v8 = vld [vmem:[#allocation39_spill] sm:$0xff] }
 0x70a   : > { %v7127_v55 = vpack.c.bf16 %v6307_v44, %v11409_v15  ;;  %6455 = vmatmul.bf16.gmra.mxu2 %v12149_v58  ;;  %v8920_v15 = vor.u32 %v9813_v25, %v8919_v63  ;;  %v9873_v44 = vld [vmem:[#allocation10 + $0x614] sm:$0xf0] }
 0x70b   : > { %v9905_v25 = vld [vmem:[#allocation10 + $0x714] sm:$0xf0] }
 0x70c   : > { %6504 = vmatmul.bf16.gmra.mxu3 %v12150_v14  ;;  %7159 = vst [vmem:[%s11543_s28 + $0x70] sm:$0xff] %v7127_v55  ;;  %v6164_v47 = vpop.f32.mrf.mxu0  ;;  %6531 = vmatpush.bf16.msrb.mxu0 %v8920_v15  ;;  %v9160_v55 = vor.u32 %v9873_v44, %v9159_v5  ;;  %v9771_v5 = vld [vmem:[#allocation10 + $0x2ec] sm:$0xf]  ;;  %v8761_v44 = vld [vmem:[#allocation10 + $0x2f8] sm:$0xf0] }
 0x70d   : > { %v6260_v7 = vpop.f32.mrf.mxu2  ;;  %v6213_v51 = vpop.f32.mrf.mxu1  ;;  %v6165_v42 = vadd.f32 %v6164_v47, %v11504_v19  ;;  %v12226_v19 = vld [vmem:[#allocation21_spill] sm:$0xff] }
 0x70e   : > { %v6261_v22 = vadd.f32 %v6260_v7, %v6212_v17  ;;  %v8903_v17 = vld [vmem:[#allocation10 + $0x408] sm:$0xf]  ;;  %6630 = vmatpush.bf16.msrb.mxu2 %v9160_v55  ;;  %v12231_v47 = vld [vmem:[#allocation69_spill] sm:$0xff]  ;;  %v8764_v55 = vor.u32 %v9771_v5, %v8761_v44 }
 0x70f   : > { %v6309_v20 = vpop.f32.mrf.mxu3  ;;  %v6214_v27 = vadd.f32 %v6213_v51, %v6165_v42  ;;  %v8904_v63 = vor.u32 %v9809_v29, %v8903_v17  ;;  %v9841_v42 = vld [vmem:[#allocation10 + $0x514] sm:$0xf0]  ;;  %v9707_v17 = vld [vmem:[#allocation10 + $0xec] sm:$0xf]  ;;  %v8505_v29 = vld [vmem:[#allocation10 + $0xf8] sm:$0xf0] }
 0x710   : > { %v6310_v38 = vadd.f32 %v6309_v20, %v6261_v22  ;;  %v12243_v5 = vld [vmem:[#allocation35_spill] sm:$0xff]  ;;  %v12244_v44 = vld [vmem:[#allocation41_spill] sm:$0xff] }
 0x711   : > { %6532 = vmatpush.bf16.msrb.mxu0 %v8904_v63  ;;  %v8889_v63 = vld [vmem:[#allocation10 + $0x3f8] sm:$0xf0] }
 0x712   : > { %v7129_v35 = vpack.c.bf16 %v6310_v38, %v11416_v24  ;;  %v12228_v24 = vld [vmem:[#allocation27_spill] sm:$0xff]  ;;  %6819 = vmatpush.bf16.msra.mxu2 %v8764_v55  ;;  %v8745_v55 = vld [vmem:[#allocation10 + $0x2d8] sm:$0xf0] }
 0x713   : > { %v9031_v38 = vld [vmem:[#allocation10 + $0x508] sm:$0xf] }
 0x714   : > { %7161 = vst [vmem:[%s11543_s28 + $0x80] sm:$0xff] %v7129_v35  ;;  %v6167_v13 = vpop.f32.mrf.mxu0 }
 0x715   : > { %v6262_v43 = vpop.f32.mrf.mxu2  ;;  %v6216_v18 = vpop.f32.mrf.mxu1  ;;  %v6168_v52 = vadd.f32 %v6167_v13, %v11511_v33  ;;  %v9287_v33 = vld [vmem:[#allocation10 + $0x708] sm:$0xf]  ;;  %v12233_v13 = vld [vmem:[#allocation22_spill] sm:$0xff] }
 0x716   : > { %v6263_v45 = vadd.f32 %v6262_v43, %v6214_v27  ;;  %v9288_v22 = vor.u32 %v9905_v25, %v9287_v33  ;;  %v9032_v27 = vor.u32 %v9841_v42, %v9031_v38  ;;  %v9803_v33 = vld [vmem:[#allocation10 + $0x3ec] sm:$0xf] }
 0x717   : > { %v6311_v11 = vpop.f32.mrf.mxu3  ;;  %6362 = vmatmul.bf16.gmra.mxu0 %v12226_v19  ;;  %v6217_v2 = vadd.f32 %v6216_v18, %v6168_v52  ;;  %v12234_v18 = vld [vmem:[#allocation26_spill] sm:$0xff]  ;;  %v12235_v52 = vld [vmem:[#allocation28_spill] sm:$0xff] }
 0x718   : > { %v6312_v4 = vadd.f32 %v6311_v11, %v6263_v45  ;;  %6411 = vmatmul.bf16.gmra.mxu1 %v12228_v24  ;;  %6679 = vmatpush.bf16.msrb.mxu3 %v9288_v22 }
 0x719   : > { %6581 = vmatpush.bf16.msrb.mxu1 %v9032_v27 }
 0x71a   : > { %v7131_v21 = vpack.c.bf16 %v6312_v4, %v12227_v9  ;;  %6460 = vmatmul.bf16.gmra.mxu2 %v12229_v6  ;;  %v12236_v9 = vld [vmem:[#allocation34_spill] sm:$0xff] }
 0x71c   : > { %6509 = vmatmul.bf16.gmra.mxu3 %v12230_v8  ;;  %7163 = vst [vmem:[%s11543_s28 + $0x90] sm:$0xff] %v7131_v21  ;;  %v6169_v62 = vpop.f32.mrf.mxu0  ;;  %v12237_v21 = vld [vmem:[#allocation40_spill] sm:$0xff] }
 0x71d   : > { %v6265_v40 = vpop.f32.mrf.mxu2  ;;  %v6218_v54 = vpop.f32.mrf.mxu1  ;;  %v6170_v15 = vadd.f32 %v6169_v62, %v12231_v47  ;;  %v8508_v62 = vor.u32 %v9707_v17, %v8505_v29  ;;  %v9703_v17 = vld [vmem:[#allocation10 + $0xcc] sm:$0xf] }
 0x71e   : > { %v6266_v50 = vadd.f32 %v6265_v40, %v6217_v2 }
 0x71f   : > { %v6314_v7 = vpop.f32.mrf.mxu3  ;;  %v6219_v32 = vadd.f32 %v6218_v54, %v6170_v15  ;;  %v8892_v54 = vor.u32 %v9803_v33, %v8889_v63  ;;  %6721 = vmatpush.bf16.msra.mxu0 %v8508_v62  ;;  %v9739_v15 = vld [vmem:[#allocation10 + $0x1ec] sm:$0xf]  ;;  %v8873_v62 = vld [vmem:[#allocation10 + $0x3d8] sm:$0xf0] }
 0x720   : > { %v6315_v20 = vadd.f32 %v6314_v7, %v6266_v50 }
 0x721   : > { %6868 = vmatpush.bf16.msra.mxu3 %v8892_v54 }
 0x722   : > { %v7133_v51 = vpack.c.bf16 %v6315_v20, %v12232_v23  ;;  %v12238_v20 = vld [vmem:[#allocation70_spill] sm:$0xff]  ;;  %v8633_v23 = vld [vmem:[#allocation10 + $0x1f8] sm:$0xf0] }
 0x724   : > { %7165 = vst [vmem:[%s11543_s28 + $0xa0] sm:$0xff] %v7133_v51  ;;  %v6172_v43 = vpop.f32.mrf.mxu0  ;;  %v8636_v51 = vor.u32 %v9739_v15, %v8633_v23  ;;  %v9735_v23 = vld [vmem:[#allocation10 + $0x1cc] sm:$0xf] }
 0x725   : > { %v6267_v35 = vpop.f32.mrf.mxu2  ;;  %v6221_v37 = vpop.f32.mrf.mxu1  ;;  %v6173_v11 = vadd.f32 %v6172_v43, %v11521_v26 }
 0x726   : > { %v6268_v31 = vadd.f32 %v6267_v35, %v6219_v32  ;;  %v12239_v32 = vld [vmem:[#allocation32_spill] sm:$0xff]  ;;  %6770 = vmatpush.bf16.msra.mxu1 %v8636_v51  ;;  %v8617_v51 = vld [vmem:[#allocation10 + $0x1d8] sm:$0xf0] }
 0x727   : > { %v6316_v28 = vpop.f32.mrf.mxu3  ;;  %6367 = vmatmul.bf16.gmra.mxu0 %v12233_v13  ;;  %v6222_v2 = vadd.f32 %v6221_v37, %v6173_v11  ;;  %v12240_v11 = vld [vmem:[#allocation23_spill] sm:$0xff] }
 0x728   : > { %v6317_v45 = vadd.f32 %v6316_v28, %v6268_v31  ;;  %6416 = vmatmul.bf16.gmra.mxu1 %v12235_v52 }
 0x72a   : > { %v7135_v4 = vpack.c.bf16 %v6317_v45, %v12234_v18  ;;  %6465 = vmatmul.bf16.gmra.mxu2 %v12236_v9  ;;  %v12241_v18 = vld [vmem:[#allocation38_spill] sm:$0xff] }
 0x72c   : > { %6514 = vmatmul.bf16.gmra.mxu3 %v12237_v21  ;;  %7167 = vst [vmem:[%s11543_s28 + $0xb0] sm:$0xff] %v7135_v4  ;;  %v6174_v7 = vpop.f32.mrf.mxu0 }
 0x72d   : > { %v6270_v40 = vpop.f32.mrf.mxu2  ;;  %v6223_v25 = vpop.f32.mrf.mxu1  ;;  %v6175_v47 = vadd.f32 %v6174_v7, %v12238_v20 }
 0x72e   : > { %v6271_v26 = vadd.f32 %v6270_v40, %v6222_v2  ;;  %v12242_v2 = vld [vmem:[#allocation29_spill] sm:$0xff]  ;;  %v9767_v40 = vld [vmem:[#allocation10 + $0x2cc] sm:$0xf] }
 0x72f   : > { %v6319_v50 = vpop.f32.mrf.mxu3  ;;  %v6224_v42 = vadd.f32 %v6223_v25, %v6175_v47  ;;  %v8748_v33 = vor.u32 %v9767_v40, %v8745_v55  ;;  %v12246_v55 = vld [vmem:[#allocation42_spill] sm:$0xff] }
 0x730   : > { %v6320_v22 = vadd.f32 %v6319_v50, %v6271_v26  ;;  %v8489_v26 = vld [vmem:[#allocation10 + $0xd8] sm:$0xf0]  ;;  %v9799_v50 = vld [vmem:[#allocation10 + $0x3cc] sm:$0xf] }
 0x731   : > { %6820 = vmatpush.bf16.msra.mxu2 %v8748_v33  ;;  %v12248_v33 = vld [vmem:[#allocation50_spill] sm:$0xff] }
 0x732   : > { %v7137_v38 = vpack.c.bf16 %v6320_v22, %v12239_v32  ;;  %v8876_v22 = vor.u32 %v9799_v50, %v8873_v62  ;;  %v8620_v32 = vor.u32 %v9735_v23, %v8617_v51  ;;  %v12250_v50 = vld [vmem:[#allocation66_spill] sm:$0xff]  ;;  %v9699_v62 = vld [vmem:[#allocation10 + $0xac] sm:$0xf] }
 0x734   : > { %7169 = vst [vmem:[%s11543_s28 + $0xc0] sm:$0xff] %v7137_v38  ;;  %v6177_v28 = vpop.f32.mrf.mxu0  ;;  %6869 = vmatpush.bf16.msra.mxu3 %v8876_v22  ;;  %v12245_v38 = vld [vmem:[#allocation67_spill] sm:$0xff]  ;;  %6771 = vmatpush.bf16.msra.mxu1 %v8620_v32 }
 0x735   : > { %v6272_v35 = vpop.f32.mrf.mxu2  ;;  %v6226_v43 = vpop.f32.mrf.mxu1  ;;  %v6178_v45 = vadd.f32 %v6177_v28, %v11531_v12  ;;  %v8492_v12 = vor.u32 %v9703_v17, %v8489_v26  ;;  %v12247_v17 = vld [vmem:[#allocation68_spill] sm:$0xff]  ;;  %v12249_v26 = vld [vmem:[#allocation58_spill] sm:$0xff] }
 0x736   : > { %v6273_v27 = vadd.f32 %v6272_v35, %v6224_v42  ;;  %v10022_v35 = vld [vmem:[%s11983_s5] sm:$0xf] }
 0x737   : > { %v6321_v31 = vpop.f32.mrf.mxu3  ;;  %6372 = vmatmul.bf16.gmra.mxu0 %v12240_v11  ;;  %v6227_v29 = vadd.f32 %v6226_v43, %v6178_v45 }
 0x738   : > { %v6322_v37 = vadd.f32 %v6321_v31, %v6273_v27  ;;  %6421 = vmatmul.bf16.gmra.mxu1 %v12242_v2  ;;  %6722 = vmatpush.bf16.msra.mxu0 %v8492_v12  ;;  %v11618_v27 = vperm.slane %v10022_v35, 2  ;;  %v8729_v12 = vld [vmem:[#allocation10 + $0x2b8] sm:$0xf0] }
 0x73a   : > { %v7139_v4 = vpack.c.bf16 %v6322_v37, %v12241_v18  ;;  %6470 = vmatmul.bf16.gmra.mxu2 %v12243_v5 }
 0x73c   : > { %6519 = vmatmul.bf16.gmra.mxu3 %v12244_v44  ;;  %7171 = vst [vmem:[%s11543_s28 + $0xd0] sm:$0xff] %v7139_v4  ;;  %v6179_v54 = vpop.f32.mrf.mxu0 }
 0x73d   : > { %v6275_v7 = vpop.f32.mrf.mxu2  ;;  %v6228_v20 = vpop.f32.mrf.mxu1  ;;  %v6180_v15 = vadd.f32 %v6179_v54, %v11533_v39  ;;  %v9795_v54 = vld [vmem:[#allocation10 + $0x3ac] sm:$0xf] }
 0x73e   : > { %v6276_v63 = vadd.f32 %v6275_v7, %v6227_v29  ;;  %v9763_v7 = vld [vmem:[#allocation10 + $0x2ac] sm:$0xf] }
 0x73f   : > { %v6324_v25 = vpop.f32.mrf.mxu3  ;;  %v6229_v31 = vadd.f32 %v6228_v20, %v6180_v15 }
 0x740   : > { %v6325_v47 = vadd.f32 %v6324_v25, %v6276_v63  ;;  %v8732_v63 = vor.u32 %v9763_v7, %v8729_v12  ;;  %v8473_v25 = vld [vmem:[#allocation10 + $0xb8] sm:$0xf0]  ;;  %v12251_v12 = vld [vmem:[#allocation43_spill] sm:$0xff] }
 0x741   : > { %v8476_v20 = vor.u32 %v9699_v62, %v8473_v25  ;;  %v12252_v62 = vld [vmem:[#allocation51_spill] sm:$0xff]  ;;  %v12254_v25 = vld [vmem:[#allocation18_spill] sm:$0xff] }
 0x742   : > { %v7141_v42 = vpack.c.bf16 %v6325_v47, %v12245_v38  ;;  %v8857_v47 = vld [vmem:[#allocation10 + $0x3b8] sm:$0xf0]  ;;  %6821 = vmatpush.bf16.msra.mxu2 %v8732_v63  ;;  %v12253_v63 = vld [vmem:[#allocation59_spill] sm:$0xff] }
 0x743   : > { %v8860_v32 = vor.u32 %v9795_v54, %v8857_v47  ;;  %6723 = vmatpush.bf16.msra.mxu0 %v8476_v20  ;;  %v9759_v54 = vld [vmem:[#allocation10 + $0x28c] sm:$0xf] }
 0x744   : > { %7173 = vst [vmem:[%s11543_s28 + $0xe0] sm:$0xff] %v7141_v42  ;;  %v6338_v39 = vpop.f32.mrf.mxu0  ;;  %v9695_v20 = vld [vmem:[#allocation10 + $0x8c] sm:$0xf] }
 0x745   : > { %v6277_v28 = vpop.f32.mrf.mxu2  ;;  %v6339_v45 = vadd.f32 %v6338_v39, %v11618_v27  ;;  %v6387_v18 = vpop.f32.mrf.mxu1  ;;  %6870 = vmatpush.bf16.msra.mxu3 %v8860_v32 }
 0x746   : > { %v6278_v43 = vadd.f32 %v6277_v28, %v6229_v31  ;;  %v9731_v31 = vld [vmem:[#allocation10 + $0x1ac] sm:$0xf]  ;;  %v8601_v28 = vld [vmem:[#allocation10 + $0x1b8] sm:$0xf0] }
 0x747   : > { %v6326_v37 = vpop.f32.mrf.mxu3  ;;  %v6388_v40 = vadd.f32 %v6387_v18, %v6339_v45  ;;  %6533 = vmatmul.bf16.vlgmr.msrb.gmra.mxu0 %v12246_v55 }
 0x748   : > { %v6327_v4 = vadd.f32 %v6326_v37, %v6278_v43  ;;  %6582 = vmatmul.bf16.vlgmr.msrb.gmra.mxu1 %v12248_v33  ;;  %v8604_v37 = vor.u32 %v9731_v31, %v8601_v28 }
 0x74a   : > { %v7143_v29 = vpack.c.bf16 %v6327_v4, %v12247_v17  ;;  %6631 = vmatmul.bf16.vlgmr.msrb.gmra.mxu2 %v12249_v26  ;;  %6772 = vmatpush.bf16.msra.mxu1 %v8604_v37 }
 0x74c   : > { %6680 = vmatmul.bf16.vlgmr.msrb.gmra.mxu3 %v12250_v50  ;;  %7175 = vst [vmem:[%s11543_s28 + $0xf0] sm:$0xff] %v7143_v29  ;;  %v6340_v51 = vpop.f32.mrf.mxu0 }
 0x74d   : > { %v6436_v22 = vpop.f32.mrf.mxu2  ;;  %v6341_v38 = vadd.f32 %v6340_v51, %v11618_v27  ;;  %v6389_v42 = vpop.f32.mrf.mxu1  ;;  %v8841_v51 = vld [vmem:[#allocation10 + $0x398] sm:$0xf0] }
 0x74e   : > { %v6437_v15 = vadd.f32 %v6436_v22, %v6388_v40  ;;  %v8713_v22 = vld [vmem:[#allocation10 + $0x298] sm:$0xf0] }
 0x74f   : > { %v6485_v23 = vpop.f32.mrf.mxu3  ;;  %v6390_v43 = vadd.f32 %v6389_v42, %v6341_v38  ;;  %v8716_v47 = vor.u32 %v9759_v54, %v8713_v22 }
 0x750   : > { %v11629_v35 = vadd.f32 %v6485_v23, %v6437_v15  ;;  %v8457_v15 = vld [vmem:[#allocation10 + $0x98] sm:$0xf0]  ;;  %v9791_v23 = vld [vmem:[#allocation10 + $0x38c] sm:$0xf] }
 0x751   : > { %v8460_v38 = vor.u32 %v9695_v20, %v8457_v15  ;;  %v8844_v42 = vor.u32 %v9791_v23, %v8841_v51  ;;  %6822 = vmatpush.bf16.msra.mxu2 %v8716_v47 }
 0x753   : > { %6724 = vmatpush.bf16.msra.mxu0 %v8460_v38  ;;  %6871 = vmatpush.bf16.msra.mxu3 %v8844_v42  ;;  %v12256_v38 = vld [vmem:[#allocation52_spill] sm:$0xff] }
 0x754   : > { %v6343_v4 = vpop.f32.mrf.mxu0  ;;  %v12257_v42 = vld [vmem:[#allocation60_spill] sm:$0xff] }
 0x755   : > { %v6438_v39 = vpop.f32.mrf.mxu2  ;;  %v6344_v40 = vadd.f32 %v6343_v4, %v11618_v27  ;;  %v6392_v17 = vpop.f32.mrf.mxu1  ;;  %v8585_v4 = vld [vmem:[#allocation10 + $0x198] sm:$0xf0] }
 0x756   : > { %v6439_v45 = vadd.f32 %v6438_v39, %v6390_v43 }
 0x757   : > { %v6487_v18 = vpop.f32.mrf.mxu3  ;;  %v6393_v7 = vadd.f32 %v6392_v17, %v6344_v40  ;;  %6538 = vmatmul.bf16.gmra.mxu0 %v12251_v12 }
 0x758   : > { %v11632_v29 = vadd.f32 %v6487_v18, %v6439_v45  ;;  %6587 = vmatmul.bf16.gmra.mxu1 %v12252_v62  ;;  %v9727_v18 = vld [vmem:[#allocation10 + $0x18c] sm:$0xf] }
 0x759   : > { %v8588_v17 = vor.u32 %v9727_v18, %v8585_v4  ;;  %v8441_v18 = vld [vmem:[#allocation10 + $0x78] sm:$0xf0]  ;;  %v9787_v4 = vld [vmem:[#allocation10 + $0x36c] sm:$0xf] }
 0x75a   : > { %6636 = vmatmul.bf16.gmra.mxu2 %v12253_v63 }
 0x75b   : > { %6773 = vmatpush.bf16.msra.mxu1 %v8588_v17 }
 0x75c   : > { %6685 = vmatmul.bf16.gmra.mxu3 %v12254_v25  ;;  %v6345_v43 = vpop.f32.mrf.mxu0 }
 0x75d   : > { %v6441_v32 = vpop.f32.mrf.mxu2  ;;  %v6346_v37 = vadd.f32 %v6345_v43, %v11618_v27  ;;  %v6394_v39 = vpop.f32.mrf.mxu1  ;;  %v8697_v43 = vld [vmem:[#allocation10 + $0x278] sm:$0xf0] }
 0x75e   : > { %v6442_v31 = vadd.f32 %v6441_v32, %v6393_v7  ;;  %v12255_v32 = vld [vmem:[#allocation44_spill] sm:$0xff] }
 0x75f   : > { %v6490_v28 = vpop.f32.mrf.mxu3  ;;  %v6395_v40 = vadd.f32 %v6394_v39, %v6346_v37  ;;  %v9691_v37 = vld [vmem:[#allocation10 + $0x6c] sm:$0xf] }
 0x760   : > { %v11639_v45 = vadd.f32 %v6490_v28, %v6442_v31  ;;  %v12258_v31 = vld [vmem:[#allocation24_spill] sm:$0xff]  ;;  %v9755_v28 = vld [vmem:[#allocation10 + $0x26c] sm:$0xf] }
 0x761   : > { %v8700_v39 = vor.u32 %v9755_v28, %v8697_v43 }
 0x763   : > { %6823 = vmatpush.bf16.msra.mxu2 %v8700_v39 }
 0x764   : > { %v6348_v15 = vpop.f32.mrf.mxu0 }
 0x765   : > { %v6443_v54 = vpop.f32.mrf.mxu2  ;;  %v6349_v7 = vadd.f32 %v6348_v15, %v11618_v27  ;;  %v6397_v23 = vpop.f32.mrf.mxu1 }
 0x766   : > { %v6444_v22 = vadd.f32 %v6443_v54, %v6395_v40  ;;  %v8825_v40 = vld [vmem:[#allocation10 + $0x378] sm:$0xf0]  ;;  %v8444_v54 = vor.u32 %v9691_v37, %v8441_v18 }
 0x767   : > { %v6492_v20 = vpop.f32.mrf.mxu3  ;;  %v6398_v51 = vadd.f32 %v6397_v23, %v6349_v7  ;;  %6543 = vmatmul.bf16.gmra.mxu0 %v12255_v32  ;;  %v8569_v32 = vld [vmem:[#allocation10 + $0x178] sm:$0xf0] }
 0x768   : > { %v11642_v47 = vadd.f32 %v6492_v20, %v6444_v22  ;;  %6592 = vmatmul.bf16.gmra.mxu1 %v12256_v38  ;;  %v8828_v22 = vor.u32 %v9787_v4, %v8825_v40  ;;  %6725 = vmatpush.bf16.msra.mxu0 %v8444_v54  ;;  %v12260_v54 = vld [vmem:[#allocation53_spill] sm:$0xff] }
 0x76a   : > { %6641 = vmatmul.bf16.gmra.mxu2 %v12257_v42  ;;  %6872 = vmatpush.bf16.msra.mxu3 %v8828_v22  ;;  %v9723_v42 = vld [vmem:[#allocation10 + $0x16c] sm:$0xf]  ;;  %v12261_v22 = vld [vmem:[#allocation61_spill] sm:$0xff] }
 0x76b   : > { %v8572_v43 = vor.u32 %v9723_v42, %v8569_v32  ;;  %v9751_v32 = vld [vmem:[#allocation10 + $0x24c] sm:$0xf] }
 0x76c   : > { %6690 = vmatmul.bf16.gmra.mxu3 %v12258_v31  ;;  %v6350_v7 = vpop.f32.mrf.mxu0  ;;  %v9687_v42 = vld [vmem:[#allocation10 + $0x4c] sm:$0xf] }
 0x76d   : > { %v6446_v17 = vpop.f32.mrf.mxu2  ;;  %v6351_v23 = vadd.f32 %v6350_v7, %v11618_v27  ;;  %v6399_v38 = vpop.f32.mrf.mxu1  ;;  %6774 = vmatpush.bf16.msra.mxu1 %v8572_v43  ;;  %v9783_v7 = vld [vmem:[#allocation10 + $0x34c] sm:$0xf] }
 0x76e   : > { %v6447_v20 = vadd.f32 %v6446_v17, %v6398_v51  ;;  %v12259_v17 = vld [vmem:[#allocation45_spill] sm:$0xff] }
 0x76f   : > { %v6495_v15 = vpop.f32.mrf.mxu3  ;;  %v6400_v28 = vadd.f32 %v6399_v38, %v6351_v23  ;;  %v8681_v38 = vld [vmem:[#allocation10 + $0x258] sm:$0xf0] }
 0x770   : > { %v11649_v31 = vadd.f32 %v6495_v15, %v6447_v20  ;;  %v12262_v20 = vld [vmem:[#allocation30_spill] sm:$0xff]  ;;  %v8425_v15 = vld [vmem:[#allocation10 + $0x58] sm:$0xf0] }
 0x771   : > { %v8809_v23 = vld [vmem:[#allocation10 + $0x358] sm:$0xf0]  ;;  %v8428_v43 = vor.u32 %v9687_v42, %v8425_v15 }
 0x773   : > { %6726 = vmatpush.bf16.msra.mxu0 %v8428_v43  ;;  %v12264_v43 = vld [vmem:[#allocation54_spill] sm:$0xff] }
 0x774   : > { %v6353_v18 = vpop.f32.mrf.mxu0 }
 0x775   : > { %v6448_v25 = vpop.f32.mrf.mxu2  ;;  %v6354_v51 = vadd.f32 %v6353_v18, %v11618_v27  ;;  %v6402_v4 = vpop.f32.mrf.mxu1 }
 0x776   : > { %v6449_v63 = vadd.f32 %v6448_v25, %v6400_v28  ;;  %v8684_v25 = vor.u32 %v9751_v32, %v8681_v38 }
 0x777   : > { %v6497_v37 = vpop.f32.mrf.mxu3  ;;  %v6403_v40 = vadd.f32 %v6402_v4, %v6354_v51  ;;  %6548 = vmatmul.bf16.gmra.mxu0 %v12259_v17  ;;  %v8553_v17 = vld [vmem:[#allocation10 + $0x158] sm:$0xf0] }
 0x778   : > { %v11652_v39 = vadd.f32 %v6497_v37, %v6449_v63  ;;  %6597 = vmatmul.bf16.gmra.mxu1 %v12260_v54  ;;  %v8812_v63 = vor.u32 %v9783_v7, %v8809_v23  ;;  %6824 = vmatpush.bf16.msra.mxu2 %v8684_v25 }
 0x77a   : > { %6646 = vmatmul.bf16.gmra.mxu2 %v12261_v22  ;;  %6873 = vmatpush.bf16.msra.mxu3 %v8812_v63  ;;  %v9719_v22 = vld [vmem:[#allocation10 + $0x14c] sm:$0xf]  ;;  %v12265_v63 = vld [vmem:[#allocation62_spill] sm:$0xff] }
 0x77b   : > { %v8556_v38 = vor.u32 %v9719_v22, %v8553_v17  ;;  %v9747_v17 = vld [vmem:[#allocation10 + $0x22c] sm:$0xf] }
 0x77c   : > { %6695 = vmatmul.bf16.gmra.mxu3 %v12262_v20  ;;  %v6355_v51 = vpop.f32.mrf.mxu0  ;;  %v9683_v22 = vld [vmem:[#allocation10 + $0x2c] sm:$0xf] }
 0x77d   : > { %v6451_v28 = vpop.f32.mrf.mxu2  ;;  %v6356_v4 = vadd.f32 %v6355_v51, %v11618_v27  ;;  %v6404_v54 = vpop.f32.mrf.mxu1  ;;  %6775 = vmatpush.bf16.msra.mxu1 %v8556_v38  ;;  %v9779_v51 = vld [vmem:[#allocation10 + $0x32c] sm:$0xf] }
 0x77e   : > { %v6452_v37 = vadd.f32 %v6451_v28, %v6403_v40  ;;  %v12263_v28 = vld [vmem:[#allocation46_spill] sm:$0xff] }
 0x77f   : > { %v6500_v18 = vpop.f32.mrf.mxu3  ;;  %v6405_v32 = vadd.f32 %v6404_v54, %v6356_v4  ;;  %v8665_v54 = vld [vmem:[#allocation10 + $0x238] sm:$0xf0] }
 0x780   : > { %v11659_v20 = vadd.f32 %v6500_v18, %v6452_v37  ;;  %v12266_v37 = vld [vmem:[#allocation36_spill] sm:$0xff]  ;;  %v8409_v18 = vld [vmem:[#allocation10 + $0x38] sm:$0xf0] }
 0x781   : > { %v8793_v4 = vld [vmem:[#allocation10 + $0x338] sm:$0xf0]  ;;  %v8412_v38 = vor.u32 %v9683_v22, %v8409_v18 }
 0x783   : > { %6727 = vmatpush.bf16.msra.mxu0 %v8412_v38  ;;  %v12268_v38 = vld [vmem:[#allocation55_spill] sm:$0xff] }
 0x784   : > { %v6358_v15 = vpop.f32.mrf.mxu0 }
 0x785   : > { %v6453_v62 = vpop.f32.mrf.mxu2  ;;  %v6359_v40 = vadd.f32 %v6358_v15, %v11618_v27  ;;  %v6407_v7 = vpop.f32.mrf.mxu1 }
 0x786   : > { %v6454_v12 = vadd.f32 %v6453_v62, %v6405_v32  ;;  %v8668_v62 = vor.u32 %v9747_v17, %v8665_v54 }
 0x787   : > { %v6502_v42 = vpop.f32.mrf.mxu3  ;;  %v6408_v23 = vadd.f32 %v6407_v7, %v6359_v40  ;;  %6553 = vmatmul.bf16.gmra.mxu0 %v12263_v28  ;;  %v8537_v28 = vld [vmem:[#allocation10 + $0x138] sm:$0xf0] }
 0x788   : > { %v11662_v25 = vadd.f32 %v6502_v42, %v6454_v12  ;;  %6602 = vmatmul.bf16.gmra.mxu1 %v12264_v43  ;;  %v8796_v12 = vor.u32 %v9779_v51, %v8793_v4  ;;  %6825 = vmatpush.bf16.msra.mxu2 %v8668_v62 }
 0x78a   : > { %6651 = vmatmul.bf16.gmra.mxu2 %v12265_v63  ;;  %6874 = vmatpush.bf16.msra.mxu3 %v8796_v12  ;;  %v9715_v63 = vld [vmem:[#allocation10 + $0x12c] sm:$0xf] }
 0x78b   : > { %v8540_v54 = vor.u32 %v9715_v63, %v8537_v28  ;;  %v12269_v12 = vld [vmem:[#allocation63_spill] sm:$0xff] }
 0x78c   : > { %6700 = vmatmul.bf16.gmra.mxu3 %v12266_v37  ;;  %v6360_v40 = vpop.f32.mrf.mxu0  ;;  %v9743_v28 = vld [vmem:[#allocation10 + $0x20c] sm:$0xf] }
 0x78d   : > { %v6456_v32 = vpop.f32.mrf.mxu2  ;;  %v6361_v7 = vadd.f32 %v6360_v40, %v11618_v27  ;;  %v6409_v43 = vpop.f32.mrf.mxu1  ;;  %6776 = vmatpush.bf16.msra.mxu1 %v8540_v54  ;;  %v9679_v63 = vld [vmem:[#allocation10 + $0xc] sm:$0xf] }
 0x78e   : > { %v6457_v42 = vadd.f32 %v6456_v32, %v6408_v23  ;;  %v12267_v32 = vld [vmem:[#allocation47_spill] sm:$0xff] }
 0x78f   : > { %v6505_v15 = vpop.f32.mrf.mxu3  ;;  %v6410_v17 = vadd.f32 %v6409_v43, %v6361_v7  ;;  %v8649_v43 = vld [vmem:[#allocation10 + $0x218] sm:$0xf0]  ;;  %v9775_v40 = vld [vmem:[#allocation10 + $0x30c] sm:$0xf] }
 0x790   : > { %v11669_v37 = vadd.f32 %v6505_v15, %v6457_v42  ;;  %v12270_v42 = vld [vmem:[#allocation19_spill] sm:$0xff]  ;;  %v8393_v15 = vld [vmem:[#allocation10 + $0x18] sm:$0xf0] }
 0x791   : > { %v8777_v7 = vld [vmem:[#allocation10 + $0x318] sm:$0xf0]  ;;  %v8396_v54 = vor.u32 %v9679_v63, %v8393_v15 }
 0x793   : > { %6728 = vmatpush.bf16.msra.mxu0 %v8396_v54  ;;  %v12272_v54 = vld [vmem:[#allocation56_spill] sm:$0xff] }
 0x794   : > { %v6363_v18 = vpop.f32.mrf.mxu0 }
 0x795   : > { %v6458_v50 = vpop.f32.mrf.mxu2  ;;  %v6364_v23 = vadd.f32 %v6363_v18, %v11618_v27  ;;  %v6412_v51 = vpop.f32.mrf.mxu1 }
 0x796   : > { %v6459_v26 = vadd.f32 %v6458_v50, %v6410_v17  ;;  %v8652_v50 = vor.u32 %v9743_v28, %v8649_v43 }
 0x797   : > { %v6507_v22 = vpop.f32.mrf.mxu3  ;;  %v6413_v4 = vadd.f32 %v6412_v51, %v6364_v23  ;;  %6558 = vmatmul.bf16.gmra.mxu0 %v12267_v32  ;;  %v8521_v32 = vld [vmem:[#allocation10 + $0x118] sm:$0xf0] }
 0x798   : > { %v11672_v62 = vadd.f32 %v6507_v22, %v6459_v26  ;;  %6607 = vmatmul.bf16.gmra.mxu1 %v12268_v38  ;;  %v8780_v26 = vor.u32 %v9775_v40, %v8777_v7  ;;  %6826 = vmatpush.bf16.msra.mxu2 %v8652_v50 }
 0x79a   : > { %6656 = vmatmul.bf16.gmra.mxu2 %v12269_v12  ;;  %6875 = vmatpush.bf16.msra.mxu3 %v8780_v26  ;;  %v9711_v12 = vld [vmem:[#allocation10 + $0x10c] sm:$0xf]  ;;  %v12273_v26 = vld [vmem:[#allocation64_spill] sm:$0xff] }
 0x79b   : > { %v8524_v43 = vor.u32 %v9711_v12, %v8521_v32  ;;  %v9899_v32 = vld [vmem:[#allocation10 + $0x6ec] sm:$0xf] }
 0x79c   : > { %6705 = vmatmul.bf16.gmra.mxu3 %v12270_v42  ;;  %v6365_v23 = vpop.f32.mrf.mxu0  ;;  %v9835_v12 = vld [vmem:[#allocation10 + $0x4ec] sm:$0xf] }
 0x79d   : > { %v6461_v17 = vpop.f32.mrf.mxu2  ;;  %v6366_v51 = vadd.f32 %v6365_v23, %v11618_v27  ;;  %v6414_v38 = vpop.f32.mrf.mxu1  ;;  %6777 = vmatpush.bf16.msra.mxu1 %v8524_v43  ;;  %v9931_v23 = vld [vmem:[#allocation10 + $0x7ec] sm:$0xf] }
 0x79e   : > { %v6462_v22 = vadd.f32 %v6461_v17, %v6413_v4  ;;  %v12271_v17 = vld [vmem:[#allocation48_spill] sm:$0xff] }
 0x79f   : > { %v6510_v18 = vpop.f32.mrf.mxu3  ;;  %v6415_v28 = vadd.f32 %v6414_v38, %v6366_v51  ;;  %v9273_v38 = vld [vmem:[#allocation10 + $0x6f8] sm:$0xf0] }
 0x7a0   : > { %v11679_v42 = vadd.f32 %v6510_v18, %v6462_v22  ;;  %v12274_v22 = vld [vmem:[#allocation25_spill] sm:$0xff] }
 0x7a1   : > { %v9017_v18 = vld [vmem:[#allocation10 + $0x4f8] sm:$0xf0] }
 0x7a2   : > { %v9401_v51 = vld [vmem:[#allocation10 + $0x7f8] sm:$0xf0]  ;;  %v9020_v43 = vor.u32 %v9835_v12, %v9017_v18 }
 0x7a4   : > { %v6368_v15 = vpop.f32.mrf.mxu0  ;;  %6917 = vmatpush.bf16.msrb.mxu0 %v9020_v43  ;;  %v12276_v43 = vld [vmem:[#allocation57_spill] sm:$0xff] }
 0x7a5   : > { %v6463_v33 = vpop.f32.mrf.mxu2  ;;  %v6369_v4 = vadd.f32 %v6368_v15, %v11618_v27  ;;  %v6417_v40 = vpop.f32.mrf.mxu1 }
 0x7a6   : > { %v6464_v55 = vadd.f32 %v6463_v33, %v6415_v28  ;;  %v9276_v33 = vor.u32 %v9899_v32, %v9273_v38 }
 0x7a7   : > { %v6512_v63 = vpop.f32.mrf.mxu3  ;;  %v6418_v7 = vadd.f32 %v6417_v40, %v6369_v4  ;;  %6563 = vmatmul.bf16.gmra.mxu0 %v12271_v17  ;;  %v9145_v17 = vld [vmem:[#allocation10 + $0x5f8] sm:$0xf0] }
 0x7a8   : > { %v11682_v50 = vadd.f32 %v6512_v63, %v6464_v55  ;;  %6612 = vmatmul.bf16.gmra.mxu1 %v12272_v54  ;;  %v9404_v55 = vor.u32 %v9931_v23, %v9401_v51  ;;  %7015 = vmatpush.bf16.msrb.mxu2 %v9276_v33 }
 0x7aa   : > { %6661 = vmatmul.bf16.gmra.mxu2 %v12273_v26  ;;  %7064 = vmatpush.bf16.msrb.mxu3 %v9404_v55  ;;  %v9867_v26 = vld [vmem:[#allocation10 + $0x5ec] sm:$0xf]  ;;  %v12277_v55 = vld [vmem:[#allocation65_spill] sm:$0xff] }
 0x7ab   : > { %v9148_v38 = vor.u32 %v9867_v26, %v9145_v17  ;;  %v9895_v17 = vld [vmem:[#allocation10 + $0x6cc] sm:$0xf] }
 0x7ac   : > { %6710 = vmatmul.bf16.gmra.mxu3 %v12274_v22  ;;  %v6370_v4 = vpop.f32.mrf.mxu0  ;;  %v9831_v26 = vld [vmem:[#allocation10 + $0x4cc] sm:$0xf] }
 0x7ad   : > { %v6466_v28 = vpop.f32.mrf.mxu2  ;;  %v6371_v40 = vadd.f32 %v6370_v4, %v11618_v27  ;;  %v6419_v54 = vpop.f32.mrf.mxu1  ;;  %6966 = vmatpush.bf16.msrb.mxu1 %v9148_v38  ;;  %v9927_v4 = vld [vmem:[#allocation10 + $0x7cc] sm:$0xf] }
 0x7ae   : > { %v6467_v63 = vadd.f32 %v6466_v28, %v6418_v7  ;;  %v12275_v28 = vld [vmem:[#allocation49_spill] sm:$0xff] }
 0x7af   : > { %v6515_v15 = vpop.f32.mrf.mxu3  ;;  %v6420_v32 = vadd.f32 %v6419_v54, %v6371_v40  ;;  %v9257_v54 = vld [vmem:[#allocation10 + $0x6d8] sm:$0xf0] }
 0x7b0   : > { %v11689_v22 = vadd.f32 %v6515_v15, %v6467_v63  ;;  %v12278_v63 = vld [vmem:[#allocation31_spill] sm:$0xff]  ;;  %v9001_v15 = vld [vmem:[#allocation10 + $0x4d8] sm:$0xf0] }
 0x7b1   : > { %v9385_v40 = vld [vmem:[#allocation10 + $0x7d8] sm:$0xf0]  ;;  %v9004_v38 = vor.u32 %v9831_v26, %v9001_v15 }
 0x7b3   : > { %6918 = vmatpush.bf16.msrb.mxu0 %v9004_v38  ;;  %v9369_v38 = vld [vmem:[#allocation10 + $0x7b8] sm:$0xf0] }
 0x7b4   : > { %v6373_v18 = vpop.f32.mrf.mxu0 }
 0x7b5   : > { %v6468_v44 = vpop.f32.mrf.mxu2  ;;  %v6374_v7 = vadd.f32 %v6373_v18, %v11618_v27  ;;  %v6422_v23 = vpop.f32.mrf.mxu1 }
 0x7b6   : > { %v6469_v5 = vadd.f32 %v6468_v44, %v6420_v32  ;;  %v9260_v44 = vor.u32 %v9895_v17, %v9257_v54 }
 0x7b7   : > { %v6517_v12 = vpop.f32.mrf.mxu3  ;;  %v6423_v51 = vadd.f32 %v6422_v23, %v6374_v7  ;;  %6568 = vmatmul.bf16.gmra.mxu0 %v12275_v28  ;;  %v9129_v28 = vld [vmem:[#allocation10 + $0x5d8] sm:$0xf0] }
 0x7b8   : > { %v11692_v33 = vadd.f32 %v6517_v12, %v6469_v5  ;;  %6617 = vmatmul.bf16.gmra.mxu1 %v12276_v43  ;;  %v9388_v5 = vor.u32 %v9927_v4, %v9385_v40  ;;  %7016 = vmatpush.bf16.msrb.mxu2 %v9260_v44  ;;  %v8985_v40 = vld [vmem:[#allocation10 + $0x4b8] sm:$0xf0] }
 0x7ba   : > { %6666 = vmatmul.bf16.gmra.mxu2 %v12277_v55  ;;  %7065 = vmatpush.bf16.msrb.mxu3 %v9388_v5  ;;  %v9863_v55 = vld [vmem:[#allocation10 + $0x5cc] sm:$0xf] }
 0x7bb   : > { %v9132_v54 = vor.u32 %v9863_v55, %v9129_v28  ;;  %v9891_v28 = vld [vmem:[#allocation10 + $0x6ac] sm:$0xf] }
 0x7bc   : > { %6715 = vmatmul.bf16.gmra.mxu3 %v12278_v63  ;;  %v6375_v7 = vpop.f32.mrf.mxu0  ;;  %v9827_v55 = vld [vmem:[#allocation10 + $0x4ac] sm:$0xf] }
 0x7bd   : > { %v6471_v32 = vpop.f32.mrf.mxu2  ;;  %v6376_v23 = vadd.f32 %v6375_v7, %v11618_v27  ;;  %v6424_v43 = vpop.f32.mrf.mxu1  ;;  %6967 = vmatpush.bf16.msrb.mxu1 %v9132_v54  ;;  %v8988_v5 = vor.u32 %v9827_v55, %v8985_v40  ;;  %v9887_v55 = vld [vmem:[#allocation10 + $0x68c] sm:$0xf] }
 0x7be   : > { %v6472_v12 = vadd.f32 %v6471_v32, %v6423_v51  ;;  %v9923_v32 = vld [vmem:[#allocation10 + $0x7ac] sm:$0xf] }
 0x7bf   : > { %v6520_v18 = vpop.f32.mrf.mxu3  ;;  %v6425_v17 = vadd.f32 %v6424_v43, %v6376_v23  ;;  %v9241_v43 = vld [vmem:[#allocation10 + $0x6b8] sm:$0xf0]  ;;  %6919 = vmatpush.bf16.msrb.mxu0 %v8988_v5  ;;  %v9823_v40 = vld [vmem:[#allocation10 + $0x48c] sm:$0xf] }
 0x7c0   : > { %v11699_v63 = vadd.f32 %v6520_v18, %v6472_v12  ;;  %v9113_v23 = vld [vmem:[#allocation10 + $0x5b8] sm:$0xf0] }
 0x7c1   : > { %v9353_v5 = vld [vmem:[#allocation10 + $0x798] sm:$0xf0] }
 0x7c4   : > { %v6534_v15 = vpop.f32.mrf.mxu0 }
 0x7c5   : > { %v6473_v2 = vpop.f32.mrf.mxu2  ;;  %v6535_v51 = vadd.f32 %v6534_v15, %v11629_v35  ;;  %v6583_v4 = vpop.f32.mrf.mxu1 }
 0x7c6   : > { %v6474_v11 = vadd.f32 %v6473_v2, %v6425_v17  ;;  %v9244_v2 = vor.u32 %v9891_v28, %v9241_v43 }
 0x7c7   : > { %v6522_v26 = vpop.f32.mrf.mxu3  ;;  %v6584_v27 = vadd.f32 %v6583_v4, %v6535_v51  ;;  %6729 = vmatmul.bf16.vlgmr.msra.gmra.mxu0 %v10757_v46 }
 0x7c8   : > { %v11702_v44 = vadd.f32 %v6522_v26, %v6474_v11  ;;  %6778 = vmatmul.bf16.vlgmr.msra.gmra.mxu1 %v10824_v30  ;;  %v9372_v11 = vor.u32 %v9923_v32, %v9369_v38  ;;  %7017 = vmatpush.bf16.msrb.mxu2 %v9244_v2  ;;  %v9225_v2 = vld [vmem:[#allocation10 + $0x698] sm:$0xf0] }
 0x7c9   : > { %v9228_v32 = vor.u32 %v9887_v55, %v9225_v2  ;;  %v8969_v38 = vld [vmem:[#allocation10 + $0x498] sm:$0xf0]  ;;  %v9819_v55 = vld [vmem:[#allocation10 + $0x46c] sm:$0xf] }
 0x7ca   : > { %6827 = vmatmul.bf16.vlgmr.msra.gmra.mxu2 %v10893_v34  ;;  %7066 = vmatpush.bf16.msrb.mxu3 %v9372_v11  ;;  %v8972_v11 = vor.u32 %v9823_v40, %v8969_v38  ;;  %v8953_v40 = vld [vmem:[#allocation10 + $0x478] sm:$0xf0] }
 0x7cb   : > { %v9337_v38 = vld [vmem:[#allocation10 + $0x778] sm:$0xf0] }
 0x7cc   : > { %6876 = vmatmul.bf16.vlgmr.msra.gmra.mxu3 %v10960_v41  ;;  %v6536_v7 = vpop.f32.mrf.mxu0  ;;  %v9859_v41 = vld [vmem:[#allocation10 + $0x5ac] sm:$0xf]  ;;  %7018 = vmatpush.bf16.msrb.mxu2 %v9228_v32 }
 0x7cd   : > { %v6632_v35 = vpop.f32.mrf.mxu2  ;;  %v6537_v46 = vadd.f32 %v6536_v7, %v11632_v29  ;;  %v6585_v30 = vpop.f32.mrf.mxu1  ;;  %v9116_v54 = vor.u32 %v9859_v41, %v9113_v23  ;;  %6920 = vmatpush.bf16.msrb.mxu0 %v8972_v11  ;;  %v9915_v32 = vld [vmem:[#allocation10 + $0x76c] sm:$0xf] }
 0x7ce   : > { %v6633_v12 = vadd.f32 %v6632_v35, %v6584_v27  ;;  %v9919_v35 = vld [vmem:[#allocation10 + $0x78c] sm:$0xf] }
 0x7cf   : > { %v6681_v18 = vpop.f32.mrf.mxu3  ;;  %v6586_v17 = vadd.f32 %v6585_v30, %v6537_v46  ;;  %6968 = vmatpush.bf16.msrb.mxu1 %v9116_v54  ;;  %v9097_v30 = vld [vmem:[#allocation10 + $0x598] sm:$0xf0] }
 0x7d0   : > { %v11709_v34 = vadd.f32 %v6681_v18, %v6633_v12  ;;  %v9356_v12 = vor.u32 %v9919_v35, %v9353_v5  ;;  %v8956_v35 = vor.u32 %v9819_v55, %v8953_v40  ;;  %v9340_v5 = vor.u32 %v9915_v32, %v9337_v38  ;;  %v9065_v38 = vld [vmem:[#allocation10 + $0x558] sm:$0xf0] }
 0x7d2   : > { %7067 = vmatpush.bf16.msrb.mxu3 %v9356_v12  ;;  %6921 = vmatpush.bf16.msrb.mxu0 %v8956_v35 }
 0x7d4   : > { %v6539_v4 = vpop.f32.mrf.mxu0 }
 0x7d5   : > { %v6634_v26 = vpop.f32.mrf.mxu2  ;;  %v6540_v27 = vadd.f32 %v6539_v4, %v11639_v45  ;;  %v6588_v28 = vpop.f32.mrf.mxu1 }
 0x7d6   : > { %v6635_v15 = vadd.f32 %v6634_v26, %v6586_v17  ;;  %7068 = vmatpush.bf16.msrb.mxu3 %v9340_v5 }
 0x7d7   : > { %v6683_v51 = vpop.f32.mrf.mxu3  ;;  %v6589_v29 = vadd.f32 %v6588_v28, %v6540_v27  ;;  %6734 = vmatmul.bf16.gmra.mxu0 %v10765_v0  ;;  %v9883_v28 = vld [vmem:[#allocation10 + $0x66c] sm:$0xf] }
 0x7d8   : > { %v11712_v43 = vadd.f32 %v6683_v51, %v6635_v15  ;;  %6783 = vmatmul.bf16.gmra.mxu1 %v10832_v1 }
 0x7da   : > { %6832 = vmatmul.bf16.gmra.mxu2 %v10901_v16 }
 0x7dc   : > { %6881 = vmatmul.bf16.gmra.mxu3 %v10968_v36  ;;  %v6541_v46 = vpop.f32.mrf.mxu0  ;;  %v9855_v36 = vld [vmem:[#allocation10 + $0x58c] sm:$0xf] }
 0x7dd   : > { %v6637_v45 = vpop.f32.mrf.mxu2  ;;  %v6542_v0 = vadd.f32 %v6541_v46, %v11642_v47  ;;  %v6590_v1 = vpop.f32.mrf.mxu1  ;;  %v9100_v23 = vor.u32 %v9855_v36, %v9097_v30 }
 0x7de   : > { %v6638_v18 = vadd.f32 %v6637_v45, %v6589_v29  ;;  %v9209_v29 = vld [vmem:[#allocation10 + $0x678] sm:$0xf0] }
 0x7df   : > { %v6686_v7 = vpop.f32.mrf.mxu3  ;;  %v6591_v41 = vadd.f32 %v6590_v1, %v6542_v0  ;;  %6969 = vmatpush.bf16.msrb.mxu1 %v9100_v23  ;;  %v9212_v2 = vor.u32 %v9883_v28, %v9209_v29  ;;  %v9321_v28 = vld [vmem:[#allocation10 + $0x758] sm:$0xf0] }
 0x7e0   : > { %v11719_v16 = vadd.f32 %v6686_v7, %v6638_v18  ;;  %v9081_v18 = vld [vmem:[#allocation10 + $0x578] sm:$0xf0] }
 0x7e1   : > { %7019 = vmatpush.bf16.msrb.mxu2 %v9212_v2 }
 0x7e4   : > { %v6544_v15 = vpop.f32.mrf.mxu0 }
 0x7e5   : > { %v6639_v17 = vpop.f32.mrf.mxu2  ;;  %v6545_v51 = vadd.f32 %v6544_v15, %v11649_v31  ;;  %v6593_v4 = vpop.f32.mrf.mxu1  ;;  %v9815_v15 = vld [vmem:[#allocation10 + $0x44c] sm:$0xf] }
 0x7e6   : > { %v6640_v54 = vadd.f32 %v6639_v17, %v6591_v41 }
 0x7e7   : > { %v6688_v26 = vpop.f32.mrf.mxu3  ;;  %v6594_v47 = vadd.f32 %v6593_v4, %v6545_v51  ;;  %6739 = vmatmul.bf16.gmra.mxu0 %v12137_v49  ;;  %v8937_v4 = vld [vmem:[#allocation10 + $0x458] sm:$0xf0] }
 0x7e8   : > { %v11722_v27 = vadd.f32 %v6688_v26, %v6640_v54  ;;  %6788 = vmatmul.bf16.gmra.mxu1 %v12138_v3  ;;  %v9879_v54 = vld [vmem:[#allocation10 + $0x64c] sm:$0xf]  ;;  %v9193_v26 = vld [vmem:[#allocation10 + $0x658] sm:$0xf0]  ;;  %v8940_v29 = vor.u32 %v9815_v15, %v8937_v4 }
 0x7e9   : > { %v9196_v51 = vor.u32 %v9879_v54, %v9193_v26  ;;  %v9049_v15 = vld [vmem:[#allocation10 + $0x538] sm:$0xf0] }
 0x7ea   : > { %6837 = vmatmul.bf16.gmra.mxu2 %v12139_v61  ;;  %6922 = vmatpush.bf16.msrb.mxu0 %v8940_v29 }
 0x7eb   : > { %7020 = vmatpush.bf16.msrb.mxu2 %v9196_v51 }
 0x7ec   : > { %6886 = vmatmul.bf16.gmra.mxu3 %v12140_v53  ;;  %v6546_v12 = vpop.f32.mrf.mxu0  ;;  %v9851_v53 = vld [vmem:[#allocation10 + $0x56c] sm:$0xf] }
 0x7ed   : > { %v6642_v31 = vpop.f32.mrf.mxu2  ;;  %v6547_v49 = vadd.f32 %v6546_v12, %v11652_v39  ;;  %v6595_v3 = vpop.f32.mrf.mxu1  ;;  %v9084_v46 = vor.u32 %v9851_v53, %v9081_v18  ;;  %v9875_v18 = vld [vmem:[#allocation10 + $0x62c] sm:$0xf] }
 0x7ee   : > { %v6643_v45 = vadd.f32 %v6642_v31, %v6594_v47  ;;  %v9911_v47 = vld [vmem:[#allocation10 + $0x74c] sm:$0xf] }
 0x7ef   : > { %v6691_v11 = vpop.f32.mrf.mxu3  ;;  %v6596_v7 = vadd.f32 %v6595_v3, %v6547_v49  ;;  %6970 = vmatpush.bf16.msrb.mxu1 %v9084_v46  ;;  %v9324_v55 = vor.u32 %v9911_v47, %v9321_v28  ;;  %v9811_v46 = vld [vmem:[#allocation10 + $0x42c] sm:$0xf] }
 0x7f0   : > { %v11729_v61 = vadd.f32 %v6691_v11, %v6643_v45 }
 0x7f1   : > { %7069 = vmatpush.bf16.msrb.mxu3 %v9324_v55 }
 0x7f4   : > { %v6549_v30 = vpop.f32.mrf.mxu0 }
 0x7f5   : > { %v6644_v0 = vpop.f32.mrf.mxu2  ;;  %v6550_v41 = vadd.f32 %v6549_v30, %v11659_v20  ;;  %v6598_v23 = vpop.f32.mrf.mxu1  ;;  %v9305_v30 = vld [vmem:[#allocation10 + $0x738] sm:$0xf0] }
 0x7f6   : > { %v6645_v1 = vadd.f32 %v6644_v0, %v6596_v7  ;;  %v9177_v7 = vld [vmem:[#allocation10 + $0x638] sm:$0xf0] }
 0x7f7   : > { %v6693_v36 = vpop.f32.mrf.mxu3  ;;  %v6599_v39 = vadd.f32 %v6598_v23, %v6550_v41  ;;  %6744 = vmatmul.bf16.gmra.mxu0 %v12142_v10  ;;  %v9180_v0 = vor.u32 %v9875_v18, %v9177_v7 }
 0x7f8   : > { %v11732_v17 = vadd.f32 %v6693_v36, %v6645_v1  ;;  %6793 = vmatmul.bf16.gmra.mxu1 %v12143_v59  ;;  %v8921_v1 = vld [vmem:[#allocation10 + $0x438] sm:$0xf0]  ;;  %v9907_v36 = vld [vmem:[#allocation10 + $0x72c] sm:$0xf] }
 0x7f9   : > { %v8924_v41 = vor.u32 %v9811_v46, %v8921_v1  ;;  %v9308_v23 = vor.u32 %v9907_v36, %v9305_v30  ;;  %7021 = vmatpush.bf16.msrb.mxu2 %v9180_v0 }
 0x7fa   : > { %6842 = vmatmul.bf16.gmra.mxu2 %v12144_v60 }
 0x7fb   : > { %6923 = vmatpush.bf16.msrb.mxu0 %v8924_v41  ;;  %7070 = vmatpush.bf16.msrb.mxu3 %v9308_v23 }
 0x7fc   : > { %6891 = vmatmul.bf16.gmra.mxu3 %v12145_v48  ;;  %v6551_v32 = vpop.f32.mrf.mxu0  ;;  %v9847_v48 = vld [vmem:[#allocation10 + $0x54c] sm:$0xf] }
 0x7fd   : > { %v6647_v20 = vpop.f32.mrf.mxu2  ;;  %v6552_v10 = vadd.f32 %v6551_v32, %v11662_v25  ;;  %v6600_v59 = vpop.f32.mrf.mxu1  ;;  %v9068_v35 = vor.u32 %v9847_v48, %v9065_v38  ;;  %v9871_v32 = vld [vmem:[#allocation10 + $0x60c] sm:$0xf]  ;;  %v8905_v38 = vld [vmem:[#allocation10 + $0x418] sm:$0xf0] }
 0x7fe   : > { %v6648_v2 = vadd.f32 %v6647_v20, %v6599_v39 }
 0x7ff   : > { %v6696_v40 = vpop.f32.mrf.mxu3  ;;  %v6601_v31 = vadd.f32 %v6600_v59, %v6552_v10  ;;  %6971 = vmatpush.bf16.msrb.mxu1 %v9068_v35  ;;  %v9161_v10 = vld [vmem:[#allocation10 + $0x618] sm:$0xf0]  ;;  %v9807_v59 = vld [vmem:[#allocation10 + $0x40c] sm:$0xf] }
 0x800   : > { %v11739_v60 = vadd.f32 %v6696_v40, %v6648_v2  ;;  %v9164_v48 = vor.u32 %v9871_v32, %v9161_v10  ;;  %v9289_v35 = vld [vmem:[#allocation10 + $0x718] sm:$0xf0] }
 0x802   : > { %7022 = vmatpush.bf16.msrb.mxu2 %v9164_v48  ;;  %v10023_v48 = vld [vmem:[%s11983_s5] sm:$0xf] }
 0x804   : > { %v6554_v12 = vpop.f32.mrf.mxu0 }
 0x805   : > { %v6649_v5 = vpop.f32.mrf.mxu2  ;;  %v6555_v49 = vadd.f32 %v6554_v12, %v11669_v37  ;;  %v6603_v3 = vpop.f32.mrf.mxu1 }
 0x806   : > { %v6650_v45 = vadd.f32 %v6649_v5, %v6601_v31  ;;  %v9903_v31 = vld [vmem:[#allocation10 + $0x70c] sm:$0xf]  ;;  %v8908_v5 = vor.u32 %v9807_v59, %v8905_v38  ;;  %v11784_v38 = vperm.slane %v10023_v48, 3 }
 0x807   : > { %v6698_v11 = vpop.f32.mrf.mxu3  ;;  %v6604_v25 = vadd.f32 %v6603_v3, %v6555_v49  ;;  %6749 = vmatmul.bf16.gmra.mxu0 %v12147_v56  ;;  %v9033_v3 = vld [vmem:[#allocation10 + $0x518] sm:$0xf0] }
 0x808   : > { %v11742_v53 = vadd.f32 %v6698_v11, %v6650_v45  ;;  %6798 = vmatmul.bf16.gmra.mxu1 %v12148_v57  ;;  %v9292_v45 = vor.u32 %v9903_v31, %v9289_v35  ;;  %6924 = vmatpush.bf16.msrb.mxu0 %v8908_v5 }
 0x80a   : > { %6847 = vmatmul.bf16.gmra.mxu2 %v12149_v58  ;;  %7071 = vmatpush.bf16.msrb.mxu3 %v9292_v45 }
 0x80c   : > { %6896 = vmatmul.bf16.gmra.mxu3 %v12150_v14  ;;  %v6556_v26 = vpop.f32.mrf.mxu0  ;;  %v9843_v14 = vld [vmem:[#allocation10 + $0x52c] sm:$0xf] }
 0x80d   : > { %v6652_v37 = vpop.f32.mrf.mxu2  ;;  %v6557_v56 = vadd.f32 %v6556_v26, %v11672_v62  ;;  %v6605_v57 = vpop.f32.mrf.mxu1  ;;  %v9052_v4 = vor.u32 %v9843_v14, %v9049_v15 }
 0x80e   : > { %v6653_v39 = vadd.f32 %v6652_v37, %v6604_v25 }
 0x80f   : > { %v6701_v54 = vpop.f32.mrf.mxu3  ;;  %v6606_v51 = vadd.f32 %v6605_v57, %v6557_v56  ;;  %6972 = vmatpush.bf16.msrb.mxu1 %v9052_v4 }
 0x810   : > { %v11749_v58 = vadd.f32 %v6701_v54, %v6653_v39 }
 0x814   : > { %v6559_v29 = vpop.f32.mrf.mxu0 }
 0x815   : > { %v6654_v47 = vpop.f32.mrf.mxu2  ;;  %v6560_v55 = vadd.f32 %v6559_v29, %v11679_v42  ;;  %v6608_v2 = vpop.f32.mrf.mxu1 }
 0x816   : > { %v6655_v28 = vadd.f32 %v6654_v47, %v6606_v51  ;;  %v12279_v47 = vld [vmem:[#allocation23_spill] sm:$0xff] }
 0x817   : > { %v6703_v20 = vpop.f32.mrf.mxu3  ;;  %v6609_v62 = vadd.f32 %v6608_v2, %v6560_v55  ;;  %6754 = vmatmul.bf16.gmra.mxu0 %v12226_v19 }
 0x818   : > { %v11752_v40 = vadd.f32 %v6703_v20, %v6655_v28  ;;  %6803 = vmatmul.bf16.gmra.mxu1 %v12228_v24  ;;  %v12280_v28 = vld [vmem:[#allocation29_spill] sm:$0xff]  ;;  %v12281_v20 = vld [vmem:[#allocation35_spill] sm:$0xff] }
 0x81a   : > { %6852 = vmatmul.bf16.gmra.mxu2 %v12229_v6 }
 0x81c   : > { %6901 = vmatmul.bf16.gmra.mxu3 %v12230_v8  ;;  %v6561_v49 = vpop.f32.mrf.mxu0  ;;  %v9839_v8 = vld [vmem:[#allocation10 + $0x50c] sm:$0xf] }
 0x81d   : > { %v6657_v42 = vpop.f32.mrf.mxu2  ;;  %v6562_v19 = vadd.f32 %v6561_v49, %v11682_v50  ;;  %v6610_v24 = vpop.f32.mrf.mxu1  ;;  %v9036_v18 = vor.u32 %v9839_v8, %v9033_v3  ;;  %v12283_v49 = vld [vmem:[#allocation42_spill] sm:$0xff] }
 0x81e   : > { %v6658_v11 = vadd.f32 %v6657_v42, %v6609_v62  ;;  %v12286_v8 = vld [vmem:[#allocation66_spill] sm:$0xff] }
 0x81f   : > { %v6706_v12 = vpop.f32.mrf.mxu3  ;;  %v6611_v25 = vadd.f32 %v6610_v24, %v6562_v19  ;;  %6973 = vmatpush.bf16.msrb.mxu1 %v9036_v18  ;;  %v12284_v19 = vld [vmem:[#allocation50_spill] sm:$0xff] }
 0x820   : > { %v11759_v6 = vadd.f32 %v6706_v12, %v6658_v11  ;;  %v12285_v24 = vld [vmem:[#allocation58_spill] sm:$0xff] }
 0x824   : > { %v6564_v1 = vpop.f32.mrf.mxu0 }
 0x825   : > { %v6659_v7 = vpop.f32.mrf.mxu2  ;;  %v6565_v36 = vadd.f32 %v6564_v1, %v11689_v22  ;;  %v6613_v30 = vpop.f32.mrf.mxu1 }
 0x826   : > { %v6660_v46 = vadd.f32 %v6659_v7, %v6611_v25 }
 0x827   : > { %v6708_v0 = vpop.f32.mrf.mxu3  ;;  %v6614_v50 = vadd.f32 %v6613_v30, %v6565_v36  ;;  %6759 = vmatmul.bf16.gmra.mxu0 %v12233_v13 }
 0x828   : > { %v11762_v37 = vadd.f32 %v6708_v0, %v6660_v46  ;;  %6808 = vmatmul.bf16.gmra.mxu1 %v12235_v52 }
 0x82a   : > { %6857 = vmatmul.bf16.gmra.mxu2 %v12236_v9 }
 0x82c   : > { %6906 = vmatmul.bf16.gmra.mxu3 %v12237_v21  ;;  %v6566_v54 = vpop.f32.mrf.mxu0 }
 0x82d   : > { %v6662_v41 = vpop.f32.mrf.mxu2  ;;  %v6567_v26 = vadd.f32 %v6566_v54, %v11692_v33  ;;  %v6615_v56 = vpop.f32.mrf.mxu1  ;;  %v12282_v33 = vld [vmem:[#allocation41_spill] sm:$0xff] }
 0x82e   : > { %v6663_v23 = vadd.f32 %v6662_v41, %v6614_v50 }
 0x82f   : > { %v6711_v39 = vpop.f32.mrf.mxu3  ;;  %v6616_v57 = vadd.f32 %v6615_v56, %v6567_v26 }
 0x830   : > { %v11769_v22 = vadd.f32 %v6711_v39, %v6663_v23 }
 0x834   : > { %v6569_v13 = vpop.f32.mrf.mxu0 }
 0x835   : > { %v6664_v14 = vpop.f32.mrf.mxu2  ;;  %v6570_v52 = vadd.f32 %v6569_v13, %v11699_v63  ;;  %v6618_v4 = vpop.f32.mrf.mxu1 }
 0x836   : > { %v6665_v15 = vadd.f32 %v6664_v14, %v6616_v57  ;;  %v12287_v57 = vld [vmem:[#allocation43_spill] sm:$0xff] }
 0x837   : > { %v6713_v51 = vpop.f32.mrf.mxu3  ;;  %v6619_v21 = vadd.f32 %v6618_v4, %v6570_v52  ;;  %6764 = vmatmul.bf16.gmra.mxu0 %v12279_v47  ;;  %v12288_v14 = vld [vmem:[#allocation51_spill] sm:$0xff] }
 0x838   : > { %v11772_v9 = vadd.f32 %v6713_v51, %v6665_v15  ;;  %6813 = vmatmul.bf16.gmra.mxu1 %v12280_v28  ;;  %v12289_v15 = vld [vmem:[#allocation59_spill] sm:$0xff]  ;;  %v12290_v51 = vld [vmem:[#allocation18_spill] sm:$0xff] }
 0x83a   : > { %6862 = vmatmul.bf16.gmra.mxu2 %v12281_v20 }
 0x83c   : > { %6911 = vmatmul.bf16.gmra.mxu3 %v12282_v33  ;;  %v6571_v62 = vpop.f32.mrf.mxu0 }
 0x83d   : > { %v6667_v29 = vpop.f32.mrf.mxu2  ;;  %v6572_v32 = vadd.f32 %v6571_v62, %v11702_v44  ;;  %v6620_v10 = vpop.f32.mrf.mxu1 }
 0x83e   : > { %v6668_v55 = vadd.f32 %v6667_v29, %v6619_v21 }
 0x83f   : > { %v6716_v2 = vpop.f32.mrf.mxu3  ;;  %v6621_v59 = vadd.f32 %v6620_v10, %v6572_v32 }
 0x840   : > { %v11779_v63 = vadd.f32 %v6716_v2, %v6668_v55 }
 0x844   : > { %v6730_v5 = vpop.f32.mrf.mxu0 }
 0x845   : > { %v6669_v31 = vpop.f32.mrf.mxu2  ;;  %v6731_v45 = vadd.f32 %v6730_v5, %v11784_v38  ;;  %v6779_v11 = vpop.f32.mrf.mxu1  ;;  %v12294_v5 = vld [vmem:[#allocation24_spill] sm:$0xff] }
 0x846   : > { %v6670_v35 = vadd.f32 %v6669_v31, %v6621_v59  ;;  %v12291_v31 = vld [vmem:[#allocation44_spill] sm:$0xff] }
 0x847   : > { %v6718_v42 = vpop.f32.mrf.mxu3  ;;  %v6780_v44 = vadd.f32 %v6779_v11, %v6731_v45  ;;  %6925 = vmatmul.bf16.vlgmr.msrb.gmra.mxu0 %v12283_v49 }
 0x848   : > { %v11787_v12 = vadd.f32 %v6718_v42, %v6670_v35  ;;  %6974 = vmatmul.bf16.vlgmr.msrb.gmra.mxu1 %v12284_v19  ;;  %v12292_v35 = vld [vmem:[#allocation52_spill] sm:$0xff] }
 0x849   : > { %v12293_v42 = vld [vmem:[#allocation60_spill] sm:$0xff] }
 0x84a   : > { %7023 = vmatmul.bf16.vlgmr.msrb.gmra.mxu2 %v12285_v24 }
 0x84c   : > { %7072 = vmatmul.bf16.vlgmr.msrb.gmra.mxu3 %v12286_v8  ;;  %v6732_v7 = vpop.f32.mrf.mxu0 }
 0x84d   : > { %v6828_v3 = vpop.f32.mrf.mxu2  ;;  %v6733_v46 = vadd.f32 %v6732_v7, %v11784_v38  ;;  %v6781_v0 = vpop.f32.mrf.mxu1 }
 0x84e   : > { %v6829_v25 = vadd.f32 %v6828_v3, %v6780_v44 }
 0x84f   : > { %v6877_v18 = vpop.f32.mrf.mxu3  ;;  %v6782_v36 = vadd.f32 %v6781_v0, %v6733_v46 }
 0x850   : > { %v11794_v1 = vadd.f32 %v6877_v18, %v6829_v25 }
 0x854   : > { %v6735_v23 = vpop.f32.mrf.mxu0 }
 0x855   : > { %v6830_v30 = vpop.f32.mrf.mxu2  ;;  %v6736_v39 = vadd.f32 %v6735_v23, %v11784_v38  ;;  %v6784_v54 = vpop.f32.mrf.mxu1  ;;  %v12296_v23 = vld [vmem:[#allocation53_spill] sm:$0xff] }
 0x856   : > { %v6831_v50 = vadd.f32 %v6830_v30, %v6782_v36 }
 0x857   : > { %v6879_v41 = vpop.f32.mrf.mxu3  ;;  %v6785_v56 = vadd.f32 %v6784_v54, %v6736_v39  ;;  %6930 = vmatmul.bf16.gmra.mxu0 %v12287_v57  ;;  %v12297_v39 = vld [vmem:[#allocation61_spill] sm:$0xff]  ;;  %v12298_v54 = vld [vmem:[#allocation30_spill] sm:$0xff] }
 0x858   : > { %v11797_v26 = vadd.f32 %v6879_v41, %v6831_v50  ;;  %6979 = vmatmul.bf16.gmra.mxu1 %v12288_v14  ;;  %v12295_v41 = vld [vmem:[#allocation45_spill] sm:$0xff] }
 0x85a   : > { %7028 = vmatmul.bf16.gmra.mxu2 %v12289_v15 }
 0x85c   : > { %7077 = vmatmul.bf16.gmra.mxu3 %v12290_v51  ;;  %v6737_v21 = vpop.f32.mrf.mxu0 }
 0x85d   : > { %v6833_v13 = vpop.f32.mrf.mxu2  ;;  %v6738_v47 = vadd.f32 %v6737_v21, %v11784_v38  ;;  %v6786_v28 = vpop.f32.mrf.mxu1 }
 0x85e   : > { %v6834_v52 = vadd.f32 %v6833_v13, %v6785_v56 }
 0x85f   : > { %v6882_v4 = vpop.f32.mrf.mxu3  ;;  %v6787_v33 = vadd.f32 %v6786_v28, %v6738_v47 }
 0x860   : > { %v11804_v20 = vadd.f32 %v6882_v4, %v6834_v52 }
 0x864   : > { %v6740_v62 = vpop.f32.mrf.mxu0 }
 0x865   : > { %v6835_v29 = vpop.f32.mrf.mxu2  ;;  %v6741_v32 = vadd.f32 %v6740_v62, %v11784_v38  ;;  %v6789_v10 = vpop.f32.mrf.mxu1 }
 0x866   : > { %v6836_v55 = vadd.f32 %v6835_v29, %v6787_v33 }
 0x867   : > { %v6884_v2 = vpop.f32.mrf.mxu3  ;;  %v6790_v48 = vadd.f32 %v6789_v10, %v6741_v32  ;;  %6935 = vmatmul.bf16.gmra.mxu0 %v12291_v31  ;;  %v12299_v32 = vld [vmem:[#allocation46_spill] sm:$0xff]  ;;  %v12302_v31 = vld [vmem:[#allocation36_spill] sm:$0xff] }
 0x868   : > { %v11807_v59 = vadd.f32 %v6884_v2, %v6836_v55  ;;  %6984 = vmatmul.bf16.gmra.mxu1 %v12292_v35  ;;  %v12300_v10 = vld [vmem:[#allocation54_spill] sm:$0xff] }
 0x86a   : > { %7033 = vmatmul.bf16.gmra.mxu2 %v12293_v42 }
 0x86c   : > { %7082 = vmatmul.bf16.gmra.mxu3 %v12294_v5  ;;  %v6742_v49 = vpop.f32.mrf.mxu0 }
 0x86d   : > { %v6838_v45 = vpop.f32.mrf.mxu2  ;;  %v6743_v19 = vadd.f32 %v6742_v49, %v11784_v38  ;;  %v6791_v24 = vpop.f32.mrf.mxu1 }
 0x86e   : > { %v6839_v11 = vadd.f32 %v6838_v45, %v6790_v48  ;;  %v12301_v48 = vld [vmem:[#allocation62_spill] sm:$0xff] }
 0x86f   : > { %v6887_v44 = vpop.f32.mrf.mxu3  ;;  %v6792_v3 = vadd.f32 %v6791_v24, %v6743_v19 }
 0x870   : > { %v11814_v8 = vadd.f32 %v6887_v44, %v6839_v11 }
 0x874   : > { %v6745_v46 = vpop.f32.mrf.mxu0 }
 0x875   : > { %v6840_v25 = vpop.f32.mrf.mxu2  ;;  %v6746_v0 = vadd.f32 %v6745_v46, %v11784_v38  ;;  %v6794_v36 = vpop.f32.mrf.mxu1 }
 0x876   : > { %v6841_v18 = vadd.f32 %v6840_v25, %v6792_v3 }
 0x877   : > { %v6889_v7 = vpop.f32.mrf.mxu3  ;;  %v6795_v50 = vadd.f32 %v6794_v36, %v6746_v0  ;;  %6940 = vmatmul.bf16.gmra.mxu0 %v12295_v41  ;;  %v12304_v41 = vld [vmem:[#allocation55_spill] sm:$0xff] }
 0x878   : > { %v11817_v30 = vadd.f32 %v6889_v7, %v6841_v18  ;;  %6989 = vmatmul.bf16.gmra.mxu1 %v12296_v23  ;;  %v12305_v23 = vld [vmem:[#allocation63_spill] sm:$0xff] }
 0x87a   : > { %7038 = vmatmul.bf16.gmra.mxu2 %v12297_v39  ;;  %v12306_v39 = vld [vmem:[#allocation19_spill] sm:$0xff] }
 0x87c   : > { %7087 = vmatmul.bf16.gmra.mxu3 %v12298_v54  ;;  %v6747_v15 = vpop.f32.mrf.mxu0 }
 0x87d   : > { %v6843_v56 = vpop.f32.mrf.mxu2  ;;  %v6748_v51 = vadd.f32 %v6747_v15, %v11784_v38  ;;  %v6796_v13 = vpop.f32.mrf.mxu1 }
 0x87e   : > { %v6844_v57 = vadd.f32 %v6843_v56, %v6795_v50  ;;  %v12303_v50 = vld [vmem:[#allocation47_spill] sm:$0xff] }
 0x87f   : > { %v6892_v14 = vpop.f32.mrf.mxu3  ;;  %v6797_v4 = vadd.f32 %v6796_v13, %v6748_v51 }
 0x880   : > { %v11824_v52 = vadd.f32 %v6892_v14, %v6844_v57 }
 0x884   : > { %v6750_v33 = vpop.f32.mrf.mxu0 }
 0x885   : > { %v6845_v21 = vpop.f32.mrf.mxu2  ;;  %v6751_v29 = vadd.f32 %v6750_v33, %v11784_v38  ;;  %v6799_v55 = vpop.f32.mrf.mxu1 }
 0x886   : > { %v6846_v47 = vadd.f32 %v6845_v21, %v6797_v4 }
 0x887   : > { %v6894_v28 = vpop.f32.mrf.mxu3  ;;  %v6800_v62 = vadd.f32 %v6799_v55, %v6751_v29  ;;  %6945 = vmatmul.bf16.gmra.mxu0 %v12299_v32 }
 0x888   : > { %v11827_v2 = vadd.f32 %v6894_v28, %v6846_v47  ;;  %6994 = vmatmul.bf16.gmra.mxu1 %v12300_v10  ;;  %v12307_v10 = vld [vmem:[#allocation48_spill] sm:$0xff] }
 0x88a   : > { %7043 = vmatmul.bf16.gmra.mxu2 %v12301_v48  ;;  %v12308_v48 = vld [vmem:[#allocation56_spill] sm:$0xff] }
 0x88c   : > { %7092 = vmatmul.bf16.gmra.mxu3 %v12302_v31  ;;  %v6752_v45 = vpop.f32.mrf.mxu0  ;;  %v12309_v31 = vld [vmem:[#allocation64_spill] sm:$0xff] }
 0x88d   : > { %v6848_v35 = vpop.f32.mrf.mxu2  ;;  %v6753_v11 = vadd.f32 %v6752_v45, %v11784_v38  ;;  %v6801_v44 = vpop.f32.mrf.mxu1 }
 0x88e   : > { %v6849_v42 = vadd.f32 %v6848_v35, %v6800_v62  ;;  %v12310_v35 = vld [vmem:[#allocation25_spill] sm:$0xff] }
 0x88f   : > { %v6897_v5 = vpop.f32.mrf.mxu3  ;;  %v6802_v19 = vadd.f32 %v6801_v44, %v6753_v11 }
 0x890   : > { %v11834_v49 = vadd.f32 %v6897_v5, %v6849_v42 }
 0x894   : > { %v6755_v18 = vpop.f32.mrf.mxu0 }
 0x895   : > { %v6850_v24 = vpop.f32.mrf.mxu2  ;;  %v6756_v7 = vadd.f32 %v6755_v18, %v11784_v38  ;;  %v6804_v46 = vpop.f32.mrf.mxu1 }
 0x896   : > { %v6851_v3 = vadd.f32 %v6850_v24, %v6802_v19 }
 0x897   : > { %v6899_v25 = vpop.f32.mrf.mxu3  ;;  %v6805_v36 = vadd.f32 %v6804_v46, %v6756_v7  ;;  %6950 = vmatmul.bf16.gmra.mxu0 %v12303_v50 }
 0x898   : > { %v11837_v0 = vadd.f32 %v6899_v25, %v6851_v3  ;;  %6999 = vmatmul.bf16.gmra.mxu1 %v12304_v41 }
 0x89a   : > { %7048 = vmatmul.bf16.gmra.mxu2 %v12305_v23 }
 0x89c   : > { %7097 = vmatmul.bf16.gmra.mxu3 %v12306_v39  ;;  %v6757_v14 = vpop.f32.mrf.mxu0  ;;  %v12311_v39 = vld [vmem:[#allocation49_spill] sm:$0xff] }
 0x89d   : > { %v6853_v54 = vpop.f32.mrf.mxu2  ;;  %v6758_v15 = vadd.f32 %v6757_v14, %v11784_v38  ;;  %v6806_v51 = vpop.f32.mrf.mxu1 }
 0x89e   : > { %v6854_v56 = vadd.f32 %v6853_v54, %v6805_v36  ;;  %v12312_v54 = vld [vmem:[#allocation57_spill] sm:$0xff] }
 0x89f   : > { %v6902_v57 = vpop.f32.mrf.mxu3  ;;  %v6807_v4 = vadd.f32 %v6806_v51, %v6758_v15 }
 0x8a0   : > { %v11844_v13 = vadd.f32 %v6902_v57, %v6854_v56  ;;  %v12313_v56 = vld [vmem:[#allocation65_spill] sm:$0xff]  ;;  %v12314_v57 = vld [vmem:[#allocation31_spill] sm:$0xff] }
 0x8a4   : > { %v6760_v33 = vpop.f32.mrf.mxu0 }
 0x8a5   : > { %v6855_v21 = vpop.f32.mrf.mxu2  ;;  %v6761_v29 = vadd.f32 %v6760_v33, %v11784_v38  ;;  %v6809_v55 = vpop.f32.mrf.mxu1 }
 0x8a6   : > { %v6856_v47 = vadd.f32 %v6855_v21, %v6807_v4 }
 0x8a7   : > { %v6904_v28 = vpop.f32.mrf.mxu3  ;;  %v6810_v32 = vadd.f32 %v6809_v55, %v6761_v29  ;;  %6955 = vmatmul.bf16.gmra.mxu0 %v12307_v10 }
 0x8a8   : > { %v11847_v62 = vadd.f32 %v6904_v28, %v6856_v47  ;;  %7004 = vmatmul.bf16.gmra.mxu1 %v12308_v48 }
 0x8aa   : > { %7053 = vmatmul.bf16.gmra.mxu2 %v12309_v31 }
 0x8ac   : > { %7102 = vmatmul.bf16.gmra.mxu3 %v12310_v35  ;;  %v6762_v11 = vpop.f32.mrf.mxu0 }
 0x8ad   : > { %v6858_v42 = vpop.f32.mrf.mxu2  ;;  %v6763_v44 = vadd.f32 %v6762_v11, %v11784_v38  ;;  %v6811_v19 = vpop.f32.mrf.mxu1 }
 0x8ae   : > { %v6859_v5 = vadd.f32 %v6858_v42, %v6810_v32 }
 0x8af   : > { %v6907_v45 = vpop.f32.mrf.mxu3  ;;  %v6812_v3 = vadd.f32 %v6811_v19, %v6763_v44 }
 0x8b0   : > { %v11854_v24 = vadd.f32 %v6907_v45, %v6859_v5 }
 0x8b4   : > { %v6765_v46 = vpop.f32.mrf.mxu0 }
 0x8b5   : > { %v6860_v25 = vpop.f32.mrf.mxu2  ;;  %v6766_v36 = vadd.f32 %v6765_v46, %v11784_v38  ;;  %v6814_v50 = vpop.f32.mrf.mxu1 }
 0x8b6   : > { %v6861_v18 = vadd.f32 %v6860_v25, %v6812_v3 }
 0x8b7   : > { %v6909_v7 = vpop.f32.mrf.mxu3  ;;  %v6815_v23 = vadd.f32 %v6814_v50, %v6766_v36  ;;  %6960 = vmatmul.bf16.gmra.mxu0 %v12311_v39 }
 0x8b8   : > { %v11857_v41 = vadd.f32 %v6909_v7, %v6861_v18  ;;  %7009 = vmatmul.bf16.gmra.mxu1 %v12312_v54 }
 0x8ba   : > { %7058 = vmatmul.bf16.gmra.mxu2 %v12313_v56 }
 0x8bc   : > { %7107 = vmatmul.bf16.gmra.mxu3 %v12314_v57  ;;  %v6767_v4 = vpop.f32.mrf.mxu0 }
 0x8bd   : > { %v6863_v14 = vpop.f32.mrf.mxu2  ;;  %v6768_v21 = vadd.f32 %v6767_v4, %v11784_v38  ;;  %v6816_v47 = vpop.f32.mrf.mxu1 }
 0x8be   : > { %v6864_v15 = vadd.f32 %v6863_v14, %v6815_v23 }
 0x8bf   : > { %v6912_v51 = vpop.f32.mrf.mxu3  ;;  %v6817_v33 = vadd.f32 %v6816_v47, %v6768_v21 }
 0x8c0   : > { %v11864_v28 = vadd.f32 %v6912_v51, %v6864_v15 }
 0x8c4   : > { %v6926_v10 = vpop.f32.mrf.mxu0 }
 0x8c5   : > { %v6865_v29 = vpop.f32.mrf.mxu2  ;;  %v6975_v48 = vpop.f32.mrf.mxu1  ;;  %v6927_v35 = vadd.f32 %v6926_v10, %v11794_v1 }
 0x8c6   : > { %v6866_v55 = vadd.f32 %v6865_v29, %v6817_v33 }
 0x8c7   : > { %v6914_v32 = vpop.f32.mrf.mxu3  ;;  %v6976_v42 = vadd.f32 %v6975_v48, %v6927_v35 }
 0x8c8   : > { %v11866_v31 = vadd.f32 %v6914_v32, %v6866_v55 }
 0x8cc   : > { %v6928_v38 = vpop.f32.mrf.mxu0 }
 0x8cd   : > { %v7024_v5 = vpop.f32.mrf.mxu2  ;;  %v6977_v44 = vpop.f32.mrf.mxu1  ;;  %v6929_v3 = vadd.f32 %v6928_v38, %v11797_v26 }
 0x8ce   : > { %v7025_v45 = vadd.f32 %v7024_v5, %v6976_v42 }
 0x8cf   : > { %v7073_v11 = vpop.f32.mrf.mxu3  ;;  %v6978_v18 = vadd.f32 %v6977_v44, %v6929_v3 }
 0x8d0   : > { %v7074_v19 = vadd.f32 %v7073_v11, %v7025_v45 }
 0x8d2   : > { %v7114_v25 = vpack.c.bf16 %v7074_v19, %v11709_v34 }
 0x8d4   : > { %7146 = vst [vmem:[%s11543_s28 + $0x8] sm:$0xff] %v7114_v25  ;;  %v6931_v50 = vpop.f32.mrf.mxu0 }
 0x8d5   : > { %v7026_v7 = vpop.f32.mrf.mxu2  ;;  %v6980_v1 = vpop.f32.mrf.mxu1  ;;  %v6932_v39 = vadd.f32 %v6931_v50, %v11804_v20 }
 0x8d6   : > { %v7027_v46 = vadd.f32 %v7026_v7, %v6978_v18 }
 0x8d7   : > { %v7075_v36 = vpop.f32.mrf.mxu3  ;;  %v6981_v56 = vadd.f32 %v6980_v1, %v6932_v39 }
 0x8d8   : > { %v7076_v23 = vadd.f32 %v7075_v36, %v7027_v46 }
 0x8da   : > { %v7116_v54 = vpack.c.bf16 %v7076_v23, %v11712_v43 }
 0x8dc   : > { %7148 = vst [vmem:[%s11543_s28 + $0x18] sm:$0xff] %v7116_v54  ;;  %v6933_v34 = vpop.f32.mrf.mxu0 }
 0x8dd   : > { %v7029_v57 = vpop.f32.mrf.mxu2  ;;  %v6982_v15 = vpop.f32.mrf.mxu1  ;;  %v6934_v4 = vadd.f32 %v6933_v34, %v11807_v59 }
 0x8de   : > { %v7030_v14 = vadd.f32 %v7029_v57, %v6981_v56 }
 0x8df   : > { %v7078_v26 = vpop.f32.mrf.mxu3  ;;  %v6983_v47 = vadd.f32 %v6982_v15, %v6934_v4 }
 0x8e0   : > { %v7079_v51 = vadd.f32 %v7078_v26, %v7030_v14 }
 0x8e2   : > { %v7118_v21 = vpack.c.bf16 %v7079_v51, %v11719_v16 }
 0x8e4   : > { %7150 = vst [vmem:[%s11543_s28 + $0x28] sm:$0xff] %v7118_v21  ;;  %v6936_v43 = vpop.f32.mrf.mxu0 }
 0x8e5   : > { %v7031_v33 = vpop.f32.mrf.mxu2  ;;  %v6985_v55 = vpop.f32.mrf.mxu1  ;;  %v6937_v10 = vadd.f32 %v6936_v43, %v11814_v8 }
 0x8e6   : > { %v7032_v29 = vadd.f32 %v7031_v33, %v6983_v47 }
 0x8e7   : > { %v7080_v20 = vpop.f32.mrf.mxu3  ;;  %v6986_v35 = vadd.f32 %v6985_v55, %v6937_v10 }
 0x8e8   : > { %v7081_v32 = vadd.f32 %v7080_v20, %v7032_v29 }
 0x8ea   : > { %v7120_v48 = vpack.c.bf16 %v7081_v32, %v11722_v27 }
 0x8ec   : > { %7152 = vst [vmem:[%s11543_s28 + $0x38] sm:$0xff] %v7120_v48  ;;  %v6938_v16 = vpop.f32.mrf.mxu0 }
 0x8ed   : > { %v7034_v42 = vpop.f32.mrf.mxu2  ;;  %v6987_v45 = vpop.f32.mrf.mxu1  ;;  %v6939_v38 = vadd.f32 %v6938_v16, %v11817_v30 }
 0x8ee   : > { %v7035_v5 = vadd.f32 %v7034_v42, %v6986_v35 }
 0x8ef   : > { %v7083_v59 = vpop.f32.mrf.mxu3  ;;  %v6988_v19 = vadd.f32 %v6987_v45, %v6939_v38 }
 0x8f0   : > { %v7084_v11 = vadd.f32 %v7083_v59, %v7035_v5 }
 0x8f2   : > { %v7122_v44 = vpack.c.bf16 %v7084_v11, %v11729_v61 }
 0x8f4   : > { %7154 = vst [vmem:[%s11543_s28 + $0x48] sm:$0xff] %v7122_v44  ;;  %v6941_v27 = vpop.f32.mrf.mxu0 }
 0x8f5   : > { %v7036_v3 = vpop.f32.mrf.mxu2  ;;  %v6990_v18 = vpop.f32.mrf.mxu1  ;;  %v6942_v46 = vadd.f32 %v6941_v27, %v11824_v52 }
 0x8f6   : > { %v7037_v25 = vadd.f32 %v7036_v3, %v6988_v19 }
 0x8f7   : > { %v7085_v8 = vpop.f32.mrf.mxu3  ;;  %v6991_v50 = vadd.f32 %v6990_v18, %v6942_v46 }
 0x8f8   : > { %v7086_v7 = vadd.f32 %v7085_v8, %v7037_v25 }
 0x8fa   : > { %v7124_v36 = vpack.c.bf16 %v7086_v7, %v11732_v17 }
 0x8fc   : > { %7156 = vst [vmem:[%s11543_s28 + $0x58] sm:$0xff] %v7124_v36  ;;  %v6943_v61 = vpop.f32.mrf.mxu0 }
 0x8fd   : > { %v7039_v1 = vpop.f32.mrf.mxu2  ;;  %v6992_v39 = vpop.f32.mrf.mxu1  ;;  %v6944_v56 = vadd.f32 %v6943_v61, %v11827_v2 }
 0x8fe   : > { %v7040_v23 = vadd.f32 %v7039_v1, %v6991_v50 }
 0x8ff   : > { %v7088_v30 = vpop.f32.mrf.mxu3  ;;  %v6993_v14 = vadd.f32 %v6992_v39, %v6944_v56 }
 0x900   : > { %v7089_v54 = vadd.f32 %v7088_v30, %v7040_v23 }
 0x902   : > { %v7126_v57 = vpack.c.bf16 %v7089_v54, %v11739_v60 }
 0x904   : > { %7158 = vst [vmem:[%s11543_s28 + $0x68] sm:$0xff] %v7126_v57  ;;  %v6946_v17 = vpop.f32.mrf.mxu0 }
 0x905   : > { %v7041_v26 = vpop.f32.mrf.mxu2  ;;  %v6995_v15 = vpop.f32.mrf.mxu1  ;;  %v6947_v4 = vadd.f32 %v6946_v17, %v11834_v49 }
 0x906   : > { %v7042_v34 = vadd.f32 %v7041_v26, %v6993_v14 }
 0x907   : > { %v7090_v52 = vpop.f32.mrf.mxu3  ;;  %v6996_v47 = vadd.f32 %v6995_v15, %v6947_v4 }
 0x908   : > { %v7091_v51 = vadd.f32 %v7090_v52, %v7042_v34 }
 0x90a   : > { %v7128_v21 = vpack.c.bf16 %v7091_v51, %v11742_v53 }
 0x90c   : > { %7160 = vst [vmem:[%s11543_s28 + $0x78] sm:$0xff] %v7128_v21  ;;  %v6948_v60 = vpop.f32.mrf.mxu0 }
 0x90d   : > { %v7044_v33 = vpop.f32.mrf.mxu2  ;;  %v6997_v20 = vpop.f32.mrf.mxu1  ;;  %v6949_v55 = vadd.f32 %v6948_v60, %v11837_v0 }
 0x90e   : > { %v7045_v29 = vadd.f32 %v7044_v33, %v6996_v47 }
 0x90f   : > { %v7093_v2 = vpop.f32.mrf.mxu3  ;;  %v6998_v10 = vadd.f32 %v6997_v20, %v6949_v55 }
 0x910   : > { %v7094_v43 = vadd.f32 %v7093_v2, %v7045_v29 }
 0x912   : > { %v7130_v32 = vpack.c.bf16 %v7094_v43, %v11749_v58 }
 0x914   : > { %7162 = vst [vmem:[%s11543_s28 + $0x88] sm:$0xff] %v7130_v32  ;;  %v6951_v53 = vpop.f32.mrf.mxu0 }
 0x915   : > { %v7046_v48 = vpop.f32.mrf.mxu2  ;;  %v7000_v42 = vpop.f32.mrf.mxu1  ;;  %v6952_v59 = vadd.f32 %v6951_v53, %v11844_v13 }
 0x916   : > { %v7047_v35 = vadd.f32 %v7046_v48, %v6998_v10 }
 0x917   : > { %v7095_v49 = vpop.f32.mrf.mxu3  ;;  %v7001_v45 = vadd.f32 %v7000_v42, %v6952_v59 }
 0x918   : > { %v7096_v5 = vadd.f32 %v7095_v49, %v7047_v35 }
 0x91a   : > { %v7132_v16 = vpack.c.bf16 %v7096_v5, %v11752_v40 }
 0x91c   : > { %7164 = vst [vmem:[%s11543_s28 + $0x98] sm:$0xff] %v7132_v16  ;;  %v6953_v58 = vpop.f32.mrf.mxu0 }
 0x91d   : > { %v7049_v11 = vpop.f32.mrf.mxu2  ;;  %v7002_v44 = vpop.f32.mrf.mxu1  ;;  %v6954_v3 = vadd.f32 %v6953_v58, %v11847_v62 }
 0x91e   : > { %v7050_v38 = vadd.f32 %v7049_v11, %v7001_v45 }
 0x91f   : > { %v7098_v0 = vpop.f32.mrf.mxu3  ;;  %v7003_v8 = vadd.f32 %v7002_v44, %v6954_v3 }
 0x920   : > { %v7099_v19 = vadd.f32 %v7098_v0, %v7050_v38 }
 0x922   : > { %v7134_v25 = vpack.c.bf16 %v7099_v19, %v11759_v6 }
 0x924   : > { %7166 = vst [vmem:[%s11543_s28 + $0xa8] sm:$0xff] %v7134_v25  ;;  %v6956_v40 = vpop.f32.mrf.mxu0 }
 0x925   : > { %v7051_v27 = vpop.f32.mrf.mxu2  ;;  %v7005_v7 = vpop.f32.mrf.mxu1  ;;  %v6957_v36 = vadd.f32 %v6956_v40, %v11854_v24 }
 0x926   : > { %v7052_v18 = vadd.f32 %v7051_v27, %v7003_v8 }
 0x927   : > { %v7100_v13 = vpop.f32.mrf.mxu3  ;;  %v7006_v1 = vadd.f32 %v7005_v7, %v6957_v36 }
 0x928   : > { %v7101_v46 = vadd.f32 %v7100_v13, %v7052_v18 }
 0x92a   : > { %v7136_v50 = vpack.c.bf16 %v7101_v46, %v11762_v37 }
 0x92c   : > { %7168 = vst [vmem:[%s11543_s28 + $0xb8] sm:$0xff] %v7136_v50  ;;  %v6958_v6 = vpop.f32.mrf.mxu0 }
 0x92d   : > { %v7054_v23 = vpop.f32.mrf.mxu2  ;;  %v7007_v61 = vpop.f32.mrf.mxu1  ;;  %v6959_v54 = vadd.f32 %v6958_v6, %v11857_v41 }
 0x92e   : > { %v7055_v30 = vadd.f32 %v7054_v23, %v7006_v1 }
 0x92f   : > { %v7103_v62 = vpop.f32.mrf.mxu3  ;;  %v7008_v57 = vadd.f32 %v7007_v61, %v6959_v54 }
 0x930   : > { %v7104_v39 = vadd.f32 %v7103_v62, %v7055_v30 }
 0x932   : > { %v7138_v56 = vpack.c.bf16 %v7104_v39, %v11769_v22 }
 0x934   : > { %7170 = vst [vmem:[%s11543_s28 + $0xc8] sm:$0xff] %v7138_v56  ;;  %v6961_v37 = vpop.f32.mrf.mxu0 }
 0x935   : > { %v7056_v14 = vpop.f32.mrf.mxu2  ;;  %v6962_v52 = vadd.f32 %v6961_v37, %v11864_v28  ;;  %v7010_v17 = vpop.f32.mrf.mxu1 }
 0x936   : > { %v7057_v26 = vadd.f32 %v7056_v14, %v7008_v57 }
 0x937   : > { %v7105_v24 = vpop.f32.mrf.mxu3  ;;  %v7011_v51 = vadd.f32 %v7010_v17, %v6962_v52 }
 0x938   : > { %v7106_v34 = vadd.f32 %v7105_v24, %v7057_v26 }
 0x93a   : > { %v7140_v15 = vpack.c.bf16 %v7106_v34, %v11772_v9 }
 0x93c   : > { %7172 = vst [vmem:[%s11543_s28 + $0xd8] sm:$0xff] %v7140_v15  ;;  %v6963_v21 = vpop.f32.mrf.mxu0 }
 0x93d   : > { %v7059_v4 = vpop.f32.mrf.mxu2  ;;  %v6964_v33 = vadd.f32 %v6963_v21, %v11866_v31  ;;  %v7012_v2 = vpop.f32.mrf.mxu1 }
 0x93e   : > { %v7060_v41 = vadd.f32 %v7059_v4, %v7011_v51 }
 0x93f   : > { %v7108_v22 = vpop.f32.mrf.mxu3  ;;  %v7013_v60 = vadd.f32 %v7012_v2, %v6964_v33 }
 0x940   : > { %v7109_v47 = vadd.f32 %v7108_v22, %v7060_v41 }
 0x942   : > { %v7142_v29 = vpack.c.bf16 %v7109_v47, %v11779_v63 }
 0x944   : > { %7174 = vst [vmem:[%s11543_s28 + $0xe8] sm:$0xff] %v7142_v29 }
 0x945   : > { %v7061_v28 = vpop.f32.mrf.mxu2 }
 0x946   : > { %v7062_v20 = vadd.f32 %v7061_v28, %v7013_v60 }
 0x947   : > { %v7110_v43 = vpop.f32.mrf.mxu3 }
 0x948   : > { %v7111_v9 = vadd.f32 %v7110_v43, %v7062_v20  ;;  %7184 = sbr.rel (!%p12315_p6) target bundleno = 2412 (0x96c), region = 68 }
 0x94a   : > { %v7144_v55 = vpack.c.bf16 %v7111_v9, %v11787_v12 }
 0x94c   : > { %7176 = vst [vmem:[%s11543_s28 + $0xf8] sm:$0xff] %v7144_v55 }
 0x94d   : > { %s12328_s7 = smov (!%p7187_p10, %s7186_s7), 16 }
 0x94e   : > { %s9934_s14 = sshll.u32 %s12328_s7, 4 }
 0x94f   : > { %s7191_s12 = ssub.s32 256, %s9934_s14 }
 0x950   : > { %s7192_s11 = sshll.u32 %s7191_s12, 4 }
 0x951   : > { %7193 = vsyncadd %s7178_s13, %s7192_s11  ;;  %p11925_p1 = scmp.ne.s32.totalorder %s9934_s14, 0  ;;  %s9936_s17 = sshll.u32 %s10355_s25, 8 }
 0x952   : > { %s7197_s18 = scalar_lea.hbm %s11984_s6, %s9936_s17  ;;  %s7199_s3 = sshll.u32 %s11543_s28, 4  ;;  %s11934_s3 = int_to_ptr.vmem [resolvable:$true] %s7199_s3 }
 0x953   : > { %s7201_s16 = sshll.u32 %s7197_s18, 4  ;;  %s9413_s26 = sshll.u32 %s12328_s7, 8  ;;  %s11936_s16 = int_to_ptr.hbm [resolvable:$true] %s7201_s16 }
 0x954   : > { %s10192_s29 = sshra.s32 %s11934_s3, 4  ;;  %s10194_s20 = sshrl.u32 %s9413_s26, 4  ;;  %s10193_s29 = int_to_ptr.vmem [resolvable:$true] %s10192_s29 }
 0x955   : > { %s10199_s19 = scalar_lea.vmem %s10193_s29, %s10194_s20  ;;  %s10296_s25 = smov [#allocation11]  }
 0x956   : > { %p10200_p0 = scmp.ne.s32.totalorder %s10193_s29, %s10199_s19  ;;  %s10203_s30 = scalar_lea.vmem %s10296_s25, 512 }
 0x957   : > { %p10205_p8 = scmp.lt.s32.totalorder %s10203_s30, %s10199_s19 }
 0x958   : > { %p10201_p2 = pnand %p10200_p0, %p11925_p1 }
 0x95a   : > { %p10202_p3 = pneg %p10201_p2 }
 0x95c   : > { %p10207_p9 = pnand %p10205_p8, %p10202_p3 }
 0x95e   : > { %10210 = shalt.err (!%p10207_p9)
}
 0x95f   : > { %s10211_s28 = sshra.s32 %s11936_s16, 4  ;;  %s10222_s17 = scalar_lea.hbm %s11984_s6, 1008  ;;  %s10212_s28 = int_to_ptr.hbm [resolvable:$true] %s10211_s28 }
 0x960   : > { %s10218_s14 = scalar_lea.hbm %s10212_s28, %s10194_s20  ;;  %p10223_p5 = scmp.lt.s32.totalorder %s10212_s28, %s11984_s6 }
 0x961   : > { %p10219_p4 = scmp.ne.s32.totalorder %s10212_s28, %s10218_s14  ;;  %p10224_p12 = scmp.lt.s32.totalorder %s10222_s17, %s10218_s14 }
 0x963   : > { %p10220_p11 = pnand %p10219_p4, %p11925_p1  ;;  %p10225_p7 = por %p10224_p12, %p10223_p5 }
 0x965   : > { %p10221_p13 = pneg %p10220_p11 }
 0x967   : > { %p10226_p6 = pnand %p10225_p7, %p10221_p13 }
 0x969   : > { %10229 = shalt.err (!%p10226_p6)
}
 0x96a   : > { %s10297_s18 = smov 256   ;;  %s10298_s29 = smov 16  }
 0x96b   : > { %7207 = dma.vmem_to_hbm [thread:$0]  (%p11925_p1), %s11934_s3, %s9413_s26, %s11936_s16, %s7178_s13, %s10297_s18, %s10297_s18, %s10298_s29  }
 0x96c PF: > { %p9972_p10 = scmp.ge.s32.totalorder %s10281_s24, 2  ;;  %s7216_s20 = sand.u32 1, %s10269_s21  }
 0x96d   : > { %p12317_p0 = scmp.ne.s32.totalorder %s12076_s10, 0  ;;  %s7217_s19 = scalar_lea.sflag [#allocation4], %s7216_s20 }
 0x96f   : > { %p9963_p2 = pnand %p9972_p10, %p12317_p0 }
 0x971   : > { %p9964_p3 = pneg %p9963_p2 }
 0x973   : > { %10264 = dma.done.wait (%p9964_p3), %s7217_s19, 4096  }
 0x974   : > { %10266 = vsyncadd (%p9964_p3), %s7217_s19, 4294963200  ;;  %s12318_s9 = sld [smem:[#allocation17_spill]]  ;;  %p23_p8 = scmp.ge.s32.totalorder %s10359_s27, 6  }
 0x975   : > { %s12319_s21 = smov %s10273_s22  ;;  %s12320_s22 = smov %s10277_s23 }
 0x976   : > { %s12322_s24 = smov %s10359_s27  ;;  %25 = sbr.rel (!%p23_p8) target bundleno = 11 (0xb), region = 114 }
 0x97a   : > { %s12321_s23 = smov %s12318_s9 }
 0x97b   :  { %7223 = vsyncpa [#allocation3], 1 }
 0x97c   :  { %7225 = vsyncpa [#allocation3 + $0x1], 1 }
 0x97d   :  { %7226 = vsyncpa [#allocation6], 1 }
 0x97e   :  { %7228 = vsyncpa [#allocation6 + $0x1], 1 }
 0x97f   :  { %7229 = vsyncpa [#allocation9], 1 }
 0x980   :  { %7230 = vsyncpa [#allocation4], 1 }
 0x981   :  { %7232 = vsyncpa [#allocation4 + $0x1], 1 }

</bundles_post_ra>
